<compile_context>
chip_gen: v5e
topology: v5e:2x2
jax: 0.10.0
libtpu: 0.0.40
codegen_flags: <defaults>
</compile_context>

<pallas_src>
import functools

import jax
import jax.numpy as jnp
from jax.experimental import pallas as pl
from jax.experimental.pallas import tpu as pltpu

IN_FEATURES = 196608   # 64 * 3 * 32 * 32, as in the original module
OUT_FEATURES = 10
NUM_SPLITS = 2         # K split across (up to) 2 TensorCores; harmless on 1-TC chips
TK = 16384             # K-tile; 196608 / (NUM_SPLITS * 16384) = 6 k-steps per split.
                       # NOTE: a (tk, 10) f32 block is lane-padded to 128 inside VMEM
                       # (512*tk bytes per buffer), so tk=16384 keeps the double-buffered
                       # footprint ~17 MB; HBM still only moves the unpadded 40*tk bytes.


def _linear_kernel(x_ref, wt_ref, b_ref, o_ref):
    c = pl.program_id(0)          # K-split index ("parallel" -> megacore shard on v7x)
    k = pl.program_id(1)          # K-tile index within this split ("arbitrary" reduction)

    @pl.when(k == 0)
    def _init():
        # Split 0 seeds its partial with the bias, the other split with zeros, so the
        # wrapper's sum over partials adds the bias exactly once.
        seed = jnp.where(c == 0, b_ref[...], jnp.zeros_like(b_ref[...]))   # (1, 1, N)
        o_ref[...] = jnp.broadcast_to(seed, o_ref.shape)

    # Accumulate directly into the resident f32 output block (no scratch accumulator).
    o_ref[...] += jnp.dot(
        x_ref[...], wt_ref[...], preferred_element_type=jnp.float32
    )[None]


@functools.partial(jax.jit, static_argnames=("tk",))
def pallas_linear(x, wt, b, *, tk=TK):
    """y = x @ wt + b with x:(B,K) f32, wt:(K,N) f32 (pre-transposed weight), b:(N,) f32."""
    B, K = x.shape
    N = wt.shape[1]
    assert K % (tk * NUM_SPLITS) == 0
    kpc = K // (tk * NUM_SPLITS)      # k-tiles per split

    b3 = b.reshape(1, 1, N)

    partials = pl.pallas_call(
        _linear_kernel,
        out_shape=jax.ShapeDtypeStruct((NUM_SPLITS, B, N), jnp.float32),
        grid_spec=pltpu.PrefetchScalarGridSpec(
            num_scalar_prefetch=0,
            grid=(NUM_SPLITS, kpc),
            in_specs=[
                pl.BlockSpec((B, tk), lambda c, k: (0, c * kpc + k)),   # x tile
                pl.BlockSpec((tk, N), lambda c, k: (c * kpc + k, 0)),   # W^T tile (unpadded)
                pl.BlockSpec((1, 1, N), lambda c, k: (0, 0, 0)),        # bias (resident)
            ],
            out_specs=pl.BlockSpec((1, B, N), lambda c, k: (c, 0, 0)),  # one partial per split
        ),
        compiler_params=pltpu.CompilerParams(
            dimension_semantics=("parallel", "arbitrary"),
            vmem_limit_bytes=32 << 20,   # actual footprint ~17 MB; leaves headroom on v7x (64 MiB VMEM)
        ),
    )(x, wt, b3)

    # One trivial (NUM_SPLITS, B, N) -> (B, N) reduction glues the per-core partials together.
    return partials.sum(axis=0)


if __name__ == "__main__":
    key = jax.random.PRNGKey(0)
    kx, kw, kb = jax.random.split(key, 3)

    # Deterministic parameter init, mimicking nn.Linear's U(-1/sqrt(K), 1/sqrt(K)).
    bound = 1.0 / jnp.sqrt(jnp.float32(IN_FEATURES))
    weight = jax.random.uniform(
        kw, (OUT_FEATURES, IN_FEATURES), jnp.float32, -bound, bound
    )  # torch nn.Linear layout: (out_features, in_features)
    bias = jax.random.uniform(kb, (OUT_FEATURES,), jnp.float32, -bound, bound)

    # One-time parameter prep (hoisted out of the per-call forward): store W^T (K, N), unpadded.
    wt = jax.block_until_ready(jnp.transpose(weight))

    # Small batch of flattened inputs (the tutorial flattens a CIFAR batch to 196608).
    B = 2
    x = jax.random.normal(kx, (B, IN_FEATURES), jnp.float32)

    out = pallas_linear(x, wt, bias)
    out = jax.block_until_ready(out)

    # Reference check against plain JAX (same math as torch.nn.Linear).
    ref = x @ weight.T + bias
    assert out.shape == (B, OUT_FEATURES)
    assert jnp.allclose(out, ref, atol=1e-3, rtol=1e-3)

    print("KERNEL_OK")
</pallas_src>

<mosaic_0001>
module attributes {stable_mosaic.version = 11 : i64} {
  func.func @_linear_kernel(%arg0: i32, %arg1: i32, %arg2: memref<2x16384xf32, #tpu.memory_space<vmem>>, %arg3: memref<16384x10xf32, #tpu.memory_space<vmem>>, %arg4: memref<1x1x10xf32, #tpu.memory_space<vmem>>, %arg5: memref<1x2x10xf32, #tpu.memory_space<vmem>>) attributes {dimension_semantics = [#tpu.dimension_semantics<parallel>, #tpu.dimension_semantics<arbitrary>], iteration_bounds = array<i64: 2, 6>, scalar_prefetch = 0 : i64, scratch_operands = 0 : i64, tpu.core_type = #tpu.core_type<tc>, window_params = [{transform_indices = @transform_0, window_bounds = array<i64: 2, 16384>}, {transform_indices = @transform_1, window_bounds = array<i64: 16384, 10>}, {pipeline_mode = #tpu.pipeline_mode<synchronous>, transform_indices = @transform_2, window_bounds = array<i64: 1, 1, 10>}, {transform_indices = @transform_3, window_bounds = array<i64: 1, 2, 10>}]} {
    %c0_i32 = arith.constant 0 : i32
    %0 = arith.cmpi eq, %arg1, %c0_i32 : i32
    %1 = arith.extui %0 : i1 to i32
    %c0_i32_0 = arith.constant 0 : i32
    %2 = arith.cmpi ne, %1, %c0_i32_0 : i32
    scf.if %2 {
      %c0_i32_10 = arith.constant 0 : i32
      %10 = arith.cmpi eq, %arg0, %c0_i32_10 : i32
      %c0_11 = arith.constant 0 : index
      %c0_12 = arith.constant 0 : index
      %c0_13 = arith.constant 0 : index
      %11 = vector.load %arg4[%c0_11, %c0_12, %c0_13] : memref<1x1x10xf32, #tpu.memory_space<vmem>>, vector<1x1x10xf32>
      %cst_14 = arith.constant 0.000000e+00 : f32
      %12 = vector.broadcast %cst_14 : f32 to vector<1x1x10xf32>
      %13 = arith.select %10, %11, %12 : vector<1x1x10xf32>
      %14 = vector.shape_cast %13 : vector<1x1x10xf32> to vector<1x1x10xf32>
      %15 = vector.broadcast %14 : vector<1x1x10xf32> to vector<1x2x10xf32>
      %c0_15 = arith.constant 0 : index
      %c0_16 = arith.constant 0 : index
      %c0_17 = arith.constant 0 : index
      %16 = vector.load %arg5[%c0_15, %c0_16, %c0_17] : memref<1x2x10xf32, #tpu.memory_space<vmem>>, vector<1x2x10xf32>
      tpu.vector_store %arg5[%c0_15, %c0_16, %c0_17], %15 {strides = array<i32>} : memref<1x2x10xf32, #tpu.memory_space<vmem>>, vector<1x2x10xf32>,
    } else {
    }
    %c0 = arith.constant 0 : index
    %c0_1 = arith.constant 0 : index
    %c0_2 = arith.constant 0 : index
    %3 = vector.load %arg5[%c0, %c0_1, %c0_2] : memref<1x2x10xf32, #tpu.memory_space<vmem>>, vector<1x2x10xf32>
    %c0_3 = arith.constant 0 : index
    %c0_4 = arith.constant 0 : index
    %4 = vector.load %arg2[%c0_3, %c0_4] : memref<2x16384xf32, #tpu.memory_space<vmem>>, vector<2x16384xf32>
    %c0_5 = arith.constant 0 : index
    %c0_6 = arith.constant 0 : index
    %5 = vector.load %arg3[%c0_5, %c0_6] : memref<16384x10xf32, #tpu.memory_space<vmem>>, vector<16384x10xf32>
    %cst = arith.constant dense<0.000000e+00> : vector<2x10xf32>
    %6 = tpu.matmul %4, %5, %cst {dimension_numbers = #tpu.dot_dimension_numbers<[1], [0], [0], [1], [0, 0, 1, 1], [], []>} : vector<2x16384xf32>, vector<16384x10xf32>, vector<2x10xf32> -> vector<2x10xf32>
    %7 = vector.shape_cast %6 : vector<2x10xf32> to vector<1x2x10xf32>
    %8 = arith.addf %3, %7 : vector<1x2x10xf32>
    %c0_7 = arith.constant 0 : index
    %c0_8 = arith.constant 0 : index
    %c0_9 = arith.constant 0 : index
    %9 = vector.load %arg5[%c0_7, %c0_8, %c0_9] : memref<1x2x10xf32, #tpu.memory_space<vmem>>, vector<1x2x10xf32>
    tpu.vector_store %arg5[%c0_7, %c0_8, %c0_9], %8 {strides = array<i32>} : memref<1x2x10xf32, #tpu.memory_space<vmem>>, vector<1x2x10xf32>,
    return
  }
  func.func @transform_0(%arg0: i32, %arg1: i32) -> (i32, i32) {
    %c6_i32 = arith.constant 6 : i32
    %0 = arith.muli %arg0, %c6_i32 : i32
    %1 = arith.addi %0, %arg1 : i32
    %c0_i32 = arith.constant 0 : i32
    %c0_i32_0 = arith.constant 0 : i32
    return %c0_i32, %1 : i32, i32
  }
  func.func @transform_1(%arg0: i32, %arg1: i32) -> (i32, i32) {
    %c6_i32 = arith.constant 6 : i32
    %0 = arith.muli %arg0, %c6_i32 : i32
    %1 = arith.addi %0, %arg1 : i32
    %c0_i32 = arith.constant 0 : i32
    %c0_i32_0 = arith.constant 0 : i32
    return %1, %c0_i32 : i32, i32
  }
  func.func @transform_2(%arg0: i32, %arg1: i32) -> (i32, i32, i32) {
    %c0_i32 = arith.constant 0 : i32
    %c0_i32_0 = arith.constant 0 : i32
    %c0_i32_1 = arith.constant 0 : i32
    %c0_i32_2 = arith.constant 0 : i32
    return %c0_i32, %c0_i32_0, %c0_i32_1 : i32, i32, i32
  }
  func.func @transform_3(%arg0: i32, %arg1: i32) -> (i32, i32, i32) {
    %c0_i32 = arith.constant 0 : i32
    %c0_i32_0 = arith.constant 0 : i32
    %c0_i32_1 = arith.constant 0 : i32
    return %arg0, %c0_i32, %c0_i32_0 : i32, i32, i32
  }
}

</mosaic_0001>

<bundles_post_ra>
// kernel: pallas_linear.1
= control target key start
LH: loop header
LB: loop body
LE: loop exit
PB: predicated region body
PF: predicated region fallthrough
CT: control target
= control target key end

     0   :  { %s7996_s0 = inlined_call_operand.hbm [shape: f32[2,196608], index: 0, kind: input, shape index: {}]   ;;  %s7997_s1 = inlined_call_operand.vmem [shape: f32[196608,10], index: 1, kind: input, shape index: {}]   ;;  %s7998_s2 = inlined_call_operand.hbm [shape: f32[1,1,10], index: 2, kind: input, shape index: {}]   ;;  %s7999_s3 = inlined_call_operand.hbm [shape: f32[2,2,10], index: 3, kind: output, shape index: {}]  }
   0x1   :  { %8007 = sst [smem:[#allocation17_spill]] %s7997_s1 }
   0x2   :  { %8008 = sst [smem:[#allocation18_spill]] %s7998_s2 }
   0x3   :  { %8009 = sst [smem:[#allocation19_spill]] %s7999_s3 }
   0x4   :  { %8 = vsyncpa [#allocation3], 0 }
   0x5   :  { %10 = vsyncpa [#allocation3 + $0x1], 0 }
   0x6   :  { %11 = vsyncpa [#allocation6], 0 }
   0x7   :  { %12 = vsyncpa [#allocation4], 0 }
   0x8   :  { %14 = vsyncpa [#allocation4 + $0x1], 0  ;;  %s5704_s12 = smov 0   ;;  %s5706_s13 = smov 0  }
   0x9   :  { %s5708_s14 = smov 0   ;;  %s5710_s15 = smov 0  }
   0xa   :  { %s5712_s16 = smov 0   ;;  %s5714_s17 = smov 0  }
   0xb   :  { %s5716_s18 = smov 0   ;;  %s5718_s19 = smov 0  }
   0xc   :  { %s5720_s20 = smov 0   ;;  %s5722_s21 = smov 0  }
   0xd   :  { %s5724_s22 = smov 0  }
   0xe LB: > { %8010 = sst [smem:[#allocation11_spill]] %s5641_s12  ;;  %s5362_s23 = sadd.s32 4294967295, %s5681_s22   ;;  %s5681_s22 = sphi %s5724_s22, %s20_s22   ;;  %s5677_s21 = sphi %s5722_s21, %s8041_s21   ;;  %s5673_s20 = sphi %s5720_s20, %s8040_s20   ;;  %s5669_s19 = sphi %s5718_s19, %s8039_s19   ;;  %s5665_s18 = sphi %s5716_s18, %s8032_s18   ;;  %s5661_s17 = sphi %s5714_s17, %s8038_s17   ;;  %s5657_s16 = sphi %s5712_s16, %s8037_s16   ;;  %s5653_s15 = sphi %s5710_s15, %s8036_s15   ;;  %s5649_s14 = sphi %s5708_s14, %s8035_s14   ;;  %s5645_s13 = sphi %s5706_s13, %s8034_s13   ;;  %s5641_s12 = sphi %s5704_s12, %s8033_s12  }
   0xf   : > { %8011 = sst [smem:[#allocation12_spill]] %s5665_s18  ;;  %s5363_s24 = sadd.s32 4294967294, %s5681_s22  }
  0x10   : > { %8012 = sst [smem:[#allocation13_spill]] %s5669_s19  ;;  %p56_p0 = scmp.ne.s32.totalorder %s5657_s16, %s5653_s15 }
  0x11   : > { %8013 = sst [smem:[#allocation14_spill]] %s5673_s20  ;;  %p5760_p1 = scmp.eq.s32.totalorder %s5362_s23, 0 }
  0x12   : > { %p130_p2 = scmp.ne.s32.totalorder %s5649_s14, %s5645_s13  ;;  %p131_p4 = scmp.eq.s32.totalorder %s5362_s23, 11 }
  0x13   : > { %p5768_p3 = por %p5760_p1, %p56_p0  ;;  %p136_p5 = scmp.ne.s32.totalorder %s5645_s13, %s5641_s12 }
  0x14   : > { %p137_p6 = scmp.eq.s32.totalorder %s5363_s24, 11  ;;  %p5774_p7 = por %p131_p4, %p130_p2 }
  0x15   : > { %p5364_p8 = scmp.ge.s32.totalorder %s5681_s22, 1  ;;  %p144_p10 = scmp.lt.s32.totalorder %s5681_s22, 13 }
  0x16   : > { %s8016_s27 = scalar_select %p5774_p7, 1, 0 }
  0x17   : > { %p5779_p9 = por %p137_p6, %p136_p5  ;;  %s8020_s2 = sld [smem:[#allocation18_spill]] }
  0x18   : > { %8017 = sst [smem:[#allocation15_spill]] %s8016_s27  ;;  %p5787_p11 = pnand %p5364_p8, %p144_p10 }
  0x19   : > { %s8018_s28 = scalar_select %p5779_p9, 1, 0 }
  0x1a   : > { %p5390_p12 = pneg %p5787_p11  ;;  %s5683_s6 = smov [#allocation5]  }
  0x1b   : > { %8019 = sst [smem:[#allocation16_spill]] %s8018_s28  ;;  %s158_s7 = sshll.u32 %s5683_s6, 4  ;;  %s159_s7 = int_to_ptr.vmem [resolvable:$true] %s158_s7 }
  0x1c   : > { %p5391_p13 = pnand %p5390_p12, %p5760_p1  ;;  %s120_s8 = sadd.s32 1, %s5649_s14 }
  0x1d   : > { %s156_s4 = sshll.u32 %s8020_s2, 4  ;;  %s29_s9 = sadd.s32 1, %s5673_s20  ;;  %s157_s4 = int_to_ptr.hbm [resolvable:$true] %s156_s4 }
  0x1e   : > { %5393 = dma.hbm_to_vmem [thread:$0]  (!%p5391_p13), %s157_s4, 16, %s159_s7, [#allocation6]  }
  0x1f   : > { %p30_p0 = scmp.ge.s32.totalorder %s29_s9, 6  ;;  %s32_s10 = sadd.s32 1, %s5677_s21 }
  0x20   : > { %s36_s11 = smul.u32 6, %s5677_s21  ;;  %s43_s15 = sadd.s32 1, %s5661_s17 }
  0x21   : > { %s8043_s9 = smov (%p30_p0, %s29_s9), 0  ;;  %s8045_s10 = smov (!%p30_p0, %s32_s10), %s5677_s21 }
  0x22   : > { %p50_p2 = scmp.ne.s32.totalorder %s5661_s17, %s5657_s16  ;;  %p34_p4 = scmp.ge.s32.totalorder %s8045_s10, 2 }
  0x23   : > { %p51_p5 = scmp.eq.s32.totalorder %s5681_s22, 0  ;;  %s37_s23 = sadd.s32 %s5673_s20, %s36_s11 }
  0x24   : > { %s169_s24 = sand.u32 1, %s5661_s17   ;;  %s8047_s10 = smov (%p34_p4, %s8045_s10), 0 }
  0x25   : > { %p5810_p6 = por %p51_p5, %p50_p2  ;;  %p5403_p8 = scmp.lt.s32.totalorder %s5681_s22, 12 }
  0x26   : > { %s38_s30 = smul.u32 6, %s8047_s10  ;;  %s117_s4 = ssub.s32 %s5677_s21, %s8047_s10 }
  0x27   : > { %p118_p10 = scmp.eq.s32.totalorder %s117_s4, 0  ;;  %s5367_s6 = sshll.u32 %s169_s24, 8 }
  0x28   : > { %s39_s7 = sadd.s32 %s38_s30, %s8043_s9  ;;  %s5381_s28 = sshll.u32 %s37_s23, 8 }
  0x29   : > { %s40_s2 = ssub.s32 %s37_s23, %s39_s7  ;;  %s180_s12 = scalar_lea.hbm %s7996_s0, %s5381_s28 }
  0x2a   : > { %p41_p12 = scmp.eq.s32.totalorder %s40_s2, 0  ;;  %s182_s1 = sshll.u32 %s180_s12, 4  ;;  %s183_s1 = int_to_ptr.hbm [resolvable:$true] %s182_s1 }
  0x2b   : > { %s5823_s27 = scalar_select %p118_p10, %s5649_s14, %s120_s8  }
  0x2c   : > { %s5826_s3 = scalar_select %p41_p12, %s5661_s17, %s43_s15  }
  0x2d   : > { %s173_s18 = scalar_lea.vmem [#allocation2], %s5367_s6  ;;  %p5395_p13 = pnand %p5403_p8, %p5810_p6 }
  0x2e   : > { %s184_s19 = sshll.u32 %s173_s18, 4  ;;  %s170_s30 = scalar_lea.sflag [#allocation3], %s169_s24  ;;  %s185_s19 = int_to_ptr.vmem [resolvable:$true] %s184_s19 }
  0x2f   : > { %5397 = dma.hbm_to_vmem [thread:$0]  (!%p5395_p13), %s183_s1, 4096, %s185_s19, %s170_s30  }
  0x30   : > { %206 = sbr.rel (%p5787_p11) target bundleno = 1308 (0x51c), region = 32  ;;  %s208_s2 = sand.u32 (!%p5787_p11), 1, %s5657_s16  }
  0x31   : > { %s5371_s20 = sshll.u32 (!%p5787_p11), %s208_s2, 8  ;;  %s209_s28 = scalar_lea.sflag (!%p5787_p11), [#allocation3], %s208_s2 }
  0x32   : > { %s5835_s8 = scalar_lea.vmem (!%p5787_p11), [#allocation2], %s5371_s20 }
  0x35   : > { %5628 = dma.done.wait (%p5768_p3), %s209_s28, 4096  }
  0x36   : > { %5630 = vsyncadd (%p5768_p3), %s209_s28, 4294963200 }
  0x37   : > { %5632 = dma.done.wait (%p5760_p1), [#allocation6], 16  }
  0x38   : > { %5634 = vsyncadd (%p5760_p1), [#allocation6], 4294967280  ;;  %s8023_s1 = sld [smem:[#allocation13_spill]]  ;;  %s245_s18 = sand.u32 1, %s5645_s13  }
  0x39   : > { %s8024_s12 = sld [smem:[#allocation12_spill]]  ;;  %s5373_s5 = sshll.u32 %s245_s18, 1 }
  0x3a   : > { %s8025_s4 = sld [smem:[#allocation17_spill]]  ;;  %s5855_s25 = scalar_lea.vmem [#allocation7], %s5373_s5 }
  0x3e   : > { %s251_s19 = smul.u32 6, %s8023_s1 }
  0x3f   : > { %p5376_p1 = scmp.ne.s32.totalorder %s8024_s12, 0 }
  0x40   : > { %s252_s15 = sadd.s32 %s8024_s12, %s251_s19  ;;  %s8026_s7 = sld [smem:[#allocation13_spill]] (!%p5376_p1) }
  0x41   : > { %s5374_s23 = sshll.u32 %s252_s15, 11 }
  0x42   : > { %p254_p11 = scmp.lt.s32.totalorder %s5374_s23, 24575  ;;  %264 = sbr.rel (%p5376_p1) target bundleno = 80 (0x50), region = 44 }
  0x44   : > { %s8049_s23 = smov (!%p254_p11, %s5374_s23), 24575 }
  0x45   : > { %s5375_s26 = sshll.u32 %s8049_s23, 3 }
  0x46   : > { %s5853_s6 = scalar_lea.vmem %s8025_s4, %s5375_s26  ;;  %p265_p3 = scmp.eq.s32.totalorder (!%p5376_p1), %s8026_s7, 0 }
  0x47   : > { %v266_v0 = vld [vmem:[#allocation5] sm:$0x1]  ;;  %vm274_vm1 = vcmask 74752  }
  0x48   : > { %s267_s11 = scalar_select %p265_p3, 1, 0 }
  0x4a   : > { %v268_v1 = vstv %s267_s11 }
  0x4b   : > { %vm269_vm0 = vcmp.eq.s32.totalorder %v268_v1, 1 }
  0x4c   : > { %v270_v2 = vsel %vm269_vm0, %v266_v0, 0.0 }
  0x4d   : > { %v272_v3 = vperm.slane %v270_v2, 0 }
  0x4f   : > { %275 = vst.msk [vmem:[%s5855_s25] sm:$0x3] %vm274_vm1, %v272_v3 }
  0x50 PF: > { %v324_v4 = vld [vmem:[%s5853_s6 + $0x78] sm:$0xff]  ;;  %v323_v6 = vld [vmem:[%s5853_s6 + $0x70] sm:$0xff]  ;;  %v322_v10 = vld [vmem:[%s5853_s6 + $0x68] sm:$0xff]  ;;  %s8027_s30 = sld [smem:[#allocation13_spill]]  ;;  %s5254_s19 = sshll.u32 %s5855_s25, 4  ;;  %vm5239_vm2 = vcmask 74752   ;;  %s5255_s19 = int_to_ptr.vmem [resolvable:$true] %s5254_s19 }
  0x51   : > { %v356_v5 = vld [vmem:[%s5853_s6 + $0x178] sm:$0xff]  ;;  %2678 = vmatpush.msra.mxu0 %v324_v4  ;;  %v355_v8 = vld [vmem:[%s5853_s6 + $0x170] sm:$0xff]  ;;  %v354_v12 = vld [vmem:[%s5853_s6 + $0x168] sm:$0xff]  ;;  %s5242_s15 = scalar_lea.sflag [#allocation4], %s245_s18 }
  0x52   : > { %2718 = vmatpush.msra.mxu2 %v356_v5  ;;  %v340_v7 = vld [vmem:[%s5853_s6 + $0xf8] sm:$0xff]  ;;  %v339_v11 = vld [vmem:[%s5853_s6 + $0xf0] sm:$0xff]  ;;  %v338_v14 = vld [vmem:[%s5853_s6 + $0xe8] sm:$0xff] }
  0x53   : > { %v372_v9 = vld [vmem:[%s5853_s6 + $0x1f8] sm:$0xff]  ;;  %2698 = vmatpush.msra.mxu1 %v340_v7  ;;  %2679 = vmatpush.msra.mxu0 %v323_v6  ;;  %v371_v13 = vld [vmem:[%s5853_s6 + $0x1f0] sm:$0xff]  ;;  %v321_v15 = vld [vmem:[%s5853_s6 + $0x60] sm:$0xff] }
  0x54   : > { %2738 = vmatpush.msra.mxu3 %v372_v9  ;;  %2719 = vmatpush.msra.mxu2 %v355_v8  ;;  %v353_v16 = vld [vmem:[%s5853_s6 + $0x160] sm:$0xff]  ;;  %v370_v17 = vld [vmem:[%s5853_s6 + $0x1e8] sm:$0xff]  ;;  %v320_v20 = vld [vmem:[%s5853_s6 + $0x58] sm:$0xff] }
  0x55   : > { %2699 = vmatpush.msra.mxu1 %v339_v11  ;;  %2680 = vmatpush.msra.mxu0 %v322_v10  ;;  %v337_v18 = vld [vmem:[%s5853_s6 + $0xe0] sm:$0xff]  ;;  %v352_v21 = vld [vmem:[%s5853_s6 + $0x158] sm:$0xff]  ;;  %v319_v24 = vld [vmem:[%s5853_s6 + $0x50] sm:$0xff] }
  0x56   : > { %2739 = vmatpush.msra.mxu3 %v371_v13  ;;  %2720 = vmatpush.msra.mxu2 %v354_v12  ;;  %v369_v19 = vld [vmem:[%s5853_s6 + $0x1e0] sm:$0xff]  ;;  %v336_v22 = vld [vmem:[%s5853_s6 + $0xd8] sm:$0xff]  ;;  %v351_v25 = vld [vmem:[%s5853_s6 + $0x150] sm:$0xff]  ;;  %s5378_s2 = sshll.u32 %s8027_s30, 1 }
  0x57   : > { %2700 = vmatpush.msra.mxu1 %v338_v14  ;;  %2681 = vmatpush.msra.mxu0 %v321_v15  ;;  %v368_v23 = vld [vmem:[%s5853_s6 + $0x1d8] sm:$0xff]  ;;  %v335_v26 = vld [vmem:[%s5853_s6 + $0xd0] sm:$0xff]  ;;  %v318_v28 = vld [vmem:[%s5853_s6 + $0x48] sm:$0xff] }
  0x58   : > { %2740 = vmatpush.msra.mxu3 %v370_v17  ;;  %2721 = vmatpush.msra.mxu2 %v353_v16  ;;  %v367_v27 = vld [vmem:[%s5853_s6 + $0x1d0] sm:$0xff]  ;;  %v350_v29 = vld [vmem:[%s5853_s6 + $0x148] sm:$0xff]  ;;  %v317_v32 = vld [vmem:[%s5853_s6 + $0x40] sm:$0xff] }
  0x59   : > { %2701 = vmatpush.msra.mxu1 %v337_v18  ;;  %2682 = vmatpush.msra.mxu0 %v320_v20  ;;  %v334_v30 = vld [vmem:[%s5853_s6 + $0xc8] sm:$0xff]  ;;  %v349_v33 = vld [vmem:[%s5853_s6 + $0x140] sm:$0xff]  ;;  %v316_v36 = vld [vmem:[%s5853_s6 + $0x38] sm:$0xff] }
  0x5a   : > { %2741 = vmatpush.msra.mxu3 %v369_v19  ;;  %2722 = vmatpush.msra.mxu2 %v352_v21  ;;  %v366_v31 = vld [vmem:[%s5853_s6 + $0x1c8] sm:$0xff]  ;;  %v333_v34 = vld [vmem:[%s5853_s6 + $0xc0] sm:$0xff]  ;;  %v348_v37 = vld [vmem:[%s5853_s6 + $0x138] sm:$0xff] }
  0x5b   : > { %2702 = vmatpush.msra.mxu1 %v336_v22  ;;  %2683 = vmatpush.msra.mxu0 %v319_v24  ;;  %v365_v35 = vld [vmem:[%s5853_s6 + $0x1c0] sm:$0xff]  ;;  %v332_v38 = vld [vmem:[%s5853_s6 + $0xb8] sm:$0xff]  ;;  %v315_v40 = vld [vmem:[%s5853_s6 + $0x30] sm:$0xff] }
  0x5c   : > { %2742 = vmatpush.msra.mxu3 %v368_v23  ;;  %2723 = vmatpush.msra.mxu2 %v351_v25  ;;  %v364_v39 = vld [vmem:[%s5853_s6 + $0x1b8] sm:$0xff]  ;;  %v347_v41 = vld [vmem:[%s5853_s6 + $0x130] sm:$0xff]  ;;  %v314_v44 = vld [vmem:[%s5853_s6 + $0x28] sm:$0xff] }
  0x5d   : > { %2703 = vmatpush.msra.mxu1 %v335_v26  ;;  %2684 = vmatpush.msra.mxu0 %v318_v28  ;;  %v331_v42 = vld [vmem:[%s5853_s6 + $0xb0] sm:$0xff]  ;;  %v346_v45 = vld [vmem:[%s5853_s6 + $0x128] sm:$0xff]  ;;  %v313_v48 = vld [vmem:[%s5853_s6 + $0x20] sm:$0xff] }
  0x5e   : > { %2743 = vmatpush.msra.mxu3 %v367_v27  ;;  %2724 = vmatpush.msra.mxu2 %v350_v29  ;;  %v363_v43 = vld [vmem:[%s5853_s6 + $0x1b0] sm:$0xff]  ;;  %v330_v46 = vld [vmem:[%s5853_s6 + $0xa8] sm:$0xff]  ;;  %v345_v49 = vld [vmem:[%s5853_s6 + $0x120] sm:$0xff] }
  0x5f   : > { %2704 = vmatpush.msra.mxu1 %v334_v30  ;;  %2685 = vmatpush.msra.mxu0 %v317_v32  ;;  %v362_v47 = vld [vmem:[%s5853_s6 + $0x1a8] sm:$0xff]  ;;  %v329_v50 = vld [vmem:[%s5853_s6 + $0xa0] sm:$0xff]  ;;  %v312_v52 = vld [vmem:[%s5853_s6 + $0x18] sm:$0xff] }
  0x60   : > { %2744 = vmatpush.msra.mxu3 %v366_v31  ;;  %2725 = vmatpush.msra.mxu2 %v349_v33  ;;  %v361_v51 = vld [vmem:[%s5853_s6 + $0x1a0] sm:$0xff]  ;;  %v344_v53 = vld [vmem:[%s5853_s6 + $0x118] sm:$0xff]  ;;  %v311_v56 = vld [vmem:[%s5853_s6 + $0x10] sm:$0xff] }
  0x61   : > { %2705 = vmatpush.msra.mxu1 %v333_v34  ;;  %2686 = vmatpush.msra.mxu0 %v316_v36  ;;  %v328_v54 = vld [vmem:[%s5853_s6 + $0x98] sm:$0xff]  ;;  %v343_v57 = vld [vmem:[%s5853_s6 + $0x110] sm:$0xff]  ;;  %v310_v60 = vld [vmem:[%s5853_s6 + $0x8] sm:$0xff] }
  0x62   : > { %2745 = vmatpush.msra.mxu3 %v365_v35  ;;  %2726 = vmatpush.msra.mxu2 %v348_v37  ;;  %v360_v55 = vld [vmem:[%s5853_s6 + $0x198] sm:$0xff]  ;;  %v327_v58 = vld [vmem:[%s5853_s6 + $0x90] sm:$0xff]  ;;  %v342_v61 = vld [vmem:[%s5853_s6 + $0x108] sm:$0xff] }
  0x63   : > { %2706 = vmatpush.msra.mxu1 %v332_v38  ;;  %2687 = vmatpush.msra.mxu0 %v315_v40  ;;  %v359_v59 = vld [vmem:[%s5853_s6 + $0x190] sm:$0xff]  ;;  %v326_v62 = vld [vmem:[%s5853_s6 + $0x88] sm:$0xff]  ;;  %v309_v0 = vld [vmem:[%s5853_s6] sm:$0xff] }
  0x64   : > { %2746 = vmatpush.msra.mxu3 %v364_v39  ;;  %2727 = vmatpush.msra.mxu2 %v347_v41  ;;  %v358_v63 = vld [vmem:[%s5853_s6 + $0x188] sm:$0xff]  ;;  %v341_v1 = vld [vmem:[%s5853_s6 + $0x100] sm:$0xff]  ;;  %v388_v2 = vld [vmem:[%s5853_s6 + $0x278] sm:$0xff] }
  0x65   : > { %2707 = vmatpush.msra.mxu1 %v331_v42  ;;  %2688 = vmatpush.msra.mxu0 %v314_v44  ;;  %v420_v3 = vld [vmem:[%s5853_s6 + $0x378] sm:$0xff]  ;;  %v325_v4 = vld [vmem:[%s5853_s6 + $0x80] sm:$0xff]  ;;  %v387_v6 = vld [vmem:[%s5853_s6 + $0x270] sm:$0xff] }
  0x66   : > { %2747 = vmatpush.msra.mxu3 %v363_v43  ;;  %2728 = vmatpush.msra.mxu2 %v346_v45  ;;  %v357_v5 = vld [vmem:[%s5853_s6 + $0x180] sm:$0xff]  ;;  %v404_v7 = vld [vmem:[%s5853_s6 + $0x2f8] sm:$0xff]  ;;  %v419_v8 = vld [vmem:[%s5853_s6 + $0x370] sm:$0xff] }
  0x67   : > { %2708 = vmatpush.msra.mxu1 %v330_v46  ;;  %2689 = vmatpush.msra.mxu0 %v313_v48  ;;  %v436_v9 = vld [vmem:[%s5853_s6 + $0x3f8] sm:$0xff]  ;;  %v386_v10 = vld [vmem:[%s5853_s6 + $0x268] sm:$0xff]  ;;  %v403_v11 = vld [vmem:[%s5853_s6 + $0x2f0] sm:$0xff] }
  0x68   : > { %2748 = vmatpush.msra.mxu3 %v362_v47  ;;  %2729 = vmatpush.msra.mxu2 %v345_v49  ;;  %v418_v12 = vld [vmem:[%s5853_s6 + $0x368] sm:$0xff]  ;;  %v435_v13 = vld [vmem:[%s5853_s6 + $0x3f0] sm:$0xff]  ;;  %v385_v14 = vld [vmem:[%s5853_s6 + $0x260] sm:$0xff] }
  0x69   : > { %2709 = vmatpush.msra.mxu1 %v329_v50  ;;  %2690 = vmatpush.msra.mxu0 %v312_v52  ;;  %v402_v15 = vld [vmem:[%s5853_s6 + $0x2e8] sm:$0xff]  ;;  %v417_v16 = vld [vmem:[%s5853_s6 + $0x360] sm:$0xff]  ;;  %v384_v18 = vld [vmem:[%s5853_s6 + $0x258] sm:$0xff] }
  0x6a   : > { %2749 = vmatpush.msra.mxu3 %v361_v51  ;;  %2730 = vmatpush.msra.mxu2 %v344_v53  ;;  %v434_v17 = vld [vmem:[%s5853_s6 + $0x3e8] sm:$0xff]  ;;  %v401_v19 = vld [vmem:[%s5853_s6 + $0x2e0] sm:$0xff]  ;;  %v416_v20 = vld [vmem:[%s5853_s6 + $0x358] sm:$0xff] }
  0x6b   : > { %2710 = vmatpush.msra.mxu1 %v328_v54  ;;  %2691 = vmatpush.msra.mxu0 %v311_v56  ;;  %v433_v21 = vld [vmem:[%s5853_s6 + $0x3e0] sm:$0xff]  ;;  %v383_v22 = vld [vmem:[%s5853_s6 + $0x250] sm:$0xff]  ;;  %v400_v23 = vld [vmem:[%s5853_s6 + $0x2d8] sm:$0xff] }
  0x6c   : > { %2750 = vmatpush.msra.mxu3 %v360_v55  ;;  %2731 = vmatpush.msra.mxu2 %v343_v57  ;;  %v415_v24 = vld [vmem:[%s5853_s6 + $0x350] sm:$0xff]  ;;  %v432_v25 = vld [vmem:[%s5853_s6 + $0x3d8] sm:$0xff]  ;;  %v277_v26 = vld [vmem:[%s5835_s8] sm:$0xff] }
  0x6d   : > { %2711 = vmatpush.msra.mxu1 %v327_v58  ;;  %2692 = vmatpush.msra.mxu0 %v310_v60  ;;  %v382_v27 = vld [vmem:[%s5853_s6 + $0x248] sm:$0xff]  ;;  %v399_v28 = vld [vmem:[%s5853_s6 + $0x2d0] sm:$0xff]  ;;  %2389 = vst [vmem:[#allocation1] ss:$4 sm:$0xff] %v277_v26  ;;  %v381_v31 = vld [vmem:[%s5853_s6 + $0x240] sm:$0xff] }
  0x6e   : > { %2751 = vmatpush.msra.mxu3 %v359_v59  ;;  %2732 = vmatpush.msra.mxu2 %v342_v61  ;;  %v414_v29 = vld [vmem:[%s5853_s6 + $0x348] sm:$0xff]  ;;  %v431_v30 = vld [vmem:[%s5853_s6 + $0x3d0] sm:$0xff]  ;;  %v413_v33 = vld [vmem:[%s5853_s6 + $0x340] sm:$0xff] }
  0x6f   : > { %2712 = vmatpush.msra.mxu1 %v326_v62  ;;  %2693 = vmatpush.msra.mxu0 %v309_v0  ;;  %v398_v32 = vld [vmem:[%s5853_s6 + $0x2c8] sm:$0xff]  ;;  %v380_v35 = vld [vmem:[%s5853_s6 + $0x238] sm:$0xff]  ;;  %v397_v36 = vld [vmem:[%s5853_s6 + $0x2c0] sm:$0xff] }
  0x70   : > { %2752 = vmatpush.msra.mxu3 %v358_v63  ;;  %2733 = vmatpush.msra.mxu2 %v341_v1  ;;  %v430_v34 = vld [vmem:[%s5853_s6 + $0x3c8] sm:$0xff]  ;;  %v412_v37 = vld [vmem:[%s5853_s6 + $0x338] sm:$0xff]  ;;  %v429_v38 = vld [vmem:[%s5853_s6 + $0x3c0] sm:$0xff] }
  0x71   : > { %2758 = vmatpush.msrb.mxu0 %v388_v2  ;;  %2713 = vmatpush.msra.mxu1 %v325_v4  ;;  %v278_v39 = vld [vmem:[%s5835_s8 + $0x8] sm:$0xff]  ;;  %v396_v41 = vld [vmem:[%s5853_s6 + $0x2b8] sm:$0xff]  ;;  %v378_v44 = vld [vmem:[%s5853_s6 + $0x228] sm:$0xff] }
  0x72   : > { %2798 = vmatpush.msrb.mxu2 %v420_v3  ;;  %2753 = vmatpush.msra.mxu3 %v357_v5  ;;  %v379_v40 = vld [vmem:[%s5853_s6 + $0x230] sm:$0xff]  ;;  %2391 = vst [vmem:[#allocation1 + $0x20] ss:$4 sm:$0xff] %v278_v39  ;;  %v428_v43 = vld [vmem:[%s5853_s6 + $0x3b8] sm:$0xff]  ;;  %v410_v46 = vld [vmem:[%s5853_s6 + $0x328] sm:$0xff] }
  0x73   : > { %2759 = vmatpush.msrb.mxu0 %v387_v6  ;;  %2778 = vmatpush.msrb.mxu1 %v404_v7  ;;  %v411_v42 = vld [vmem:[%s5853_s6 + $0x330] sm:$0xff]  ;;  %v377_v48 = vld [vmem:[%s5853_s6 + $0x220] sm:$0xff]  ;;  %v394_v49 = vld [vmem:[%s5853_s6 + $0x2a8] sm:$0xff] }
  0x74   : > { %2799 = vmatpush.msrb.mxu2 %v419_v8  ;;  %2818 = vmatpush.msrb.mxu3 %v436_v9  ;;  %v395_v45 = vld [vmem:[%s5853_s6 + $0x2b0] sm:$0xff]  ;;  %v409_v50 = vld [vmem:[%s5853_s6 + $0x320] sm:$0xff]  ;;  %v426_v51 = vld [vmem:[%s5853_s6 + $0x3a8] sm:$0xff] }
  0x75   : > { %2760 = vmatpush.msrb.mxu0 %v386_v10  ;;  %2779 = vmatpush.msrb.mxu1 %v403_v11  ;;  %v427_v47 = vld [vmem:[%s5853_s6 + $0x3b0] sm:$0xff]  ;;  %v376_v52 = vld [vmem:[%s5853_s6 + $0x218] sm:$0xff]  ;;  %v393_v53 = vld [vmem:[%s5853_s6 + $0x2a0] sm:$0xff] }
  0x76   : > { %2800 = vmatpush.msrb.mxu2 %v418_v12  ;;  %2819 = vmatpush.msrb.mxu3 %v435_v13  ;;  %v408_v54 = vld [vmem:[%s5853_s6 + $0x318] sm:$0xff]  ;;  %v425_v55 = vld [vmem:[%s5853_s6 + $0x3a0] sm:$0xff]  ;;  %v375_v56 = vld [vmem:[%s5853_s6 + $0x210] sm:$0xff] }
  0x77   : > { %2761 = vmatpush.msrb.mxu0 %v385_v14  ;;  %2780 = vmatpush.msrb.mxu1 %v402_v15  ;;  %v392_v57 = vld [vmem:[%s5853_s6 + $0x298] sm:$0xff]  ;;  %v407_v58 = vld [vmem:[%s5853_s6 + $0x310] sm:$0xff]  ;;  %v374_v60 = vld [vmem:[%s5853_s6 + $0x208] sm:$0xff] }
  0x78   : > { %2801 = vmatpush.msrb.mxu2 %v417_v16  ;;  %2820 = vmatpush.msrb.mxu3 %v434_v17  ;;  %v424_v59 = vld [vmem:[%s5853_s6 + $0x398] sm:$0xff]  ;;  %v391_v61 = vld [vmem:[%s5853_s6 + $0x290] sm:$0xff]  ;;  %v406_v62 = vld [vmem:[%s5853_s6 + $0x308] sm:$0xff] }
  0x79   : > { %2762 = vmatpush.msrb.mxu0 %v384_v18  ;;  %2781 = vmatpush.msrb.mxu1 %v401_v19  ;;  %v423_v63 = vld [vmem:[%s5853_s6 + $0x390] sm:$0xff]  ;;  %v373_v1 = vld [vmem:[%s5853_s6 + $0x200] sm:$0xff]  ;;  %v390_v2 = vld [vmem:[%s5853_s6 + $0x288] sm:$0xff] }
  0x7a   : > { %2802 = vmatpush.msrb.mxu2 %v416_v20  ;;  %2821 = vmatpush.msrb.mxu3 %v433_v21  ;;  %v2394_v0 = vld.sshfl [vmem:[#allocation1 + $0x10] sm:$0xff pattern:$0x73625140]  ;;  %v405_v3 = vld [vmem:[%s5853_s6 + $0x300] sm:$0xff]  ;;  %v422_v4 = vld [vmem:[%s5853_s6 + $0x388] sm:$0xff] }
  0x7b   : > { %2763 = vmatpush.msrb.mxu0 %v383_v22  ;;  %2782 = vmatpush.msrb.mxu1 %v400_v23  ;;  %v2392_v5 = vld.sshfl [vmem:[#allocation1] sm:$0xff pattern:$0x73625140]  ;;  %v2395_v6 = vld.sshfl [vmem:[#allocation1 + $0x18] sm:$0xff pattern:$0x73625140] }
  0x7c   : > { %2803 = vmatpush.msrb.mxu2 %v415_v24  ;;  %2822 = vmatpush.msrb.mxu3 %v432_v25  ;;  %v452_v7 = vld [vmem:[%s5853_s6 + $0x478] sm:$0xff]  ;;  %v389_v9 = vld [vmem:[%s5853_s6 + $0x280] sm:$0xff]  ;;  %v2393_v11 = vld.sshfl [vmem:[#allocation1 + $0x8] sm:$0xff pattern:$0x73625140] }
  0x7d   : > { %2764 = vmatpush.msrb.mxu0 %v382_v27  ;;  %2783 = vmatpush.msrb.mxu1 %v399_v28  ;;  %v484_v8 = vld [vmem:[%s5853_s6 + $0x578] sm:$0xff]  ;;  %v421_v10 = vld [vmem:[%s5853_s6 + $0x380] sm:$0xff]  ;;  %v451_v12 = vld [vmem:[%s5853_s6 + $0x470] sm:$0xff] }
  0x7e   : > { %2804 = vmatpush.msrb.mxu2 %v414_v29  ;;  %2823 = vmatpush.msrb.mxu3 %v431_v30  ;;  %v468_v13 = vld [vmem:[%s5853_s6 + $0x4f8] sm:$0xff]  ;;  %v483_v14 = vld [vmem:[%s5853_s6 + $0x570] sm:$0xff]  ;;  %v450_v16 = vld [vmem:[%s5853_s6 + $0x468] sm:$0xff] }
  0x7f   : > { %2765 = vmatpush.msrb.mxu0 %v381_v31  ;;  %2784 = vmatpush.msrb.mxu1 %v398_v32  ;;  %v500_v15 = vld [vmem:[%s5853_s6 + $0x5f8] sm:$0xff]  ;;  %v467_v17 = vld [vmem:[%s5853_s6 + $0x4f0] sm:$0xff]  ;;  %v482_v18 = vld [vmem:[%s5853_s6 + $0x568] sm:$0xff] }
  0x80   : > { %2805 = vmatpush.msrb.mxu2 %v413_v33  ;;  %2824 = vmatpush.msrb.mxu3 %v430_v34  ;;  %v499_v19 = vld [vmem:[%s5853_s6 + $0x5f0] sm:$0xff]  ;;  %v279_v20 = vld [vmem:[%s5835_s8 + $0x10] sm:$0xff]  ;;  %v449_v22 = vld [vmem:[%s5853_s6 + $0x460] sm:$0xff] }
  0x81   : > { %2766 = vmatpush.msrb.mxu0 %v380_v35  ;;  %2785 = vmatpush.msrb.mxu1 %v397_v36  ;;  %v2398_v21 = vld.sshfl [vmem:[#allocation1 + $0x30] sm:$0xff pattern:$0x73625140]  ;;  %2400 = vst [vmem:[#allocation1] ss:$4 sm:$0xff] %v279_v20  ;;  %v466_v23 = vld [vmem:[%s5853_s6 + $0x4e8] sm:$0xff] }
  0x82   : > { %2806 = vmatpush.msrb.mxu2 %v412_v37  ;;  %2825 = vmatpush.msrb.mxu3 %v429_v38  ;;  %v481_v24 = vld [vmem:[%s5853_s6 + $0x560] sm:$0xff]  ;;  %v498_v25 = vld [vmem:[%s5853_s6 + $0x5e8] sm:$0xff]  ;;  %v2399_v27 = vld.sshfl [vmem:[#allocation1 + $0x38] sm:$0xff pattern:$0x73625140] }
  0x83   : > { %2767 = vmatpush.msrb.mxu0 %v379_v40  ;;  %2786 = vmatpush.msrb.mxu1 %v396_v41  ;;  %v2396_v26 = vld.sshfl [vmem:[#allocation1 + $0x20] sm:$0xff pattern:$0x73625140]  ;;  %v448_v28 = vld [vmem:[%s5853_s6 + $0x458] sm:$0xff]  ;;  %v447_v33 = vld [vmem:[%s5853_s6 + $0x450] sm:$0xff] }
  0x84   : > { %2807 = vmatpush.msrb.mxu2 %v411_v42  ;;  %2826 = vmatpush.msrb.mxu3 %v428_v43  ;;  %v465_v29 = vld [vmem:[%s5853_s6 + $0x4e0] sm:$0xff]  ;;  %v480_v30 = vld [vmem:[%s5853_s6 + $0x558] sm:$0xff]  ;;  %v2397_v32 = vld.sshfl [vmem:[#allocation1 + $0x28] sm:$0xff pattern:$0x73625140] }
  0x85   : > { %2768 = vmatpush.msrb.mxu0 %v378_v44  ;;  %2787 = vmatpush.msrb.mxu1 %v395_v45  ;;  %v497_v31 = vld [vmem:[%s5853_s6 + $0x5e0] sm:$0xff]  ;;  %v464_v34 = vld [vmem:[%s5853_s6 + $0x4d8] sm:$0xff]  ;;  %v479_v35 = vld [vmem:[%s5853_s6 + $0x550] sm:$0xff] }
  0x86   : > { %2808 = vmatpush.msrb.mxu2 %v410_v46  ;;  %2827 = vmatpush.msrb.mxu3 %v427_v47  ;;  %v496_v36 = vld [vmem:[%s5853_s6 + $0x5d8] sm:$0xff]  ;;  %v446_v37 = vld [vmem:[%s5853_s6 + $0x448] sm:$0xff]  ;;  %v463_v38 = vld [vmem:[%s5853_s6 + $0x4d0] sm:$0xff] }
  0x87   : > { %2769 = vmatpush.msrb.mxu0 %v377_v48  ;;  %2788 = vmatpush.msrb.mxu1 %v394_v49  ;;  %v478_v39 = vld [vmem:[%s5853_s6 + $0x548] sm:$0xff]  ;;  %v495_v40 = vld [vmem:[%s5853_s6 + $0x5d0] sm:$0xff]  ;;  %v445_v41 = vld [vmem:[%s5853_s6 + $0x440] sm:$0xff] }
  0x88   : > { %2809 = vmatpush.msrb.mxu2 %v409_v50  ;;  %2828 = vmatpush.msrb.mxu3 %v426_v51  ;;  %v462_v42 = vld [vmem:[%s5853_s6 + $0x4c8] sm:$0xff]  ;;  %v477_v43 = vld [vmem:[%s5853_s6 + $0x540] sm:$0xff]  ;;  %v444_v45 = vld [vmem:[%s5853_s6 + $0x438] sm:$0xff] }
  0x89   : > { %2770 = vmatpush.msrb.mxu0 %v376_v52  ;;  %2789 = vmatpush.msrb.mxu1 %v393_v53  ;;  %v494_v44 = vld [vmem:[%s5853_s6 + $0x5c8] sm:$0xff]  ;;  %v461_v46 = vld [vmem:[%s5853_s6 + $0x4c0] sm:$0xff]  ;;  %v476_v47 = vld [vmem:[%s5853_s6 + $0x538] sm:$0xff] }
  0x8a   : > { %2810 = vmatpush.msrb.mxu2 %v408_v54  ;;  %2829 = vmatpush.msrb.mxu3 %v425_v55  ;;  %v493_v48 = vld [vmem:[%s5853_s6 + $0x5c0] sm:$0xff]  ;;  %v443_v49 = vld [vmem:[%s5853_s6 + $0x430] sm:$0xff]  ;;  %v460_v50 = vld [vmem:[%s5853_s6 + $0x4b8] sm:$0xff] }
  0x8b   : > { %2771 = vmatpush.msrb.mxu0 %v375_v56  ;;  %2790 = vmatpush.msrb.mxu1 %v392_v57  ;;  %v475_v51 = vld [vmem:[%s5853_s6 + $0x530] sm:$0xff]  ;;  %v492_v52 = vld [vmem:[%s5853_s6 + $0x5b8] sm:$0xff]  ;;  %v442_v53 = vld [vmem:[%s5853_s6 + $0x428] sm:$0xff] }
  0x8c   : > { %2811 = vmatpush.msrb.mxu2 %v407_v58  ;;  %2830 = vmatpush.msrb.mxu3 %v424_v59  ;;  %v459_v54 = vld [vmem:[%s5853_s6 + $0x4b0] sm:$0xff]  ;;  %v474_v55 = vld [vmem:[%s5853_s6 + $0x528] sm:$0xff]  ;;  %v441_v57 = vld [vmem:[%s5853_s6 + $0x420] sm:$0xff] }
  0x8d   : > { %2772 = vmatpush.msrb.mxu0 %v374_v60  ;;  %2791 = vmatpush.msrb.mxu1 %v391_v61  ;;  %v491_v56 = vld [vmem:[%s5853_s6 + $0x5b0] sm:$0xff]  ;;  %v458_v58 = vld [vmem:[%s5853_s6 + $0x4a8] sm:$0xff]  ;;  %v473_v59 = vld [vmem:[%s5853_s6 + $0x520] sm:$0xff] }
  0x8e   : > { %2812 = vmatpush.msrb.mxu2 %v406_v62  ;;  %2831 = vmatpush.msrb.mxu3 %v423_v63  ;;  %v490_v60 = vld [vmem:[%s5853_s6 + $0x5a8] sm:$0xff]  ;;  %v440_v61 = vld [vmem:[%s5853_s6 + $0x418] sm:$0xff]  ;;  %v457_v62 = vld [vmem:[%s5853_s6 + $0x4a0] sm:$0xff] }
  0x8f   : > { %2734 = vmatmul.f32.vlgmr.msra.gmra.mxu2 %v2394_v0  ;;  %2773 = vmatpush.msrb.mxu0 %v373_v1  ;;  %v472_v63 = vld [vmem:[%s5853_s6 + $0x518] sm:$0xff]  ;;  %v489_v0 = vld [vmem:[%s5853_s6 + $0x5a0] sm:$0xff]  ;;  %v439_v1 = vld [vmem:[%s5853_s6 + $0x410] sm:$0xff] }
  0x90   : > { %2792 = vmatpush.msrb.mxu1 %v390_v2  ;;  %2813 = vmatpush.msrb.mxu2 %v405_v3  ;;  %v456_v2 = vld [vmem:[%s5853_s6 + $0x498] sm:$0xff]  ;;  %v471_v3 = vld [vmem:[%s5853_s6 + $0x510] sm:$0xff]  ;;  %v2403_v20 = vld.sshfl [vmem:[#allocation1 + $0x8] sm:$0xff pattern:$0x73625140] }
  0x91   : > { %2832 = vmatpush.msrb.mxu3 %v422_v4  ;;  %2694 = vmatmul.f32.vlgmr.msra.gmra.mxu0 %v2392_v5  ;;  %v488_v4 = vld [vmem:[%s5853_s6 + $0x598] sm:$0xff]  ;;  %v438_v5 = vld [vmem:[%s5853_s6 + $0x408] sm:$0xff] }
  0x92   : > { %2754 = vmatmul.f32.vlgmr.msra.gmra.mxu3 %v2395_v6  ;;  %2838 = vmatpush.msra.mxu0 %v452_v7  ;;  %v455_v6 = vld [vmem:[%s5853_s6 + $0x490] sm:$0xff]  ;;  %v280_v7 = vld [vmem:[%s5835_s8 + $0x18] sm:$0xff] }
  0x93   : > { %2878 = vmatpush.msra.mxu2 %v484_v8  ;;  %2793 = vmatpush.msrb.mxu1 %v389_v9  ;;  %v470_v8 = vld [vmem:[%s5853_s6 + $0x508] sm:$0xff]  ;;  %v487_v9 = vld [vmem:[%s5853_s6 + $0x590] sm:$0xff]  ;;  %2401 = vst [vmem:[#allocation1 + $0x20] ss:$4 sm:$0xff] %v280_v7  ;;  %v520_v7 = vld [vmem:[%s5853_s6 + $0x698] sm:$0xff] }
  0x94   : > { %2833 = vmatpush.msrb.mxu3 %v421_v10  ;;  %2714 = vmatmul.f32.vlgmr.msra.gmra.mxu1 %v2393_v11  ;;  %v437_v10 = vld [vmem:[%s5853_s6 + $0x400] sm:$0xff]  ;;  %v454_v11 = vld [vmem:[%s5853_s6 + $0x488] sm:$0xff] }
  0x95   : > { %2839 = vmatpush.msra.mxu0 %v451_v12  ;;  %2858 = vmatpush.msra.mxu1 %v468_v13  ;;  %v469_v12 = vld [vmem:[%s5853_s6 + $0x500] sm:$0xff]  ;;  %v486_v13 = vld [vmem:[%s5853_s6 + $0x588] sm:$0xff] }
  0x96   : > { %2879 = vmatpush.msra.mxu2 %v483_v14  ;;  %2898 = vmatpush.msra.mxu3 %v500_v15  ;;  %v2402_v14 = vld.sshfl [vmem:[#allocation1] sm:$0xff pattern:$0x73625140]  ;;  %v2404_v15 = vld.sshfl [vmem:[#allocation1 + $0x10] sm:$0xff pattern:$0x73625140] }
  0x97   : > { %2840 = vmatpush.msra.mxu0 %v450_v16  ;;  %2859 = vmatpush.msra.mxu1 %v467_v17  ;;  %v516_v16 = vld [vmem:[%s5853_s6 + $0x678] sm:$0xff] }
  0x98   : > { %2880 = vmatpush.msra.mxu2 %v482_v18  ;;  %2899 = vmatpush.msra.mxu3 %v499_v19  ;;  %v548_v17 = vld [vmem:[%s5853_s6 + $0x778] sm:$0xff]  ;;  %v453_v18 = vld [vmem:[%s5853_s6 + $0x480] sm:$0xff] }
  0x99   : > { %2814 = vmatmul.f32.vlgmr.msrb.gmra.mxu2 %v2398_v21  ;;  %2841 = vmatpush.msra.mxu0 %v449_v22  ;;  %v485_v19 = vld [vmem:[%s5853_s6 + $0x580] sm:$0xff]  ;;  %v2405_v21 = vld.sshfl [vmem:[#allocation1 + $0x18] sm:$0xff pattern:$0x73625140]  ;;  %v515_v22 = vld [vmem:[%s5853_s6 + $0x670] sm:$0xff] }
  0x9a   : > { %2860 = vmatpush.msra.mxu1 %v466_v23  ;;  %2881 = vmatpush.msra.mxu2 %v481_v24  ;;  %v532_v23 = vld [vmem:[%s5853_s6 + $0x6f8] sm:$0xff]  ;;  %v547_v24 = vld [vmem:[%s5853_s6 + $0x770] sm:$0xff] }
  0x9b   : > { %2900 = vmatpush.msra.mxu3 %v498_v25  ;;  %2774 = vmatmul.f32.vlgmr.msrb.gmra.mxu0 %v2396_v26  ;;  %v564_v25 = vld [vmem:[%s5853_s6 + $0x7f8] sm:$0xff]  ;;  %v514_v26 = vld [vmem:[%s5853_s6 + $0x668] sm:$0xff] }
  0x9c   : > { %2834 = vmatmul.f32.vlgmr.msrb.gmra.mxu3 %v2399_v27  ;;  %2842 = vmatpush.msra.mxu0 %v448_v28  ;;  %v531_v27 = vld [vmem:[%s5853_s6 + $0x6f0] sm:$0xff]  ;;  %v546_v28 = vld [vmem:[%s5853_s6 + $0x768] sm:$0xff] }
  0x9d   : > { %2861 = vmatpush.msra.mxu1 %v465_v29  ;;  %2882 = vmatpush.msra.mxu2 %v480_v30  ;;  %v563_v29 = vld [vmem:[%s5853_s6 + $0x7f0] sm:$0xff]  ;;  %v513_v30 = vld [vmem:[%s5853_s6 + $0x660] sm:$0xff] }
  0x9e   : > { %2901 = vmatpush.msra.mxu3 %v497_v31  ;;  %2794 = vmatmul.f32.vlgmr.msrb.gmra.mxu1 %v2397_v32  ;;  %v530_v31 = vld [vmem:[%s5853_s6 + $0x6e8] sm:$0xff]  ;;  %v545_v32 = vld [vmem:[%s5853_s6 + $0x760] sm:$0xff] }
  0x9f   : > { %2843 = vmatpush.msra.mxu0 %v447_v33  ;;  %2862 = vmatpush.msra.mxu1 %v464_v34  ;;  %v562_v33 = vld [vmem:[%s5853_s6 + $0x7e8] sm:$0xff]  ;;  %v512_v34 = vld [vmem:[%s5853_s6 + $0x658] sm:$0xff] }
  0xa0   : > { %2883 = vmatpush.msra.mxu2 %v479_v35  ;;  %2902 = vmatpush.msra.mxu3 %v496_v36  ;;  %v529_v35 = vld [vmem:[%s5853_s6 + $0x6e0] sm:$0xff]  ;;  %v544_v36 = vld [vmem:[%s5853_s6 + $0x758] sm:$0xff] }
  0xa1   : > { %2844 = vmatpush.msra.mxu0 %v446_v37  ;;  %2863 = vmatpush.msra.mxu1 %v463_v38  ;;  %v561_v37 = vld [vmem:[%s5853_s6 + $0x7e0] sm:$0xff]  ;;  %v511_v38 = vld [vmem:[%s5853_s6 + $0x650] sm:$0xff] }
  0xa2   : > { %2884 = vmatpush.msra.mxu2 %v478_v39  ;;  %2903 = vmatpush.msra.mxu3 %v495_v40  ;;  %v528_v39 = vld [vmem:[%s5853_s6 + $0x6d8] sm:$0xff]  ;;  %v543_v40 = vld [vmem:[%s5853_s6 + $0x750] sm:$0xff] }
  0xa3   : > { %2845 = vmatpush.msra.mxu0 %v445_v41  ;;  %2864 = vmatpush.msra.mxu1 %v462_v42  ;;  %v560_v41 = vld [vmem:[%s5853_s6 + $0x7d8] sm:$0xff]  ;;  %v510_v42 = vld [vmem:[%s5853_s6 + $0x648] sm:$0xff] }
  0xa4   : > { %2885 = vmatpush.msra.mxu2 %v477_v43  ;;  %2904 = vmatpush.msra.mxu3 %v494_v44  ;;  %v527_v43 = vld [vmem:[%s5853_s6 + $0x6d0] sm:$0xff]  ;;  %v542_v44 = vld [vmem:[%s5853_s6 + $0x748] sm:$0xff] }
  0xa5   : > { %2846 = vmatpush.msra.mxu0 %v444_v45  ;;  %2865 = vmatpush.msra.mxu1 %v461_v46  ;;  %v559_v45 = vld [vmem:[%s5853_s6 + $0x7d0] sm:$0xff]  ;;  %v509_v46 = vld [vmem:[%s5853_s6 + $0x640] sm:$0xff] }
  0xa6   : > { %2886 = vmatpush.msra.mxu2 %v476_v47  ;;  %2905 = vmatpush.msra.mxu3 %v493_v48  ;;  %v526_v47 = vld [vmem:[%s5853_s6 + $0x6c8] sm:$0xff]  ;;  %v541_v48 = vld [vmem:[%s5853_s6 + $0x740] sm:$0xff] }
  0xa7   : > { %2847 = vmatpush.msra.mxu0 %v443_v49  ;;  %2866 = vmatpush.msra.mxu1 %v460_v50  ;;  %v558_v49 = vld [vmem:[%s5853_s6 + $0x7c8] sm:$0xff]  ;;  %v508_v50 = vld [vmem:[%s5853_s6 + $0x638] sm:$0xff] }
  0xa8   : > { %2887 = vmatpush.msra.mxu2 %v475_v51  ;;  %2906 = vmatpush.msra.mxu3 %v492_v52  ;;  %v525_v51 = vld [vmem:[%s5853_s6 + $0x6c0] sm:$0xff]  ;;  %v540_v52 = vld [vmem:[%s5853_s6 + $0x738] sm:$0xff] }
  0xa9   : > { %2848 = vmatpush.msra.mxu0 %v442_v53  ;;  %2867 = vmatpush.msra.mxu1 %v459_v54  ;;  %v557_v53 = vld [vmem:[%s5853_s6 + $0x7c0] sm:$0xff]  ;;  %v507_v54 = vld [vmem:[%s5853_s6 + $0x630] sm:$0xff] }
  0xaa   : > { %2888 = vmatpush.msra.mxu2 %v474_v55  ;;  %2907 = vmatpush.msra.mxu3 %v491_v56  ;;  %v524_v55 = vld [vmem:[%s5853_s6 + $0x6b8] sm:$0xff]  ;;  %v539_v56 = vld [vmem:[%s5853_s6 + $0x730] sm:$0xff] }
  0xab   : > { %2849 = vmatpush.msra.mxu0 %v441_v57  ;;  %2868 = vmatpush.msra.mxu1 %v458_v58  ;;  %v556_v57 = vld [vmem:[%s5853_s6 + $0x7b8] sm:$0xff]  ;;  %v506_v58 = vld [vmem:[%s5853_s6 + $0x628] sm:$0xff] }
  0xac   : > { %2889 = vmatpush.msra.mxu2 %v473_v59  ;;  %2908 = vmatpush.msra.mxu3 %v490_v60  ;;  %v523_v59 = vld [vmem:[%s5853_s6 + $0x6b0] sm:$0xff]  ;;  %v538_v60 = vld [vmem:[%s5853_s6 + $0x728] sm:$0xff] }
  0xad   : > { %2850 = vmatpush.msra.mxu0 %v440_v61  ;;  %2869 = vmatpush.msra.mxu1 %v457_v62  ;;  %v555_v61 = vld [vmem:[%s5853_s6 + $0x7b0] sm:$0xff]  ;;  %v505_v62 = vld [vmem:[%s5853_s6 + $0x620] sm:$0xff] }
  0xae   : > { %2890 = vmatpush.msra.mxu2 %v472_v63  ;;  %2909 = vmatpush.msra.mxu3 %v489_v0  ;;  %v522_v63 = vld [vmem:[%s5853_s6 + $0x6a8] sm:$0xff]  ;;  %v537_v0 = vld [vmem:[%s5853_s6 + $0x720] sm:$0xff] }
  0xaf   : > { %2851 = vmatpush.msra.mxu0 %v439_v1  ;;  %2870 = vmatpush.msra.mxu1 %v456_v2  ;;  %v554_v1 = vld [vmem:[%s5853_s6 + $0x7a8] sm:$0xff]  ;;  %v504_v2 = vld [vmem:[%s5853_s6 + $0x618] sm:$0xff] }
  0xb0   : > { %2891 = vmatpush.msra.mxu2 %v471_v3  ;;  %2910 = vmatpush.msra.mxu3 %v488_v4  ;;  %v521_v3 = vld [vmem:[%s5853_s6 + $0x6a0] sm:$0xff]  ;;  %v536_v4 = vld [vmem:[%s5853_s6 + $0x718] sm:$0xff] }
  0xb1   : > { %2852 = vmatpush.msra.mxu0 %v438_v5  ;;  %2871 = vmatpush.msra.mxu1 %v455_v6  ;;  %v553_v5 = vld [vmem:[%s5853_s6 + $0x7a0] sm:$0xff]  ;;  %v503_v6 = vld [vmem:[%s5853_s6 + $0x610] sm:$0xff] }
  0xb2   : > { %2892 = vmatpush.msra.mxu2 %v470_v8  ;;  %2911 = vmatpush.msra.mxu3 %v487_v9  ;;  %v535_v8 = vld [vmem:[%s5853_s6 + $0x710] sm:$0xff]  ;;  %v552_v9 = vld [vmem:[%s5853_s6 + $0x798] sm:$0xff] }
  0xb3   : > { %2853 = vmatpush.msra.mxu0 %v437_v10  ;;  %2872 = vmatpush.msra.mxu1 %v454_v11  ;;  %v502_v10 = vld [vmem:[%s5853_s6 + $0x608] sm:$0xff]  ;;  %v519_v11 = vld [vmem:[%s5853_s6 + $0x690] sm:$0xff] }
  0xb4   : > { %2893 = vmatpush.msra.mxu2 %v469_v12  ;;  %2912 = vmatpush.msra.mxu3 %v486_v13  ;;  %v281_v12 = vld [vmem:[%s5835_s8 + $0x20] sm:$0xff] }
  0xb5   : > { %2854 = vmatmul.f32.vlgmr.msra.gmra.mxu0 %v2402_v14  ;;  %2894 = vmatmul.f32.vlgmr.msra.gmra.mxu2 %v2404_v15  ;;  %v534_v13 = vld [vmem:[%s5853_s6 + $0x708] sm:$0xff]  ;;  %v551_v14 = vld [vmem:[%s5853_s6 + $0x790] sm:$0xff]  ;;  %2410 = vst [vmem:[#allocation1] ss:$4 sm:$0xff] %v281_v12  ;;  %v501_v15 = vld [vmem:[%s5853_s6 + $0x600] sm:$0xff] }
  0xb6   : > { %2918 = vmatpush.msrb.mxu0 %v516_v16  ;;  %2958 = vmatpush.msrb.mxu2 %v548_v17  ;;  %v518_v16 = vld [vmem:[%s5853_s6 + $0x688] sm:$0xff]  ;;  %v533_v17 = vld [vmem:[%s5853_s6 + $0x700] sm:$0xff]  ;;  %v584_v12 = vld [vmem:[%s5853_s6 + $0x898] sm:$0xff] }
  0xb7   : > { %2873 = vmatpush.msra.mxu1 %v453_v18  ;;  %2913 = vmatpush.msra.mxu3 %v485_v19  ;;  %v550_v18 = vld [vmem:[%s5853_s6 + $0x788] sm:$0xff]  ;;  %v2406_v19 = vld.sshfl [vmem:[#allocation1 + $0x20] sm:$0xff pattern:$0x73625140] }
  0xb8   : > { %2874 = vmatmul.f32.vlgmr.msra.gmra.mxu1 %v2403_v20  ;;  %2914 = vmatmul.f32.vlgmr.msra.gmra.mxu3 %v2405_v21  ;;  %v2408_v20 = vld.sshfl [vmem:[#allocation1 + $0x30] sm:$0xff pattern:$0x73625140]  ;;  %v580_v21 = vld [vmem:[%s5853_s6 + $0x878] sm:$0xff] }
  0xb9   : > { %2919 = vmatpush.msrb.mxu0 %v515_v22  ;;  %2938 = vmatpush.msrb.mxu1 %v532_v23  ;;  %v612_v22 = vld [vmem:[%s5853_s6 + $0x978] sm:$0xff]  ;;  %v517_v23 = vld [vmem:[%s5853_s6 + $0x680] sm:$0xff] }
  0xba   : > { %2959 = vmatpush.msrb.mxu2 %v547_v24  ;;  %2978 = vmatpush.msrb.mxu3 %v564_v25  ;;  %v549_v24 = vld [vmem:[%s5853_s6 + $0x780] sm:$0xff]  ;;  %v2407_v25 = vld.sshfl [vmem:[#allocation1 + $0x28] sm:$0xff pattern:$0x73625140] }
  0xbb   : > { %2920 = vmatpush.msrb.mxu0 %v514_v26  ;;  %2939 = vmatpush.msrb.mxu1 %v531_v27  ;;  %v2409_v26 = vld.sshfl [vmem:[#allocation1 + $0x38] sm:$0xff pattern:$0x73625140]  ;;  %v579_v27 = vld [vmem:[%s5853_s6 + $0x870] sm:$0xff] }
  0xbc   : > { %2960 = vmatpush.msrb.mxu2 %v546_v28  ;;  %2979 = vmatpush.msrb.mxu3 %v563_v29  ;;  %v596_v28 = vld [vmem:[%s5853_s6 + $0x8f8] sm:$0xff]  ;;  %v611_v29 = vld [vmem:[%s5853_s6 + $0x970] sm:$0xff] }
  0xbd   : > { %2921 = vmatpush.msrb.mxu0 %v513_v30  ;;  %2940 = vmatpush.msrb.mxu1 %v530_v31  ;;  %v628_v30 = vld [vmem:[%s5853_s6 + $0x9f8] sm:$0xff]  ;;  %v578_v31 = vld [vmem:[%s5853_s6 + $0x868] sm:$0xff] }
  0xbe   : > { %2961 = vmatpush.msrb.mxu2 %v545_v32  ;;  %2980 = vmatpush.msrb.mxu3 %v562_v33  ;;  %v595_v32 = vld [vmem:[%s5853_s6 + $0x8f0] sm:$0xff]  ;;  %v610_v33 = vld [vmem:[%s5853_s6 + $0x968] sm:$0xff] }
  0xbf   : > { %2922 = vmatpush.msrb.mxu0 %v512_v34  ;;  %2941 = vmatpush.msrb.mxu1 %v529_v35  ;;  %v627_v34 = vld [vmem:[%s5853_s6 + $0x9f0] sm:$0xff]  ;;  %v577_v35 = vld [vmem:[%s5853_s6 + $0x860] sm:$0xff] }
  0xc0   : > { %2962 = vmatpush.msrb.mxu2 %v544_v36  ;;  %2981 = vmatpush.msrb.mxu3 %v561_v37  ;;  %v594_v36 = vld [vmem:[%s5853_s6 + $0x8e8] sm:$0xff]  ;;  %v609_v37 = vld [vmem:[%s5853_s6 + $0x960] sm:$0xff] }
  0xc1   : > { %2923 = vmatpush.msrb.mxu0 %v511_v38  ;;  %2942 = vmatpush.msrb.mxu1 %v528_v39  ;;  %v626_v38 = vld [vmem:[%s5853_s6 + $0x9e8] sm:$0xff]  ;;  %v576_v39 = vld [vmem:[%s5853_s6 + $0x858] sm:$0xff] }
  0xc2   : > { %2963 = vmatpush.msrb.mxu2 %v543_v40  ;;  %2982 = vmatpush.msrb.mxu3 %v560_v41  ;;  %v593_v40 = vld [vmem:[%s5853_s6 + $0x8e0] sm:$0xff]  ;;  %v608_v41 = vld [vmem:[%s5853_s6 + $0x958] sm:$0xff] }
  0xc3   : > { %2924 = vmatpush.msrb.mxu0 %v510_v42  ;;  %2943 = vmatpush.msrb.mxu1 %v527_v43  ;;  %v625_v42 = vld [vmem:[%s5853_s6 + $0x9e0] sm:$0xff]  ;;  %v575_v43 = vld [vmem:[%s5853_s6 + $0x850] sm:$0xff] }
  0xc4   : > { %2964 = vmatpush.msrb.mxu2 %v542_v44  ;;  %2983 = vmatpush.msrb.mxu3 %v559_v45  ;;  %v592_v44 = vld [vmem:[%s5853_s6 + $0x8d8] sm:$0xff]  ;;  %v607_v45 = vld [vmem:[%s5853_s6 + $0x950] sm:$0xff] }
  0xc5   : > { %2925 = vmatpush.msrb.mxu0 %v509_v46  ;;  %2944 = vmatpush.msrb.mxu1 %v526_v47  ;;  %v624_v46 = vld [vmem:[%s5853_s6 + $0x9d8] sm:$0xff]  ;;  %v574_v47 = vld [vmem:[%s5853_s6 + $0x848] sm:$0xff] }
  0xc6   : > { %2965 = vmatpush.msrb.mxu2 %v541_v48  ;;  %2984 = vmatpush.msrb.mxu3 %v558_v49  ;;  %v591_v48 = vld [vmem:[%s5853_s6 + $0x8d0] sm:$0xff]  ;;  %v606_v49 = vld [vmem:[%s5853_s6 + $0x948] sm:$0xff] }
  0xc7   : > { %2926 = vmatpush.msrb.mxu0 %v508_v50  ;;  %2945 = vmatpush.msrb.mxu1 %v525_v51  ;;  %v623_v50 = vld [vmem:[%s5853_s6 + $0x9d0] sm:$0xff]  ;;  %v573_v51 = vld [vmem:[%s5853_s6 + $0x840] sm:$0xff] }
  0xc8   : > { %2966 = vmatpush.msrb.mxu2 %v540_v52  ;;  %2985 = vmatpush.msrb.mxu3 %v557_v53  ;;  %v590_v52 = vld [vmem:[%s5853_s6 + $0x8c8] sm:$0xff]  ;;  %v605_v53 = vld [vmem:[%s5853_s6 + $0x940] sm:$0xff] }
  0xc9   : > { %2927 = vmatpush.msrb.mxu0 %v507_v54  ;;  %2946 = vmatpush.msrb.mxu1 %v524_v55  ;;  %v622_v54 = vld [vmem:[%s5853_s6 + $0x9c8] sm:$0xff]  ;;  %v572_v55 = vld [vmem:[%s5853_s6 + $0x838] sm:$0xff] }
  0xca   : > { %2967 = vmatpush.msrb.mxu2 %v539_v56  ;;  %2986 = vmatpush.msrb.mxu3 %v556_v57  ;;  %v589_v56 = vld [vmem:[%s5853_s6 + $0x8c0] sm:$0xff]  ;;  %v604_v57 = vld [vmem:[%s5853_s6 + $0x938] sm:$0xff] }
  0xcb   : > { %2928 = vmatpush.msrb.mxu0 %v506_v58  ;;  %2947 = vmatpush.msrb.mxu1 %v523_v59  ;;  %v621_v58 = vld [vmem:[%s5853_s6 + $0x9c0] sm:$0xff]  ;;  %v571_v59 = vld [vmem:[%s5853_s6 + $0x830] sm:$0xff] }
  0xcc   : > { %2968 = vmatpush.msrb.mxu2 %v538_v60  ;;  %2987 = vmatpush.msrb.mxu3 %v555_v61  ;;  %v588_v60 = vld [vmem:[%s5853_s6 + $0x8b8] sm:$0xff]  ;;  %v603_v61 = vld [vmem:[%s5853_s6 + $0x930] sm:$0xff] }
  0xcd   : > { %2929 = vmatpush.msrb.mxu0 %v505_v62  ;;  %2948 = vmatpush.msrb.mxu1 %v522_v63  ;;  %v620_v62 = vld [vmem:[%s5853_s6 + $0x9b8] sm:$0xff]  ;;  %v570_v63 = vld [vmem:[%s5853_s6 + $0x828] sm:$0xff] }
  0xce   : > { %2969 = vmatpush.msrb.mxu2 %v537_v0  ;;  %2988 = vmatpush.msrb.mxu3 %v554_v1  ;;  %v587_v0 = vld [vmem:[%s5853_s6 + $0x8b0] sm:$0xff]  ;;  %v602_v1 = vld [vmem:[%s5853_s6 + $0x928] sm:$0xff] }
  0xcf   : > { %2930 = vmatpush.msrb.mxu0 %v504_v2  ;;  %2949 = vmatpush.msrb.mxu1 %v521_v3  ;;  %v619_v2 = vld [vmem:[%s5853_s6 + $0x9b0] sm:$0xff]  ;;  %v569_v3 = vld [vmem:[%s5853_s6 + $0x820] sm:$0xff] }
  0xd0   : > { %2970 = vmatpush.msrb.mxu2 %v536_v4  ;;  %2989 = vmatpush.msrb.mxu3 %v553_v5  ;;  %v586_v4 = vld [vmem:[%s5853_s6 + $0x8a8] sm:$0xff]  ;;  %v601_v5 = vld [vmem:[%s5853_s6 + $0x920] sm:$0xff] }
  0xd1   : > { %2931 = vmatpush.msrb.mxu0 %v503_v6  ;;  %2950 = vmatpush.msrb.mxu1 %v520_v7  ;;  %v618_v6 = vld [vmem:[%s5853_s6 + $0x9a8] sm:$0xff]  ;;  %v568_v7 = vld [vmem:[%s5853_s6 + $0x818] sm:$0xff] }
  0xd2   : > { %2971 = vmatpush.msrb.mxu2 %v535_v8  ;;  %2990 = vmatpush.msrb.mxu3 %v552_v9  ;;  %v585_v8 = vld [vmem:[%s5853_s6 + $0x8a0] sm:$0xff]  ;;  %v600_v9 = vld [vmem:[%s5853_s6 + $0x918] sm:$0xff] }
  0xd3   : > { %2932 = vmatpush.msrb.mxu0 %v502_v10  ;;  %2951 = vmatpush.msrb.mxu1 %v519_v11  ;;  %v617_v10 = vld [vmem:[%s5853_s6 + $0x9a0] sm:$0xff]  ;;  %v567_v11 = vld [vmem:[%s5853_s6 + $0x810] sm:$0xff] }
  0xd4   : > { %2972 = vmatpush.msrb.mxu2 %v534_v13  ;;  %2991 = vmatpush.msrb.mxu3 %v551_v14  ;;  %v599_v13 = vld [vmem:[%s5853_s6 + $0x910] sm:$0xff]  ;;  %v616_v14 = vld [vmem:[%s5853_s6 + $0x998] sm:$0xff] }
  0xd5   : > { %2933 = vmatpush.msrb.mxu0 %v501_v15  ;;  %2952 = vmatpush.msrb.mxu1 %v518_v16  ;;  %v566_v15 = vld [vmem:[%s5853_s6 + $0x808] sm:$0xff]  ;;  %v583_v16 = vld [vmem:[%s5853_s6 + $0x890] sm:$0xff] }
  0xd6   : > { %2973 = vmatpush.msrb.mxu2 %v533_v17  ;;  %2992 = vmatpush.msrb.mxu3 %v550_v18  ;;  %v282_v17 = vld [vmem:[%s5835_s8 + $0x28] sm:$0xff]  ;;  %v598_v18 = vld [vmem:[%s5853_s6 + $0x908] sm:$0xff] }
  0xd7   : > { %2934 = vmatmul.f32.vlgmr.msrb.gmra.mxu0 %v2406_v19  ;;  %2974 = vmatmul.f32.vlgmr.msrb.gmra.mxu2 %v2408_v20  ;;  %v615_v19 = vld [vmem:[%s5853_s6 + $0x990] sm:$0xff]  ;;  %2411 = vst [vmem:[#allocation1 + $0x20] ss:$4 sm:$0xff] %v282_v17  ;;  %v565_v20 = vld [vmem:[%s5853_s6 + $0x800] sm:$0xff]  ;;  %v648_v17 = vld [vmem:[%s5853_s6 + $0xa98] sm:$0xff] }
  0xd8   : > { %2998 = vmatpush.msra.mxu0 %v580_v21  ;;  %3038 = vmatpush.msra.mxu2 %v612_v22  ;;  %v582_v21 = vld [vmem:[%s5853_s6 + $0x888] sm:$0xff]  ;;  %v597_v22 = vld [vmem:[%s5853_s6 + $0x900] sm:$0xff] }
  0xd9   : > { %2953 = vmatpush.msrb.mxu1 %v517_v23  ;;  %2993 = vmatpush.msrb.mxu3 %v549_v24  ;;  %v614_v23 = vld [vmem:[%s5853_s6 + $0x988] sm:$0xff]  ;;  %v2412_v24 = vld.sshfl [vmem:[#allocation1] sm:$0xff pattern:$0x73625140] }
  0xda   : > { %2954 = vmatmul.f32.vlgmr.msrb.gmra.mxu1 %v2407_v25  ;;  %2994 = vmatmul.f32.vlgmr.msrb.gmra.mxu3 %v2409_v26  ;;  %v2414_v25 = vld.sshfl [vmem:[#allocation1 + $0x10] sm:$0xff pattern:$0x73625140]  ;;  %v644_v26 = vld [vmem:[%s5853_s6 + $0xa78] sm:$0xff] }
  0xdb   : > { %2999 = vmatpush.msra.mxu0 %v579_v27  ;;  %3018 = vmatpush.msra.mxu1 %v596_v28  ;;  %v676_v27 = vld [vmem:[%s5853_s6 + $0xb78] sm:$0xff]  ;;  %v581_v28 = vld [vmem:[%s5853_s6 + $0x880] sm:$0xff] }
  0xdc   : > { %3039 = vmatpush.msra.mxu2 %v611_v29  ;;  %3058 = vmatpush.msra.mxu3 %v628_v30  ;;  %v613_v29 = vld [vmem:[%s5853_s6 + $0x980] sm:$0xff]  ;;  %v2413_v30 = vld.sshfl [vmem:[#allocation1 + $0x8] sm:$0xff pattern:$0x73625140] }
  0xdd   : > { %3000 = vmatpush.msra.mxu0 %v578_v31  ;;  %3019 = vmatpush.msra.mxu1 %v595_v32  ;;  %v2415_v31 = vld.sshfl [vmem:[#allocation1 + $0x18] sm:$0xff pattern:$0x73625140]  ;;  %v643_v32 = vld [vmem:[%s5853_s6 + $0xa70] sm:$0xff] }
  0xde   : > { %3040 = vmatpush.msra.mxu2 %v610_v33  ;;  %3059 = vmatpush.msra.mxu3 %v627_v34  ;;  %v660_v33 = vld [vmem:[%s5853_s6 + $0xaf8] sm:$0xff]  ;;  %v675_v34 = vld [vmem:[%s5853_s6 + $0xb70] sm:$0xff] }
  0xdf   : > { %3001 = vmatpush.msra.mxu0 %v577_v35  ;;  %3020 = vmatpush.msra.mxu1 %v594_v36  ;;  %v692_v35 = vld [vmem:[%s5853_s6 + $0xbf8] sm:$0xff]  ;;  %v642_v36 = vld [vmem:[%s5853_s6 + $0xa68] sm:$0xff] }
  0xe0   : > { %3041 = vmatpush.msra.mxu2 %v609_v37  ;;  %3060 = vmatpush.msra.mxu3 %v626_v38  ;;  %v659_v37 = vld [vmem:[%s5853_s6 + $0xaf0] sm:$0xff]  ;;  %v674_v38 = vld [vmem:[%s5853_s6 + $0xb68] sm:$0xff] }
  0xe1   : > { %3002 = vmatpush.msra.mxu0 %v576_v39  ;;  %3021 = vmatpush.msra.mxu1 %v593_v40  ;;  %v691_v39 = vld [vmem:[%s5853_s6 + $0xbf0] sm:$0xff]  ;;  %v641_v40 = vld [vmem:[%s5853_s6 + $0xa60] sm:$0xff] }
  0xe2   : > { %3042 = vmatpush.msra.mxu2 %v608_v41  ;;  %3061 = vmatpush.msra.mxu3 %v625_v42  ;;  %v658_v41 = vld [vmem:[%s5853_s6 + $0xae8] sm:$0xff]  ;;  %v673_v42 = vld [vmem:[%s5853_s6 + $0xb60] sm:$0xff] }
  0xe3   : > { %3003 = vmatpush.msra.mxu0 %v575_v43  ;;  %3022 = vmatpush.msra.mxu1 %v592_v44  ;;  %v690_v43 = vld [vmem:[%s5853_s6 + $0xbe8] sm:$0xff]  ;;  %v640_v44 = vld [vmem:[%s5853_s6 + $0xa58] sm:$0xff] }
  0xe4   : > { %3043 = vmatpush.msra.mxu2 %v607_v45  ;;  %3062 = vmatpush.msra.mxu3 %v624_v46  ;;  %v657_v45 = vld [vmem:[%s5853_s6 + $0xae0] sm:$0xff]  ;;  %v672_v46 = vld [vmem:[%s5853_s6 + $0xb58] sm:$0xff] }
  0xe5   : > { %3004 = vmatpush.msra.mxu0 %v574_v47  ;;  %3023 = vmatpush.msra.mxu1 %v591_v48  ;;  %v689_v47 = vld [vmem:[%s5853_s6 + $0xbe0] sm:$0xff]  ;;  %v639_v48 = vld [vmem:[%s5853_s6 + $0xa50] sm:$0xff] }
  0xe6   : > { %3044 = vmatpush.msra.mxu2 %v606_v49  ;;  %3063 = vmatpush.msra.mxu3 %v623_v50  ;;  %v656_v49 = vld [vmem:[%s5853_s6 + $0xad8] sm:$0xff]  ;;  %v671_v50 = vld [vmem:[%s5853_s6 + $0xb50] sm:$0xff] }
  0xe7   : > { %3005 = vmatpush.msra.mxu0 %v573_v51  ;;  %3024 = vmatpush.msra.mxu1 %v590_v52  ;;  %v688_v51 = vld [vmem:[%s5853_s6 + $0xbd8] sm:$0xff]  ;;  %v638_v52 = vld [vmem:[%s5853_s6 + $0xa48] sm:$0xff] }
  0xe8   : > { %3045 = vmatpush.msra.mxu2 %v605_v53  ;;  %3064 = vmatpush.msra.mxu3 %v622_v54  ;;  %v655_v53 = vld [vmem:[%s5853_s6 + $0xad0] sm:$0xff]  ;;  %v670_v54 = vld [vmem:[%s5853_s6 + $0xb48] sm:$0xff] }
  0xe9   : > { %3006 = vmatpush.msra.mxu0 %v572_v55  ;;  %3025 = vmatpush.msra.mxu1 %v589_v56  ;;  %v687_v55 = vld [vmem:[%s5853_s6 + $0xbd0] sm:$0xff]  ;;  %v637_v56 = vld [vmem:[%s5853_s6 + $0xa40] sm:$0xff] }
  0xea   : > { %3046 = vmatpush.msra.mxu2 %v604_v57  ;;  %3065 = vmatpush.msra.mxu3 %v621_v58  ;;  %v654_v57 = vld [vmem:[%s5853_s6 + $0xac8] sm:$0xff]  ;;  %v669_v58 = vld [vmem:[%s5853_s6 + $0xb40] sm:$0xff] }
  0xeb   : > { %3007 = vmatpush.msra.mxu0 %v571_v59  ;;  %3026 = vmatpush.msra.mxu1 %v588_v60  ;;  %v686_v59 = vld [vmem:[%s5853_s6 + $0xbc8] sm:$0xff]  ;;  %v636_v60 = vld [vmem:[%s5853_s6 + $0xa38] sm:$0xff] }
  0xec   : > { %3047 = vmatpush.msra.mxu2 %v603_v61  ;;  %3066 = vmatpush.msra.mxu3 %v620_v62  ;;  %v653_v61 = vld [vmem:[%s5853_s6 + $0xac0] sm:$0xff]  ;;  %v668_v62 = vld [vmem:[%s5853_s6 + $0xb38] sm:$0xff] }
  0xed   : > { %3008 = vmatpush.msra.mxu0 %v570_v63  ;;  %3027 = vmatpush.msra.mxu1 %v587_v0  ;;  %v685_v63 = vld [vmem:[%s5853_s6 + $0xbc0] sm:$0xff]  ;;  %v635_v0 = vld [vmem:[%s5853_s6 + $0xa30] sm:$0xff] }
  0xee   : > { %3048 = vmatpush.msra.mxu2 %v602_v1  ;;  %3067 = vmatpush.msra.mxu3 %v619_v2  ;;  %v652_v1 = vld [vmem:[%s5853_s6 + $0xab8] sm:$0xff]  ;;  %v667_v2 = vld [vmem:[%s5853_s6 + $0xb30] sm:$0xff] }
  0xef   : > { %3009 = vmatpush.msra.mxu0 %v569_v3  ;;  %3028 = vmatpush.msra.mxu1 %v586_v4  ;;  %v684_v3 = vld [vmem:[%s5853_s6 + $0xbb8] sm:$0xff]  ;;  %v634_v4 = vld [vmem:[%s5853_s6 + $0xa28] sm:$0xff] }
  0xf0   : > { %3049 = vmatpush.msra.mxu2 %v601_v5  ;;  %3068 = vmatpush.msra.mxu3 %v618_v6  ;;  %v651_v5 = vld [vmem:[%s5853_s6 + $0xab0] sm:$0xff]  ;;  %v666_v6 = vld [vmem:[%s5853_s6 + $0xb28] sm:$0xff] }
  0xf1   : > { %3010 = vmatpush.msra.mxu0 %v568_v7  ;;  %3029 = vmatpush.msra.mxu1 %v585_v8  ;;  %v683_v7 = vld [vmem:[%s5853_s6 + $0xbb0] sm:$0xff]  ;;  %v633_v8 = vld [vmem:[%s5853_s6 + $0xa20] sm:$0xff] }
  0xf2   : > { %3050 = vmatpush.msra.mxu2 %v600_v9  ;;  %3069 = vmatpush.msra.mxu3 %v617_v10  ;;  %v650_v9 = vld [vmem:[%s5853_s6 + $0xaa8] sm:$0xff]  ;;  %v665_v10 = vld [vmem:[%s5853_s6 + $0xb20] sm:$0xff] }
  0xf3   : > { %3011 = vmatpush.msra.mxu0 %v567_v11  ;;  %3030 = vmatpush.msra.mxu1 %v584_v12  ;;  %v682_v11 = vld [vmem:[%s5853_s6 + $0xba8] sm:$0xff]  ;;  %v632_v12 = vld [vmem:[%s5853_s6 + $0xa18] sm:$0xff] }
  0xf4   : > { %3051 = vmatpush.msra.mxu2 %v599_v13  ;;  %3070 = vmatpush.msra.mxu3 %v616_v14  ;;  %v649_v13 = vld [vmem:[%s5853_s6 + $0xaa0] sm:$0xff]  ;;  %v664_v14 = vld [vmem:[%s5853_s6 + $0xb18] sm:$0xff] }
  0xf5   : > { %3012 = vmatpush.msra.mxu0 %v566_v15  ;;  %3031 = vmatpush.msra.mxu1 %v583_v16  ;;  %v681_v15 = vld [vmem:[%s5853_s6 + $0xba0] sm:$0xff]  ;;  %v631_v16 = vld [vmem:[%s5853_s6 + $0xa10] sm:$0xff] }
  0xf6   : > { %3052 = vmatpush.msra.mxu2 %v598_v18  ;;  %3071 = vmatpush.msra.mxu3 %v615_v19  ;;  %v663_v18 = vld [vmem:[%s5853_s6 + $0xb10] sm:$0xff]  ;;  %v680_v19 = vld [vmem:[%s5853_s6 + $0xb98] sm:$0xff] }
  0xf7   : > { %3013 = vmatpush.msra.mxu0 %v565_v20  ;;  %3032 = vmatpush.msra.mxu1 %v582_v21  ;;  %v630_v20 = vld [vmem:[%s5853_s6 + $0xa08] sm:$0xff]  ;;  %v647_v21 = vld [vmem:[%s5853_s6 + $0xa90] sm:$0xff] }
  0xf8   : > { %3053 = vmatpush.msra.mxu2 %v597_v22  ;;  %3072 = vmatpush.msra.mxu3 %v614_v23  ;;  %v283_v22 = vld [vmem:[%s5835_s8 + $0x30] sm:$0xff]  ;;  %v662_v23 = vld [vmem:[%s5853_s6 + $0xb08] sm:$0xff] }
  0xf9   : > { %3014 = vmatmul.f32.vlgmr.msra.gmra.mxu0 %v2412_v24  ;;  %3054 = vmatmul.f32.vlgmr.msra.gmra.mxu2 %v2414_v25  ;;  %v679_v24 = vld [vmem:[%s5853_s6 + $0xb90] sm:$0xff]  ;;  %2420 = vst [vmem:[#allocation1] ss:$4 sm:$0xff] %v283_v22  ;;  %v629_v25 = vld [vmem:[%s5853_s6 + $0xa00] sm:$0xff]  ;;  %v712_v22 = vld [vmem:[%s5853_s6 + $0xc98] sm:$0xff] }
  0xfa   : > { %3078 = vmatpush.msrb.mxu0 %v644_v26  ;;  %3118 = vmatpush.msrb.mxu2 %v676_v27  ;;  %v646_v26 = vld [vmem:[%s5853_s6 + $0xa88] sm:$0xff]  ;;  %v661_v27 = vld [vmem:[%s5853_s6 + $0xb00] sm:$0xff] }
  0xfb   : > { %3033 = vmatpush.msra.mxu1 %v581_v28  ;;  %3073 = vmatpush.msra.mxu3 %v613_v29  ;;  %v678_v28 = vld [vmem:[%s5853_s6 + $0xb88] sm:$0xff]  ;;  %v2416_v29 = vld.sshfl [vmem:[#allocation1 + $0x20] sm:$0xff pattern:$0x73625140] }
  0xfc   : > { %3034 = vmatmul.f32.vlgmr.msra.gmra.mxu1 %v2413_v30  ;;  %3074 = vmatmul.f32.vlgmr.msra.gmra.mxu3 %v2415_v31  ;;  %v2418_v30 = vld.sshfl [vmem:[#allocation1 + $0x30] sm:$0xff pattern:$0x73625140]  ;;  %v708_v31 = vld [vmem:[%s5853_s6 + $0xc78] sm:$0xff] }
  0xfd   : > { %3079 = vmatpush.msrb.mxu0 %v643_v32  ;;  %3098 = vmatpush.msrb.mxu1 %v660_v33  ;;  %v740_v32 = vld [vmem:[%s5853_s6 + $0xd78] sm:$0xff]  ;;  %v645_v33 = vld [vmem:[%s5853_s6 + $0xa80] sm:$0xff] }
  0xfe   : > { %3119 = vmatpush.msrb.mxu2 %v675_v34  ;;  %3138 = vmatpush.msrb.mxu3 %v692_v35  ;;  %v677_v34 = vld [vmem:[%s5853_s6 + $0xb80] sm:$0xff]  ;;  %v2417_v35 = vld.sshfl [vmem:[#allocation1 + $0x28] sm:$0xff pattern:$0x73625140] }
  0xff   : > { %3080 = vmatpush.msrb.mxu0 %v642_v36  ;;  %3099 = vmatpush.msrb.mxu1 %v659_v37  ;;  %v2419_v36 = vld.sshfl [vmem:[#allocation1 + $0x38] sm:$0xff pattern:$0x73625140]  ;;  %v707_v37 = vld [vmem:[%s5853_s6 + $0xc70] sm:$0xff] }
 0x100   : > { %3120 = vmatpush.msrb.mxu2 %v674_v38  ;;  %3139 = vmatpush.msrb.mxu3 %v691_v39  ;;  %v724_v38 = vld [vmem:[%s5853_s6 + $0xcf8] sm:$0xff]  ;;  %v739_v39 = vld [vmem:[%s5853_s6 + $0xd70] sm:$0xff] }
 0x101   : > { %3081 = vmatpush.msrb.mxu0 %v641_v40  ;;  %3100 = vmatpush.msrb.mxu1 %v658_v41  ;;  %v756_v40 = vld [vmem:[%s5853_s6 + $0xdf8] sm:$0xff]  ;;  %v706_v41 = vld [vmem:[%s5853_s6 + $0xc68] sm:$0xff] }
 0x102   : > { %3121 = vmatpush.msrb.mxu2 %v673_v42  ;;  %3140 = vmatpush.msrb.mxu3 %v690_v43  ;;  %v723_v42 = vld [vmem:[%s5853_s6 + $0xcf0] sm:$0xff]  ;;  %v738_v43 = vld [vmem:[%s5853_s6 + $0xd68] sm:$0xff] }
 0x103   : > { %3082 = vmatpush.msrb.mxu0 %v640_v44  ;;  %3101 = vmatpush.msrb.mxu1 %v657_v45  ;;  %v755_v44 = vld [vmem:[%s5853_s6 + $0xdf0] sm:$0xff]  ;;  %v705_v45 = vld [vmem:[%s5853_s6 + $0xc60] sm:$0xff] }
 0x104   : > { %3122 = vmatpush.msrb.mxu2 %v672_v46  ;;  %3141 = vmatpush.msrb.mxu3 %v689_v47  ;;  %v722_v46 = vld [vmem:[%s5853_s6 + $0xce8] sm:$0xff]  ;;  %v737_v47 = vld [vmem:[%s5853_s6 + $0xd60] sm:$0xff] }
 0x105   : > { %3083 = vmatpush.msrb.mxu0 %v639_v48  ;;  %3102 = vmatpush.msrb.mxu1 %v656_v49  ;;  %v754_v48 = vld [vmem:[%s5853_s6 + $0xde8] sm:$0xff]  ;;  %v704_v49 = vld [vmem:[%s5853_s6 + $0xc58] sm:$0xff] }
 0x106   : > { %3123 = vmatpush.msrb.mxu2 %v671_v50  ;;  %3142 = vmatpush.msrb.mxu3 %v688_v51  ;;  %v721_v50 = vld [vmem:[%s5853_s6 + $0xce0] sm:$0xff]  ;;  %v736_v51 = vld [vmem:[%s5853_s6 + $0xd58] sm:$0xff] }
 0x107   : > { %3084 = vmatpush.msrb.mxu0 %v638_v52  ;;  %3103 = vmatpush.msrb.mxu1 %v655_v53  ;;  %v753_v52 = vld [vmem:[%s5853_s6 + $0xde0] sm:$0xff]  ;;  %v703_v53 = vld [vmem:[%s5853_s6 + $0xc50] sm:$0xff] }
 0x108   : > { %3124 = vmatpush.msrb.mxu2 %v670_v54  ;;  %3143 = vmatpush.msrb.mxu3 %v687_v55  ;;  %v720_v54 = vld [vmem:[%s5853_s6 + $0xcd8] sm:$0xff]  ;;  %v735_v55 = vld [vmem:[%s5853_s6 + $0xd50] sm:$0xff] }
 0x109   : > { %3085 = vmatpush.msrb.mxu0 %v637_v56  ;;  %3104 = vmatpush.msrb.mxu1 %v654_v57  ;;  %v752_v56 = vld [vmem:[%s5853_s6 + $0xdd8] sm:$0xff]  ;;  %v702_v57 = vld [vmem:[%s5853_s6 + $0xc48] sm:$0xff] }
 0x10a   : > { %3125 = vmatpush.msrb.mxu2 %v669_v58  ;;  %3144 = vmatpush.msrb.mxu3 %v686_v59  ;;  %v719_v58 = vld [vmem:[%s5853_s6 + $0xcd0] sm:$0xff]  ;;  %v734_v59 = vld [vmem:[%s5853_s6 + $0xd48] sm:$0xff] }
 0x10b   : > { %3086 = vmatpush.msrb.mxu0 %v636_v60  ;;  %3105 = vmatpush.msrb.mxu1 %v653_v61  ;;  %v751_v60 = vld [vmem:[%s5853_s6 + $0xdd0] sm:$0xff]  ;;  %v701_v61 = vld [vmem:[%s5853_s6 + $0xc40] sm:$0xff] }
 0x10c   : > { %3126 = vmatpush.msrb.mxu2 %v668_v62  ;;  %3145 = vmatpush.msrb.mxu3 %v685_v63  ;;  %v718_v62 = vld [vmem:[%s5853_s6 + $0xcc8] sm:$0xff]  ;;  %v733_v63 = vld [vmem:[%s5853_s6 + $0xd40] sm:$0xff] }
 0x10d   : > { %3087 = vmatpush.msrb.mxu0 %v635_v0  ;;  %3106 = vmatpush.msrb.mxu1 %v652_v1  ;;  %v750_v0 = vld [vmem:[%s5853_s6 + $0xdc8] sm:$0xff]  ;;  %v700_v1 = vld [vmem:[%s5853_s6 + $0xc38] sm:$0xff] }
 0x10e   : > { %3127 = vmatpush.msrb.mxu2 %v667_v2  ;;  %3146 = vmatpush.msrb.mxu3 %v684_v3  ;;  %v717_v2 = vld [vmem:[%s5853_s6 + $0xcc0] sm:$0xff]  ;;  %v732_v3 = vld [vmem:[%s5853_s6 + $0xd38] sm:$0xff] }
 0x10f   : > { %3088 = vmatpush.msrb.mxu0 %v634_v4  ;;  %3107 = vmatpush.msrb.mxu1 %v651_v5  ;;  %v749_v4 = vld [vmem:[%s5853_s6 + $0xdc0] sm:$0xff]  ;;  %v699_v5 = vld [vmem:[%s5853_s6 + $0xc30] sm:$0xff] }
 0x110   : > { %3128 = vmatpush.msrb.mxu2 %v666_v6  ;;  %3147 = vmatpush.msrb.mxu3 %v683_v7  ;;  %v716_v6 = vld [vmem:[%s5853_s6 + $0xcb8] sm:$0xff]  ;;  %v731_v7 = vld [vmem:[%s5853_s6 + $0xd30] sm:$0xff] }
 0x111   : > { %3089 = vmatpush.msrb.mxu0 %v633_v8  ;;  %3108 = vmatpush.msrb.mxu1 %v650_v9  ;;  %v748_v8 = vld [vmem:[%s5853_s6 + $0xdb8] sm:$0xff]  ;;  %v698_v9 = vld [vmem:[%s5853_s6 + $0xc28] sm:$0xff] }
 0x112   : > { %3129 = vmatpush.msrb.mxu2 %v665_v10  ;;  %3148 = vmatpush.msrb.mxu3 %v682_v11  ;;  %v715_v10 = vld [vmem:[%s5853_s6 + $0xcb0] sm:$0xff]  ;;  %v730_v11 = vld [vmem:[%s5853_s6 + $0xd28] sm:$0xff] }
 0x113   : > { %3090 = vmatpush.msrb.mxu0 %v632_v12  ;;  %3109 = vmatpush.msrb.mxu1 %v649_v13  ;;  %v747_v12 = vld [vmem:[%s5853_s6 + $0xdb0] sm:$0xff]  ;;  %v697_v13 = vld [vmem:[%s5853_s6 + $0xc20] sm:$0xff] }
 0x114   : > { %3130 = vmatpush.msrb.mxu2 %v664_v14  ;;  %3149 = vmatpush.msrb.mxu3 %v681_v15  ;;  %v714_v14 = vld [vmem:[%s5853_s6 + $0xca8] sm:$0xff]  ;;  %v729_v15 = vld [vmem:[%s5853_s6 + $0xd20] sm:$0xff] }
 0x115   : > { %3091 = vmatpush.msrb.mxu0 %v631_v16  ;;  %3110 = vmatpush.msrb.mxu1 %v648_v17  ;;  %v746_v16 = vld [vmem:[%s5853_s6 + $0xda8] sm:$0xff]  ;;  %v696_v17 = vld [vmem:[%s5853_s6 + $0xc18] sm:$0xff] }
 0x116   : > { %3131 = vmatpush.msrb.mxu2 %v663_v18  ;;  %3150 = vmatpush.msrb.mxu3 %v680_v19  ;;  %v713_v18 = vld [vmem:[%s5853_s6 + $0xca0] sm:$0xff]  ;;  %v728_v19 = vld [vmem:[%s5853_s6 + $0xd18] sm:$0xff] }
 0x117   : > { %3092 = vmatpush.msrb.mxu0 %v630_v20  ;;  %3111 = vmatpush.msrb.mxu1 %v647_v21  ;;  %v745_v20 = vld [vmem:[%s5853_s6 + $0xda0] sm:$0xff]  ;;  %v695_v21 = vld [vmem:[%s5853_s6 + $0xc10] sm:$0xff] }
 0x118   : > { %3132 = vmatpush.msrb.mxu2 %v662_v23  ;;  %3151 = vmatpush.msrb.mxu3 %v679_v24  ;;  %v727_v23 = vld [vmem:[%s5853_s6 + $0xd10] sm:$0xff]  ;;  %v744_v24 = vld [vmem:[%s5853_s6 + $0xd98] sm:$0xff] }
 0x119   : > { %3093 = vmatpush.msrb.mxu0 %v629_v25  ;;  %3112 = vmatpush.msrb.mxu1 %v646_v26  ;;  %v694_v25 = vld [vmem:[%s5853_s6 + $0xc08] sm:$0xff]  ;;  %v711_v26 = vld [vmem:[%s5853_s6 + $0xc90] sm:$0xff] }
 0x11a   : > { %3133 = vmatpush.msrb.mxu2 %v661_v27  ;;  %3152 = vmatpush.msrb.mxu3 %v678_v28  ;;  %v284_v27 = vld [vmem:[%s5835_s8 + $0x38] sm:$0xff]  ;;  %v726_v28 = vld [vmem:[%s5853_s6 + $0xd08] sm:$0xff] }
 0x11b   : > { %3094 = vmatmul.f32.vlgmr.msrb.gmra.mxu0 %v2416_v29  ;;  %3134 = vmatmul.f32.vlgmr.msrb.gmra.mxu2 %v2418_v30  ;;  %v743_v29 = vld [vmem:[%s5853_s6 + $0xd90] sm:$0xff]  ;;  %2421 = vst [vmem:[#allocation1 + $0x20] ss:$4 sm:$0xff] %v284_v27  ;;  %v693_v30 = vld [vmem:[%s5853_s6 + $0xc00] sm:$0xff]  ;;  %v776_v27 = vld [vmem:[%s5853_s6 + $0xe98] sm:$0xff] }
 0x11c   : > { %3158 = vmatpush.msra.mxu0 %v708_v31  ;;  %3198 = vmatpush.msra.mxu2 %v740_v32  ;;  %v710_v31 = vld [vmem:[%s5853_s6 + $0xc88] sm:$0xff]  ;;  %v725_v32 = vld [vmem:[%s5853_s6 + $0xd00] sm:$0xff] }
 0x11d   : > { %3113 = vmatpush.msrb.mxu1 %v645_v33  ;;  %3153 = vmatpush.msrb.mxu3 %v677_v34  ;;  %v742_v33 = vld [vmem:[%s5853_s6 + $0xd88] sm:$0xff]  ;;  %v2422_v34 = vld.sshfl [vmem:[#allocation1] sm:$0xff pattern:$0x73625140] }
 0x11e   : > { %3114 = vmatmul.f32.vlgmr.msrb.gmra.mxu1 %v2417_v35  ;;  %3154 = vmatmul.f32.vlgmr.msrb.gmra.mxu3 %v2419_v36  ;;  %v2424_v35 = vld.sshfl [vmem:[#allocation1 + $0x10] sm:$0xff pattern:$0x73625140]  ;;  %v772_v36 = vld [vmem:[%s5853_s6 + $0xe78] sm:$0xff] }
 0x11f   : > { %3159 = vmatpush.msra.mxu0 %v707_v37  ;;  %3178 = vmatpush.msra.mxu1 %v724_v38  ;;  %v804_v37 = vld [vmem:[%s5853_s6 + $0xf78] sm:$0xff]  ;;  %v709_v38 = vld [vmem:[%s5853_s6 + $0xc80] sm:$0xff] }
 0x120   : > { %3199 = vmatpush.msra.mxu2 %v739_v39  ;;  %3218 = vmatpush.msra.mxu3 %v756_v40  ;;  %v741_v39 = vld [vmem:[%s5853_s6 + $0xd80] sm:$0xff]  ;;  %v2423_v40 = vld.sshfl [vmem:[#allocation1 + $0x8] sm:$0xff pattern:$0x73625140] }
 0x121   : > { %3160 = vmatpush.msra.mxu0 %v706_v41  ;;  %3179 = vmatpush.msra.mxu1 %v723_v42  ;;  %v2425_v41 = vld.sshfl [vmem:[#allocation1 + $0x18] sm:$0xff pattern:$0x73625140]  ;;  %v771_v42 = vld [vmem:[%s5853_s6 + $0xe70] sm:$0xff] }
 0x122   : > { %3200 = vmatpush.msra.mxu2 %v738_v43  ;;  %3219 = vmatpush.msra.mxu3 %v755_v44  ;;  %v788_v43 = vld [vmem:[%s5853_s6 + $0xef8] sm:$0xff]  ;;  %v803_v44 = vld [vmem:[%s5853_s6 + $0xf70] sm:$0xff] }
 0x123   : > { %3161 = vmatpush.msra.mxu0 %v705_v45  ;;  %3180 = vmatpush.msra.mxu1 %v722_v46  ;;  %v820_v45 = vld [vmem:[%s5853_s6 + $0xff8] sm:$0xff]  ;;  %v770_v46 = vld [vmem:[%s5853_s6 + $0xe68] sm:$0xff] }
 0x124   : > { %3201 = vmatpush.msra.mxu2 %v737_v47  ;;  %3220 = vmatpush.msra.mxu3 %v754_v48  ;;  %v787_v47 = vld [vmem:[%s5853_s6 + $0xef0] sm:$0xff]  ;;  %v802_v48 = vld [vmem:[%s5853_s6 + $0xf68] sm:$0xff] }
 0x125   : > { %3162 = vmatpush.msra.mxu0 %v704_v49  ;;  %3181 = vmatpush.msra.mxu1 %v721_v50  ;;  %v819_v49 = vld [vmem:[%s5853_s6 + $0xff0] sm:$0xff]  ;;  %v769_v50 = vld [vmem:[%s5853_s6 + $0xe60] sm:$0xff] }
 0x126   : > { %3202 = vmatpush.msra.mxu2 %v736_v51  ;;  %3221 = vmatpush.msra.mxu3 %v753_v52  ;;  %v786_v51 = vld [vmem:[%s5853_s6 + $0xee8] sm:$0xff]  ;;  %v801_v52 = vld [vmem:[%s5853_s6 + $0xf60] sm:$0xff] }
 0x127   : > { %3163 = vmatpush.msra.mxu0 %v703_v53  ;;  %3182 = vmatpush.msra.mxu1 %v720_v54  ;;  %v818_v53 = vld [vmem:[%s5853_s6 + $0xfe8] sm:$0xff]  ;;  %v768_v54 = vld [vmem:[%s5853_s6 + $0xe58] sm:$0xff] }
 0x128   : > { %3203 = vmatpush.msra.mxu2 %v735_v55  ;;  %3222 = vmatpush.msra.mxu3 %v752_v56  ;;  %v785_v55 = vld [vmem:[%s5853_s6 + $0xee0] sm:$0xff]  ;;  %v800_v56 = vld [vmem:[%s5853_s6 + $0xf58] sm:$0xff] }
 0x129   : > { %3164 = vmatpush.msra.mxu0 %v702_v57  ;;  %3183 = vmatpush.msra.mxu1 %v719_v58  ;;  %v817_v57 = vld [vmem:[%s5853_s6 + $0xfe0] sm:$0xff]  ;;  %v767_v58 = vld [vmem:[%s5853_s6 + $0xe50] sm:$0xff] }
 0x12a   : > { %3204 = vmatpush.msra.mxu2 %v734_v59  ;;  %3223 = vmatpush.msra.mxu3 %v751_v60  ;;  %v784_v59 = vld [vmem:[%s5853_s6 + $0xed8] sm:$0xff]  ;;  %v799_v60 = vld [vmem:[%s5853_s6 + $0xf50] sm:$0xff] }
 0x12b   : > { %3165 = vmatpush.msra.mxu0 %v701_v61  ;;  %3184 = vmatpush.msra.mxu1 %v718_v62  ;;  %v816_v61 = vld [vmem:[%s5853_s6 + $0xfd8] sm:$0xff]  ;;  %v766_v62 = vld [vmem:[%s5853_s6 + $0xe48] sm:$0xff] }
 0x12c   : > { %3205 = vmatpush.msra.mxu2 %v733_v63  ;;  %3224 = vmatpush.msra.mxu3 %v750_v0  ;;  %v783_v63 = vld [vmem:[%s5853_s6 + $0xed0] sm:$0xff]  ;;  %v798_v0 = vld [vmem:[%s5853_s6 + $0xf48] sm:$0xff] }
 0x12d   : > { %3166 = vmatpush.msra.mxu0 %v700_v1  ;;  %3185 = vmatpush.msra.mxu1 %v717_v2  ;;  %v815_v1 = vld [vmem:[%s5853_s6 + $0xfd0] sm:$0xff]  ;;  %v765_v2 = vld [vmem:[%s5853_s6 + $0xe40] sm:$0xff] }
 0x12e   : > { %3206 = vmatpush.msra.mxu2 %v732_v3  ;;  %3225 = vmatpush.msra.mxu3 %v749_v4  ;;  %v782_v3 = vld [vmem:[%s5853_s6 + $0xec8] sm:$0xff]  ;;  %v797_v4 = vld [vmem:[%s5853_s6 + $0xf40] sm:$0xff] }
 0x12f   : > { %3167 = vmatpush.msra.mxu0 %v699_v5  ;;  %3186 = vmatpush.msra.mxu1 %v716_v6  ;;  %v814_v5 = vld [vmem:[%s5853_s6 + $0xfc8] sm:$0xff]  ;;  %v764_v6 = vld [vmem:[%s5853_s6 + $0xe38] sm:$0xff] }
 0x130   : > { %3207 = vmatpush.msra.mxu2 %v731_v7  ;;  %3226 = vmatpush.msra.mxu3 %v748_v8  ;;  %v781_v7 = vld [vmem:[%s5853_s6 + $0xec0] sm:$0xff]  ;;  %v796_v8 = vld [vmem:[%s5853_s6 + $0xf38] sm:$0xff] }
 0x131   : > { %3168 = vmatpush.msra.mxu0 %v698_v9  ;;  %3187 = vmatpush.msra.mxu1 %v715_v10  ;;  %v813_v9 = vld [vmem:[%s5853_s6 + $0xfc0] sm:$0xff]  ;;  %v763_v10 = vld [vmem:[%s5853_s6 + $0xe30] sm:$0xff] }
 0x132   : > { %3208 = vmatpush.msra.mxu2 %v730_v11  ;;  %3227 = vmatpush.msra.mxu3 %v747_v12  ;;  %v780_v11 = vld [vmem:[%s5853_s6 + $0xeb8] sm:$0xff]  ;;  %v795_v12 = vld [vmem:[%s5853_s6 + $0xf30] sm:$0xff] }
 0x133   : > { %3169 = vmatpush.msra.mxu0 %v697_v13  ;;  %3188 = vmatpush.msra.mxu1 %v714_v14  ;;  %v812_v13 = vld [vmem:[%s5853_s6 + $0xfb8] sm:$0xff]  ;;  %v762_v14 = vld [vmem:[%s5853_s6 + $0xe28] sm:$0xff] }
 0x134   : > { %3209 = vmatpush.msra.mxu2 %v729_v15  ;;  %3228 = vmatpush.msra.mxu3 %v746_v16  ;;  %v779_v15 = vld [vmem:[%s5853_s6 + $0xeb0] sm:$0xff]  ;;  %v794_v16 = vld [vmem:[%s5853_s6 + $0xf28] sm:$0xff] }
 0x135   : > { %3170 = vmatpush.msra.mxu0 %v696_v17  ;;  %3189 = vmatpush.msra.mxu1 %v713_v18  ;;  %v811_v17 = vld [vmem:[%s5853_s6 + $0xfb0] sm:$0xff]  ;;  %v761_v18 = vld [vmem:[%s5853_s6 + $0xe20] sm:$0xff] }
 0x136   : > { %3210 = vmatpush.msra.mxu2 %v728_v19  ;;  %3229 = vmatpush.msra.mxu3 %v745_v20  ;;  %v778_v19 = vld [vmem:[%s5853_s6 + $0xea8] sm:$0xff]  ;;  %v793_v20 = vld [vmem:[%s5853_s6 + $0xf20] sm:$0xff] }
 0x137   : > { %3171 = vmatpush.msra.mxu0 %v695_v21  ;;  %3190 = vmatpush.msra.mxu1 %v712_v22  ;;  %v810_v21 = vld [vmem:[%s5853_s6 + $0xfa8] sm:$0xff]  ;;  %v760_v22 = vld [vmem:[%s5853_s6 + $0xe18] sm:$0xff] }
 0x138   : > { %3211 = vmatpush.msra.mxu2 %v727_v23  ;;  %3230 = vmatpush.msra.mxu3 %v744_v24  ;;  %v777_v23 = vld [vmem:[%s5853_s6 + $0xea0] sm:$0xff]  ;;  %v792_v24 = vld [vmem:[%s5853_s6 + $0xf18] sm:$0xff] }
 0x139   : > { %3172 = vmatpush.msra.mxu0 %v694_v25  ;;  %3191 = vmatpush.msra.mxu1 %v711_v26  ;;  %v809_v25 = vld [vmem:[%s5853_s6 + $0xfa0] sm:$0xff]  ;;  %v759_v26 = vld [vmem:[%s5853_s6 + $0xe10] sm:$0xff] }
 0x13a   : > { %3212 = vmatpush.msra.mxu2 %v726_v28  ;;  %3231 = vmatpush.msra.mxu3 %v743_v29  ;;  %v791_v28 = vld [vmem:[%s5853_s6 + $0xf10] sm:$0xff]  ;;  %v808_v29 = vld [vmem:[%s5853_s6 + $0xf98] sm:$0xff] }
 0x13b   : > { %3173 = vmatpush.msra.mxu0 %v693_v30  ;;  %3192 = vmatpush.msra.mxu1 %v710_v31  ;;  %v758_v30 = vld [vmem:[%s5853_s6 + $0xe08] sm:$0xff]  ;;  %v775_v31 = vld [vmem:[%s5853_s6 + $0xe90] sm:$0xff] }
 0x13c   : > { %3213 = vmatpush.msra.mxu2 %v725_v32  ;;  %3232 = vmatpush.msra.mxu3 %v742_v33  ;;  %v285_v32 = vld [vmem:[%s5835_s8 + $0x40] sm:$0xff] }
 0x13d   : > { %3174 = vmatmul.f32.vlgmr.msra.gmra.mxu0 %v2422_v34  ;;  %3214 = vmatmul.f32.vlgmr.msra.gmra.mxu2 %v2424_v35  ;;  %v790_v33 = vld [vmem:[%s5853_s6 + $0xf08] sm:$0xff]  ;;  %v807_v34 = vld [vmem:[%s5853_s6 + $0xf90] sm:$0xff]  ;;  %2430 = vst [vmem:[#allocation1] ss:$4 sm:$0xff] %v285_v32  ;;  %v757_v35 = vld [vmem:[%s5853_s6 + $0xe00] sm:$0xff] }
 0x13e   : > { %3238 = vmatpush.msrb.mxu0 %v772_v36  ;;  %3278 = vmatpush.msrb.mxu2 %v804_v37  ;;  %v774_v36 = vld [vmem:[%s5853_s6 + $0xe88] sm:$0xff]  ;;  %v789_v37 = vld [vmem:[%s5853_s6 + $0xf00] sm:$0xff]  ;;  %v840_v32 = vld [vmem:[%s5853_s6 + $0x1098] sm:$0xff] }
 0x13f   : > { %3193 = vmatpush.msra.mxu1 %v709_v38  ;;  %3233 = vmatpush.msra.mxu3 %v741_v39  ;;  %v806_v38 = vld [vmem:[%s5853_s6 + $0xf88] sm:$0xff]  ;;  %v2426_v39 = vld.sshfl [vmem:[#allocation1 + $0x20] sm:$0xff pattern:$0x73625140] }
 0x140   : > { %3194 = vmatmul.f32.vlgmr.msra.gmra.mxu1 %v2423_v40  ;;  %3234 = vmatmul.f32.vlgmr.msra.gmra.mxu3 %v2425_v41  ;;  %v2428_v40 = vld.sshfl [vmem:[#allocation1 + $0x30] sm:$0xff pattern:$0x73625140]  ;;  %v836_v41 = vld [vmem:[%s5853_s6 + $0x1078] sm:$0xff] }
 0x141   : > { %3239 = vmatpush.msrb.mxu0 %v771_v42  ;;  %3258 = vmatpush.msrb.mxu1 %v788_v43  ;;  %v868_v42 = vld [vmem:[%s5853_s6 + $0x1178] sm:$0xff]  ;;  %v773_v43 = vld [vmem:[%s5853_s6 + $0xe80] sm:$0xff] }
 0x142   : > { %3279 = vmatpush.msrb.mxu2 %v803_v44  ;;  %3298 = vmatpush.msrb.mxu3 %v820_v45  ;;  %v805_v44 = vld [vmem:[%s5853_s6 + $0xf80] sm:$0xff]  ;;  %v2427_v45 = vld.sshfl [vmem:[#allocation1 + $0x28] sm:$0xff pattern:$0x73625140] }
 0x143   : > { %3240 = vmatpush.msrb.mxu0 %v770_v46  ;;  %3259 = vmatpush.msrb.mxu1 %v787_v47  ;;  %v2429_v46 = vld.sshfl [vmem:[#allocation1 + $0x38] sm:$0xff pattern:$0x73625140]  ;;  %v835_v47 = vld [vmem:[%s5853_s6 + $0x1070] sm:$0xff] }
 0x144   : > { %3280 = vmatpush.msrb.mxu2 %v802_v48  ;;  %3299 = vmatpush.msrb.mxu3 %v819_v49  ;;  %v852_v48 = vld [vmem:[%s5853_s6 + $0x10f8] sm:$0xff]  ;;  %v867_v49 = vld [vmem:[%s5853_s6 + $0x1170] sm:$0xff] }
 0x145   : > { %3241 = vmatpush.msrb.mxu0 %v769_v50  ;;  %3260 = vmatpush.msrb.mxu1 %v786_v51  ;;  %v884_v50 = vld [vmem:[%s5853_s6 + $0x11f8] sm:$0xff]  ;;  %v834_v51 = vld [vmem:[%s5853_s6 + $0x1068] sm:$0xff] }
 0x146   : > { %3281 = vmatpush.msrb.mxu2 %v801_v52  ;;  %3300 = vmatpush.msrb.mxu3 %v818_v53  ;;  %v851_v52 = vld [vmem:[%s5853_s6 + $0x10f0] sm:$0xff]  ;;  %v866_v53 = vld [vmem:[%s5853_s6 + $0x1168] sm:$0xff] }
 0x147   : > { %3242 = vmatpush.msrb.mxu0 %v768_v54  ;;  %3261 = vmatpush.msrb.mxu1 %v785_v55  ;;  %v883_v54 = vld [vmem:[%s5853_s6 + $0x11f0] sm:$0xff]  ;;  %v833_v55 = vld [vmem:[%s5853_s6 + $0x1060] sm:$0xff] }
 0x148   : > { %3282 = vmatpush.msrb.mxu2 %v800_v56  ;;  %3301 = vmatpush.msrb.mxu3 %v817_v57  ;;  %v850_v56 = vld [vmem:[%s5853_s6 + $0x10e8] sm:$0xff]  ;;  %v865_v57 = vld [vmem:[%s5853_s6 + $0x1160] sm:$0xff] }
 0x149   : > { %3243 = vmatpush.msrb.mxu0 %v767_v58  ;;  %3262 = vmatpush.msrb.mxu1 %v784_v59  ;;  %v882_v58 = vld [vmem:[%s5853_s6 + $0x11e8] sm:$0xff]  ;;  %v832_v59 = vld [vmem:[%s5853_s6 + $0x1058] sm:$0xff] }
 0x14a   : > { %3283 = vmatpush.msrb.mxu2 %v799_v60  ;;  %3302 = vmatpush.msrb.mxu3 %v816_v61  ;;  %v849_v60 = vld [vmem:[%s5853_s6 + $0x10e0] sm:$0xff]  ;;  %v864_v61 = vld [vmem:[%s5853_s6 + $0x1158] sm:$0xff] }
 0x14b   : > { %3244 = vmatpush.msrb.mxu0 %v766_v62  ;;  %3263 = vmatpush.msrb.mxu1 %v783_v63  ;;  %v881_v62 = vld [vmem:[%s5853_s6 + $0x11e0] sm:$0xff]  ;;  %v831_v63 = vld [vmem:[%s5853_s6 + $0x1050] sm:$0xff] }
 0x14c   : > { %3284 = vmatpush.msrb.mxu2 %v798_v0  ;;  %3303 = vmatpush.msrb.mxu3 %v815_v1  ;;  %v848_v0 = vld [vmem:[%s5853_s6 + $0x10d8] sm:$0xff]  ;;  %v863_v1 = vld [vmem:[%s5853_s6 + $0x1150] sm:$0xff] }
 0x14d   : > { %3245 = vmatpush.msrb.mxu0 %v765_v2  ;;  %3264 = vmatpush.msrb.mxu1 %v782_v3  ;;  %v880_v2 = vld [vmem:[%s5853_s6 + $0x11d8] sm:$0xff]  ;;  %v830_v3 = vld [vmem:[%s5853_s6 + $0x1048] sm:$0xff] }
 0x14e   : > { %3285 = vmatpush.msrb.mxu2 %v797_v4  ;;  %3304 = vmatpush.msrb.mxu3 %v814_v5  ;;  %v847_v4 = vld [vmem:[%s5853_s6 + $0x10d0] sm:$0xff]  ;;  %v862_v5 = vld [vmem:[%s5853_s6 + $0x1148] sm:$0xff] }
 0x14f   : > { %3246 = vmatpush.msrb.mxu0 %v764_v6  ;;  %3265 = vmatpush.msrb.mxu1 %v781_v7  ;;  %v879_v6 = vld [vmem:[%s5853_s6 + $0x11d0] sm:$0xff]  ;;  %v829_v7 = vld [vmem:[%s5853_s6 + $0x1040] sm:$0xff] }
 0x150   : > { %3286 = vmatpush.msrb.mxu2 %v796_v8  ;;  %3305 = vmatpush.msrb.mxu3 %v813_v9  ;;  %v846_v8 = vld [vmem:[%s5853_s6 + $0x10c8] sm:$0xff]  ;;  %v861_v9 = vld [vmem:[%s5853_s6 + $0x1140] sm:$0xff] }
 0x151   : > { %3247 = vmatpush.msrb.mxu0 %v763_v10  ;;  %3266 = vmatpush.msrb.mxu1 %v780_v11  ;;  %v878_v10 = vld [vmem:[%s5853_s6 + $0x11c8] sm:$0xff]  ;;  %v828_v11 = vld [vmem:[%s5853_s6 + $0x1038] sm:$0xff] }
 0x152   : > { %3287 = vmatpush.msrb.mxu2 %v795_v12  ;;  %3306 = vmatpush.msrb.mxu3 %v812_v13  ;;  %v845_v12 = vld [vmem:[%s5853_s6 + $0x10c0] sm:$0xff]  ;;  %v860_v13 = vld [vmem:[%s5853_s6 + $0x1138] sm:$0xff] }
 0x153   : > { %3248 = vmatpush.msrb.mxu0 %v762_v14  ;;  %3267 = vmatpush.msrb.mxu1 %v779_v15  ;;  %v877_v14 = vld [vmem:[%s5853_s6 + $0x11c0] sm:$0xff]  ;;  %v827_v15 = vld [vmem:[%s5853_s6 + $0x1030] sm:$0xff] }
 0x154   : > { %3288 = vmatpush.msrb.mxu2 %v794_v16  ;;  %3307 = vmatpush.msrb.mxu3 %v811_v17  ;;  %v844_v16 = vld [vmem:[%s5853_s6 + $0x10b8] sm:$0xff]  ;;  %v859_v17 = vld [vmem:[%s5853_s6 + $0x1130] sm:$0xff] }
 0x155   : > { %3249 = vmatpush.msrb.mxu0 %v761_v18  ;;  %3268 = vmatpush.msrb.mxu1 %v778_v19  ;;  %v876_v18 = vld [vmem:[%s5853_s6 + $0x11b8] sm:$0xff]  ;;  %v826_v19 = vld [vmem:[%s5853_s6 + $0x1028] sm:$0xff] }
 0x156   : > { %3289 = vmatpush.msrb.mxu2 %v793_v20  ;;  %3308 = vmatpush.msrb.mxu3 %v810_v21  ;;  %v843_v20 = vld [vmem:[%s5853_s6 + $0x10b0] sm:$0xff]  ;;  %v858_v21 = vld [vmem:[%s5853_s6 + $0x1128] sm:$0xff] }
 0x157   : > { %3250 = vmatpush.msrb.mxu0 %v760_v22  ;;  %3269 = vmatpush.msrb.mxu1 %v777_v23  ;;  %v875_v22 = vld [vmem:[%s5853_s6 + $0x11b0] sm:$0xff]  ;;  %v825_v23 = vld [vmem:[%s5853_s6 + $0x1020] sm:$0xff] }
 0x158   : > { %3290 = vmatpush.msrb.mxu2 %v792_v24  ;;  %3309 = vmatpush.msrb.mxu3 %v809_v25  ;;  %v842_v24 = vld [vmem:[%s5853_s6 + $0x10a8] sm:$0xff]  ;;  %v857_v25 = vld [vmem:[%s5853_s6 + $0x1120] sm:$0xff] }
 0x159   : > { %3251 = vmatpush.msrb.mxu0 %v759_v26  ;;  %3270 = vmatpush.msrb.mxu1 %v776_v27  ;;  %v874_v26 = vld [vmem:[%s5853_s6 + $0x11a8] sm:$0xff]  ;;  %v824_v27 = vld [vmem:[%s5853_s6 + $0x1018] sm:$0xff] }
 0x15a   : > { %3291 = vmatpush.msrb.mxu2 %v791_v28  ;;  %3310 = vmatpush.msrb.mxu3 %v808_v29  ;;  %v841_v28 = vld [vmem:[%s5853_s6 + $0x10a0] sm:$0xff]  ;;  %v856_v29 = vld [vmem:[%s5853_s6 + $0x1118] sm:$0xff] }
 0x15b   : > { %3252 = vmatpush.msrb.mxu0 %v758_v30  ;;  %3271 = vmatpush.msrb.mxu1 %v775_v31  ;;  %v873_v30 = vld [vmem:[%s5853_s6 + $0x11a0] sm:$0xff]  ;;  %v823_v31 = vld [vmem:[%s5853_s6 + $0x1010] sm:$0xff] }
 0x15c   : > { %3292 = vmatpush.msrb.mxu2 %v790_v33  ;;  %3311 = vmatpush.msrb.mxu3 %v807_v34  ;;  %v855_v33 = vld [vmem:[%s5853_s6 + $0x1110] sm:$0xff]  ;;  %v872_v34 = vld [vmem:[%s5853_s6 + $0x1198] sm:$0xff] }
 0x15d   : > { %3253 = vmatpush.msrb.mxu0 %v757_v35  ;;  %3272 = vmatpush.msrb.mxu1 %v774_v36  ;;  %v822_v35 = vld [vmem:[%s5853_s6 + $0x1008] sm:$0xff]  ;;  %v839_v36 = vld [vmem:[%s5853_s6 + $0x1090] sm:$0xff] }
 0x15e   : > { %3293 = vmatpush.msrb.mxu2 %v789_v37  ;;  %3312 = vmatpush.msrb.mxu3 %v806_v38  ;;  %v286_v37 = vld [vmem:[%s5835_s8 + $0x48] sm:$0xff]  ;;  %v854_v38 = vld [vmem:[%s5853_s6 + $0x1108] sm:$0xff] }
 0x15f   : > { %3254 = vmatmul.f32.vlgmr.msrb.gmra.mxu0 %v2426_v39  ;;  %3294 = vmatmul.f32.vlgmr.msrb.gmra.mxu2 %v2428_v40  ;;  %v871_v39 = vld [vmem:[%s5853_s6 + $0x1190] sm:$0xff]  ;;  %2431 = vst [vmem:[#allocation1 + $0x20] ss:$4 sm:$0xff] %v286_v37  ;;  %v821_v40 = vld [vmem:[%s5853_s6 + $0x1000] sm:$0xff]  ;;  %v904_v37 = vld [vmem:[%s5853_s6 + $0x1298] sm:$0xff] }
 0x160   : > { %3318 = vmatpush.msra.mxu0 %v836_v41  ;;  %3358 = vmatpush.msra.mxu2 %v868_v42  ;;  %v838_v41 = vld [vmem:[%s5853_s6 + $0x1088] sm:$0xff]  ;;  %v853_v42 = vld [vmem:[%s5853_s6 + $0x1100] sm:$0xff] }
 0x161   : > { %3273 = vmatpush.msrb.mxu1 %v773_v43  ;;  %3313 = vmatpush.msrb.mxu3 %v805_v44  ;;  %v870_v43 = vld [vmem:[%s5853_s6 + $0x1188] sm:$0xff]  ;;  %v2432_v44 = vld.sshfl [vmem:[#allocation1] sm:$0xff pattern:$0x73625140] }
 0x162   : > { %3274 = vmatmul.f32.vlgmr.msrb.gmra.mxu1 %v2427_v45  ;;  %3314 = vmatmul.f32.vlgmr.msrb.gmra.mxu3 %v2429_v46  ;;  %v2434_v45 = vld.sshfl [vmem:[#allocation1 + $0x10] sm:$0xff pattern:$0x73625140]  ;;  %v900_v46 = vld [vmem:[%s5853_s6 + $0x1278] sm:$0xff] }
 0x163   : > { %3319 = vmatpush.msra.mxu0 %v835_v47  ;;  %3338 = vmatpush.msra.mxu1 %v852_v48  ;;  %v932_v47 = vld [vmem:[%s5853_s6 + $0x1378] sm:$0xff]  ;;  %v837_v48 = vld [vmem:[%s5853_s6 + $0x1080] sm:$0xff] }
 0x164   : > { %3359 = vmatpush.msra.mxu2 %v867_v49  ;;  %3378 = vmatpush.msra.mxu3 %v884_v50  ;;  %v869_v49 = vld [vmem:[%s5853_s6 + $0x1180] sm:$0xff]  ;;  %v2433_v50 = vld.sshfl [vmem:[#allocation1 + $0x8] sm:$0xff pattern:$0x73625140] }
 0x165   : > { %3320 = vmatpush.msra.mxu0 %v834_v51  ;;  %3339 = vmatpush.msra.mxu1 %v851_v52  ;;  %v2435_v51 = vld.sshfl [vmem:[#allocation1 + $0x18] sm:$0xff pattern:$0x73625140]  ;;  %v899_v52 = vld [vmem:[%s5853_s6 + $0x1270] sm:$0xff] }
 0x166   : > { %3360 = vmatpush.msra.mxu2 %v866_v53  ;;  %3379 = vmatpush.msra.mxu3 %v883_v54  ;;  %v916_v53 = vld [vmem:[%s5853_s6 + $0x12f8] sm:$0xff]  ;;  %v931_v54 = vld [vmem:[%s5853_s6 + $0x1370] sm:$0xff] }
 0x167   : > { %3321 = vmatpush.msra.mxu0 %v833_v55  ;;  %3340 = vmatpush.msra.mxu1 %v850_v56  ;;  %v948_v55 = vld [vmem:[%s5853_s6 + $0x13f8] sm:$0xff]  ;;  %v898_v56 = vld [vmem:[%s5853_s6 + $0x1268] sm:$0xff] }
 0x168   : > { %3361 = vmatpush.msra.mxu2 %v865_v57  ;;  %3380 = vmatpush.msra.mxu3 %v882_v58  ;;  %v915_v57 = vld [vmem:[%s5853_s6 + $0x12f0] sm:$0xff]  ;;  %v930_v58 = vld [vmem:[%s5853_s6 + $0x1368] sm:$0xff] }
 0x169   : > { %3322 = vmatpush.msra.mxu0 %v832_v59  ;;  %3341 = vmatpush.msra.mxu1 %v849_v60  ;;  %v947_v59 = vld [vmem:[%s5853_s6 + $0x13f0] sm:$0xff]  ;;  %v897_v60 = vld [vmem:[%s5853_s6 + $0x1260] sm:$0xff] }
 0x16a   : > { %3362 = vmatpush.msra.mxu2 %v864_v61  ;;  %3381 = vmatpush.msra.mxu3 %v881_v62  ;;  %v914_v61 = vld [vmem:[%s5853_s6 + $0x12e8] sm:$0xff]  ;;  %v929_v62 = vld [vmem:[%s5853_s6 + $0x1360] sm:$0xff] }
 0x16b   : > { %3323 = vmatpush.msra.mxu0 %v831_v63  ;;  %3342 = vmatpush.msra.mxu1 %v848_v0  ;;  %v946_v63 = vld [vmem:[%s5853_s6 + $0x13e8] sm:$0xff]  ;;  %v896_v0 = vld [vmem:[%s5853_s6 + $0x1258] sm:$0xff] }
 0x16c   : > { %3363 = vmatpush.msra.mxu2 %v863_v1  ;;  %3382 = vmatpush.msra.mxu3 %v880_v2  ;;  %v913_v1 = vld [vmem:[%s5853_s6 + $0x12e0] sm:$0xff]  ;;  %v928_v2 = vld [vmem:[%s5853_s6 + $0x1358] sm:$0xff] }
 0x16d   : > { %3324 = vmatpush.msra.mxu0 %v830_v3  ;;  %3343 = vmatpush.msra.mxu1 %v847_v4  ;;  %v945_v3 = vld [vmem:[%s5853_s6 + $0x13e0] sm:$0xff]  ;;  %v895_v4 = vld [vmem:[%s5853_s6 + $0x1250] sm:$0xff] }
 0x16e   : > { %3364 = vmatpush.msra.mxu2 %v862_v5  ;;  %3383 = vmatpush.msra.mxu3 %v879_v6  ;;  %v912_v5 = vld [vmem:[%s5853_s6 + $0x12d8] sm:$0xff]  ;;  %v927_v6 = vld [vmem:[%s5853_s6 + $0x1350] sm:$0xff] }
 0x16f   : > { %3325 = vmatpush.msra.mxu0 %v829_v7  ;;  %3344 = vmatpush.msra.mxu1 %v846_v8  ;;  %v944_v7 = vld [vmem:[%s5853_s6 + $0x13d8] sm:$0xff]  ;;  %v894_v8 = vld [vmem:[%s5853_s6 + $0x1248] sm:$0xff] }
 0x170   : > { %3365 = vmatpush.msra.mxu2 %v861_v9  ;;  %3384 = vmatpush.msra.mxu3 %v878_v10  ;;  %v911_v9 = vld [vmem:[%s5853_s6 + $0x12d0] sm:$0xff]  ;;  %v926_v10 = vld [vmem:[%s5853_s6 + $0x1348] sm:$0xff] }
 0x171   : > { %3326 = vmatpush.msra.mxu0 %v828_v11  ;;  %3345 = vmatpush.msra.mxu1 %v845_v12  ;;  %v943_v11 = vld [vmem:[%s5853_s6 + $0x13d0] sm:$0xff]  ;;  %v893_v12 = vld [vmem:[%s5853_s6 + $0x1240] sm:$0xff] }
 0x172   : > { %3366 = vmatpush.msra.mxu2 %v860_v13  ;;  %3385 = vmatpush.msra.mxu3 %v877_v14  ;;  %v910_v13 = vld [vmem:[%s5853_s6 + $0x12c8] sm:$0xff]  ;;  %v925_v14 = vld [vmem:[%s5853_s6 + $0x1340] sm:$0xff] }
 0x173   : > { %3327 = vmatpush.msra.mxu0 %v827_v15  ;;  %3346 = vmatpush.msra.mxu1 %v844_v16  ;;  %v942_v15 = vld [vmem:[%s5853_s6 + $0x13c8] sm:$0xff]  ;;  %v892_v16 = vld [vmem:[%s5853_s6 + $0x1238] sm:$0xff] }
 0x174   : > { %3367 = vmatpush.msra.mxu2 %v859_v17  ;;  %3386 = vmatpush.msra.mxu3 %v876_v18  ;;  %v909_v17 = vld [vmem:[%s5853_s6 + $0x12c0] sm:$0xff]  ;;  %v924_v18 = vld [vmem:[%s5853_s6 + $0x1338] sm:$0xff] }
 0x175   : > { %3328 = vmatpush.msra.mxu0 %v826_v19  ;;  %3347 = vmatpush.msra.mxu1 %v843_v20  ;;  %v941_v19 = vld [vmem:[%s5853_s6 + $0x13c0] sm:$0xff]  ;;  %v891_v20 = vld [vmem:[%s5853_s6 + $0x1230] sm:$0xff] }
 0x176   : > { %3368 = vmatpush.msra.mxu2 %v858_v21  ;;  %3387 = vmatpush.msra.mxu3 %v875_v22  ;;  %v908_v21 = vld [vmem:[%s5853_s6 + $0x12b8] sm:$0xff]  ;;  %v923_v22 = vld [vmem:[%s5853_s6 + $0x1330] sm:$0xff] }
 0x177   : > { %3329 = vmatpush.msra.mxu0 %v825_v23  ;;  %3348 = vmatpush.msra.mxu1 %v842_v24  ;;  %v940_v23 = vld [vmem:[%s5853_s6 + $0x13b8] sm:$0xff]  ;;  %v890_v24 = vld [vmem:[%s5853_s6 + $0x1228] sm:$0xff] }
 0x178   : > { %3369 = vmatpush.msra.mxu2 %v857_v25  ;;  %3388 = vmatpush.msra.mxu3 %v874_v26  ;;  %v907_v25 = vld [vmem:[%s5853_s6 + $0x12b0] sm:$0xff]  ;;  %v922_v26 = vld [vmem:[%s5853_s6 + $0x1328] sm:$0xff] }
 0x179   : > { %3330 = vmatpush.msra.mxu0 %v824_v27  ;;  %3349 = vmatpush.msra.mxu1 %v841_v28  ;;  %v939_v27 = vld [vmem:[%s5853_s6 + $0x13b0] sm:$0xff]  ;;  %v889_v28 = vld [vmem:[%s5853_s6 + $0x1220] sm:$0xff] }
 0x17a   : > { %3370 = vmatpush.msra.mxu2 %v856_v29  ;;  %3389 = vmatpush.msra.mxu3 %v873_v30  ;;  %v906_v29 = vld [vmem:[%s5853_s6 + $0x12a8] sm:$0xff]  ;;  %v921_v30 = vld [vmem:[%s5853_s6 + $0x1320] sm:$0xff] }
 0x17b   : > { %3331 = vmatpush.msra.mxu0 %v823_v31  ;;  %3350 = vmatpush.msra.mxu1 %v840_v32  ;;  %v938_v31 = vld [vmem:[%s5853_s6 + $0x13a8] sm:$0xff]  ;;  %v888_v32 = vld [vmem:[%s5853_s6 + $0x1218] sm:$0xff] }
 0x17c   : > { %3371 = vmatpush.msra.mxu2 %v855_v33  ;;  %3390 = vmatpush.msra.mxu3 %v872_v34  ;;  %v905_v33 = vld [vmem:[%s5853_s6 + $0x12a0] sm:$0xff]  ;;  %v920_v34 = vld [vmem:[%s5853_s6 + $0x1318] sm:$0xff] }
 0x17d   : > { %3332 = vmatpush.msra.mxu0 %v822_v35  ;;  %3351 = vmatpush.msra.mxu1 %v839_v36  ;;  %v937_v35 = vld [vmem:[%s5853_s6 + $0x13a0] sm:$0xff]  ;;  %v887_v36 = vld [vmem:[%s5853_s6 + $0x1210] sm:$0xff] }
 0x17e   : > { %3372 = vmatpush.msra.mxu2 %v854_v38  ;;  %3391 = vmatpush.msra.mxu3 %v871_v39  ;;  %v919_v38 = vld [vmem:[%s5853_s6 + $0x1310] sm:$0xff]  ;;  %v936_v39 = vld [vmem:[%s5853_s6 + $0x1398] sm:$0xff] }
 0x17f   : > { %3333 = vmatpush.msra.mxu0 %v821_v40  ;;  %3352 = vmatpush.msra.mxu1 %v838_v41  ;;  %v886_v40 = vld [vmem:[%s5853_s6 + $0x1208] sm:$0xff]  ;;  %v903_v41 = vld [vmem:[%s5853_s6 + $0x1290] sm:$0xff] }
 0x180   : > { %3373 = vmatpush.msra.mxu2 %v853_v42  ;;  %3392 = vmatpush.msra.mxu3 %v870_v43  ;;  %v287_v42 = vld [vmem:[%s5835_s8 + $0x50] sm:$0xff]  ;;  %v918_v43 = vld [vmem:[%s5853_s6 + $0x1308] sm:$0xff] }
 0x181   : > { %3334 = vmatmul.f32.vlgmr.msra.gmra.mxu0 %v2432_v44  ;;  %3374 = vmatmul.f32.vlgmr.msra.gmra.mxu2 %v2434_v45  ;;  %v935_v44 = vld [vmem:[%s5853_s6 + $0x1390] sm:$0xff]  ;;  %2440 = vst [vmem:[#allocation1] ss:$4 sm:$0xff] %v287_v42  ;;  %v885_v45 = vld [vmem:[%s5853_s6 + $0x1200] sm:$0xff]  ;;  %v968_v42 = vld [vmem:[%s5853_s6 + $0x1498] sm:$0xff] }
 0x182   : > { %3398 = vmatpush.msrb.mxu0 %v900_v46  ;;  %3438 = vmatpush.msrb.mxu2 %v932_v47  ;;  %v902_v46 = vld [vmem:[%s5853_s6 + $0x1288] sm:$0xff]  ;;  %v917_v47 = vld [vmem:[%s5853_s6 + $0x1300] sm:$0xff] }
 0x183   : > { %3353 = vmatpush.msra.mxu1 %v837_v48  ;;  %3393 = vmatpush.msra.mxu3 %v869_v49  ;;  %v934_v48 = vld [vmem:[%s5853_s6 + $0x1388] sm:$0xff]  ;;  %v2436_v49 = vld.sshfl [vmem:[#allocation1 + $0x20] sm:$0xff pattern:$0x73625140] }
 0x184   : > { %3354 = vmatmul.f32.vlgmr.msra.gmra.mxu1 %v2433_v50  ;;  %3394 = vmatmul.f32.vlgmr.msra.gmra.mxu3 %v2435_v51  ;;  %v2438_v50 = vld.sshfl [vmem:[#allocation1 + $0x30] sm:$0xff pattern:$0x73625140]  ;;  %v964_v51 = vld [vmem:[%s5853_s6 + $0x1478] sm:$0xff] }
 0x185   : > { %3399 = vmatpush.msrb.mxu0 %v899_v52  ;;  %3418 = vmatpush.msrb.mxu1 %v916_v53  ;;  %v996_v52 = vld [vmem:[%s5853_s6 + $0x1578] sm:$0xff]  ;;  %v901_v53 = vld [vmem:[%s5853_s6 + $0x1280] sm:$0xff] }
 0x186   : > { %3439 = vmatpush.msrb.mxu2 %v931_v54  ;;  %3458 = vmatpush.msrb.mxu3 %v948_v55  ;;  %v933_v54 = vld [vmem:[%s5853_s6 + $0x1380] sm:$0xff]  ;;  %v2437_v55 = vld.sshfl [vmem:[#allocation1 + $0x28] sm:$0xff pattern:$0x73625140] }
 0x187   : > { %3400 = vmatpush.msrb.mxu0 %v898_v56  ;;  %3419 = vmatpush.msrb.mxu1 %v915_v57  ;;  %v2439_v56 = vld.sshfl [vmem:[#allocation1 + $0x38] sm:$0xff pattern:$0x73625140]  ;;  %v963_v57 = vld [vmem:[%s5853_s6 + $0x1470] sm:$0xff] }
 0x188   : > { %3440 = vmatpush.msrb.mxu2 %v930_v58  ;;  %3459 = vmatpush.msrb.mxu3 %v947_v59  ;;  %v980_v58 = vld [vmem:[%s5853_s6 + $0x14f8] sm:$0xff]  ;;  %v995_v59 = vld [vmem:[%s5853_s6 + $0x1570] sm:$0xff] }
 0x189   : > { %3401 = vmatpush.msrb.mxu0 %v897_v60  ;;  %3420 = vmatpush.msrb.mxu1 %v914_v61  ;;  %v1012_v60 = vld [vmem:[%s5853_s6 + $0x15f8] sm:$0xff]  ;;  %v962_v61 = vld [vmem:[%s5853_s6 + $0x1468] sm:$0xff] }
 0x18a   : > { %3441 = vmatpush.msrb.mxu2 %v929_v62  ;;  %3460 = vmatpush.msrb.mxu3 %v946_v63  ;;  %v979_v62 = vld [vmem:[%s5853_s6 + $0x14f0] sm:$0xff]  ;;  %v994_v63 = vld [vmem:[%s5853_s6 + $0x1568] sm:$0xff] }
 0x18b   : > { %3402 = vmatpush.msrb.mxu0 %v896_v0  ;;  %3421 = vmatpush.msrb.mxu1 %v913_v1  ;;  %v1011_v0 = vld [vmem:[%s5853_s6 + $0x15f0] sm:$0xff]  ;;  %v961_v1 = vld [vmem:[%s5853_s6 + $0x1460] sm:$0xff] }
 0x18c   : > { %3442 = vmatpush.msrb.mxu2 %v928_v2  ;;  %3461 = vmatpush.msrb.mxu3 %v945_v3  ;;  %v978_v2 = vld [vmem:[%s5853_s6 + $0x14e8] sm:$0xff]  ;;  %v993_v3 = vld [vmem:[%s5853_s6 + $0x1560] sm:$0xff] }
 0x18d   : > { %3403 = vmatpush.msrb.mxu0 %v895_v4  ;;  %3422 = vmatpush.msrb.mxu1 %v912_v5  ;;  %v1010_v4 = vld [vmem:[%s5853_s6 + $0x15e8] sm:$0xff]  ;;  %v960_v5 = vld [vmem:[%s5853_s6 + $0x1458] sm:$0xff] }
 0x18e   : > { %3443 = vmatpush.msrb.mxu2 %v927_v6  ;;  %3462 = vmatpush.msrb.mxu3 %v944_v7  ;;  %v977_v6 = vld [vmem:[%s5853_s6 + $0x14e0] sm:$0xff]  ;;  %v992_v7 = vld [vmem:[%s5853_s6 + $0x1558] sm:$0xff] }
 0x18f   : > { %3404 = vmatpush.msrb.mxu0 %v894_v8  ;;  %3423 = vmatpush.msrb.mxu1 %v911_v9  ;;  %v1009_v8 = vld [vmem:[%s5853_s6 + $0x15e0] sm:$0xff]  ;;  %v959_v9 = vld [vmem:[%s5853_s6 + $0x1450] sm:$0xff] }
 0x190   : > { %3444 = vmatpush.msrb.mxu2 %v926_v10  ;;  %3463 = vmatpush.msrb.mxu3 %v943_v11  ;;  %v976_v10 = vld [vmem:[%s5853_s6 + $0x14d8] sm:$0xff]  ;;  %v991_v11 = vld [vmem:[%s5853_s6 + $0x1550] sm:$0xff] }
 0x191   : > { %3405 = vmatpush.msrb.mxu0 %v893_v12  ;;  %3424 = vmatpush.msrb.mxu1 %v910_v13  ;;  %v1008_v12 = vld [vmem:[%s5853_s6 + $0x15d8] sm:$0xff]  ;;  %v958_v13 = vld [vmem:[%s5853_s6 + $0x1448] sm:$0xff] }
 0x192   : > { %3445 = vmatpush.msrb.mxu2 %v925_v14  ;;  %3464 = vmatpush.msrb.mxu3 %v942_v15  ;;  %v975_v14 = vld [vmem:[%s5853_s6 + $0x14d0] sm:$0xff]  ;;  %v990_v15 = vld [vmem:[%s5853_s6 + $0x1548] sm:$0xff] }
 0x193   : > { %3406 = vmatpush.msrb.mxu0 %v892_v16  ;;  %3425 = vmatpush.msrb.mxu1 %v909_v17  ;;  %v1007_v16 = vld [vmem:[%s5853_s6 + $0x15d0] sm:$0xff]  ;;  %v957_v17 = vld [vmem:[%s5853_s6 + $0x1440] sm:$0xff] }
 0x194   : > { %3446 = vmatpush.msrb.mxu2 %v924_v18  ;;  %3465 = vmatpush.msrb.mxu3 %v941_v19  ;;  %v974_v18 = vld [vmem:[%s5853_s6 + $0x14c8] sm:$0xff]  ;;  %v989_v19 = vld [vmem:[%s5853_s6 + $0x1540] sm:$0xff] }
 0x195   : > { %3407 = vmatpush.msrb.mxu0 %v891_v20  ;;  %3426 = vmatpush.msrb.mxu1 %v908_v21  ;;  %v1006_v20 = vld [vmem:[%s5853_s6 + $0x15c8] sm:$0xff]  ;;  %v956_v21 = vld [vmem:[%s5853_s6 + $0x1438] sm:$0xff] }
 0x196   : > { %3447 = vmatpush.msrb.mxu2 %v923_v22  ;;  %3466 = vmatpush.msrb.mxu3 %v940_v23  ;;  %v973_v22 = vld [vmem:[%s5853_s6 + $0x14c0] sm:$0xff]  ;;  %v988_v23 = vld [vmem:[%s5853_s6 + $0x1538] sm:$0xff] }
 0x197   : > { %3408 = vmatpush.msrb.mxu0 %v890_v24  ;;  %3427 = vmatpush.msrb.mxu1 %v907_v25  ;;  %v1005_v24 = vld [vmem:[%s5853_s6 + $0x15c0] sm:$0xff]  ;;  %v955_v25 = vld [vmem:[%s5853_s6 + $0x1430] sm:$0xff] }
 0x198   : > { %3448 = vmatpush.msrb.mxu2 %v922_v26  ;;  %3467 = vmatpush.msrb.mxu3 %v939_v27  ;;  %v972_v26 = vld [vmem:[%s5853_s6 + $0x14b8] sm:$0xff]  ;;  %v987_v27 = vld [vmem:[%s5853_s6 + $0x1530] sm:$0xff] }
 0x199   : > { %3409 = vmatpush.msrb.mxu0 %v889_v28  ;;  %3428 = vmatpush.msrb.mxu1 %v906_v29  ;;  %v1004_v28 = vld [vmem:[%s5853_s6 + $0x15b8] sm:$0xff]  ;;  %v954_v29 = vld [vmem:[%s5853_s6 + $0x1428] sm:$0xff] }
 0x19a   : > { %3449 = vmatpush.msrb.mxu2 %v921_v30  ;;  %3468 = vmatpush.msrb.mxu3 %v938_v31  ;;  %v971_v30 = vld [vmem:[%s5853_s6 + $0x14b0] sm:$0xff]  ;;  %v986_v31 = vld [vmem:[%s5853_s6 + $0x1528] sm:$0xff] }
 0x19b   : > { %3410 = vmatpush.msrb.mxu0 %v888_v32  ;;  %3429 = vmatpush.msrb.mxu1 %v905_v33  ;;  %v1003_v32 = vld [vmem:[%s5853_s6 + $0x15b0] sm:$0xff]  ;;  %v953_v33 = vld [vmem:[%s5853_s6 + $0x1420] sm:$0xff] }
 0x19c   : > { %3450 = vmatpush.msrb.mxu2 %v920_v34  ;;  %3469 = vmatpush.msrb.mxu3 %v937_v35  ;;  %v970_v34 = vld [vmem:[%s5853_s6 + $0x14a8] sm:$0xff]  ;;  %v985_v35 = vld [vmem:[%s5853_s6 + $0x1520] sm:$0xff] }
 0x19d   : > { %3411 = vmatpush.msrb.mxu0 %v887_v36  ;;  %3430 = vmatpush.msrb.mxu1 %v904_v37  ;;  %v1002_v36 = vld [vmem:[%s5853_s6 + $0x15a8] sm:$0xff]  ;;  %v952_v37 = vld [vmem:[%s5853_s6 + $0x1418] sm:$0xff] }
 0x19e   : > { %3451 = vmatpush.msrb.mxu2 %v919_v38  ;;  %3470 = vmatpush.msrb.mxu3 %v936_v39  ;;  %v969_v38 = vld [vmem:[%s5853_s6 + $0x14a0] sm:$0xff]  ;;  %v984_v39 = vld [vmem:[%s5853_s6 + $0x1518] sm:$0xff] }
 0x19f   : > { %3412 = vmatpush.msrb.mxu0 %v886_v40  ;;  %3431 = vmatpush.msrb.mxu1 %v903_v41  ;;  %v1001_v40 = vld [vmem:[%s5853_s6 + $0x15a0] sm:$0xff]  ;;  %v951_v41 = vld [vmem:[%s5853_s6 + $0x1410] sm:$0xff] }
 0x1a0   : > { %3452 = vmatpush.msrb.mxu2 %v918_v43  ;;  %3471 = vmatpush.msrb.mxu3 %v935_v44  ;;  %v983_v43 = vld [vmem:[%s5853_s6 + $0x1510] sm:$0xff]  ;;  %v1000_v44 = vld [vmem:[%s5853_s6 + $0x1598] sm:$0xff] }
 0x1a1   : > { %3413 = vmatpush.msrb.mxu0 %v885_v45  ;;  %3432 = vmatpush.msrb.mxu1 %v902_v46  ;;  %v950_v45 = vld [vmem:[%s5853_s6 + $0x1408] sm:$0xff]  ;;  %v967_v46 = vld [vmem:[%s5853_s6 + $0x1490] sm:$0xff] }
 0x1a2   : > { %3453 = vmatpush.msrb.mxu2 %v917_v47  ;;  %3472 = vmatpush.msrb.mxu3 %v934_v48  ;;  %v288_v47 = vld [vmem:[%s5835_s8 + $0x58] sm:$0xff]  ;;  %v982_v48 = vld [vmem:[%s5853_s6 + $0x1508] sm:$0xff] }
 0x1a3   : > { %3414 = vmatmul.f32.vlgmr.msrb.gmra.mxu0 %v2436_v49  ;;  %3454 = vmatmul.f32.vlgmr.msrb.gmra.mxu2 %v2438_v50  ;;  %v999_v49 = vld [vmem:[%s5853_s6 + $0x1590] sm:$0xff]  ;;  %2441 = vst [vmem:[#allocation1 + $0x20] ss:$4 sm:$0xff] %v288_v47  ;;  %v949_v50 = vld [vmem:[%s5853_s6 + $0x1400] sm:$0xff]  ;;  %v1032_v47 = vld [vmem:[%s5853_s6 + $0x1698] sm:$0xff] }
 0x1a4   : > { %3478 = vmatpush.msra.mxu0 %v964_v51  ;;  %3518 = vmatpush.msra.mxu2 %v996_v52  ;;  %v966_v51 = vld [vmem:[%s5853_s6 + $0x1488] sm:$0xff]  ;;  %v981_v52 = vld [vmem:[%s5853_s6 + $0x1500] sm:$0xff] }
 0x1a5   : > { %3433 = vmatpush.msrb.mxu1 %v901_v53  ;;  %3473 = vmatpush.msrb.mxu3 %v933_v54  ;;  %v998_v53 = vld [vmem:[%s5853_s6 + $0x1588] sm:$0xff]  ;;  %v2442_v54 = vld.sshfl [vmem:[#allocation1] sm:$0xff pattern:$0x73625140] }
 0x1a6   : > { %3434 = vmatmul.f32.vlgmr.msrb.gmra.mxu1 %v2437_v55  ;;  %3474 = vmatmul.f32.vlgmr.msrb.gmra.mxu3 %v2439_v56  ;;  %v2444_v55 = vld.sshfl [vmem:[#allocation1 + $0x10] sm:$0xff pattern:$0x73625140]  ;;  %v1028_v56 = vld [vmem:[%s5853_s6 + $0x1678] sm:$0xff] }
 0x1a7   : > { %3479 = vmatpush.msra.mxu0 %v963_v57  ;;  %3498 = vmatpush.msra.mxu1 %v980_v58  ;;  %v1060_v57 = vld [vmem:[%s5853_s6 + $0x1778] sm:$0xff]  ;;  %v965_v58 = vld [vmem:[%s5853_s6 + $0x1480] sm:$0xff] }
 0x1a8   : > { %3519 = vmatpush.msra.mxu2 %v995_v59  ;;  %3538 = vmatpush.msra.mxu3 %v1012_v60  ;;  %v997_v59 = vld [vmem:[%s5853_s6 + $0x1580] sm:$0xff]  ;;  %v2443_v60 = vld.sshfl [vmem:[#allocation1 + $0x8] sm:$0xff pattern:$0x73625140] }
 0x1a9   : > { %3480 = vmatpush.msra.mxu0 %v962_v61  ;;  %3499 = vmatpush.msra.mxu1 %v979_v62  ;;  %v2445_v61 = vld.sshfl [vmem:[#allocation1 + $0x18] sm:$0xff pattern:$0x73625140]  ;;  %v1027_v62 = vld [vmem:[%s5853_s6 + $0x1670] sm:$0xff] }
 0x1aa   : > { %3520 = vmatpush.msra.mxu2 %v994_v63  ;;  %3539 = vmatpush.msra.mxu3 %v1011_v0  ;;  %v1044_v63 = vld [vmem:[%s5853_s6 + $0x16f8] sm:$0xff]  ;;  %v1059_v0 = vld [vmem:[%s5853_s6 + $0x1770] sm:$0xff] }
 0x1ab   : > { %3481 = vmatpush.msra.mxu0 %v961_v1  ;;  %3500 = vmatpush.msra.mxu1 %v978_v2  ;;  %v1076_v1 = vld [vmem:[%s5853_s6 + $0x17f8] sm:$0xff]  ;;  %v1026_v2 = vld [vmem:[%s5853_s6 + $0x1668] sm:$0xff] }
 0x1ac   : > { %3521 = vmatpush.msra.mxu2 %v993_v3  ;;  %3540 = vmatpush.msra.mxu3 %v1010_v4  ;;  %v1043_v3 = vld [vmem:[%s5853_s6 + $0x16f0] sm:$0xff]  ;;  %v1058_v4 = vld [vmem:[%s5853_s6 + $0x1768] sm:$0xff] }
 0x1ad   : > { %3482 = vmatpush.msra.mxu0 %v960_v5  ;;  %3501 = vmatpush.msra.mxu1 %v977_v6  ;;  %v1075_v5 = vld [vmem:[%s5853_s6 + $0x17f0] sm:$0xff]  ;;  %v1025_v6 = vld [vmem:[%s5853_s6 + $0x1660] sm:$0xff] }
 0x1ae   : > { %3522 = vmatpush.msra.mxu2 %v992_v7  ;;  %3541 = vmatpush.msra.mxu3 %v1009_v8  ;;  %v1042_v7 = vld [vmem:[%s5853_s6 + $0x16e8] sm:$0xff]  ;;  %v1057_v8 = vld [vmem:[%s5853_s6 + $0x1760] sm:$0xff] }
 0x1af   : > { %3483 = vmatpush.msra.mxu0 %v959_v9  ;;  %3502 = vmatpush.msra.mxu1 %v976_v10  ;;  %v1074_v9 = vld [vmem:[%s5853_s6 + $0x17e8] sm:$0xff]  ;;  %v1024_v10 = vld [vmem:[%s5853_s6 + $0x1658] sm:$0xff] }
 0x1b0   : > { %3523 = vmatpush.msra.mxu2 %v991_v11  ;;  %3542 = vmatpush.msra.mxu3 %v1008_v12  ;;  %v1041_v11 = vld [vmem:[%s5853_s6 + $0x16e0] sm:$0xff]  ;;  %v1056_v12 = vld [vmem:[%s5853_s6 + $0x1758] sm:$0xff] }
 0x1b1   : > { %3484 = vmatpush.msra.mxu0 %v958_v13  ;;  %3503 = vmatpush.msra.mxu1 %v975_v14  ;;  %v1073_v13 = vld [vmem:[%s5853_s6 + $0x17e0] sm:$0xff]  ;;  %v1023_v14 = vld [vmem:[%s5853_s6 + $0x1650] sm:$0xff] }
 0x1b2   : > { %3524 = vmatpush.msra.mxu2 %v990_v15  ;;  %3543 = vmatpush.msra.mxu3 %v1007_v16  ;;  %v1040_v15 = vld [vmem:[%s5853_s6 + $0x16d8] sm:$0xff]  ;;  %v1055_v16 = vld [vmem:[%s5853_s6 + $0x1750] sm:$0xff] }
 0x1b3   : > { %3485 = vmatpush.msra.mxu0 %v957_v17  ;;  %3504 = vmatpush.msra.mxu1 %v974_v18  ;;  %v1072_v17 = vld [vmem:[%s5853_s6 + $0x17d8] sm:$0xff]  ;;  %v1022_v18 = vld [vmem:[%s5853_s6 + $0x1648] sm:$0xff] }
 0x1b4   : > { %3525 = vmatpush.msra.mxu2 %v989_v19  ;;  %3544 = vmatpush.msra.mxu3 %v1006_v20  ;;  %v1039_v19 = vld [vmem:[%s5853_s6 + $0x16d0] sm:$0xff]  ;;  %v1054_v20 = vld [vmem:[%s5853_s6 + $0x1748] sm:$0xff] }
 0x1b5   : > { %3486 = vmatpush.msra.mxu0 %v956_v21  ;;  %3505 = vmatpush.msra.mxu1 %v973_v22  ;;  %v1071_v21 = vld [vmem:[%s5853_s6 + $0x17d0] sm:$0xff]  ;;  %v1021_v22 = vld [vmem:[%s5853_s6 + $0x1640] sm:$0xff] }
 0x1b6   : > { %3526 = vmatpush.msra.mxu2 %v988_v23  ;;  %3545 = vmatpush.msra.mxu3 %v1005_v24  ;;  %v1038_v23 = vld [vmem:[%s5853_s6 + $0x16c8] sm:$0xff]  ;;  %v1053_v24 = vld [vmem:[%s5853_s6 + $0x1740] sm:$0xff] }
 0x1b7   : > { %3487 = vmatpush.msra.mxu0 %v955_v25  ;;  %3506 = vmatpush.msra.mxu1 %v972_v26  ;;  %v1070_v25 = vld [vmem:[%s5853_s6 + $0x17c8] sm:$0xff]  ;;  %v1020_v26 = vld [vmem:[%s5853_s6 + $0x1638] sm:$0xff] }
 0x1b8   : > { %3527 = vmatpush.msra.mxu2 %v987_v27  ;;  %3546 = vmatpush.msra.mxu3 %v1004_v28  ;;  %v1037_v27 = vld [vmem:[%s5853_s6 + $0x16c0] sm:$0xff]  ;;  %v1052_v28 = vld [vmem:[%s5853_s6 + $0x1738] sm:$0xff] }
 0x1b9   : > { %3488 = vmatpush.msra.mxu0 %v954_v29  ;;  %3507 = vmatpush.msra.mxu1 %v971_v30  ;;  %v1069_v29 = vld [vmem:[%s5853_s6 + $0x17c0] sm:$0xff]  ;;  %v1019_v30 = vld [vmem:[%s5853_s6 + $0x1630] sm:$0xff] }
 0x1ba   : > { %3528 = vmatpush.msra.mxu2 %v986_v31  ;;  %3547 = vmatpush.msra.mxu3 %v1003_v32  ;;  %v1036_v31 = vld [vmem:[%s5853_s6 + $0x16b8] sm:$0xff]  ;;  %v1051_v32 = vld [vmem:[%s5853_s6 + $0x1730] sm:$0xff] }
 0x1bb   : > { %3489 = vmatpush.msra.mxu0 %v953_v33  ;;  %3508 = vmatpush.msra.mxu1 %v970_v34  ;;  %v1068_v33 = vld [vmem:[%s5853_s6 + $0x17b8] sm:$0xff]  ;;  %v1018_v34 = vld [vmem:[%s5853_s6 + $0x1628] sm:$0xff] }
 0x1bc   : > { %3529 = vmatpush.msra.mxu2 %v985_v35  ;;  %3548 = vmatpush.msra.mxu3 %v1002_v36  ;;  %v1035_v35 = vld [vmem:[%s5853_s6 + $0x16b0] sm:$0xff]  ;;  %v1050_v36 = vld [vmem:[%s5853_s6 + $0x1728] sm:$0xff] }
 0x1bd   : > { %3490 = vmatpush.msra.mxu0 %v952_v37  ;;  %3509 = vmatpush.msra.mxu1 %v969_v38  ;;  %v1067_v37 = vld [vmem:[%s5853_s6 + $0x17b0] sm:$0xff]  ;;  %v1017_v38 = vld [vmem:[%s5853_s6 + $0x1620] sm:$0xff] }
 0x1be   : > { %3530 = vmatpush.msra.mxu2 %v984_v39  ;;  %3549 = vmatpush.msra.mxu3 %v1001_v40  ;;  %v1034_v39 = vld [vmem:[%s5853_s6 + $0x16a8] sm:$0xff]  ;;  %v1049_v40 = vld [vmem:[%s5853_s6 + $0x1720] sm:$0xff] }
 0x1bf   : > { %3491 = vmatpush.msra.mxu0 %v951_v41  ;;  %3510 = vmatpush.msra.mxu1 %v968_v42  ;;  %v1066_v41 = vld [vmem:[%s5853_s6 + $0x17a8] sm:$0xff]  ;;  %v1016_v42 = vld [vmem:[%s5853_s6 + $0x1618] sm:$0xff] }
 0x1c0   : > { %3531 = vmatpush.msra.mxu2 %v983_v43  ;;  %3550 = vmatpush.msra.mxu3 %v1000_v44  ;;  %v1033_v43 = vld [vmem:[%s5853_s6 + $0x16a0] sm:$0xff]  ;;  %v1048_v44 = vld [vmem:[%s5853_s6 + $0x1718] sm:$0xff] }
 0x1c1   : > { %3492 = vmatpush.msra.mxu0 %v950_v45  ;;  %3511 = vmatpush.msra.mxu1 %v967_v46  ;;  %v1065_v45 = vld [vmem:[%s5853_s6 + $0x17a0] sm:$0xff]  ;;  %v1015_v46 = vld [vmem:[%s5853_s6 + $0x1610] sm:$0xff] }
 0x1c2   : > { %3532 = vmatpush.msra.mxu2 %v982_v48  ;;  %3551 = vmatpush.msra.mxu3 %v999_v49  ;;  %v1047_v48 = vld [vmem:[%s5853_s6 + $0x1710] sm:$0xff]  ;;  %v1064_v49 = vld [vmem:[%s5853_s6 + $0x1798] sm:$0xff] }
 0x1c3   : > { %3493 = vmatpush.msra.mxu0 %v949_v50  ;;  %3512 = vmatpush.msra.mxu1 %v966_v51  ;;  %v1014_v50 = vld [vmem:[%s5853_s6 + $0x1608] sm:$0xff]  ;;  %v1031_v51 = vld [vmem:[%s5853_s6 + $0x1690] sm:$0xff] }
 0x1c4   : > { %3533 = vmatpush.msra.mxu2 %v981_v52  ;;  %3552 = vmatpush.msra.mxu3 %v998_v53  ;;  %v289_v52 = vld [vmem:[%s5835_s8 + $0x60] sm:$0xff] }
 0x1c5   : > { %3494 = vmatmul.f32.vlgmr.msra.gmra.mxu0 %v2442_v54  ;;  %3534 = vmatmul.f32.vlgmr.msra.gmra.mxu2 %v2444_v55  ;;  %v1046_v53 = vld [vmem:[%s5853_s6 + $0x1708] sm:$0xff]  ;;  %v1063_v54 = vld [vmem:[%s5853_s6 + $0x1790] sm:$0xff]  ;;  %2450 = vst [vmem:[#allocation1] ss:$4 sm:$0xff] %v289_v52  ;;  %v1013_v55 = vld [vmem:[%s5853_s6 + $0x1600] sm:$0xff] }
 0x1c6   : > { %3558 = vmatpush.msrb.mxu0 %v1028_v56  ;;  %3598 = vmatpush.msrb.mxu2 %v1060_v57  ;;  %v1030_v56 = vld [vmem:[%s5853_s6 + $0x1688] sm:$0xff]  ;;  %v1045_v57 = vld [vmem:[%s5853_s6 + $0x1700] sm:$0xff]  ;;  %v1096_v52 = vld [vmem:[%s5853_s6 + $0x1898] sm:$0xff] }
 0x1c7   : > { %3513 = vmatpush.msra.mxu1 %v965_v58  ;;  %3553 = vmatpush.msra.mxu3 %v997_v59  ;;  %v1062_v58 = vld [vmem:[%s5853_s6 + $0x1788] sm:$0xff]  ;;  %v2446_v59 = vld.sshfl [vmem:[#allocation1 + $0x20] sm:$0xff pattern:$0x73625140] }
 0x1c8   : > { %3514 = vmatmul.f32.vlgmr.msra.gmra.mxu1 %v2443_v60  ;;  %3554 = vmatmul.f32.vlgmr.msra.gmra.mxu3 %v2445_v61  ;;  %v2448_v60 = vld.sshfl [vmem:[#allocation1 + $0x30] sm:$0xff pattern:$0x73625140]  ;;  %v1092_v61 = vld [vmem:[%s5853_s6 + $0x1878] sm:$0xff] }
 0x1c9   : > { %3559 = vmatpush.msrb.mxu0 %v1027_v62  ;;  %3578 = vmatpush.msrb.mxu1 %v1044_v63  ;;  %v1124_v62 = vld [vmem:[%s5853_s6 + $0x1978] sm:$0xff]  ;;  %v1029_v63 = vld [vmem:[%s5853_s6 + $0x1680] sm:$0xff] }
 0x1ca   : > { %3599 = vmatpush.msrb.mxu2 %v1059_v0  ;;  %3618 = vmatpush.msrb.mxu3 %v1076_v1  ;;  %v1061_v0 = vld [vmem:[%s5853_s6 + $0x1780] sm:$0xff]  ;;  %v2447_v1 = vld.sshfl [vmem:[#allocation1 + $0x28] sm:$0xff pattern:$0x73625140] }
 0x1cb   : > { %3560 = vmatpush.msrb.mxu0 %v1026_v2  ;;  %3579 = vmatpush.msrb.mxu1 %v1043_v3  ;;  %v2449_v2 = vld.sshfl [vmem:[#allocation1 + $0x38] sm:$0xff pattern:$0x73625140]  ;;  %v1091_v3 = vld [vmem:[%s5853_s6 + $0x1870] sm:$0xff] }
 0x1cc   : > { %3600 = vmatpush.msrb.mxu2 %v1058_v4  ;;  %3619 = vmatpush.msrb.mxu3 %v1075_v5  ;;  %v1108_v4 = vld [vmem:[%s5853_s6 + $0x18f8] sm:$0xff]  ;;  %v1123_v5 = vld [vmem:[%s5853_s6 + $0x1970] sm:$0xff] }
 0x1cd   : > { %3561 = vmatpush.msrb.mxu0 %v1025_v6  ;;  %3580 = vmatpush.msrb.mxu1 %v1042_v7  ;;  %v1140_v6 = vld [vmem:[%s5853_s6 + $0x19f8] sm:$0xff]  ;;  %v1090_v7 = vld [vmem:[%s5853_s6 + $0x1868] sm:$0xff] }
 0x1ce   : > { %3601 = vmatpush.msrb.mxu2 %v1057_v8  ;;  %3620 = vmatpush.msrb.mxu3 %v1074_v9  ;;  %v1107_v8 = vld [vmem:[%s5853_s6 + $0x18f0] sm:$0xff]  ;;  %v1122_v9 = vld [vmem:[%s5853_s6 + $0x1968] sm:$0xff] }
 0x1cf   : > { %3562 = vmatpush.msrb.mxu0 %v1024_v10  ;;  %3581 = vmatpush.msrb.mxu1 %v1041_v11  ;;  %v1139_v10 = vld [vmem:[%s5853_s6 + $0x19f0] sm:$0xff]  ;;  %v1089_v11 = vld [vmem:[%s5853_s6 + $0x1860] sm:$0xff] }
 0x1d0   : > { %3602 = vmatpush.msrb.mxu2 %v1056_v12  ;;  %3621 = vmatpush.msrb.mxu3 %v1073_v13  ;;  %v1106_v12 = vld [vmem:[%s5853_s6 + $0x18e8] sm:$0xff]  ;;  %v1121_v13 = vld [vmem:[%s5853_s6 + $0x1960] sm:$0xff] }
 0x1d1   : > { %3563 = vmatpush.msrb.mxu0 %v1023_v14  ;;  %3582 = vmatpush.msrb.mxu1 %v1040_v15  ;;  %v1138_v14 = vld [vmem:[%s5853_s6 + $0x19e8] sm:$0xff]  ;;  %v1088_v15 = vld [vmem:[%s5853_s6 + $0x1858] sm:$0xff] }
 0x1d2   : > { %3603 = vmatpush.msrb.mxu2 %v1055_v16  ;;  %3622 = vmatpush.msrb.mxu3 %v1072_v17  ;;  %v1105_v16 = vld [vmem:[%s5853_s6 + $0x18e0] sm:$0xff]  ;;  %v1120_v17 = vld [vmem:[%s5853_s6 + $0x1958] sm:$0xff] }
 0x1d3   : > { %3564 = vmatpush.msrb.mxu0 %v1022_v18  ;;  %3583 = vmatpush.msrb.mxu1 %v1039_v19  ;;  %v1137_v18 = vld [vmem:[%s5853_s6 + $0x19e0] sm:$0xff]  ;;  %v1087_v19 = vld [vmem:[%s5853_s6 + $0x1850] sm:$0xff] }
 0x1d4   : > { %3604 = vmatpush.msrb.mxu2 %v1054_v20  ;;  %3623 = vmatpush.msrb.mxu3 %v1071_v21  ;;  %v1104_v20 = vld [vmem:[%s5853_s6 + $0x18d8] sm:$0xff]  ;;  %v1119_v21 = vld [vmem:[%s5853_s6 + $0x1950] sm:$0xff] }
 0x1d5   : > { %3565 = vmatpush.msrb.mxu0 %v1021_v22  ;;  %3584 = vmatpush.msrb.mxu1 %v1038_v23  ;;  %v1136_v22 = vld [vmem:[%s5853_s6 + $0x19d8] sm:$0xff]  ;;  %v1086_v23 = vld [vmem:[%s5853_s6 + $0x1848] sm:$0xff] }
 0x1d6   : > { %3605 = vmatpush.msrb.mxu2 %v1053_v24  ;;  %3624 = vmatpush.msrb.mxu3 %v1070_v25  ;;  %v1103_v24 = vld [vmem:[%s5853_s6 + $0x18d0] sm:$0xff]  ;;  %v1118_v25 = vld [vmem:[%s5853_s6 + $0x1948] sm:$0xff] }
 0x1d7   : > { %3566 = vmatpush.msrb.mxu0 %v1020_v26  ;;  %3585 = vmatpush.msrb.mxu1 %v1037_v27  ;;  %v1135_v26 = vld [vmem:[%s5853_s6 + $0x19d0] sm:$0xff]  ;;  %v1085_v27 = vld [vmem:[%s5853_s6 + $0x1840] sm:$0xff] }
 0x1d8   : > { %3606 = vmatpush.msrb.mxu2 %v1052_v28  ;;  %3625 = vmatpush.msrb.mxu3 %v1069_v29  ;;  %v1102_v28 = vld [vmem:[%s5853_s6 + $0x18c8] sm:$0xff]  ;;  %v1117_v29 = vld [vmem:[%s5853_s6 + $0x1940] sm:$0xff] }
 0x1d9   : > { %3567 = vmatpush.msrb.mxu0 %v1019_v30  ;;  %3586 = vmatpush.msrb.mxu1 %v1036_v31  ;;  %v1134_v30 = vld [vmem:[%s5853_s6 + $0x19c8] sm:$0xff]  ;;  %v1084_v31 = vld [vmem:[%s5853_s6 + $0x1838] sm:$0xff] }
 0x1da   : > { %3607 = vmatpush.msrb.mxu2 %v1051_v32  ;;  %3626 = vmatpush.msrb.mxu3 %v1068_v33  ;;  %v1101_v32 = vld [vmem:[%s5853_s6 + $0x18c0] sm:$0xff]  ;;  %v1116_v33 = vld [vmem:[%s5853_s6 + $0x1938] sm:$0xff] }
 0x1db   : > { %3568 = vmatpush.msrb.mxu0 %v1018_v34  ;;  %3587 = vmatpush.msrb.mxu1 %v1035_v35  ;;  %v1133_v34 = vld [vmem:[%s5853_s6 + $0x19c0] sm:$0xff]  ;;  %v1083_v35 = vld [vmem:[%s5853_s6 + $0x1830] sm:$0xff] }
 0x1dc   : > { %3608 = vmatpush.msrb.mxu2 %v1050_v36  ;;  %3627 = vmatpush.msrb.mxu3 %v1067_v37  ;;  %v1100_v36 = vld [vmem:[%s5853_s6 + $0x18b8] sm:$0xff]  ;;  %v1115_v37 = vld [vmem:[%s5853_s6 + $0x1930] sm:$0xff] }
 0x1dd   : > { %3569 = vmatpush.msrb.mxu0 %v1017_v38  ;;  %3588 = vmatpush.msrb.mxu1 %v1034_v39  ;;  %v1132_v38 = vld [vmem:[%s5853_s6 + $0x19b8] sm:$0xff]  ;;  %v1082_v39 = vld [vmem:[%s5853_s6 + $0x1828] sm:$0xff] }
 0x1de   : > { %3609 = vmatpush.msrb.mxu2 %v1049_v40  ;;  %3628 = vmatpush.msrb.mxu3 %v1066_v41  ;;  %v1099_v40 = vld [vmem:[%s5853_s6 + $0x18b0] sm:$0xff]  ;;  %v1114_v41 = vld [vmem:[%s5853_s6 + $0x1928] sm:$0xff] }
 0x1df   : > { %3570 = vmatpush.msrb.mxu0 %v1016_v42  ;;  %3589 = vmatpush.msrb.mxu1 %v1033_v43  ;;  %v1131_v42 = vld [vmem:[%s5853_s6 + $0x19b0] sm:$0xff]  ;;  %v1081_v43 = vld [vmem:[%s5853_s6 + $0x1820] sm:$0xff] }
 0x1e0   : > { %3610 = vmatpush.msrb.mxu2 %v1048_v44  ;;  %3629 = vmatpush.msrb.mxu3 %v1065_v45  ;;  %v1098_v44 = vld [vmem:[%s5853_s6 + $0x18a8] sm:$0xff]  ;;  %v1113_v45 = vld [vmem:[%s5853_s6 + $0x1920] sm:$0xff] }
 0x1e1   : > { %3571 = vmatpush.msrb.mxu0 %v1015_v46  ;;  %3590 = vmatpush.msrb.mxu1 %v1032_v47  ;;  %v1130_v46 = vld [vmem:[%s5853_s6 + $0x19a8] sm:$0xff]  ;;  %v1080_v47 = vld [vmem:[%s5853_s6 + $0x1818] sm:$0xff] }
 0x1e2   : > { %3611 = vmatpush.msrb.mxu2 %v1047_v48  ;;  %3630 = vmatpush.msrb.mxu3 %v1064_v49  ;;  %v1097_v48 = vld [vmem:[%s5853_s6 + $0x18a0] sm:$0xff]  ;;  %v1112_v49 = vld [vmem:[%s5853_s6 + $0x1918] sm:$0xff] }
 0x1e3   : > { %3572 = vmatpush.msrb.mxu0 %v1014_v50  ;;  %3591 = vmatpush.msrb.mxu1 %v1031_v51  ;;  %v1129_v50 = vld [vmem:[%s5853_s6 + $0x19a0] sm:$0xff]  ;;  %v1079_v51 = vld [vmem:[%s5853_s6 + $0x1810] sm:$0xff] }
 0x1e4   : > { %3612 = vmatpush.msrb.mxu2 %v1046_v53  ;;  %3631 = vmatpush.msrb.mxu3 %v1063_v54  ;;  %v1111_v53 = vld [vmem:[%s5853_s6 + $0x1910] sm:$0xff]  ;;  %v1128_v54 = vld [vmem:[%s5853_s6 + $0x1998] sm:$0xff] }
 0x1e5   : > { %3573 = vmatpush.msrb.mxu0 %v1013_v55  ;;  %3592 = vmatpush.msrb.mxu1 %v1030_v56  ;;  %v1078_v55 = vld [vmem:[%s5853_s6 + $0x1808] sm:$0xff]  ;;  %v1095_v56 = vld [vmem:[%s5853_s6 + $0x1890] sm:$0xff] }
 0x1e6   : > { %3613 = vmatpush.msrb.mxu2 %v1045_v57  ;;  %3632 = vmatpush.msrb.mxu3 %v1062_v58  ;;  %v290_v57 = vld [vmem:[%s5835_s8 + $0x68] sm:$0xff]  ;;  %v1110_v58 = vld [vmem:[%s5853_s6 + $0x1908] sm:$0xff] }
 0x1e7   : > { %3574 = vmatmul.f32.vlgmr.msrb.gmra.mxu0 %v2446_v59  ;;  %3614 = vmatmul.f32.vlgmr.msrb.gmra.mxu2 %v2448_v60  ;;  %v1127_v59 = vld [vmem:[%s5853_s6 + $0x1990] sm:$0xff]  ;;  %2451 = vst [vmem:[#allocation1 + $0x20] ss:$4 sm:$0xff] %v290_v57  ;;  %v1077_v60 = vld [vmem:[%s5853_s6 + $0x1800] sm:$0xff]  ;;  %v1160_v57 = vld [vmem:[%s5853_s6 + $0x1a98] sm:$0xff] }
 0x1e8   : > { %3638 = vmatpush.msra.mxu0 %v1092_v61  ;;  %3678 = vmatpush.msra.mxu2 %v1124_v62  ;;  %v1094_v61 = vld [vmem:[%s5853_s6 + $0x1888] sm:$0xff]  ;;  %v1109_v62 = vld [vmem:[%s5853_s6 + $0x1900] sm:$0xff] }
 0x1e9   : > { %3593 = vmatpush.msrb.mxu1 %v1029_v63  ;;  %3633 = vmatpush.msrb.mxu3 %v1061_v0  ;;  %v1126_v63 = vld [vmem:[%s5853_s6 + $0x1988] sm:$0xff]  ;;  %v2452_v0 = vld.sshfl [vmem:[#allocation1] sm:$0xff pattern:$0x73625140] }
 0x1ea   : > { %3594 = vmatmul.f32.vlgmr.msrb.gmra.mxu1 %v2447_v1  ;;  %3634 = vmatmul.f32.vlgmr.msrb.gmra.mxu3 %v2449_v2  ;;  %v2454_v1 = vld.sshfl [vmem:[#allocation1 + $0x10] sm:$0xff pattern:$0x73625140]  ;;  %v1156_v2 = vld [vmem:[%s5853_s6 + $0x1a78] sm:$0xff] }
 0x1eb   : > { %3639 = vmatpush.msra.mxu0 %v1091_v3  ;;  %3658 = vmatpush.msra.mxu1 %v1108_v4  ;;  %v1188_v3 = vld [vmem:[%s5853_s6 + $0x1b78] sm:$0xff]  ;;  %v1093_v4 = vld [vmem:[%s5853_s6 + $0x1880] sm:$0xff] }
 0x1ec   : > { %3679 = vmatpush.msra.mxu2 %v1123_v5  ;;  %3698 = vmatpush.msra.mxu3 %v1140_v6  ;;  %v1125_v5 = vld [vmem:[%s5853_s6 + $0x1980] sm:$0xff]  ;;  %v2453_v6 = vld.sshfl [vmem:[#allocation1 + $0x8] sm:$0xff pattern:$0x73625140] }
 0x1ed   : > { %3640 = vmatpush.msra.mxu0 %v1090_v7  ;;  %3659 = vmatpush.msra.mxu1 %v1107_v8  ;;  %v2455_v7 = vld.sshfl [vmem:[#allocation1 + $0x18] sm:$0xff pattern:$0x73625140]  ;;  %v1155_v8 = vld [vmem:[%s5853_s6 + $0x1a70] sm:$0xff] }
 0x1ee   : > { %3680 = vmatpush.msra.mxu2 %v1122_v9  ;;  %3699 = vmatpush.msra.mxu3 %v1139_v10  ;;  %v1172_v9 = vld [vmem:[%s5853_s6 + $0x1af8] sm:$0xff]  ;;  %v1187_v10 = vld [vmem:[%s5853_s6 + $0x1b70] sm:$0xff] }
 0x1ef   : > { %3641 = vmatpush.msra.mxu0 %v1089_v11  ;;  %3660 = vmatpush.msra.mxu1 %v1106_v12  ;;  %v1204_v11 = vld [vmem:[%s5853_s6 + $0x1bf8] sm:$0xff]  ;;  %v1154_v12 = vld [vmem:[%s5853_s6 + $0x1a68] sm:$0xff] }
 0x1f0   : > { %3681 = vmatpush.msra.mxu2 %v1121_v13  ;;  %3700 = vmatpush.msra.mxu3 %v1138_v14  ;;  %v1171_v13 = vld [vmem:[%s5853_s6 + $0x1af0] sm:$0xff]  ;;  %v1186_v14 = vld [vmem:[%s5853_s6 + $0x1b68] sm:$0xff] }
 0x1f1   : > { %3642 = vmatpush.msra.mxu0 %v1088_v15  ;;  %3661 = vmatpush.msra.mxu1 %v1105_v16  ;;  %v1203_v15 = vld [vmem:[%s5853_s6 + $0x1bf0] sm:$0xff]  ;;  %v1153_v16 = vld [vmem:[%s5853_s6 + $0x1a60] sm:$0xff] }
 0x1f2   : > { %3682 = vmatpush.msra.mxu2 %v1120_v17  ;;  %3701 = vmatpush.msra.mxu3 %v1137_v18  ;;  %v1170_v17 = vld [vmem:[%s5853_s6 + $0x1ae8] sm:$0xff]  ;;  %v1185_v18 = vld [vmem:[%s5853_s6 + $0x1b60] sm:$0xff] }
 0x1f3   : > { %3643 = vmatpush.msra.mxu0 %v1087_v19  ;;  %3662 = vmatpush.msra.mxu1 %v1104_v20  ;;  %v1202_v19 = vld [vmem:[%s5853_s6 + $0x1be8] sm:$0xff]  ;;  %v1152_v20 = vld [vmem:[%s5853_s6 + $0x1a58] sm:$0xff] }
 0x1f4   : > { %3683 = vmatpush.msra.mxu2 %v1119_v21  ;;  %3702 = vmatpush.msra.mxu3 %v1136_v22  ;;  %v1169_v21 = vld [vmem:[%s5853_s6 + $0x1ae0] sm:$0xff]  ;;  %v1184_v22 = vld [vmem:[%s5853_s6 + $0x1b58] sm:$0xff] }
 0x1f5   : > { %3644 = vmatpush.msra.mxu0 %v1086_v23  ;;  %3663 = vmatpush.msra.mxu1 %v1103_v24  ;;  %v1201_v23 = vld [vmem:[%s5853_s6 + $0x1be0] sm:$0xff]  ;;  %v1151_v24 = vld [vmem:[%s5853_s6 + $0x1a50] sm:$0xff] }
 0x1f6   : > { %3684 = vmatpush.msra.mxu2 %v1118_v25  ;;  %3703 = vmatpush.msra.mxu3 %v1135_v26  ;;  %v1168_v25 = vld [vmem:[%s5853_s6 + $0x1ad8] sm:$0xff]  ;;  %v1183_v26 = vld [vmem:[%s5853_s6 + $0x1b50] sm:$0xff] }
 0x1f7   : > { %3645 = vmatpush.msra.mxu0 %v1085_v27  ;;  %3664 = vmatpush.msra.mxu1 %v1102_v28  ;;  %v1200_v27 = vld [vmem:[%s5853_s6 + $0x1bd8] sm:$0xff]  ;;  %v1150_v28 = vld [vmem:[%s5853_s6 + $0x1a48] sm:$0xff] }
 0x1f8   : > { %3685 = vmatpush.msra.mxu2 %v1117_v29  ;;  %3704 = vmatpush.msra.mxu3 %v1134_v30  ;;  %v1167_v29 = vld [vmem:[%s5853_s6 + $0x1ad0] sm:$0xff]  ;;  %v1182_v30 = vld [vmem:[%s5853_s6 + $0x1b48] sm:$0xff] }
 0x1f9   : > { %3646 = vmatpush.msra.mxu0 %v1084_v31  ;;  %3665 = vmatpush.msra.mxu1 %v1101_v32  ;;  %v1199_v31 = vld [vmem:[%s5853_s6 + $0x1bd0] sm:$0xff]  ;;  %v1149_v32 = vld [vmem:[%s5853_s6 + $0x1a40] sm:$0xff] }
 0x1fa   : > { %3686 = vmatpush.msra.mxu2 %v1116_v33  ;;  %3705 = vmatpush.msra.mxu3 %v1133_v34  ;;  %v1166_v33 = vld [vmem:[%s5853_s6 + $0x1ac8] sm:$0xff]  ;;  %v1181_v34 = vld [vmem:[%s5853_s6 + $0x1b40] sm:$0xff] }
 0x1fb   : > { %3647 = vmatpush.msra.mxu0 %v1083_v35  ;;  %3666 = vmatpush.msra.mxu1 %v1100_v36  ;;  %v1198_v35 = vld [vmem:[%s5853_s6 + $0x1bc8] sm:$0xff]  ;;  %v1148_v36 = vld [vmem:[%s5853_s6 + $0x1a38] sm:$0xff] }
 0x1fc   : > { %3687 = vmatpush.msra.mxu2 %v1115_v37  ;;  %3706 = vmatpush.msra.mxu3 %v1132_v38  ;;  %v1165_v37 = vld [vmem:[%s5853_s6 + $0x1ac0] sm:$0xff]  ;;  %v1180_v38 = vld [vmem:[%s5853_s6 + $0x1b38] sm:$0xff] }
 0x1fd   : > { %3648 = vmatpush.msra.mxu0 %v1082_v39  ;;  %3667 = vmatpush.msra.mxu1 %v1099_v40  ;;  %v1197_v39 = vld [vmem:[%s5853_s6 + $0x1bc0] sm:$0xff]  ;;  %v1147_v40 = vld [vmem:[%s5853_s6 + $0x1a30] sm:$0xff] }
 0x1fe   : > { %3688 = vmatpush.msra.mxu2 %v1114_v41  ;;  %3707 = vmatpush.msra.mxu3 %v1131_v42  ;;  %v1164_v41 = vld [vmem:[%s5853_s6 + $0x1ab8] sm:$0xff]  ;;  %v1179_v42 = vld [vmem:[%s5853_s6 + $0x1b30] sm:$0xff] }
 0x1ff   : > { %3649 = vmatpush.msra.mxu0 %v1081_v43  ;;  %3668 = vmatpush.msra.mxu1 %v1098_v44  ;;  %v1196_v43 = vld [vmem:[%s5853_s6 + $0x1bb8] sm:$0xff]  ;;  %v1146_v44 = vld [vmem:[%s5853_s6 + $0x1a28] sm:$0xff] }
 0x200   : > { %3689 = vmatpush.msra.mxu2 %v1113_v45  ;;  %3708 = vmatpush.msra.mxu3 %v1130_v46  ;;  %v1163_v45 = vld [vmem:[%s5853_s6 + $0x1ab0] sm:$0xff]  ;;  %v1178_v46 = vld [vmem:[%s5853_s6 + $0x1b28] sm:$0xff] }
 0x201   : > { %3650 = vmatpush.msra.mxu0 %v1080_v47  ;;  %3669 = vmatpush.msra.mxu1 %v1097_v48  ;;  %v1195_v47 = vld [vmem:[%s5853_s6 + $0x1bb0] sm:$0xff]  ;;  %v1145_v48 = vld [vmem:[%s5853_s6 + $0x1a20] sm:$0xff] }
 0x202   : > { %3690 = vmatpush.msra.mxu2 %v1112_v49  ;;  %3709 = vmatpush.msra.mxu3 %v1129_v50  ;;  %v1162_v49 = vld [vmem:[%s5853_s6 + $0x1aa8] sm:$0xff]  ;;  %v1177_v50 = vld [vmem:[%s5853_s6 + $0x1b20] sm:$0xff] }
 0x203   : > { %3651 = vmatpush.msra.mxu0 %v1079_v51  ;;  %3670 = vmatpush.msra.mxu1 %v1096_v52  ;;  %v1194_v51 = vld [vmem:[%s5853_s6 + $0x1ba8] sm:$0xff]  ;;  %v1144_v52 = vld [vmem:[%s5853_s6 + $0x1a18] sm:$0xff] }
 0x204   : > { %3691 = vmatpush.msra.mxu2 %v1111_v53  ;;  %3710 = vmatpush.msra.mxu3 %v1128_v54  ;;  %v1161_v53 = vld [vmem:[%s5853_s6 + $0x1aa0] sm:$0xff]  ;;  %v1176_v54 = vld [vmem:[%s5853_s6 + $0x1b18] sm:$0xff] }
 0x205   : > { %3652 = vmatpush.msra.mxu0 %v1078_v55  ;;  %3671 = vmatpush.msra.mxu1 %v1095_v56  ;;  %v1193_v55 = vld [vmem:[%s5853_s6 + $0x1ba0] sm:$0xff]  ;;  %v1143_v56 = vld [vmem:[%s5853_s6 + $0x1a10] sm:$0xff] }
 0x206   : > { %3692 = vmatpush.msra.mxu2 %v1110_v58  ;;  %3711 = vmatpush.msra.mxu3 %v1127_v59  ;;  %v1175_v58 = vld [vmem:[%s5853_s6 + $0x1b10] sm:$0xff]  ;;  %v1192_v59 = vld [vmem:[%s5853_s6 + $0x1b98] sm:$0xff] }
 0x207   : > { %3653 = vmatpush.msra.mxu0 %v1077_v60  ;;  %3672 = vmatpush.msra.mxu1 %v1094_v61  ;;  %v1142_v60 = vld [vmem:[%s5853_s6 + $0x1a08] sm:$0xff]  ;;  %v1159_v61 = vld [vmem:[%s5853_s6 + $0x1a90] sm:$0xff] }
 0x208   : > { %3693 = vmatpush.msra.mxu2 %v1109_v62  ;;  %3712 = vmatpush.msra.mxu3 %v1126_v63  ;;  %v291_v62 = vld [vmem:[%s5835_s8 + $0x70] sm:$0xff]  ;;  %v1174_v63 = vld [vmem:[%s5853_s6 + $0x1b08] sm:$0xff] }
 0x209   : > { %3654 = vmatmul.f32.vlgmr.msra.gmra.mxu0 %v2452_v0  ;;  %3694 = vmatmul.f32.vlgmr.msra.gmra.mxu2 %v2454_v1  ;;  %v1191_v0 = vld [vmem:[%s5853_s6 + $0x1b90] sm:$0xff]  ;;  %2460 = vst [vmem:[#allocation1] ss:$4 sm:$0xff] %v291_v62  ;;  %v1141_v1 = vld [vmem:[%s5853_s6 + $0x1a00] sm:$0xff]  ;;  %v1224_v62 = vld [vmem:[%s5853_s6 + $0x1c98] sm:$0xff] }
 0x20a   : > { %3718 = vmatpush.msrb.mxu0 %v1156_v2  ;;  %3758 = vmatpush.msrb.mxu2 %v1188_v3  ;;  %v1158_v2 = vld [vmem:[%s5853_s6 + $0x1a88] sm:$0xff]  ;;  %v1173_v3 = vld [vmem:[%s5853_s6 + $0x1b00] sm:$0xff] }
 0x20b   : > { %3673 = vmatpush.msra.mxu1 %v1093_v4  ;;  %3713 = vmatpush.msra.mxu3 %v1125_v5  ;;  %v1190_v4 = vld [vmem:[%s5853_s6 + $0x1b88] sm:$0xff]  ;;  %v2456_v5 = vld.sshfl [vmem:[#allocation1 + $0x20] sm:$0xff pattern:$0x73625140] }
 0x20c   : > { %3674 = vmatmul.f32.vlgmr.msra.gmra.mxu1 %v2453_v6  ;;  %3714 = vmatmul.f32.vlgmr.msra.gmra.mxu3 %v2455_v7  ;;  %v2458_v6 = vld.sshfl [vmem:[#allocation1 + $0x30] sm:$0xff pattern:$0x73625140]  ;;  %v1220_v7 = vld [vmem:[%s5853_s6 + $0x1c78] sm:$0xff] }
 0x20d   : > { %3719 = vmatpush.msrb.mxu0 %v1155_v8  ;;  %3738 = vmatpush.msrb.mxu1 %v1172_v9  ;;  %v1252_v8 = vld [vmem:[%s5853_s6 + $0x1d78] sm:$0xff]  ;;  %v1157_v9 = vld [vmem:[%s5853_s6 + $0x1a80] sm:$0xff] }
 0x20e   : > { %3759 = vmatpush.msrb.mxu2 %v1187_v10  ;;  %3778 = vmatpush.msrb.mxu3 %v1204_v11  ;;  %v1189_v10 = vld [vmem:[%s5853_s6 + $0x1b80] sm:$0xff]  ;;  %v2457_v11 = vld.sshfl [vmem:[#allocation1 + $0x28] sm:$0xff pattern:$0x73625140] }
 0x20f   : > { %3720 = vmatpush.msrb.mxu0 %v1154_v12  ;;  %3739 = vmatpush.msrb.mxu1 %v1171_v13  ;;  %v2459_v12 = vld.sshfl [vmem:[#allocation1 + $0x38] sm:$0xff pattern:$0x73625140]  ;;  %v1219_v13 = vld [vmem:[%s5853_s6 + $0x1c70] sm:$0xff] }
 0x210   : > { %3760 = vmatpush.msrb.mxu2 %v1186_v14  ;;  %3779 = vmatpush.msrb.mxu3 %v1203_v15  ;;  %v1236_v14 = vld [vmem:[%s5853_s6 + $0x1cf8] sm:$0xff]  ;;  %v1251_v15 = vld [vmem:[%s5853_s6 + $0x1d70] sm:$0xff] }
 0x211   : > { %3721 = vmatpush.msrb.mxu0 %v1153_v16  ;;  %3740 = vmatpush.msrb.mxu1 %v1170_v17  ;;  %v1268_v16 = vld [vmem:[%s5853_s6 + $0x1df8] sm:$0xff]  ;;  %v1218_v17 = vld [vmem:[%s5853_s6 + $0x1c68] sm:$0xff] }
 0x212   : > { %3761 = vmatpush.msrb.mxu2 %v1185_v18  ;;  %3780 = vmatpush.msrb.mxu3 %v1202_v19  ;;  %v1235_v18 = vld [vmem:[%s5853_s6 + $0x1cf0] sm:$0xff]  ;;  %v1250_v19 = vld [vmem:[%s5853_s6 + $0x1d68] sm:$0xff] }
 0x213   : > { %3722 = vmatpush.msrb.mxu0 %v1152_v20  ;;  %3741 = vmatpush.msrb.mxu1 %v1169_v21  ;;  %v1267_v20 = vld [vmem:[%s5853_s6 + $0x1df0] sm:$0xff]  ;;  %v1217_v21 = vld [vmem:[%s5853_s6 + $0x1c60] sm:$0xff] }
 0x214   : > { %3762 = vmatpush.msrb.mxu2 %v1184_v22  ;;  %3781 = vmatpush.msrb.mxu3 %v1201_v23  ;;  %v1234_v22 = vld [vmem:[%s5853_s6 + $0x1ce8] sm:$0xff]  ;;  %v1249_v23 = vld [vmem:[%s5853_s6 + $0x1d60] sm:$0xff] }
 0x215   : > { %3723 = vmatpush.msrb.mxu0 %v1151_v24  ;;  %3742 = vmatpush.msrb.mxu1 %v1168_v25  ;;  %v1266_v24 = vld [vmem:[%s5853_s6 + $0x1de8] sm:$0xff]  ;;  %v1216_v25 = vld [vmem:[%s5853_s6 + $0x1c58] sm:$0xff] }
 0x216   : > { %3763 = vmatpush.msrb.mxu2 %v1183_v26  ;;  %3782 = vmatpush.msrb.mxu3 %v1200_v27  ;;  %v1233_v26 = vld [vmem:[%s5853_s6 + $0x1ce0] sm:$0xff]  ;;  %v1248_v27 = vld [vmem:[%s5853_s6 + $0x1d58] sm:$0xff] }
 0x217   : > { %3724 = vmatpush.msrb.mxu0 %v1150_v28  ;;  %3743 = vmatpush.msrb.mxu1 %v1167_v29  ;;  %v1265_v28 = vld [vmem:[%s5853_s6 + $0x1de0] sm:$0xff]  ;;  %v1215_v29 = vld [vmem:[%s5853_s6 + $0x1c50] sm:$0xff] }
 0x218   : > { %3764 = vmatpush.msrb.mxu2 %v1182_v30  ;;  %3783 = vmatpush.msrb.mxu3 %v1199_v31  ;;  %v1232_v30 = vld [vmem:[%s5853_s6 + $0x1cd8] sm:$0xff]  ;;  %v1247_v31 = vld [vmem:[%s5853_s6 + $0x1d50] sm:$0xff] }
 0x219   : > { %3725 = vmatpush.msrb.mxu0 %v1149_v32  ;;  %3744 = vmatpush.msrb.mxu1 %v1166_v33  ;;  %v1264_v32 = vld [vmem:[%s5853_s6 + $0x1dd8] sm:$0xff]  ;;  %v1214_v33 = vld [vmem:[%s5853_s6 + $0x1c48] sm:$0xff] }
 0x21a   : > { %3765 = vmatpush.msrb.mxu2 %v1181_v34  ;;  %3784 = vmatpush.msrb.mxu3 %v1198_v35  ;;  %v1231_v34 = vld [vmem:[%s5853_s6 + $0x1cd0] sm:$0xff]  ;;  %v1246_v35 = vld [vmem:[%s5853_s6 + $0x1d48] sm:$0xff] }
 0x21b   : > { %3726 = vmatpush.msrb.mxu0 %v1148_v36  ;;  %3745 = vmatpush.msrb.mxu1 %v1165_v37  ;;  %v1263_v36 = vld [vmem:[%s5853_s6 + $0x1dd0] sm:$0xff]  ;;  %v1213_v37 = vld [vmem:[%s5853_s6 + $0x1c40] sm:$0xff] }
 0x21c   : > { %3766 = vmatpush.msrb.mxu2 %v1180_v38  ;;  %3785 = vmatpush.msrb.mxu3 %v1197_v39  ;;  %v1230_v38 = vld [vmem:[%s5853_s6 + $0x1cc8] sm:$0xff]  ;;  %v1245_v39 = vld [vmem:[%s5853_s6 + $0x1d40] sm:$0xff] }
 0x21d   : > { %3727 = vmatpush.msrb.mxu0 %v1147_v40  ;;  %3746 = vmatpush.msrb.mxu1 %v1164_v41  ;;  %v1262_v40 = vld [vmem:[%s5853_s6 + $0x1dc8] sm:$0xff]  ;;  %v1212_v41 = vld [vmem:[%s5853_s6 + $0x1c38] sm:$0xff] }
 0x21e   : > { %3767 = vmatpush.msrb.mxu2 %v1179_v42  ;;  %3786 = vmatpush.msrb.mxu3 %v1196_v43  ;;  %v1229_v42 = vld [vmem:[%s5853_s6 + $0x1cc0] sm:$0xff]  ;;  %v1244_v43 = vld [vmem:[%s5853_s6 + $0x1d38] sm:$0xff] }
 0x21f   : > { %3728 = vmatpush.msrb.mxu0 %v1146_v44  ;;  %3747 = vmatpush.msrb.mxu1 %v1163_v45  ;;  %v1261_v44 = vld [vmem:[%s5853_s6 + $0x1dc0] sm:$0xff]  ;;  %v1211_v45 = vld [vmem:[%s5853_s6 + $0x1c30] sm:$0xff] }
 0x220   : > { %3768 = vmatpush.msrb.mxu2 %v1178_v46  ;;  %3787 = vmatpush.msrb.mxu3 %v1195_v47  ;;  %v1228_v46 = vld [vmem:[%s5853_s6 + $0x1cb8] sm:$0xff]  ;;  %v1243_v47 = vld [vmem:[%s5853_s6 + $0x1d30] sm:$0xff] }
 0x221   : > { %3729 = vmatpush.msrb.mxu0 %v1145_v48  ;;  %3748 = vmatpush.msrb.mxu1 %v1162_v49  ;;  %v1260_v48 = vld [vmem:[%s5853_s6 + $0x1db8] sm:$0xff]  ;;  %v1210_v49 = vld [vmem:[%s5853_s6 + $0x1c28] sm:$0xff] }
 0x222   : > { %3769 = vmatpush.msrb.mxu2 %v1177_v50  ;;  %3788 = vmatpush.msrb.mxu3 %v1194_v51  ;;  %v1227_v50 = vld [vmem:[%s5853_s6 + $0x1cb0] sm:$0xff]  ;;  %v1242_v51 = vld [vmem:[%s5853_s6 + $0x1d28] sm:$0xff] }
 0x223   : > { %3730 = vmatpush.msrb.mxu0 %v1144_v52  ;;  %3749 = vmatpush.msrb.mxu1 %v1161_v53  ;;  %v1259_v52 = vld [vmem:[%s5853_s6 + $0x1db0] sm:$0xff]  ;;  %v1209_v53 = vld [vmem:[%s5853_s6 + $0x1c20] sm:$0xff] }
 0x224   : > { %3770 = vmatpush.msrb.mxu2 %v1176_v54  ;;  %3789 = vmatpush.msrb.mxu3 %v1193_v55  ;;  %v1226_v54 = vld [vmem:[%s5853_s6 + $0x1ca8] sm:$0xff]  ;;  %v1241_v55 = vld [vmem:[%s5853_s6 + $0x1d20] sm:$0xff] }
 0x225   : > { %3731 = vmatpush.msrb.mxu0 %v1143_v56  ;;  %3750 = vmatpush.msrb.mxu1 %v1160_v57  ;;  %v1258_v56 = vld [vmem:[%s5853_s6 + $0x1da8] sm:$0xff]  ;;  %v1208_v57 = vld [vmem:[%s5853_s6 + $0x1c18] sm:$0xff] }
 0x226   : > { %3771 = vmatpush.msrb.mxu2 %v1175_v58  ;;  %3790 = vmatpush.msrb.mxu3 %v1192_v59  ;;  %v1225_v58 = vld [vmem:[%s5853_s6 + $0x1ca0] sm:$0xff]  ;;  %v1240_v59 = vld [vmem:[%s5853_s6 + $0x1d18] sm:$0xff] }
 0x227   : > { %3732 = vmatpush.msrb.mxu0 %v1142_v60  ;;  %3751 = vmatpush.msrb.mxu1 %v1159_v61  ;;  %v1257_v60 = vld [vmem:[%s5853_s6 + $0x1da0] sm:$0xff]  ;;  %v1207_v61 = vld [vmem:[%s5853_s6 + $0x1c10] sm:$0xff] }
 0x228   : > { %3772 = vmatpush.msrb.mxu2 %v1174_v63  ;;  %3791 = vmatpush.msrb.mxu3 %v1191_v0  ;;  %v1239_v63 = vld [vmem:[%s5853_s6 + $0x1d10] sm:$0xff]  ;;  %v1256_v0 = vld [vmem:[%s5853_s6 + $0x1d98] sm:$0xff] }
 0x229   : > { %3733 = vmatpush.msrb.mxu0 %v1141_v1  ;;  %3752 = vmatpush.msrb.mxu1 %v1158_v2  ;;  %v1206_v1 = vld [vmem:[%s5853_s6 + $0x1c08] sm:$0xff]  ;;  %v1223_v2 = vld [vmem:[%s5853_s6 + $0x1c90] sm:$0xff] }
 0x22a   : > { %3773 = vmatpush.msrb.mxu2 %v1173_v3  ;;  %3792 = vmatpush.msrb.mxu3 %v1190_v4  ;;  %v292_v3 = vld [vmem:[%s5835_s8 + $0x78] sm:$0xff]  ;;  %v1238_v4 = vld [vmem:[%s5853_s6 + $0x1d08] sm:$0xff] }
 0x22b   : > { %3734 = vmatmul.f32.vlgmr.msrb.gmra.mxu0 %v2456_v5  ;;  %3774 = vmatmul.f32.vlgmr.msrb.gmra.mxu2 %v2458_v6  ;;  %v1255_v5 = vld [vmem:[%s5853_s6 + $0x1d90] sm:$0xff]  ;;  %2461 = vst [vmem:[#allocation1 + $0x20] ss:$4 sm:$0xff] %v292_v3  ;;  %v1205_v6 = vld [vmem:[%s5853_s6 + $0x1c00] sm:$0xff]  ;;  %v1288_v3 = vld [vmem:[%s5853_s6 + $0x1e98] sm:$0xff] }
 0x22c   : > { %3798 = vmatpush.msra.mxu0 %v1220_v7  ;;  %3838 = vmatpush.msra.mxu2 %v1252_v8  ;;  %v1222_v7 = vld [vmem:[%s5853_s6 + $0x1c88] sm:$0xff]  ;;  %v1237_v8 = vld [vmem:[%s5853_s6 + $0x1d00] sm:$0xff] }
 0x22d   : > { %3753 = vmatpush.msrb.mxu1 %v1157_v9  ;;  %3793 = vmatpush.msrb.mxu3 %v1189_v10  ;;  %v1254_v9 = vld [vmem:[%s5853_s6 + $0x1d88] sm:$0xff]  ;;  %v2462_v10 = vld.sshfl [vmem:[#allocation1] sm:$0xff pattern:$0x73625140] }
 0x22e   : > { %3754 = vmatmul.f32.vlgmr.msrb.gmra.mxu1 %v2457_v11  ;;  %3794 = vmatmul.f32.vlgmr.msrb.gmra.mxu3 %v2459_v12  ;;  %v2464_v11 = vld.sshfl [vmem:[#allocation1 + $0x10] sm:$0xff pattern:$0x73625140]  ;;  %v1284_v12 = vld [vmem:[%s5853_s6 + $0x1e78] sm:$0xff] }
 0x22f   : > { %3799 = vmatpush.msra.mxu0 %v1219_v13  ;;  %3818 = vmatpush.msra.mxu1 %v1236_v14  ;;  %v1316_v13 = vld [vmem:[%s5853_s6 + $0x1f78] sm:$0xff]  ;;  %v1221_v14 = vld [vmem:[%s5853_s6 + $0x1c80] sm:$0xff] }
 0x230   : > { %3839 = vmatpush.msra.mxu2 %v1251_v15  ;;  %3858 = vmatpush.msra.mxu3 %v1268_v16  ;;  %v1253_v15 = vld [vmem:[%s5853_s6 + $0x1d80] sm:$0xff]  ;;  %v2463_v16 = vld.sshfl [vmem:[#allocation1 + $0x8] sm:$0xff pattern:$0x73625140] }
 0x231   : > { %3800 = vmatpush.msra.mxu0 %v1218_v17  ;;  %3819 = vmatpush.msra.mxu1 %v1235_v18  ;;  %v2465_v17 = vld.sshfl [vmem:[#allocation1 + $0x18] sm:$0xff pattern:$0x73625140]  ;;  %v1283_v18 = vld [vmem:[%s5853_s6 + $0x1e70] sm:$0xff] }
 0x232   : > { %3840 = vmatpush.msra.mxu2 %v1250_v19  ;;  %3859 = vmatpush.msra.mxu3 %v1267_v20  ;;  %v1300_v19 = vld [vmem:[%s5853_s6 + $0x1ef8] sm:$0xff]  ;;  %v1315_v20 = vld [vmem:[%s5853_s6 + $0x1f70] sm:$0xff] }
 0x233   : > { %3801 = vmatpush.msra.mxu0 %v1217_v21  ;;  %3820 = vmatpush.msra.mxu1 %v1234_v22  ;;  %v1332_v21 = vld [vmem:[%s5853_s6 + $0x1ff8] sm:$0xff]  ;;  %v1282_v22 = vld [vmem:[%s5853_s6 + $0x1e68] sm:$0xff] }
 0x234   : > { %3841 = vmatpush.msra.mxu2 %v1249_v23  ;;  %3860 = vmatpush.msra.mxu3 %v1266_v24  ;;  %v1299_v23 = vld [vmem:[%s5853_s6 + $0x1ef0] sm:$0xff]  ;;  %v1314_v24 = vld [vmem:[%s5853_s6 + $0x1f68] sm:$0xff] }
 0x235   : > { %3802 = vmatpush.msra.mxu0 %v1216_v25  ;;  %3821 = vmatpush.msra.mxu1 %v1233_v26  ;;  %v1331_v25 = vld [vmem:[%s5853_s6 + $0x1ff0] sm:$0xff]  ;;  %v1281_v26 = vld [vmem:[%s5853_s6 + $0x1e60] sm:$0xff] }
 0x236   : > { %3842 = vmatpush.msra.mxu2 %v1248_v27  ;;  %3861 = vmatpush.msra.mxu3 %v1265_v28  ;;  %v1298_v27 = vld [vmem:[%s5853_s6 + $0x1ee8] sm:$0xff]  ;;  %v1313_v28 = vld [vmem:[%s5853_s6 + $0x1f60] sm:$0xff] }
 0x237   : > { %3803 = vmatpush.msra.mxu0 %v1215_v29  ;;  %3822 = vmatpush.msra.mxu1 %v1232_v30  ;;  %v1330_v29 = vld [vmem:[%s5853_s6 + $0x1fe8] sm:$0xff]  ;;  %v1280_v30 = vld [vmem:[%s5853_s6 + $0x1e58] sm:$0xff] }
 0x238   : > { %3843 = vmatpush.msra.mxu2 %v1247_v31  ;;  %3862 = vmatpush.msra.mxu3 %v1264_v32  ;;  %v1297_v31 = vld [vmem:[%s5853_s6 + $0x1ee0] sm:$0xff]  ;;  %v1312_v32 = vld [vmem:[%s5853_s6 + $0x1f58] sm:$0xff] }
 0x239   : > { %3804 = vmatpush.msra.mxu0 %v1214_v33  ;;  %3823 = vmatpush.msra.mxu1 %v1231_v34  ;;  %v1329_v33 = vld [vmem:[%s5853_s6 + $0x1fe0] sm:$0xff]  ;;  %v1279_v34 = vld [vmem:[%s5853_s6 + $0x1e50] sm:$0xff] }
 0x23a   : > { %3844 = vmatpush.msra.mxu2 %v1246_v35  ;;  %3863 = vmatpush.msra.mxu3 %v1263_v36  ;;  %v1296_v35 = vld [vmem:[%s5853_s6 + $0x1ed8] sm:$0xff]  ;;  %v1311_v36 = vld [vmem:[%s5853_s6 + $0x1f50] sm:$0xff] }
 0x23b   : > { %3805 = vmatpush.msra.mxu0 %v1213_v37  ;;  %3824 = vmatpush.msra.mxu1 %v1230_v38  ;;  %v1328_v37 = vld [vmem:[%s5853_s6 + $0x1fd8] sm:$0xff]  ;;  %v1278_v38 = vld [vmem:[%s5853_s6 + $0x1e48] sm:$0xff] }
 0x23c   : > { %3845 = vmatpush.msra.mxu2 %v1245_v39  ;;  %3864 = vmatpush.msra.mxu3 %v1262_v40  ;;  %v1295_v39 = vld [vmem:[%s5853_s6 + $0x1ed0] sm:$0xff]  ;;  %v1310_v40 = vld [vmem:[%s5853_s6 + $0x1f48] sm:$0xff] }
 0x23d   : > { %3806 = vmatpush.msra.mxu0 %v1212_v41  ;;  %3825 = vmatpush.msra.mxu1 %v1229_v42  ;;  %v1327_v41 = vld [vmem:[%s5853_s6 + $0x1fd0] sm:$0xff]  ;;  %v1277_v42 = vld [vmem:[%s5853_s6 + $0x1e40] sm:$0xff] }
 0x23e   : > { %3846 = vmatpush.msra.mxu2 %v1244_v43  ;;  %3865 = vmatpush.msra.mxu3 %v1261_v44  ;;  %v1294_v43 = vld [vmem:[%s5853_s6 + $0x1ec8] sm:$0xff]  ;;  %v1309_v44 = vld [vmem:[%s5853_s6 + $0x1f40] sm:$0xff] }
 0x23f   : > { %3807 = vmatpush.msra.mxu0 %v1211_v45  ;;  %3826 = vmatpush.msra.mxu1 %v1228_v46  ;;  %v1326_v45 = vld [vmem:[%s5853_s6 + $0x1fc8] sm:$0xff]  ;;  %v1276_v46 = vld [vmem:[%s5853_s6 + $0x1e38] sm:$0xff] }
 0x240   : > { %3847 = vmatpush.msra.mxu2 %v1243_v47  ;;  %3866 = vmatpush.msra.mxu3 %v1260_v48  ;;  %v1293_v47 = vld [vmem:[%s5853_s6 + $0x1ec0] sm:$0xff]  ;;  %v1308_v48 = vld [vmem:[%s5853_s6 + $0x1f38] sm:$0xff] }
 0x241   : > { %3808 = vmatpush.msra.mxu0 %v1210_v49  ;;  %3827 = vmatpush.msra.mxu1 %v1227_v50  ;;  %v1325_v49 = vld [vmem:[%s5853_s6 + $0x1fc0] sm:$0xff]  ;;  %v1275_v50 = vld [vmem:[%s5853_s6 + $0x1e30] sm:$0xff] }
 0x242   : > { %3848 = vmatpush.msra.mxu2 %v1242_v51  ;;  %3867 = vmatpush.msra.mxu3 %v1259_v52  ;;  %v1292_v51 = vld [vmem:[%s5853_s6 + $0x1eb8] sm:$0xff]  ;;  %v1307_v52 = vld [vmem:[%s5853_s6 + $0x1f30] sm:$0xff] }
 0x243   : > { %3809 = vmatpush.msra.mxu0 %v1209_v53  ;;  %3828 = vmatpush.msra.mxu1 %v1226_v54  ;;  %v1324_v53 = vld [vmem:[%s5853_s6 + $0x1fb8] sm:$0xff]  ;;  %v1274_v54 = vld [vmem:[%s5853_s6 + $0x1e28] sm:$0xff] }
 0x244   : > { %3849 = vmatpush.msra.mxu2 %v1241_v55  ;;  %3868 = vmatpush.msra.mxu3 %v1258_v56  ;;  %v1291_v55 = vld [vmem:[%s5853_s6 + $0x1eb0] sm:$0xff]  ;;  %v1306_v56 = vld [vmem:[%s5853_s6 + $0x1f28] sm:$0xff] }
 0x245   : > { %3810 = vmatpush.msra.mxu0 %v1208_v57  ;;  %3829 = vmatpush.msra.mxu1 %v1225_v58  ;;  %v1323_v57 = vld [vmem:[%s5853_s6 + $0x1fb0] sm:$0xff]  ;;  %v1273_v58 = vld [vmem:[%s5853_s6 + $0x1e20] sm:$0xff] }
 0x246   : > { %3850 = vmatpush.msra.mxu2 %v1240_v59  ;;  %3869 = vmatpush.msra.mxu3 %v1257_v60  ;;  %v1290_v59 = vld [vmem:[%s5853_s6 + $0x1ea8] sm:$0xff]  ;;  %v1305_v60 = vld [vmem:[%s5853_s6 + $0x1f20] sm:$0xff] }
 0x247   : > { %3811 = vmatpush.msra.mxu0 %v1207_v61  ;;  %3830 = vmatpush.msra.mxu1 %v1224_v62  ;;  %v1322_v61 = vld [vmem:[%s5853_s6 + $0x1fa8] sm:$0xff]  ;;  %v1272_v62 = vld [vmem:[%s5853_s6 + $0x1e18] sm:$0xff] }
 0x248   : > { %3851 = vmatpush.msra.mxu2 %v1239_v63  ;;  %3870 = vmatpush.msra.mxu3 %v1256_v0  ;;  %v1289_v63 = vld [vmem:[%s5853_s6 + $0x1ea0] sm:$0xff]  ;;  %v1304_v0 = vld [vmem:[%s5853_s6 + $0x1f18] sm:$0xff] }
 0x249   : > { %3812 = vmatpush.msra.mxu0 %v1206_v1  ;;  %3831 = vmatpush.msra.mxu1 %v1223_v2  ;;  %v1321_v1 = vld [vmem:[%s5853_s6 + $0x1fa0] sm:$0xff]  ;;  %v1271_v2 = vld [vmem:[%s5853_s6 + $0x1e10] sm:$0xff] }
 0x24a   : > { %3852 = vmatpush.msra.mxu2 %v1238_v4  ;;  %3871 = vmatpush.msra.mxu3 %v1255_v5  ;;  %v1303_v4 = vld [vmem:[%s5853_s6 + $0x1f10] sm:$0xff]  ;;  %v1320_v5 = vld [vmem:[%s5853_s6 + $0x1f98] sm:$0xff] }
 0x24b   : > { %3813 = vmatpush.msra.mxu0 %v1205_v6  ;;  %3832 = vmatpush.msra.mxu1 %v1222_v7  ;;  %v1270_v6 = vld [vmem:[%s5853_s6 + $0x1e08] sm:$0xff]  ;;  %v1287_v7 = vld [vmem:[%s5853_s6 + $0x1e90] sm:$0xff] }
 0x24c   : > { %3853 = vmatpush.msra.mxu2 %v1237_v8  ;;  %3872 = vmatpush.msra.mxu3 %v1254_v9  ;;  %v293_v8 = vld [vmem:[%s5835_s8 + $0x80] sm:$0xff] }
 0x24d   : > { %3814 = vmatmul.f32.vlgmr.msra.gmra.mxu0 %v2462_v10  ;;  %3854 = vmatmul.f32.vlgmr.msra.gmra.mxu2 %v2464_v11  ;;  %v1302_v9 = vld [vmem:[%s5853_s6 + $0x1f08] sm:$0xff]  ;;  %v1319_v10 = vld [vmem:[%s5853_s6 + $0x1f90] sm:$0xff]  ;;  %2470 = vst [vmem:[#allocation1] ss:$4 sm:$0xff] %v293_v8  ;;  %v1269_v11 = vld [vmem:[%s5853_s6 + $0x1e00] sm:$0xff] }
 0x24e   : > { %3878 = vmatpush.msrb.mxu0 %v1284_v12  ;;  %3918 = vmatpush.msrb.mxu2 %v1316_v13  ;;  %v1286_v12 = vld [vmem:[%s5853_s6 + $0x1e88] sm:$0xff]  ;;  %v1301_v13 = vld [vmem:[%s5853_s6 + $0x1f00] sm:$0xff]  ;;  %v1352_v8 = vld [vmem:[%s5853_s6 + $0x2098] sm:$0xff] }
 0x24f   : > { %3833 = vmatpush.msra.mxu1 %v1221_v14  ;;  %3873 = vmatpush.msra.mxu3 %v1253_v15  ;;  %v1318_v14 = vld [vmem:[%s5853_s6 + $0x1f88] sm:$0xff]  ;;  %v2466_v15 = vld.sshfl [vmem:[#allocation1 + $0x20] sm:$0xff pattern:$0x73625140] }
 0x250   : > { %3834 = vmatmul.f32.vlgmr.msra.gmra.mxu1 %v2463_v16  ;;  %3874 = vmatmul.f32.vlgmr.msra.gmra.mxu3 %v2465_v17  ;;  %v2468_v16 = vld.sshfl [vmem:[#allocation1 + $0x30] sm:$0xff pattern:$0x73625140]  ;;  %v1348_v17 = vld [vmem:[%s5853_s6 + $0x2078] sm:$0xff] }
 0x251   : > { %3879 = vmatpush.msrb.mxu0 %v1283_v18  ;;  %3898 = vmatpush.msrb.mxu1 %v1300_v19  ;;  %v1380_v18 = vld [vmem:[%s5853_s6 + $0x2178] sm:$0xff]  ;;  %v1285_v19 = vld [vmem:[%s5853_s6 + $0x1e80] sm:$0xff] }
 0x252   : > { %3919 = vmatpush.msrb.mxu2 %v1315_v20  ;;  %3938 = vmatpush.msrb.mxu3 %v1332_v21  ;;  %v1317_v20 = vld [vmem:[%s5853_s6 + $0x1f80] sm:$0xff]  ;;  %v2467_v21 = vld.sshfl [vmem:[#allocation1 + $0x28] sm:$0xff pattern:$0x73625140] }
 0x253   : > { %3880 = vmatpush.msrb.mxu0 %v1282_v22  ;;  %3899 = vmatpush.msrb.mxu1 %v1299_v23  ;;  %v2469_v22 = vld.sshfl [vmem:[#allocation1 + $0x38] sm:$0xff pattern:$0x73625140]  ;;  %v1347_v23 = vld [vmem:[%s5853_s6 + $0x2070] sm:$0xff] }
 0x254   : > { %3920 = vmatpush.msrb.mxu2 %v1314_v24  ;;  %3939 = vmatpush.msrb.mxu3 %v1331_v25  ;;  %v1364_v24 = vld [vmem:[%s5853_s6 + $0x20f8] sm:$0xff]  ;;  %v1379_v25 = vld [vmem:[%s5853_s6 + $0x2170] sm:$0xff] }
 0x255   : > { %3881 = vmatpush.msrb.mxu0 %v1281_v26  ;;  %3900 = vmatpush.msrb.mxu1 %v1298_v27  ;;  %v1396_v26 = vld [vmem:[%s5853_s6 + $0x21f8] sm:$0xff]  ;;  %v1346_v27 = vld [vmem:[%s5853_s6 + $0x2068] sm:$0xff] }
 0x256   : > { %3921 = vmatpush.msrb.mxu2 %v1313_v28  ;;  %3940 = vmatpush.msrb.mxu3 %v1330_v29  ;;  %v1363_v28 = vld [vmem:[%s5853_s6 + $0x20f0] sm:$0xff]  ;;  %v1378_v29 = vld [vmem:[%s5853_s6 + $0x2168] sm:$0xff] }
 0x257   : > { %3882 = vmatpush.msrb.mxu0 %v1280_v30  ;;  %3901 = vmatpush.msrb.mxu1 %v1297_v31  ;;  %v1395_v30 = vld [vmem:[%s5853_s6 + $0x21f0] sm:$0xff]  ;;  %v1345_v31 = vld [vmem:[%s5853_s6 + $0x2060] sm:$0xff] }
 0x258   : > { %3922 = vmatpush.msrb.mxu2 %v1312_v32  ;;  %3941 = vmatpush.msrb.mxu3 %v1329_v33  ;;  %v1362_v32 = vld [vmem:[%s5853_s6 + $0x20e8] sm:$0xff]  ;;  %v1377_v33 = vld [vmem:[%s5853_s6 + $0x2160] sm:$0xff] }
 0x259   : > { %3883 = vmatpush.msrb.mxu0 %v1279_v34  ;;  %3902 = vmatpush.msrb.mxu1 %v1296_v35  ;;  %v1394_v34 = vld [vmem:[%s5853_s6 + $0x21e8] sm:$0xff]  ;;  %v1344_v35 = vld [vmem:[%s5853_s6 + $0x2058] sm:$0xff] }
 0x25a   : > { %3923 = vmatpush.msrb.mxu2 %v1311_v36  ;;  %3942 = vmatpush.msrb.mxu3 %v1328_v37  ;;  %v1361_v36 = vld [vmem:[%s5853_s6 + $0x20e0] sm:$0xff]  ;;  %v1376_v37 = vld [vmem:[%s5853_s6 + $0x2158] sm:$0xff] }
 0x25b   : > { %3884 = vmatpush.msrb.mxu0 %v1278_v38  ;;  %3903 = vmatpush.msrb.mxu1 %v1295_v39  ;;  %v1393_v38 = vld [vmem:[%s5853_s6 + $0x21e0] sm:$0xff]  ;;  %v1343_v39 = vld [vmem:[%s5853_s6 + $0x2050] sm:$0xff] }
 0x25c   : > { %3924 = vmatpush.msrb.mxu2 %v1310_v40  ;;  %3943 = vmatpush.msrb.mxu3 %v1327_v41  ;;  %v1360_v40 = vld [vmem:[%s5853_s6 + $0x20d8] sm:$0xff]  ;;  %v1375_v41 = vld [vmem:[%s5853_s6 + $0x2150] sm:$0xff] }
 0x25d   : > { %3885 = vmatpush.msrb.mxu0 %v1277_v42  ;;  %3904 = vmatpush.msrb.mxu1 %v1294_v43  ;;  %v1392_v42 = vld [vmem:[%s5853_s6 + $0x21d8] sm:$0xff]  ;;  %v1342_v43 = vld [vmem:[%s5853_s6 + $0x2048] sm:$0xff] }
 0x25e   : > { %3925 = vmatpush.msrb.mxu2 %v1309_v44  ;;  %3944 = vmatpush.msrb.mxu3 %v1326_v45  ;;  %v1359_v44 = vld [vmem:[%s5853_s6 + $0x20d0] sm:$0xff]  ;;  %v1374_v45 = vld [vmem:[%s5853_s6 + $0x2148] sm:$0xff] }
 0x25f   : > { %3886 = vmatpush.msrb.mxu0 %v1276_v46  ;;  %3905 = vmatpush.msrb.mxu1 %v1293_v47  ;;  %v1391_v46 = vld [vmem:[%s5853_s6 + $0x21d0] sm:$0xff]  ;;  %v1341_v47 = vld [vmem:[%s5853_s6 + $0x2040] sm:$0xff] }
 0x260   : > { %3926 = vmatpush.msrb.mxu2 %v1308_v48  ;;  %3945 = vmatpush.msrb.mxu3 %v1325_v49  ;;  %v1358_v48 = vld [vmem:[%s5853_s6 + $0x20c8] sm:$0xff]  ;;  %v1373_v49 = vld [vmem:[%s5853_s6 + $0x2140] sm:$0xff] }
 0x261   : > { %3887 = vmatpush.msrb.mxu0 %v1275_v50  ;;  %3906 = vmatpush.msrb.mxu1 %v1292_v51  ;;  %v1390_v50 = vld [vmem:[%s5853_s6 + $0x21c8] sm:$0xff]  ;;  %v1340_v51 = vld [vmem:[%s5853_s6 + $0x2038] sm:$0xff] }
 0x262   : > { %3927 = vmatpush.msrb.mxu2 %v1307_v52  ;;  %3946 = vmatpush.msrb.mxu3 %v1324_v53  ;;  %v1357_v52 = vld [vmem:[%s5853_s6 + $0x20c0] sm:$0xff]  ;;  %v1372_v53 = vld [vmem:[%s5853_s6 + $0x2138] sm:$0xff] }
 0x263   : > { %3888 = vmatpush.msrb.mxu0 %v1274_v54  ;;  %3907 = vmatpush.msrb.mxu1 %v1291_v55  ;;  %v1389_v54 = vld [vmem:[%s5853_s6 + $0x21c0] sm:$0xff]  ;;  %v1339_v55 = vld [vmem:[%s5853_s6 + $0x2030] sm:$0xff] }
 0x264   : > { %3928 = vmatpush.msrb.mxu2 %v1306_v56  ;;  %3947 = vmatpush.msrb.mxu3 %v1323_v57  ;;  %v1356_v56 = vld [vmem:[%s5853_s6 + $0x20b8] sm:$0xff]  ;;  %v1371_v57 = vld [vmem:[%s5853_s6 + $0x2130] sm:$0xff] }
 0x265   : > { %3889 = vmatpush.msrb.mxu0 %v1273_v58  ;;  %3908 = vmatpush.msrb.mxu1 %v1290_v59  ;;  %v1388_v58 = vld [vmem:[%s5853_s6 + $0x21b8] sm:$0xff]  ;;  %v1338_v59 = vld [vmem:[%s5853_s6 + $0x2028] sm:$0xff] }
 0x266   : > { %3929 = vmatpush.msrb.mxu2 %v1305_v60  ;;  %3948 = vmatpush.msrb.mxu3 %v1322_v61  ;;  %v1355_v60 = vld [vmem:[%s5853_s6 + $0x20b0] sm:$0xff]  ;;  %v1370_v61 = vld [vmem:[%s5853_s6 + $0x2128] sm:$0xff] }
 0x267   : > { %3890 = vmatpush.msrb.mxu0 %v1272_v62  ;;  %3909 = vmatpush.msrb.mxu1 %v1289_v63  ;;  %v1387_v62 = vld [vmem:[%s5853_s6 + $0x21b0] sm:$0xff]  ;;  %v1337_v63 = vld [vmem:[%s5853_s6 + $0x2020] sm:$0xff] }
 0x268   : > { %3930 = vmatpush.msrb.mxu2 %v1304_v0  ;;  %3949 = vmatpush.msrb.mxu3 %v1321_v1  ;;  %v1354_v0 = vld [vmem:[%s5853_s6 + $0x20a8] sm:$0xff]  ;;  %v1369_v1 = vld [vmem:[%s5853_s6 + $0x2120] sm:$0xff] }
 0x269   : > { %3891 = vmatpush.msrb.mxu0 %v1271_v2  ;;  %3910 = vmatpush.msrb.mxu1 %v1288_v3  ;;  %v1386_v2 = vld [vmem:[%s5853_s6 + $0x21a8] sm:$0xff]  ;;  %v1336_v3 = vld [vmem:[%s5853_s6 + $0x2018] sm:$0xff] }
 0x26a   : > { %3931 = vmatpush.msrb.mxu2 %v1303_v4  ;;  %3950 = vmatpush.msrb.mxu3 %v1320_v5  ;;  %v1353_v4 = vld [vmem:[%s5853_s6 + $0x20a0] sm:$0xff]  ;;  %v1368_v5 = vld [vmem:[%s5853_s6 + $0x2118] sm:$0xff] }
 0x26b   : > { %3892 = vmatpush.msrb.mxu0 %v1270_v6  ;;  %3911 = vmatpush.msrb.mxu1 %v1287_v7  ;;  %v1385_v6 = vld [vmem:[%s5853_s6 + $0x21a0] sm:$0xff]  ;;  %v1335_v7 = vld [vmem:[%s5853_s6 + $0x2010] sm:$0xff] }
 0x26c   : > { %3932 = vmatpush.msrb.mxu2 %v1302_v9  ;;  %3951 = vmatpush.msrb.mxu3 %v1319_v10  ;;  %v1367_v9 = vld [vmem:[%s5853_s6 + $0x2110] sm:$0xff]  ;;  %v1384_v10 = vld [vmem:[%s5853_s6 + $0x2198] sm:$0xff] }
 0x26d   : > { %3893 = vmatpush.msrb.mxu0 %v1269_v11  ;;  %3912 = vmatpush.msrb.mxu1 %v1286_v12  ;;  %v1334_v11 = vld [vmem:[%s5853_s6 + $0x2008] sm:$0xff]  ;;  %v1351_v12 = vld [vmem:[%s5853_s6 + $0x2090] sm:$0xff] }
 0x26e   : > { %3933 = vmatpush.msrb.mxu2 %v1301_v13  ;;  %3952 = vmatpush.msrb.mxu3 %v1318_v14  ;;  %v294_v13 = vld [vmem:[%s5835_s8 + $0x88] sm:$0xff]  ;;  %v1366_v14 = vld [vmem:[%s5853_s6 + $0x2108] sm:$0xff] }
 0x26f   : > { %3894 = vmatmul.f32.vlgmr.msrb.gmra.mxu0 %v2466_v15  ;;  %3934 = vmatmul.f32.vlgmr.msrb.gmra.mxu2 %v2468_v16  ;;  %v1383_v15 = vld [vmem:[%s5853_s6 + $0x2190] sm:$0xff]  ;;  %2471 = vst [vmem:[#allocation1 + $0x20] ss:$4 sm:$0xff] %v294_v13  ;;  %v1333_v16 = vld [vmem:[%s5853_s6 + $0x2000] sm:$0xff]  ;;  %v1416_v13 = vld [vmem:[%s5853_s6 + $0x2298] sm:$0xff] }
 0x270   : > { %3958 = vmatpush.msra.mxu0 %v1348_v17  ;;  %3998 = vmatpush.msra.mxu2 %v1380_v18  ;;  %v1350_v17 = vld [vmem:[%s5853_s6 + $0x2088] sm:$0xff]  ;;  %v1365_v18 = vld [vmem:[%s5853_s6 + $0x2100] sm:$0xff] }
 0x271   : > { %3913 = vmatpush.msrb.mxu1 %v1285_v19  ;;  %3953 = vmatpush.msrb.mxu3 %v1317_v20  ;;  %v1382_v19 = vld [vmem:[%s5853_s6 + $0x2188] sm:$0xff]  ;;  %v2472_v20 = vld.sshfl [vmem:[#allocation1] sm:$0xff pattern:$0x73625140] }
 0x272   : > { %3914 = vmatmul.f32.vlgmr.msrb.gmra.mxu1 %v2467_v21  ;;  %3954 = vmatmul.f32.vlgmr.msrb.gmra.mxu3 %v2469_v22  ;;  %v2474_v21 = vld.sshfl [vmem:[#allocation1 + $0x10] sm:$0xff pattern:$0x73625140]  ;;  %v1412_v22 = vld [vmem:[%s5853_s6 + $0x2278] sm:$0xff] }
 0x273   : > { %3959 = vmatpush.msra.mxu0 %v1347_v23  ;;  %3978 = vmatpush.msra.mxu1 %v1364_v24  ;;  %v1444_v23 = vld [vmem:[%s5853_s6 + $0x2378] sm:$0xff]  ;;  %v1349_v24 = vld [vmem:[%s5853_s6 + $0x2080] sm:$0xff] }
 0x274   : > { %3999 = vmatpush.msra.mxu2 %v1379_v25  ;;  %4018 = vmatpush.msra.mxu3 %v1396_v26  ;;  %v1381_v25 = vld [vmem:[%s5853_s6 + $0x2180] sm:$0xff]  ;;  %v2473_v26 = vld.sshfl [vmem:[#allocation1 + $0x8] sm:$0xff pattern:$0x73625140] }
 0x275   : > { %3960 = vmatpush.msra.mxu0 %v1346_v27  ;;  %3979 = vmatpush.msra.mxu1 %v1363_v28  ;;  %v2475_v27 = vld.sshfl [vmem:[#allocation1 + $0x18] sm:$0xff pattern:$0x73625140]  ;;  %v1411_v28 = vld [vmem:[%s5853_s6 + $0x2270] sm:$0xff] }
 0x276   : > { %4000 = vmatpush.msra.mxu2 %v1378_v29  ;;  %4019 = vmatpush.msra.mxu3 %v1395_v30  ;;  %v1428_v29 = vld [vmem:[%s5853_s6 + $0x22f8] sm:$0xff]  ;;  %v1443_v30 = vld [vmem:[%s5853_s6 + $0x2370] sm:$0xff] }
 0x277   : > { %3961 = vmatpush.msra.mxu0 %v1345_v31  ;;  %3980 = vmatpush.msra.mxu1 %v1362_v32  ;;  %v1460_v31 = vld [vmem:[%s5853_s6 + $0x23f8] sm:$0xff]  ;;  %v1410_v32 = vld [vmem:[%s5853_s6 + $0x2268] sm:$0xff] }
 0x278   : > { %4001 = vmatpush.msra.mxu2 %v1377_v33  ;;  %4020 = vmatpush.msra.mxu3 %v1394_v34  ;;  %v1427_v33 = vld [vmem:[%s5853_s6 + $0x22f0] sm:$0xff]  ;;  %v1442_v34 = vld [vmem:[%s5853_s6 + $0x2368] sm:$0xff] }
 0x279   : > { %3962 = vmatpush.msra.mxu0 %v1344_v35  ;;  %3981 = vmatpush.msra.mxu1 %v1361_v36  ;;  %v1459_v35 = vld [vmem:[%s5853_s6 + $0x23f0] sm:$0xff]  ;;  %v1409_v36 = vld [vmem:[%s5853_s6 + $0x2260] sm:$0xff] }
 0x27a   : > { %4002 = vmatpush.msra.mxu2 %v1376_v37  ;;  %4021 = vmatpush.msra.mxu3 %v1393_v38  ;;  %v1426_v37 = vld [vmem:[%s5853_s6 + $0x22e8] sm:$0xff]  ;;  %v1441_v38 = vld [vmem:[%s5853_s6 + $0x2360] sm:$0xff] }
 0x27b   : > { %3963 = vmatpush.msra.mxu0 %v1343_v39  ;;  %3982 = vmatpush.msra.mxu1 %v1360_v40  ;;  %v1458_v39 = vld [vmem:[%s5853_s6 + $0x23e8] sm:$0xff]  ;;  %v1408_v40 = vld [vmem:[%s5853_s6 + $0x2258] sm:$0xff] }
 0x27c   : > { %4003 = vmatpush.msra.mxu2 %v1375_v41  ;;  %4022 = vmatpush.msra.mxu3 %v1392_v42  ;;  %v1425_v41 = vld [vmem:[%s5853_s6 + $0x22e0] sm:$0xff]  ;;  %v1440_v42 = vld [vmem:[%s5853_s6 + $0x2358] sm:$0xff] }
 0x27d   : > { %3964 = vmatpush.msra.mxu0 %v1342_v43  ;;  %3983 = vmatpush.msra.mxu1 %v1359_v44  ;;  %v1457_v43 = vld [vmem:[%s5853_s6 + $0x23e0] sm:$0xff]  ;;  %v1407_v44 = vld [vmem:[%s5853_s6 + $0x2250] sm:$0xff] }
 0x27e   : > { %4004 = vmatpush.msra.mxu2 %v1374_v45  ;;  %4023 = vmatpush.msra.mxu3 %v1391_v46  ;;  %v1424_v45 = vld [vmem:[%s5853_s6 + $0x22d8] sm:$0xff]  ;;  %v1439_v46 = vld [vmem:[%s5853_s6 + $0x2350] sm:$0xff] }
 0x27f   : > { %3965 = vmatpush.msra.mxu0 %v1341_v47  ;;  %3984 = vmatpush.msra.mxu1 %v1358_v48  ;;  %v1456_v47 = vld [vmem:[%s5853_s6 + $0x23d8] sm:$0xff]  ;;  %v1406_v48 = vld [vmem:[%s5853_s6 + $0x2248] sm:$0xff] }
 0x280   : > { %4005 = vmatpush.msra.mxu2 %v1373_v49  ;;  %4024 = vmatpush.msra.mxu3 %v1390_v50  ;;  %v1423_v49 = vld [vmem:[%s5853_s6 + $0x22d0] sm:$0xff]  ;;  %v1438_v50 = vld [vmem:[%s5853_s6 + $0x2348] sm:$0xff] }
 0x281   : > { %3966 = vmatpush.msra.mxu0 %v1340_v51  ;;  %3985 = vmatpush.msra.mxu1 %v1357_v52  ;;  %v1455_v51 = vld [vmem:[%s5853_s6 + $0x23d0] sm:$0xff]  ;;  %v1405_v52 = vld [vmem:[%s5853_s6 + $0x2240] sm:$0xff] }
 0x282   : > { %4006 = vmatpush.msra.mxu2 %v1372_v53  ;;  %4025 = vmatpush.msra.mxu3 %v1389_v54  ;;  %v1422_v53 = vld [vmem:[%s5853_s6 + $0x22c8] sm:$0xff]  ;;  %v1437_v54 = vld [vmem:[%s5853_s6 + $0x2340] sm:$0xff] }
 0x283   : > { %3967 = vmatpush.msra.mxu0 %v1339_v55  ;;  %3986 = vmatpush.msra.mxu1 %v1356_v56  ;;  %v1454_v55 = vld [vmem:[%s5853_s6 + $0x23c8] sm:$0xff]  ;;  %v1404_v56 = vld [vmem:[%s5853_s6 + $0x2238] sm:$0xff] }
 0x284   : > { %4007 = vmatpush.msra.mxu2 %v1371_v57  ;;  %4026 = vmatpush.msra.mxu3 %v1388_v58  ;;  %v1421_v57 = vld [vmem:[%s5853_s6 + $0x22c0] sm:$0xff]  ;;  %v1436_v58 = vld [vmem:[%s5853_s6 + $0x2338] sm:$0xff] }
 0x285   : > { %3968 = vmatpush.msra.mxu0 %v1338_v59  ;;  %3987 = vmatpush.msra.mxu1 %v1355_v60  ;;  %v1453_v59 = vld [vmem:[%s5853_s6 + $0x23c0] sm:$0xff]  ;;  %v1403_v60 = vld [vmem:[%s5853_s6 + $0x2230] sm:$0xff] }
 0x286   : > { %4008 = vmatpush.msra.mxu2 %v1370_v61  ;;  %4027 = vmatpush.msra.mxu3 %v1387_v62  ;;  %v1420_v61 = vld [vmem:[%s5853_s6 + $0x22b8] sm:$0xff]  ;;  %v1435_v62 = vld [vmem:[%s5853_s6 + $0x2330] sm:$0xff] }
 0x287   : > { %3969 = vmatpush.msra.mxu0 %v1337_v63  ;;  %3988 = vmatpush.msra.mxu1 %v1354_v0  ;;  %v1452_v63 = vld [vmem:[%s5853_s6 + $0x23b8] sm:$0xff]  ;;  %v1402_v0 = vld [vmem:[%s5853_s6 + $0x2228] sm:$0xff] }
 0x288   : > { %4009 = vmatpush.msra.mxu2 %v1369_v1  ;;  %4028 = vmatpush.msra.mxu3 %v1386_v2  ;;  %v1419_v1 = vld [vmem:[%s5853_s6 + $0x22b0] sm:$0xff]  ;;  %v1434_v2 = vld [vmem:[%s5853_s6 + $0x2328] sm:$0xff] }
 0x289   : > { %3970 = vmatpush.msra.mxu0 %v1336_v3  ;;  %3989 = vmatpush.msra.mxu1 %v1353_v4  ;;  %v1451_v3 = vld [vmem:[%s5853_s6 + $0x23b0] sm:$0xff]  ;;  %v1401_v4 = vld [vmem:[%s5853_s6 + $0x2220] sm:$0xff] }
 0x28a   : > { %4010 = vmatpush.msra.mxu2 %v1368_v5  ;;  %4029 = vmatpush.msra.mxu3 %v1385_v6  ;;  %v1418_v5 = vld [vmem:[%s5853_s6 + $0x22a8] sm:$0xff]  ;;  %v1433_v6 = vld [vmem:[%s5853_s6 + $0x2320] sm:$0xff] }
 0x28b   : > { %3971 = vmatpush.msra.mxu0 %v1335_v7  ;;  %3990 = vmatpush.msra.mxu1 %v1352_v8  ;;  %v1450_v7 = vld [vmem:[%s5853_s6 + $0x23a8] sm:$0xff]  ;;  %v1400_v8 = vld [vmem:[%s5853_s6 + $0x2218] sm:$0xff] }
 0x28c   : > { %4011 = vmatpush.msra.mxu2 %v1367_v9  ;;  %4030 = vmatpush.msra.mxu3 %v1384_v10  ;;  %v1417_v9 = vld [vmem:[%s5853_s6 + $0x22a0] sm:$0xff]  ;;  %v1432_v10 = vld [vmem:[%s5853_s6 + $0x2318] sm:$0xff] }
 0x28d   : > { %3972 = vmatpush.msra.mxu0 %v1334_v11  ;;  %3991 = vmatpush.msra.mxu1 %v1351_v12  ;;  %v1449_v11 = vld [vmem:[%s5853_s6 + $0x23a0] sm:$0xff]  ;;  %v1399_v12 = vld [vmem:[%s5853_s6 + $0x2210] sm:$0xff] }
 0x28e   : > { %4012 = vmatpush.msra.mxu2 %v1366_v14  ;;  %4031 = vmatpush.msra.mxu3 %v1383_v15  ;;  %v1431_v14 = vld [vmem:[%s5853_s6 + $0x2310] sm:$0xff]  ;;  %v1448_v15 = vld [vmem:[%s5853_s6 + $0x2398] sm:$0xff] }
 0x28f   : > { %3973 = vmatpush.msra.mxu0 %v1333_v16  ;;  %3992 = vmatpush.msra.mxu1 %v1350_v17  ;;  %v1398_v16 = vld [vmem:[%s5853_s6 + $0x2208] sm:$0xff]  ;;  %v1415_v17 = vld [vmem:[%s5853_s6 + $0x2290] sm:$0xff] }
 0x290   : > { %4013 = vmatpush.msra.mxu2 %v1365_v18  ;;  %4032 = vmatpush.msra.mxu3 %v1382_v19  ;;  %v295_v18 = vld [vmem:[%s5835_s8 + $0x90] sm:$0xff]  ;;  %v1430_v19 = vld [vmem:[%s5853_s6 + $0x2308] sm:$0xff] }
 0x291   : > { %3974 = vmatmul.f32.vlgmr.msra.gmra.mxu0 %v2472_v20  ;;  %4014 = vmatmul.f32.vlgmr.msra.gmra.mxu2 %v2474_v21  ;;  %v1447_v20 = vld [vmem:[%s5853_s6 + $0x2390] sm:$0xff]  ;;  %2480 = vst [vmem:[#allocation1] ss:$4 sm:$0xff] %v295_v18  ;;  %v1397_v21 = vld [vmem:[%s5853_s6 + $0x2200] sm:$0xff]  ;;  %v1480_v18 = vld [vmem:[%s5853_s6 + $0x2498] sm:$0xff] }
 0x292   : > { %4038 = vmatpush.msrb.mxu0 %v1412_v22  ;;  %4078 = vmatpush.msrb.mxu2 %v1444_v23  ;;  %v1414_v22 = vld [vmem:[%s5853_s6 + $0x2288] sm:$0xff]  ;;  %v1429_v23 = vld [vmem:[%s5853_s6 + $0x2300] sm:$0xff] }
 0x293   : > { %3993 = vmatpush.msra.mxu1 %v1349_v24  ;;  %4033 = vmatpush.msra.mxu3 %v1381_v25  ;;  %v1446_v24 = vld [vmem:[%s5853_s6 + $0x2388] sm:$0xff]  ;;  %v2476_v25 = vld.sshfl [vmem:[#allocation1 + $0x20] sm:$0xff pattern:$0x73625140] }
 0x294   : > { %3994 = vmatmul.f32.vlgmr.msra.gmra.mxu1 %v2473_v26  ;;  %4034 = vmatmul.f32.vlgmr.msra.gmra.mxu3 %v2475_v27  ;;  %v2478_v26 = vld.sshfl [vmem:[#allocation1 + $0x30] sm:$0xff pattern:$0x73625140]  ;;  %v1476_v27 = vld [vmem:[%s5853_s6 + $0x2478] sm:$0xff] }
 0x295   : > { %4039 = vmatpush.msrb.mxu0 %v1411_v28  ;;  %4058 = vmatpush.msrb.mxu1 %v1428_v29  ;;  %v1508_v28 = vld [vmem:[%s5853_s6 + $0x2578] sm:$0xff]  ;;  %v1413_v29 = vld [vmem:[%s5853_s6 + $0x2280] sm:$0xff] }
 0x296   : > { %4079 = vmatpush.msrb.mxu2 %v1443_v30  ;;  %4098 = vmatpush.msrb.mxu3 %v1460_v31  ;;  %v1445_v30 = vld [vmem:[%s5853_s6 + $0x2380] sm:$0xff]  ;;  %v2477_v31 = vld.sshfl [vmem:[#allocation1 + $0x28] sm:$0xff pattern:$0x73625140] }
 0x297   : > { %4040 = vmatpush.msrb.mxu0 %v1410_v32  ;;  %4059 = vmatpush.msrb.mxu1 %v1427_v33  ;;  %v2479_v32 = vld.sshfl [vmem:[#allocation1 + $0x38] sm:$0xff pattern:$0x73625140]  ;;  %v1475_v33 = vld [vmem:[%s5853_s6 + $0x2470] sm:$0xff] }
 0x298   : > { %4080 = vmatpush.msrb.mxu2 %v1442_v34  ;;  %4099 = vmatpush.msrb.mxu3 %v1459_v35  ;;  %v1492_v34 = vld [vmem:[%s5853_s6 + $0x24f8] sm:$0xff]  ;;  %v1507_v35 = vld [vmem:[%s5853_s6 + $0x2570] sm:$0xff] }
 0x299   : > { %4041 = vmatpush.msrb.mxu0 %v1409_v36  ;;  %4060 = vmatpush.msrb.mxu1 %v1426_v37  ;;  %v1524_v36 = vld [vmem:[%s5853_s6 + $0x25f8] sm:$0xff]  ;;  %v1474_v37 = vld [vmem:[%s5853_s6 + $0x2468] sm:$0xff] }
 0x29a   : > { %4081 = vmatpush.msrb.mxu2 %v1441_v38  ;;  %4100 = vmatpush.msrb.mxu3 %v1458_v39  ;;  %v1491_v38 = vld [vmem:[%s5853_s6 + $0x24f0] sm:$0xff]  ;;  %v1506_v39 = vld [vmem:[%s5853_s6 + $0x2568] sm:$0xff] }
 0x29b   : > { %4042 = vmatpush.msrb.mxu0 %v1408_v40  ;;  %4061 = vmatpush.msrb.mxu1 %v1425_v41  ;;  %v1523_v40 = vld [vmem:[%s5853_s6 + $0x25f0] sm:$0xff]  ;;  %v1473_v41 = vld [vmem:[%s5853_s6 + $0x2460] sm:$0xff] }
 0x29c   : > { %4082 = vmatpush.msrb.mxu2 %v1440_v42  ;;  %4101 = vmatpush.msrb.mxu3 %v1457_v43  ;;  %v1490_v42 = vld [vmem:[%s5853_s6 + $0x24e8] sm:$0xff]  ;;  %v1505_v43 = vld [vmem:[%s5853_s6 + $0x2560] sm:$0xff] }
 0x29d   : > { %4043 = vmatpush.msrb.mxu0 %v1407_v44  ;;  %4062 = vmatpush.msrb.mxu1 %v1424_v45  ;;  %v1522_v44 = vld [vmem:[%s5853_s6 + $0x25e8] sm:$0xff]  ;;  %v1472_v45 = vld [vmem:[%s5853_s6 + $0x2458] sm:$0xff] }
 0x29e   : > { %4083 = vmatpush.msrb.mxu2 %v1439_v46  ;;  %4102 = vmatpush.msrb.mxu3 %v1456_v47  ;;  %v1489_v46 = vld [vmem:[%s5853_s6 + $0x24e0] sm:$0xff]  ;;  %v1504_v47 = vld [vmem:[%s5853_s6 + $0x2558] sm:$0xff] }
 0x29f   : > { %4044 = vmatpush.msrb.mxu0 %v1406_v48  ;;  %4063 = vmatpush.msrb.mxu1 %v1423_v49  ;;  %v1521_v48 = vld [vmem:[%s5853_s6 + $0x25e0] sm:$0xff]  ;;  %v1471_v49 = vld [vmem:[%s5853_s6 + $0x2450] sm:$0xff] }
 0x2a0   : > { %4084 = vmatpush.msrb.mxu2 %v1438_v50  ;;  %4103 = vmatpush.msrb.mxu3 %v1455_v51  ;;  %v1488_v50 = vld [vmem:[%s5853_s6 + $0x24d8] sm:$0xff]  ;;  %v1503_v51 = vld [vmem:[%s5853_s6 + $0x2550] sm:$0xff] }
 0x2a1   : > { %4045 = vmatpush.msrb.mxu0 %v1405_v52  ;;  %4064 = vmatpush.msrb.mxu1 %v1422_v53  ;;  %v1520_v52 = vld [vmem:[%s5853_s6 + $0x25d8] sm:$0xff]  ;;  %v1470_v53 = vld [vmem:[%s5853_s6 + $0x2448] sm:$0xff] }
 0x2a2   : > { %4085 = vmatpush.msrb.mxu2 %v1437_v54  ;;  %4104 = vmatpush.msrb.mxu3 %v1454_v55  ;;  %v1487_v54 = vld [vmem:[%s5853_s6 + $0x24d0] sm:$0xff]  ;;  %v1502_v55 = vld [vmem:[%s5853_s6 + $0x2548] sm:$0xff] }
 0x2a3   : > { %4046 = vmatpush.msrb.mxu0 %v1404_v56  ;;  %4065 = vmatpush.msrb.mxu1 %v1421_v57  ;;  %v1519_v56 = vld [vmem:[%s5853_s6 + $0x25d0] sm:$0xff]  ;;  %v1469_v57 = vld [vmem:[%s5853_s6 + $0x2440] sm:$0xff] }
 0x2a4   : > { %4086 = vmatpush.msrb.mxu2 %v1436_v58  ;;  %4105 = vmatpush.msrb.mxu3 %v1453_v59  ;;  %v1486_v58 = vld [vmem:[%s5853_s6 + $0x24c8] sm:$0xff]  ;;  %v1501_v59 = vld [vmem:[%s5853_s6 + $0x2540] sm:$0xff] }
 0x2a5   : > { %4047 = vmatpush.msrb.mxu0 %v1403_v60  ;;  %4066 = vmatpush.msrb.mxu1 %v1420_v61  ;;  %v1518_v60 = vld [vmem:[%s5853_s6 + $0x25c8] sm:$0xff]  ;;  %v1468_v61 = vld [vmem:[%s5853_s6 + $0x2438] sm:$0xff] }
 0x2a6   : > { %4087 = vmatpush.msrb.mxu2 %v1435_v62  ;;  %4106 = vmatpush.msrb.mxu3 %v1452_v63  ;;  %v1485_v62 = vld [vmem:[%s5853_s6 + $0x24c0] sm:$0xff]  ;;  %v1500_v63 = vld [vmem:[%s5853_s6 + $0x2538] sm:$0xff] }
 0x2a7   : > { %4048 = vmatpush.msrb.mxu0 %v1402_v0  ;;  %4067 = vmatpush.msrb.mxu1 %v1419_v1  ;;  %v1517_v0 = vld [vmem:[%s5853_s6 + $0x25c0] sm:$0xff]  ;;  %v1467_v1 = vld [vmem:[%s5853_s6 + $0x2430] sm:$0xff] }
 0x2a8   : > { %4088 = vmatpush.msrb.mxu2 %v1434_v2  ;;  %4107 = vmatpush.msrb.mxu3 %v1451_v3  ;;  %v1484_v2 = vld [vmem:[%s5853_s6 + $0x24b8] sm:$0xff]  ;;  %v1499_v3 = vld [vmem:[%s5853_s6 + $0x2530] sm:$0xff] }
 0x2a9   : > { %4049 = vmatpush.msrb.mxu0 %v1401_v4  ;;  %4068 = vmatpush.msrb.mxu1 %v1418_v5  ;;  %v1516_v4 = vld [vmem:[%s5853_s6 + $0x25b8] sm:$0xff]  ;;  %v1466_v5 = vld [vmem:[%s5853_s6 + $0x2428] sm:$0xff] }
 0x2aa   : > { %4089 = vmatpush.msrb.mxu2 %v1433_v6  ;;  %4108 = vmatpush.msrb.mxu3 %v1450_v7  ;;  %v1483_v6 = vld [vmem:[%s5853_s6 + $0x24b0] sm:$0xff]  ;;  %v1498_v7 = vld [vmem:[%s5853_s6 + $0x2528] sm:$0xff] }
 0x2ab   : > { %4050 = vmatpush.msrb.mxu0 %v1400_v8  ;;  %4069 = vmatpush.msrb.mxu1 %v1417_v9  ;;  %v1515_v8 = vld [vmem:[%s5853_s6 + $0x25b0] sm:$0xff]  ;;  %v1465_v9 = vld [vmem:[%s5853_s6 + $0x2420] sm:$0xff] }
 0x2ac   : > { %4090 = vmatpush.msrb.mxu2 %v1432_v10  ;;  %4109 = vmatpush.msrb.mxu3 %v1449_v11  ;;  %v1482_v10 = vld [vmem:[%s5853_s6 + $0x24a8] sm:$0xff]  ;;  %v1497_v11 = vld [vmem:[%s5853_s6 + $0x2520] sm:$0xff] }
 0x2ad   : > { %4051 = vmatpush.msrb.mxu0 %v1399_v12  ;;  %4070 = vmatpush.msrb.mxu1 %v1416_v13  ;;  %v1514_v12 = vld [vmem:[%s5853_s6 + $0x25a8] sm:$0xff]  ;;  %v1464_v13 = vld [vmem:[%s5853_s6 + $0x2418] sm:$0xff] }
 0x2ae   : > { %4091 = vmatpush.msrb.mxu2 %v1431_v14  ;;  %4110 = vmatpush.msrb.mxu3 %v1448_v15  ;;  %v1481_v14 = vld [vmem:[%s5853_s6 + $0x24a0] sm:$0xff]  ;;  %v1496_v15 = vld [vmem:[%s5853_s6 + $0x2518] sm:$0xff] }
 0x2af   : > { %4052 = vmatpush.msrb.mxu0 %v1398_v16  ;;  %4071 = vmatpush.msrb.mxu1 %v1415_v17  ;;  %v1513_v16 = vld [vmem:[%s5853_s6 + $0x25a0] sm:$0xff]  ;;  %v1463_v17 = vld [vmem:[%s5853_s6 + $0x2410] sm:$0xff] }
 0x2b0   : > { %4092 = vmatpush.msrb.mxu2 %v1430_v19  ;;  %4111 = vmatpush.msrb.mxu3 %v1447_v20  ;;  %v1495_v19 = vld [vmem:[%s5853_s6 + $0x2510] sm:$0xff]  ;;  %v1512_v20 = vld [vmem:[%s5853_s6 + $0x2598] sm:$0xff] }
 0x2b1   : > { %4053 = vmatpush.msrb.mxu0 %v1397_v21  ;;  %4072 = vmatpush.msrb.mxu1 %v1414_v22  ;;  %v1462_v21 = vld [vmem:[%s5853_s6 + $0x2408] sm:$0xff]  ;;  %v1479_v22 = vld [vmem:[%s5853_s6 + $0x2490] sm:$0xff] }
 0x2b2   : > { %4093 = vmatpush.msrb.mxu2 %v1429_v23  ;;  %4112 = vmatpush.msrb.mxu3 %v1446_v24  ;;  %v296_v23 = vld [vmem:[%s5835_s8 + $0x98] sm:$0xff]  ;;  %v1494_v24 = vld [vmem:[%s5853_s6 + $0x2508] sm:$0xff] }
 0x2b3   : > { %4054 = vmatmul.f32.vlgmr.msrb.gmra.mxu0 %v2476_v25  ;;  %4094 = vmatmul.f32.vlgmr.msrb.gmra.mxu2 %v2478_v26  ;;  %v1511_v25 = vld [vmem:[%s5853_s6 + $0x2590] sm:$0xff]  ;;  %2481 = vst [vmem:[#allocation1 + $0x20] ss:$4 sm:$0xff] %v296_v23  ;;  %v1461_v26 = vld [vmem:[%s5853_s6 + $0x2400] sm:$0xff]  ;;  %v1544_v23 = vld [vmem:[%s5853_s6 + $0x2698] sm:$0xff] }
 0x2b4   : > { %4118 = vmatpush.msra.mxu0 %v1476_v27  ;;  %4158 = vmatpush.msra.mxu2 %v1508_v28  ;;  %v1478_v27 = vld [vmem:[%s5853_s6 + $0x2488] sm:$0xff]  ;;  %v1493_v28 = vld [vmem:[%s5853_s6 + $0x2500] sm:$0xff] }
 0x2b5   : > { %4073 = vmatpush.msrb.mxu1 %v1413_v29  ;;  %4113 = vmatpush.msrb.mxu3 %v1445_v30  ;;  %v1510_v29 = vld [vmem:[%s5853_s6 + $0x2588] sm:$0xff]  ;;  %v2482_v30 = vld.sshfl [vmem:[#allocation1] sm:$0xff pattern:$0x73625140] }
 0x2b6   : > { %4074 = vmatmul.f32.vlgmr.msrb.gmra.mxu1 %v2477_v31  ;;  %4114 = vmatmul.f32.vlgmr.msrb.gmra.mxu3 %v2479_v32  ;;  %v2484_v31 = vld.sshfl [vmem:[#allocation1 + $0x10] sm:$0xff pattern:$0x73625140]  ;;  %v1540_v32 = vld [vmem:[%s5853_s6 + $0x2678] sm:$0xff] }
 0x2b7   : > { %4119 = vmatpush.msra.mxu0 %v1475_v33  ;;  %4138 = vmatpush.msra.mxu1 %v1492_v34  ;;  %v1572_v33 = vld [vmem:[%s5853_s6 + $0x2778] sm:$0xff]  ;;  %v1477_v34 = vld [vmem:[%s5853_s6 + $0x2480] sm:$0xff] }
 0x2b8   : > { %4159 = vmatpush.msra.mxu2 %v1507_v35  ;;  %4178 = vmatpush.msra.mxu3 %v1524_v36  ;;  %v1509_v35 = vld [vmem:[%s5853_s6 + $0x2580] sm:$0xff]  ;;  %v2483_v36 = vld.sshfl [vmem:[#allocation1 + $0x8] sm:$0xff pattern:$0x73625140] }
 0x2b9   : > { %4120 = vmatpush.msra.mxu0 %v1474_v37  ;;  %4139 = vmatpush.msra.mxu1 %v1491_v38  ;;  %v2485_v37 = vld.sshfl [vmem:[#allocation1 + $0x18] sm:$0xff pattern:$0x73625140]  ;;  %v1539_v38 = vld [vmem:[%s5853_s6 + $0x2670] sm:$0xff] }
 0x2ba   : > { %4160 = vmatpush.msra.mxu2 %v1506_v39  ;;  %4179 = vmatpush.msra.mxu3 %v1523_v40  ;;  %v1556_v39 = vld [vmem:[%s5853_s6 + $0x26f8] sm:$0xff]  ;;  %v1571_v40 = vld [vmem:[%s5853_s6 + $0x2770] sm:$0xff] }
 0x2bb   : > { %4121 = vmatpush.msra.mxu0 %v1473_v41  ;;  %4140 = vmatpush.msra.mxu1 %v1490_v42  ;;  %v1588_v41 = vld [vmem:[%s5853_s6 + $0x27f8] sm:$0xff]  ;;  %v1538_v42 = vld [vmem:[%s5853_s6 + $0x2668] sm:$0xff] }
 0x2bc   : > { %4161 = vmatpush.msra.mxu2 %v1505_v43  ;;  %4180 = vmatpush.msra.mxu3 %v1522_v44  ;;  %v1555_v43 = vld [vmem:[%s5853_s6 + $0x26f0] sm:$0xff]  ;;  %v1570_v44 = vld [vmem:[%s5853_s6 + $0x2768] sm:$0xff] }
 0x2bd   : > { %4122 = vmatpush.msra.mxu0 %v1472_v45  ;;  %4141 = vmatpush.msra.mxu1 %v1489_v46  ;;  %v1587_v45 = vld [vmem:[%s5853_s6 + $0x27f0] sm:$0xff]  ;;  %v1537_v46 = vld [vmem:[%s5853_s6 + $0x2660] sm:$0xff] }
 0x2be   : > { %4162 = vmatpush.msra.mxu2 %v1504_v47  ;;  %4181 = vmatpush.msra.mxu3 %v1521_v48  ;;  %v1554_v47 = vld [vmem:[%s5853_s6 + $0x26e8] sm:$0xff]  ;;  %v1569_v48 = vld [vmem:[%s5853_s6 + $0x2760] sm:$0xff] }
 0x2bf   : > { %4123 = vmatpush.msra.mxu0 %v1471_v49  ;;  %4142 = vmatpush.msra.mxu1 %v1488_v50  ;;  %v1586_v49 = vld [vmem:[%s5853_s6 + $0x27e8] sm:$0xff]  ;;  %v1536_v50 = vld [vmem:[%s5853_s6 + $0x2658] sm:$0xff] }
 0x2c0   : > { %4163 = vmatpush.msra.mxu2 %v1503_v51  ;;  %4182 = vmatpush.msra.mxu3 %v1520_v52  ;;  %v1553_v51 = vld [vmem:[%s5853_s6 + $0x26e0] sm:$0xff]  ;;  %v1568_v52 = vld [vmem:[%s5853_s6 + $0x2758] sm:$0xff] }
 0x2c1   : > { %4124 = vmatpush.msra.mxu0 %v1470_v53  ;;  %4143 = vmatpush.msra.mxu1 %v1487_v54  ;;  %v1585_v53 = vld [vmem:[%s5853_s6 + $0x27e0] sm:$0xff]  ;;  %v1535_v54 = vld [vmem:[%s5853_s6 + $0x2650] sm:$0xff] }
 0x2c2   : > { %4164 = vmatpush.msra.mxu2 %v1502_v55  ;;  %4183 = vmatpush.msra.mxu3 %v1519_v56  ;;  %v1552_v55 = vld [vmem:[%s5853_s6 + $0x26d8] sm:$0xff]  ;;  %v1567_v56 = vld [vmem:[%s5853_s6 + $0x2750] sm:$0xff] }
 0x2c3   : > { %4125 = vmatpush.msra.mxu0 %v1469_v57  ;;  %4144 = vmatpush.msra.mxu1 %v1486_v58  ;;  %v1584_v57 = vld [vmem:[%s5853_s6 + $0x27d8] sm:$0xff]  ;;  %v1534_v58 = vld [vmem:[%s5853_s6 + $0x2648] sm:$0xff] }
 0x2c4   : > { %4165 = vmatpush.msra.mxu2 %v1501_v59  ;;  %4184 = vmatpush.msra.mxu3 %v1518_v60  ;;  %v1551_v59 = vld [vmem:[%s5853_s6 + $0x26d0] sm:$0xff]  ;;  %v1566_v60 = vld [vmem:[%s5853_s6 + $0x2748] sm:$0xff] }
 0x2c5   : > { %4126 = vmatpush.msra.mxu0 %v1468_v61  ;;  %4145 = vmatpush.msra.mxu1 %v1485_v62  ;;  %v1583_v61 = vld [vmem:[%s5853_s6 + $0x27d0] sm:$0xff]  ;;  %v1533_v62 = vld [vmem:[%s5853_s6 + $0x2640] sm:$0xff] }
 0x2c6   : > { %4166 = vmatpush.msra.mxu2 %v1500_v63  ;;  %4185 = vmatpush.msra.mxu3 %v1517_v0  ;;  %v1550_v63 = vld [vmem:[%s5853_s6 + $0x26c8] sm:$0xff]  ;;  %v1565_v0 = vld [vmem:[%s5853_s6 + $0x2740] sm:$0xff] }
 0x2c7   : > { %4127 = vmatpush.msra.mxu0 %v1467_v1  ;;  %4146 = vmatpush.msra.mxu1 %v1484_v2  ;;  %v1582_v1 = vld [vmem:[%s5853_s6 + $0x27c8] sm:$0xff]  ;;  %v1532_v2 = vld [vmem:[%s5853_s6 + $0x2638] sm:$0xff] }
 0x2c8   : > { %4167 = vmatpush.msra.mxu2 %v1499_v3  ;;  %4186 = vmatpush.msra.mxu3 %v1516_v4  ;;  %v1549_v3 = vld [vmem:[%s5853_s6 + $0x26c0] sm:$0xff]  ;;  %v1564_v4 = vld [vmem:[%s5853_s6 + $0x2738] sm:$0xff] }
 0x2c9   : > { %4128 = vmatpush.msra.mxu0 %v1466_v5  ;;  %4147 = vmatpush.msra.mxu1 %v1483_v6  ;;  %v1581_v5 = vld [vmem:[%s5853_s6 + $0x27c0] sm:$0xff]  ;;  %v1531_v6 = vld [vmem:[%s5853_s6 + $0x2630] sm:$0xff] }
 0x2ca   : > { %4168 = vmatpush.msra.mxu2 %v1498_v7  ;;  %4187 = vmatpush.msra.mxu3 %v1515_v8  ;;  %v1548_v7 = vld [vmem:[%s5853_s6 + $0x26b8] sm:$0xff]  ;;  %v1563_v8 = vld [vmem:[%s5853_s6 + $0x2730] sm:$0xff] }
 0x2cb   : > { %4129 = vmatpush.msra.mxu0 %v1465_v9  ;;  %4148 = vmatpush.msra.mxu1 %v1482_v10  ;;  %v1580_v9 = vld [vmem:[%s5853_s6 + $0x27b8] sm:$0xff]  ;;  %v1530_v10 = vld [vmem:[%s5853_s6 + $0x2628] sm:$0xff] }
 0x2cc   : > { %4169 = vmatpush.msra.mxu2 %v1497_v11  ;;  %4188 = vmatpush.msra.mxu3 %v1514_v12  ;;  %v1547_v11 = vld [vmem:[%s5853_s6 + $0x26b0] sm:$0xff]  ;;  %v1562_v12 = vld [vmem:[%s5853_s6 + $0x2728] sm:$0xff] }
 0x2cd   : > { %4130 = vmatpush.msra.mxu0 %v1464_v13  ;;  %4149 = vmatpush.msra.mxu1 %v1481_v14  ;;  %v1579_v13 = vld [vmem:[%s5853_s6 + $0x27b0] sm:$0xff]  ;;  %v1529_v14 = vld [vmem:[%s5853_s6 + $0x2620] sm:$0xff] }
 0x2ce   : > { %4170 = vmatpush.msra.mxu2 %v1496_v15  ;;  %4189 = vmatpush.msra.mxu3 %v1513_v16  ;;  %v1546_v15 = vld [vmem:[%s5853_s6 + $0x26a8] sm:$0xff]  ;;  %v1561_v16 = vld [vmem:[%s5853_s6 + $0x2720] sm:$0xff] }
 0x2cf   : > { %4131 = vmatpush.msra.mxu0 %v1463_v17  ;;  %4150 = vmatpush.msra.mxu1 %v1480_v18  ;;  %v1578_v17 = vld [vmem:[%s5853_s6 + $0x27a8] sm:$0xff]  ;;  %v1528_v18 = vld [vmem:[%s5853_s6 + $0x2618] sm:$0xff] }
 0x2d0   : > { %4171 = vmatpush.msra.mxu2 %v1495_v19  ;;  %4190 = vmatpush.msra.mxu3 %v1512_v20  ;;  %v1545_v19 = vld [vmem:[%s5853_s6 + $0x26a0] sm:$0xff]  ;;  %v1560_v20 = vld [vmem:[%s5853_s6 + $0x2718] sm:$0xff] }
 0x2d1   : > { %4132 = vmatpush.msra.mxu0 %v1462_v21  ;;  %4151 = vmatpush.msra.mxu1 %v1479_v22  ;;  %v1577_v21 = vld [vmem:[%s5853_s6 + $0x27a0] sm:$0xff]  ;;  %v1527_v22 = vld [vmem:[%s5853_s6 + $0x2610] sm:$0xff] }
 0x2d2   : > { %4172 = vmatpush.msra.mxu2 %v1494_v24  ;;  %4191 = vmatpush.msra.mxu3 %v1511_v25  ;;  %v1559_v24 = vld [vmem:[%s5853_s6 + $0x2710] sm:$0xff]  ;;  %v1576_v25 = vld [vmem:[%s5853_s6 + $0x2798] sm:$0xff] }
 0x2d3   : > { %4133 = vmatpush.msra.mxu0 %v1461_v26  ;;  %4152 = vmatpush.msra.mxu1 %v1478_v27  ;;  %v1526_v26 = vld [vmem:[%s5853_s6 + $0x2608] sm:$0xff]  ;;  %v1543_v27 = vld [vmem:[%s5853_s6 + $0x2690] sm:$0xff] }
 0x2d4   : > { %4173 = vmatpush.msra.mxu2 %v1493_v28  ;;  %4192 = vmatpush.msra.mxu3 %v1510_v29  ;;  %v297_v28 = vld [vmem:[%s5835_s8 + $0xa0] sm:$0xff] }
 0x2d5   : > { %4134 = vmatmul.f32.vlgmr.msra.gmra.mxu0 %v2482_v30  ;;  %4174 = vmatmul.f32.vlgmr.msra.gmra.mxu2 %v2484_v31  ;;  %v1558_v29 = vld [vmem:[%s5853_s6 + $0x2708] sm:$0xff]  ;;  %v1575_v30 = vld [vmem:[%s5853_s6 + $0x2790] sm:$0xff]  ;;  %2490 = vst [vmem:[#allocation1] ss:$4 sm:$0xff] %v297_v28  ;;  %v1525_v31 = vld [vmem:[%s5853_s6 + $0x2600] sm:$0xff] }
 0x2d6   : > { %4198 = vmatpush.msrb.mxu0 %v1540_v32  ;;  %4238 = vmatpush.msrb.mxu2 %v1572_v33  ;;  %v1542_v32 = vld [vmem:[%s5853_s6 + $0x2688] sm:$0xff]  ;;  %v1557_v33 = vld [vmem:[%s5853_s6 + $0x2700] sm:$0xff]  ;;  %v1608_v28 = vld [vmem:[%s5853_s6 + $0x2898] sm:$0xff] }
 0x2d7   : > { %4153 = vmatpush.msra.mxu1 %v1477_v34  ;;  %4193 = vmatpush.msra.mxu3 %v1509_v35  ;;  %v1574_v34 = vld [vmem:[%s5853_s6 + $0x2788] sm:$0xff]  ;;  %v2486_v35 = vld.sshfl [vmem:[#allocation1 + $0x20] sm:$0xff pattern:$0x73625140] }
 0x2d8   : > { %4154 = vmatmul.f32.vlgmr.msra.gmra.mxu1 %v2483_v36  ;;  %4194 = vmatmul.f32.vlgmr.msra.gmra.mxu3 %v2485_v37  ;;  %v2488_v36 = vld.sshfl [vmem:[#allocation1 + $0x30] sm:$0xff pattern:$0x73625140]  ;;  %v1604_v37 = vld [vmem:[%s5853_s6 + $0x2878] sm:$0xff] }
 0x2d9   : > { %4199 = vmatpush.msrb.mxu0 %v1539_v38  ;;  %4218 = vmatpush.msrb.mxu1 %v1556_v39  ;;  %v1636_v38 = vld [vmem:[%s5853_s6 + $0x2978] sm:$0xff]  ;;  %v1541_v39 = vld [vmem:[%s5853_s6 + $0x2680] sm:$0xff] }
 0x2da   : > { %4239 = vmatpush.msrb.mxu2 %v1571_v40  ;;  %4258 = vmatpush.msrb.mxu3 %v1588_v41  ;;  %v1573_v40 = vld [vmem:[%s5853_s6 + $0x2780] sm:$0xff]  ;;  %v2487_v41 = vld.sshfl [vmem:[#allocation1 + $0x28] sm:$0xff pattern:$0x73625140] }
 0x2db   : > { %4200 = vmatpush.msrb.mxu0 %v1538_v42  ;;  %4219 = vmatpush.msrb.mxu1 %v1555_v43  ;;  %v2489_v42 = vld.sshfl [vmem:[#allocation1 + $0x38] sm:$0xff pattern:$0x73625140]  ;;  %v1603_v43 = vld [vmem:[%s5853_s6 + $0x2870] sm:$0xff] }
 0x2dc   : > { %4240 = vmatpush.msrb.mxu2 %v1570_v44  ;;  %4259 = vmatpush.msrb.mxu3 %v1587_v45  ;;  %v1620_v44 = vld [vmem:[%s5853_s6 + $0x28f8] sm:$0xff]  ;;  %v1635_v45 = vld [vmem:[%s5853_s6 + $0x2970] sm:$0xff] }
 0x2dd   : > { %4201 = vmatpush.msrb.mxu0 %v1537_v46  ;;  %4220 = vmatpush.msrb.mxu1 %v1554_v47  ;;  %v1652_v46 = vld [vmem:[%s5853_s6 + $0x29f8] sm:$0xff]  ;;  %v1602_v47 = vld [vmem:[%s5853_s6 + $0x2868] sm:$0xff] }
 0x2de   : > { %4241 = vmatpush.msrb.mxu2 %v1569_v48  ;;  %4260 = vmatpush.msrb.mxu3 %v1586_v49  ;;  %v1619_v48 = vld [vmem:[%s5853_s6 + $0x28f0] sm:$0xff]  ;;  %v1634_v49 = vld [vmem:[%s5853_s6 + $0x2968] sm:$0xff] }
 0x2df   : > { %4202 = vmatpush.msrb.mxu0 %v1536_v50  ;;  %4221 = vmatpush.msrb.mxu1 %v1553_v51  ;;  %v1651_v50 = vld [vmem:[%s5853_s6 + $0x29f0] sm:$0xff]  ;;  %v1601_v51 = vld [vmem:[%s5853_s6 + $0x2860] sm:$0xff] }
 0x2e0   : > { %4242 = vmatpush.msrb.mxu2 %v1568_v52  ;;  %4261 = vmatpush.msrb.mxu3 %v1585_v53  ;;  %v1618_v52 = vld [vmem:[%s5853_s6 + $0x28e8] sm:$0xff]  ;;  %v1633_v53 = vld [vmem:[%s5853_s6 + $0x2960] sm:$0xff] }
 0x2e1   : > { %4203 = vmatpush.msrb.mxu0 %v1535_v54  ;;  %4222 = vmatpush.msrb.mxu1 %v1552_v55  ;;  %v1650_v54 = vld [vmem:[%s5853_s6 + $0x29e8] sm:$0xff]  ;;  %v1600_v55 = vld [vmem:[%s5853_s6 + $0x2858] sm:$0xff] }
 0x2e2   : > { %4243 = vmatpush.msrb.mxu2 %v1567_v56  ;;  %4262 = vmatpush.msrb.mxu3 %v1584_v57  ;;  %v1617_v56 = vld [vmem:[%s5853_s6 + $0x28e0] sm:$0xff]  ;;  %v1632_v57 = vld [vmem:[%s5853_s6 + $0x2958] sm:$0xff] }
 0x2e3   : > { %4204 = vmatpush.msrb.mxu0 %v1534_v58  ;;  %4223 = vmatpush.msrb.mxu1 %v1551_v59  ;;  %v1649_v58 = vld [vmem:[%s5853_s6 + $0x29e0] sm:$0xff]  ;;  %v1599_v59 = vld [vmem:[%s5853_s6 + $0x2850] sm:$0xff] }
 0x2e4   : > { %4244 = vmatpush.msrb.mxu2 %v1566_v60  ;;  %4263 = vmatpush.msrb.mxu3 %v1583_v61  ;;  %v1616_v60 = vld [vmem:[%s5853_s6 + $0x28d8] sm:$0xff]  ;;  %v1631_v61 = vld [vmem:[%s5853_s6 + $0x2950] sm:$0xff] }
 0x2e5   : > { %4205 = vmatpush.msrb.mxu0 %v1533_v62  ;;  %4224 = vmatpush.msrb.mxu1 %v1550_v63  ;;  %v1648_v62 = vld [vmem:[%s5853_s6 + $0x29d8] sm:$0xff]  ;;  %v1598_v63 = vld [vmem:[%s5853_s6 + $0x2848] sm:$0xff] }
 0x2e6   : > { %4245 = vmatpush.msrb.mxu2 %v1565_v0  ;;  %4264 = vmatpush.msrb.mxu3 %v1582_v1  ;;  %v1615_v0 = vld [vmem:[%s5853_s6 + $0x28d0] sm:$0xff]  ;;  %v1630_v1 = vld [vmem:[%s5853_s6 + $0x2948] sm:$0xff] }
 0x2e7   : > { %4206 = vmatpush.msrb.mxu0 %v1532_v2  ;;  %4225 = vmatpush.msrb.mxu1 %v1549_v3  ;;  %v1647_v2 = vld [vmem:[%s5853_s6 + $0x29d0] sm:$0xff]  ;;  %v1597_v3 = vld [vmem:[%s5853_s6 + $0x2840] sm:$0xff] }
 0x2e8   : > { %4246 = vmatpush.msrb.mxu2 %v1564_v4  ;;  %4265 = vmatpush.msrb.mxu3 %v1581_v5  ;;  %v1614_v4 = vld [vmem:[%s5853_s6 + $0x28c8] sm:$0xff]  ;;  %v1629_v5 = vld [vmem:[%s5853_s6 + $0x2940] sm:$0xff] }
 0x2e9   : > { %4207 = vmatpush.msrb.mxu0 %v1531_v6  ;;  %4226 = vmatpush.msrb.mxu1 %v1548_v7  ;;  %v1646_v6 = vld [vmem:[%s5853_s6 + $0x29c8] sm:$0xff]  ;;  %v1596_v7 = vld [vmem:[%s5853_s6 + $0x2838] sm:$0xff] }
 0x2ea   : > { %4247 = vmatpush.msrb.mxu2 %v1563_v8  ;;  %4266 = vmatpush.msrb.mxu3 %v1580_v9  ;;  %v1613_v8 = vld [vmem:[%s5853_s6 + $0x28c0] sm:$0xff]  ;;  %v1628_v9 = vld [vmem:[%s5853_s6 + $0x2938] sm:$0xff] }
 0x2eb   : > { %4208 = vmatpush.msrb.mxu0 %v1530_v10  ;;  %4227 = vmatpush.msrb.mxu1 %v1547_v11  ;;  %v1645_v10 = vld [vmem:[%s5853_s6 + $0x29c0] sm:$0xff]  ;;  %v1595_v11 = vld [vmem:[%s5853_s6 + $0x2830] sm:$0xff] }
 0x2ec   : > { %4248 = vmatpush.msrb.mxu2 %v1562_v12  ;;  %4267 = vmatpush.msrb.mxu3 %v1579_v13  ;;  %v1612_v12 = vld [vmem:[%s5853_s6 + $0x28b8] sm:$0xff]  ;;  %v1627_v13 = vld [vmem:[%s5853_s6 + $0x2930] sm:$0xff] }
 0x2ed   : > { %4209 = vmatpush.msrb.mxu0 %v1529_v14  ;;  %4228 = vmatpush.msrb.mxu1 %v1546_v15  ;;  %v1644_v14 = vld [vmem:[%s5853_s6 + $0x29b8] sm:$0xff]  ;;  %v1594_v15 = vld [vmem:[%s5853_s6 + $0x2828] sm:$0xff] }
 0x2ee   : > { %4249 = vmatpush.msrb.mxu2 %v1561_v16  ;;  %4268 = vmatpush.msrb.mxu3 %v1578_v17  ;;  %v1611_v16 = vld [vmem:[%s5853_s6 + $0x28b0] sm:$0xff]  ;;  %v1626_v17 = vld [vmem:[%s5853_s6 + $0x2928] sm:$0xff] }
 0x2ef   : > { %4210 = vmatpush.msrb.mxu0 %v1528_v18  ;;  %4229 = vmatpush.msrb.mxu1 %v1545_v19  ;;  %v1643_v18 = vld [vmem:[%s5853_s6 + $0x29b0] sm:$0xff]  ;;  %v1593_v19 = vld [vmem:[%s5853_s6 + $0x2820] sm:$0xff] }
 0x2f0   : > { %4250 = vmatpush.msrb.mxu2 %v1560_v20  ;;  %4269 = vmatpush.msrb.mxu3 %v1577_v21  ;;  %v1610_v20 = vld [vmem:[%s5853_s6 + $0x28a8] sm:$0xff]  ;;  %v1625_v21 = vld [vmem:[%s5853_s6 + $0x2920] sm:$0xff] }
 0x2f1   : > { %4211 = vmatpush.msrb.mxu0 %v1527_v22  ;;  %4230 = vmatpush.msrb.mxu1 %v1544_v23  ;;  %v1642_v22 = vld [vmem:[%s5853_s6 + $0x29a8] sm:$0xff]  ;;  %v1592_v23 = vld [vmem:[%s5853_s6 + $0x2818] sm:$0xff] }
 0x2f2   : > { %4251 = vmatpush.msrb.mxu2 %v1559_v24  ;;  %4270 = vmatpush.msrb.mxu3 %v1576_v25  ;;  %v1609_v24 = vld [vmem:[%s5853_s6 + $0x28a0] sm:$0xff]  ;;  %v1624_v25 = vld [vmem:[%s5853_s6 + $0x2918] sm:$0xff] }
 0x2f3   : > { %4212 = vmatpush.msrb.mxu0 %v1526_v26  ;;  %4231 = vmatpush.msrb.mxu1 %v1543_v27  ;;  %v1641_v26 = vld [vmem:[%s5853_s6 + $0x29a0] sm:$0xff]  ;;  %v1591_v27 = vld [vmem:[%s5853_s6 + $0x2810] sm:$0xff] }
 0x2f4   : > { %4252 = vmatpush.msrb.mxu2 %v1558_v29  ;;  %4271 = vmatpush.msrb.mxu3 %v1575_v30  ;;  %v1623_v29 = vld [vmem:[%s5853_s6 + $0x2910] sm:$0xff]  ;;  %v1640_v30 = vld [vmem:[%s5853_s6 + $0x2998] sm:$0xff] }
 0x2f5   : > { %4213 = vmatpush.msrb.mxu0 %v1525_v31  ;;  %4232 = vmatpush.msrb.mxu1 %v1542_v32  ;;  %v1590_v31 = vld [vmem:[%s5853_s6 + $0x2808] sm:$0xff]  ;;  %v1607_v32 = vld [vmem:[%s5853_s6 + $0x2890] sm:$0xff] }
 0x2f6   : > { %4253 = vmatpush.msrb.mxu2 %v1557_v33  ;;  %4272 = vmatpush.msrb.mxu3 %v1574_v34  ;;  %v298_v33 = vld [vmem:[%s5835_s8 + $0xa8] sm:$0xff]  ;;  %v1622_v34 = vld [vmem:[%s5853_s6 + $0x2908] sm:$0xff] }
 0x2f7   : > { %4214 = vmatmul.f32.vlgmr.msrb.gmra.mxu0 %v2486_v35  ;;  %4254 = vmatmul.f32.vlgmr.msrb.gmra.mxu2 %v2488_v36  ;;  %v1639_v35 = vld [vmem:[%s5853_s6 + $0x2990] sm:$0xff]  ;;  %2491 = vst [vmem:[#allocation1 + $0x20] ss:$4 sm:$0xff] %v298_v33  ;;  %v1589_v36 = vld [vmem:[%s5853_s6 + $0x2800] sm:$0xff]  ;;  %v1672_v33 = vld [vmem:[%s5853_s6 + $0x2a98] sm:$0xff] }
 0x2f8   : > { %4278 = vmatpush.msra.mxu0 %v1604_v37  ;;  %4318 = vmatpush.msra.mxu2 %v1636_v38  ;;  %v1606_v37 = vld [vmem:[%s5853_s6 + $0x2888] sm:$0xff]  ;;  %v1621_v38 = vld [vmem:[%s5853_s6 + $0x2900] sm:$0xff] }
 0x2f9   : > { %4233 = vmatpush.msrb.mxu1 %v1541_v39  ;;  %4273 = vmatpush.msrb.mxu3 %v1573_v40  ;;  %v1638_v39 = vld [vmem:[%s5853_s6 + $0x2988] sm:$0xff]  ;;  %v2492_v40 = vld.sshfl [vmem:[#allocation1] sm:$0xff pattern:$0x73625140] }
 0x2fa   : > { %4234 = vmatmul.f32.vlgmr.msrb.gmra.mxu1 %v2487_v41  ;;  %4274 = vmatmul.f32.vlgmr.msrb.gmra.mxu3 %v2489_v42  ;;  %v2494_v41 = vld.sshfl [vmem:[#allocation1 + $0x10] sm:$0xff pattern:$0x73625140]  ;;  %v1668_v42 = vld [vmem:[%s5853_s6 + $0x2a78] sm:$0xff] }
 0x2fb   : > { %4279 = vmatpush.msra.mxu0 %v1603_v43  ;;  %4298 = vmatpush.msra.mxu1 %v1620_v44  ;;  %v1700_v43 = vld [vmem:[%s5853_s6 + $0x2b78] sm:$0xff]  ;;  %v1605_v44 = vld [vmem:[%s5853_s6 + $0x2880] sm:$0xff] }
 0x2fc   : > { %4319 = vmatpush.msra.mxu2 %v1635_v45  ;;  %4338 = vmatpush.msra.mxu3 %v1652_v46  ;;  %v1637_v45 = vld [vmem:[%s5853_s6 + $0x2980] sm:$0xff]  ;;  %v2493_v46 = vld.sshfl [vmem:[#allocation1 + $0x8] sm:$0xff pattern:$0x73625140] }
 0x2fd   : > { %4280 = vmatpush.msra.mxu0 %v1602_v47  ;;  %4299 = vmatpush.msra.mxu1 %v1619_v48  ;;  %v2495_v47 = vld.sshfl [vmem:[#allocation1 + $0x18] sm:$0xff pattern:$0x73625140]  ;;  %v1667_v48 = vld [vmem:[%s5853_s6 + $0x2a70] sm:$0xff] }
 0x2fe   : > { %4320 = vmatpush.msra.mxu2 %v1634_v49  ;;  %4339 = vmatpush.msra.mxu3 %v1651_v50  ;;  %v1684_v49 = vld [vmem:[%s5853_s6 + $0x2af8] sm:$0xff]  ;;  %v1699_v50 = vld [vmem:[%s5853_s6 + $0x2b70] sm:$0xff] }
 0x2ff   : > { %4281 = vmatpush.msra.mxu0 %v1601_v51  ;;  %4300 = vmatpush.msra.mxu1 %v1618_v52  ;;  %v1716_v51 = vld [vmem:[%s5853_s6 + $0x2bf8] sm:$0xff]  ;;  %v1666_v52 = vld [vmem:[%s5853_s6 + $0x2a68] sm:$0xff] }
 0x300   : > { %4321 = vmatpush.msra.mxu2 %v1633_v53  ;;  %4340 = vmatpush.msra.mxu3 %v1650_v54  ;;  %v1683_v53 = vld [vmem:[%s5853_s6 + $0x2af0] sm:$0xff]  ;;  %v1698_v54 = vld [vmem:[%s5853_s6 + $0x2b68] sm:$0xff] }
 0x301   : > { %4282 = vmatpush.msra.mxu0 %v1600_v55  ;;  %4301 = vmatpush.msra.mxu1 %v1617_v56  ;;  %v1715_v55 = vld [vmem:[%s5853_s6 + $0x2bf0] sm:$0xff]  ;;  %v1665_v56 = vld [vmem:[%s5853_s6 + $0x2a60] sm:$0xff] }
 0x302   : > { %4322 = vmatpush.msra.mxu2 %v1632_v57  ;;  %4341 = vmatpush.msra.mxu3 %v1649_v58  ;;  %v1682_v57 = vld [vmem:[%s5853_s6 + $0x2ae8] sm:$0xff]  ;;  %v1697_v58 = vld [vmem:[%s5853_s6 + $0x2b60] sm:$0xff] }
 0x303   : > { %4283 = vmatpush.msra.mxu0 %v1599_v59  ;;  %4302 = vmatpush.msra.mxu1 %v1616_v60  ;;  %v1714_v59 = vld [vmem:[%s5853_s6 + $0x2be8] sm:$0xff]  ;;  %v1664_v60 = vld [vmem:[%s5853_s6 + $0x2a58] sm:$0xff] }
 0x304   : > { %4323 = vmatpush.msra.mxu2 %v1631_v61  ;;  %4342 = vmatpush.msra.mxu3 %v1648_v62  ;;  %v1681_v61 = vld [vmem:[%s5853_s6 + $0x2ae0] sm:$0xff]  ;;  %v1696_v62 = vld [vmem:[%s5853_s6 + $0x2b58] sm:$0xff] }
 0x305   : > { %4284 = vmatpush.msra.mxu0 %v1598_v63  ;;  %4303 = vmatpush.msra.mxu1 %v1615_v0  ;;  %v1713_v63 = vld [vmem:[%s5853_s6 + $0x2be0] sm:$0xff]  ;;  %v1663_v0 = vld [vmem:[%s5853_s6 + $0x2a50] sm:$0xff] }
 0x306   : > { %4324 = vmatpush.msra.mxu2 %v1630_v1  ;;  %4343 = vmatpush.msra.mxu3 %v1647_v2  ;;  %v1680_v1 = vld [vmem:[%s5853_s6 + $0x2ad8] sm:$0xff]  ;;  %v1695_v2 = vld [vmem:[%s5853_s6 + $0x2b50] sm:$0xff] }
 0x307   : > { %4285 = vmatpush.msra.mxu0 %v1597_v3  ;;  %4304 = vmatpush.msra.mxu1 %v1614_v4  ;;  %v1712_v3 = vld [vmem:[%s5853_s6 + $0x2bd8] sm:$0xff]  ;;  %v1662_v4 = vld [vmem:[%s5853_s6 + $0x2a48] sm:$0xff] }
 0x308   : > { %4325 = vmatpush.msra.mxu2 %v1629_v5  ;;  %4344 = vmatpush.msra.mxu3 %v1646_v6  ;;  %v1679_v5 = vld [vmem:[%s5853_s6 + $0x2ad0] sm:$0xff]  ;;  %v1694_v6 = vld [vmem:[%s5853_s6 + $0x2b48] sm:$0xff] }
 0x309   : > { %4286 = vmatpush.msra.mxu0 %v1596_v7  ;;  %4305 = vmatpush.msra.mxu1 %v1613_v8  ;;  %v1711_v7 = vld [vmem:[%s5853_s6 + $0x2bd0] sm:$0xff]  ;;  %v1661_v8 = vld [vmem:[%s5853_s6 + $0x2a40] sm:$0xff] }
 0x30a   : > { %4326 = vmatpush.msra.mxu2 %v1628_v9  ;;  %4345 = vmatpush.msra.mxu3 %v1645_v10  ;;  %v1678_v9 = vld [vmem:[%s5853_s6 + $0x2ac8] sm:$0xff]  ;;  %v1693_v10 = vld [vmem:[%s5853_s6 + $0x2b40] sm:$0xff] }
 0x30b   : > { %4287 = vmatpush.msra.mxu0 %v1595_v11  ;;  %4306 = vmatpush.msra.mxu1 %v1612_v12  ;;  %v1710_v11 = vld [vmem:[%s5853_s6 + $0x2bc8] sm:$0xff]  ;;  %v1660_v12 = vld [vmem:[%s5853_s6 + $0x2a38] sm:$0xff] }
 0x30c   : > { %4327 = vmatpush.msra.mxu2 %v1627_v13  ;;  %4346 = vmatpush.msra.mxu3 %v1644_v14  ;;  %v1677_v13 = vld [vmem:[%s5853_s6 + $0x2ac0] sm:$0xff]  ;;  %v1692_v14 = vld [vmem:[%s5853_s6 + $0x2b38] sm:$0xff] }
 0x30d   : > { %4288 = vmatpush.msra.mxu0 %v1594_v15  ;;  %4307 = vmatpush.msra.mxu1 %v1611_v16  ;;  %v1709_v15 = vld [vmem:[%s5853_s6 + $0x2bc0] sm:$0xff]  ;;  %v1659_v16 = vld [vmem:[%s5853_s6 + $0x2a30] sm:$0xff] }
 0x30e   : > { %4328 = vmatpush.msra.mxu2 %v1626_v17  ;;  %4347 = vmatpush.msra.mxu3 %v1643_v18  ;;  %v1676_v17 = vld [vmem:[%s5853_s6 + $0x2ab8] sm:$0xff]  ;;  %v1691_v18 = vld [vmem:[%s5853_s6 + $0x2b30] sm:$0xff] }
 0x30f   : > { %4289 = vmatpush.msra.mxu0 %v1593_v19  ;;  %4308 = vmatpush.msra.mxu1 %v1610_v20  ;;  %v1708_v19 = vld [vmem:[%s5853_s6 + $0x2bb8] sm:$0xff]  ;;  %v1658_v20 = vld [vmem:[%s5853_s6 + $0x2a28] sm:$0xff] }
 0x310   : > { %4329 = vmatpush.msra.mxu2 %v1625_v21  ;;  %4348 = vmatpush.msra.mxu3 %v1642_v22  ;;  %v1675_v21 = vld [vmem:[%s5853_s6 + $0x2ab0] sm:$0xff]  ;;  %v1690_v22 = vld [vmem:[%s5853_s6 + $0x2b28] sm:$0xff] }
 0x311   : > { %4290 = vmatpush.msra.mxu0 %v1592_v23  ;;  %4309 = vmatpush.msra.mxu1 %v1609_v24  ;;  %v1707_v23 = vld [vmem:[%s5853_s6 + $0x2bb0] sm:$0xff]  ;;  %v1657_v24 = vld [vmem:[%s5853_s6 + $0x2a20] sm:$0xff] }
 0x312   : > { %4330 = vmatpush.msra.mxu2 %v1624_v25  ;;  %4349 = vmatpush.msra.mxu3 %v1641_v26  ;;  %v1674_v25 = vld [vmem:[%s5853_s6 + $0x2aa8] sm:$0xff]  ;;  %v1689_v26 = vld [vmem:[%s5853_s6 + $0x2b20] sm:$0xff] }
 0x313   : > { %4291 = vmatpush.msra.mxu0 %v1591_v27  ;;  %4310 = vmatpush.msra.mxu1 %v1608_v28  ;;  %v1706_v27 = vld [vmem:[%s5853_s6 + $0x2ba8] sm:$0xff]  ;;  %v1656_v28 = vld [vmem:[%s5853_s6 + $0x2a18] sm:$0xff] }
 0x314   : > { %4331 = vmatpush.msra.mxu2 %v1623_v29  ;;  %4350 = vmatpush.msra.mxu3 %v1640_v30  ;;  %v1673_v29 = vld [vmem:[%s5853_s6 + $0x2aa0] sm:$0xff]  ;;  %v1688_v30 = vld [vmem:[%s5853_s6 + $0x2b18] sm:$0xff] }
 0x315   : > { %4292 = vmatpush.msra.mxu0 %v1590_v31  ;;  %4311 = vmatpush.msra.mxu1 %v1607_v32  ;;  %v1705_v31 = vld [vmem:[%s5853_s6 + $0x2ba0] sm:$0xff]  ;;  %v1655_v32 = vld [vmem:[%s5853_s6 + $0x2a10] sm:$0xff] }
 0x316   : > { %4332 = vmatpush.msra.mxu2 %v1622_v34  ;;  %4351 = vmatpush.msra.mxu3 %v1639_v35  ;;  %v1687_v34 = vld [vmem:[%s5853_s6 + $0x2b10] sm:$0xff]  ;;  %v1704_v35 = vld [vmem:[%s5853_s6 + $0x2b98] sm:$0xff] }
 0x317   : > { %4293 = vmatpush.msra.mxu0 %v1589_v36  ;;  %4312 = vmatpush.msra.mxu1 %v1606_v37  ;;  %v1654_v36 = vld [vmem:[%s5853_s6 + $0x2a08] sm:$0xff]  ;;  %v1671_v37 = vld [vmem:[%s5853_s6 + $0x2a90] sm:$0xff] }
 0x318   : > { %4333 = vmatpush.msra.mxu2 %v1621_v38  ;;  %4352 = vmatpush.msra.mxu3 %v1638_v39  ;;  %v299_v38 = vld [vmem:[%s5835_s8 + $0xb0] sm:$0xff]  ;;  %v1686_v39 = vld [vmem:[%s5853_s6 + $0x2b08] sm:$0xff] }
 0x319   : > { %4294 = vmatmul.f32.vlgmr.msra.gmra.mxu0 %v2492_v40  ;;  %4334 = vmatmul.f32.vlgmr.msra.gmra.mxu2 %v2494_v41  ;;  %v1703_v40 = vld [vmem:[%s5853_s6 + $0x2b90] sm:$0xff]  ;;  %2500 = vst [vmem:[#allocation1] ss:$4 sm:$0xff] %v299_v38  ;;  %v1653_v41 = vld [vmem:[%s5853_s6 + $0x2a00] sm:$0xff]  ;;  %v1736_v38 = vld [vmem:[%s5853_s6 + $0x2c98] sm:$0xff] }
 0x31a   : > { %4358 = vmatpush.msrb.mxu0 %v1668_v42  ;;  %4398 = vmatpush.msrb.mxu2 %v1700_v43  ;;  %v1670_v42 = vld [vmem:[%s5853_s6 + $0x2a88] sm:$0xff]  ;;  %v1685_v43 = vld [vmem:[%s5853_s6 + $0x2b00] sm:$0xff] }
 0x31b   : > { %4313 = vmatpush.msra.mxu1 %v1605_v44  ;;  %4353 = vmatpush.msra.mxu3 %v1637_v45  ;;  %v1702_v44 = vld [vmem:[%s5853_s6 + $0x2b88] sm:$0xff]  ;;  %v2496_v45 = vld.sshfl [vmem:[#allocation1 + $0x20] sm:$0xff pattern:$0x73625140] }
 0x31c   : > { %4314 = vmatmul.f32.vlgmr.msra.gmra.mxu1 %v2493_v46  ;;  %4354 = vmatmul.f32.vlgmr.msra.gmra.mxu3 %v2495_v47  ;;  %v2498_v46 = vld.sshfl [vmem:[#allocation1 + $0x30] sm:$0xff pattern:$0x73625140]  ;;  %v1732_v47 = vld [vmem:[%s5853_s6 + $0x2c78] sm:$0xff] }
 0x31d   : > { %4359 = vmatpush.msrb.mxu0 %v1667_v48  ;;  %4378 = vmatpush.msrb.mxu1 %v1684_v49  ;;  %v1764_v48 = vld [vmem:[%s5853_s6 + $0x2d78] sm:$0xff]  ;;  %v1669_v49 = vld [vmem:[%s5853_s6 + $0x2a80] sm:$0xff] }
 0x31e   : > { %4399 = vmatpush.msrb.mxu2 %v1699_v50  ;;  %4418 = vmatpush.msrb.mxu3 %v1716_v51  ;;  %v1701_v50 = vld [vmem:[%s5853_s6 + $0x2b80] sm:$0xff]  ;;  %v2497_v51 = vld.sshfl [vmem:[#allocation1 + $0x28] sm:$0xff pattern:$0x73625140] }
 0x31f   : > { %4360 = vmatpush.msrb.mxu0 %v1666_v52  ;;  %4379 = vmatpush.msrb.mxu1 %v1683_v53  ;;  %v2499_v52 = vld.sshfl [vmem:[#allocation1 + $0x38] sm:$0xff pattern:$0x73625140]  ;;  %v1731_v53 = vld [vmem:[%s5853_s6 + $0x2c70] sm:$0xff] }
 0x320   : > { %4400 = vmatpush.msrb.mxu2 %v1698_v54  ;;  %4419 = vmatpush.msrb.mxu3 %v1715_v55  ;;  %v1748_v54 = vld [vmem:[%s5853_s6 + $0x2cf8] sm:$0xff]  ;;  %v1763_v55 = vld [vmem:[%s5853_s6 + $0x2d70] sm:$0xff] }
 0x321   : > { %4361 = vmatpush.msrb.mxu0 %v1665_v56  ;;  %4380 = vmatpush.msrb.mxu1 %v1682_v57  ;;  %v1780_v56 = vld [vmem:[%s5853_s6 + $0x2df8] sm:$0xff]  ;;  %v1730_v57 = vld [vmem:[%s5853_s6 + $0x2c68] sm:$0xff] }
 0x322   : > { %4401 = vmatpush.msrb.mxu2 %v1697_v58  ;;  %4420 = vmatpush.msrb.mxu3 %v1714_v59  ;;  %v1747_v58 = vld [vmem:[%s5853_s6 + $0x2cf0] sm:$0xff]  ;;  %v1762_v59 = vld [vmem:[%s5853_s6 + $0x2d68] sm:$0xff] }
 0x323   : > { %4362 = vmatpush.msrb.mxu0 %v1664_v60  ;;  %4381 = vmatpush.msrb.mxu1 %v1681_v61  ;;  %v1779_v60 = vld [vmem:[%s5853_s6 + $0x2df0] sm:$0xff]  ;;  %v1729_v61 = vld [vmem:[%s5853_s6 + $0x2c60] sm:$0xff] }
 0x324   : > { %4402 = vmatpush.msrb.mxu2 %v1696_v62  ;;  %4421 = vmatpush.msrb.mxu3 %v1713_v63  ;;  %v1746_v62 = vld [vmem:[%s5853_s6 + $0x2ce8] sm:$0xff]  ;;  %v1761_v63 = vld [vmem:[%s5853_s6 + $0x2d60] sm:$0xff] }
 0x325   : > { %4363 = vmatpush.msrb.mxu0 %v1663_v0  ;;  %4382 = vmatpush.msrb.mxu1 %v1680_v1  ;;  %v1778_v0 = vld [vmem:[%s5853_s6 + $0x2de8] sm:$0xff]  ;;  %v1728_v1 = vld [vmem:[%s5853_s6 + $0x2c58] sm:$0xff] }
 0x326   : > { %4403 = vmatpush.msrb.mxu2 %v1695_v2  ;;  %4422 = vmatpush.msrb.mxu3 %v1712_v3  ;;  %v1745_v2 = vld [vmem:[%s5853_s6 + $0x2ce0] sm:$0xff]  ;;  %v1760_v3 = vld [vmem:[%s5853_s6 + $0x2d58] sm:$0xff] }
 0x327   : > { %4364 = vmatpush.msrb.mxu0 %v1662_v4  ;;  %4383 = vmatpush.msrb.mxu1 %v1679_v5  ;;  %v1777_v4 = vld [vmem:[%s5853_s6 + $0x2de0] sm:$0xff]  ;;  %v1727_v5 = vld [vmem:[%s5853_s6 + $0x2c50] sm:$0xff] }
 0x328   : > { %4404 = vmatpush.msrb.mxu2 %v1694_v6  ;;  %4423 = vmatpush.msrb.mxu3 %v1711_v7  ;;  %v1744_v6 = vld [vmem:[%s5853_s6 + $0x2cd8] sm:$0xff]  ;;  %v1759_v7 = vld [vmem:[%s5853_s6 + $0x2d50] sm:$0xff] }
 0x329   : > { %4365 = vmatpush.msrb.mxu0 %v1661_v8  ;;  %4384 = vmatpush.msrb.mxu1 %v1678_v9  ;;  %v1776_v8 = vld [vmem:[%s5853_s6 + $0x2dd8] sm:$0xff]  ;;  %v1726_v9 = vld [vmem:[%s5853_s6 + $0x2c48] sm:$0xff] }
 0x32a   : > { %4405 = vmatpush.msrb.mxu2 %v1693_v10  ;;  %4424 = vmatpush.msrb.mxu3 %v1710_v11  ;;  %v1743_v10 = vld [vmem:[%s5853_s6 + $0x2cd0] sm:$0xff]  ;;  %v1758_v11 = vld [vmem:[%s5853_s6 + $0x2d48] sm:$0xff] }
 0x32b   : > { %4366 = vmatpush.msrb.mxu0 %v1660_v12  ;;  %4385 = vmatpush.msrb.mxu1 %v1677_v13  ;;  %v1775_v12 = vld [vmem:[%s5853_s6 + $0x2dd0] sm:$0xff]  ;;  %v1725_v13 = vld [vmem:[%s5853_s6 + $0x2c40] sm:$0xff] }
 0x32c   : > { %4406 = vmatpush.msrb.mxu2 %v1692_v14  ;;  %4425 = vmatpush.msrb.mxu3 %v1709_v15  ;;  %v1742_v14 = vld [vmem:[%s5853_s6 + $0x2cc8] sm:$0xff]  ;;  %v1757_v15 = vld [vmem:[%s5853_s6 + $0x2d40] sm:$0xff] }
 0x32d   : > { %4367 = vmatpush.msrb.mxu0 %v1659_v16  ;;  %4386 = vmatpush.msrb.mxu1 %v1676_v17  ;;  %v1774_v16 = vld [vmem:[%s5853_s6 + $0x2dc8] sm:$0xff]  ;;  %v1724_v17 = vld [vmem:[%s5853_s6 + $0x2c38] sm:$0xff] }
 0x32e   : > { %4407 = vmatpush.msrb.mxu2 %v1691_v18  ;;  %4426 = vmatpush.msrb.mxu3 %v1708_v19  ;;  %v1741_v18 = vld [vmem:[%s5853_s6 + $0x2cc0] sm:$0xff]  ;;  %v1756_v19 = vld [vmem:[%s5853_s6 + $0x2d38] sm:$0xff] }
 0x32f   : > { %4368 = vmatpush.msrb.mxu0 %v1658_v20  ;;  %4387 = vmatpush.msrb.mxu1 %v1675_v21  ;;  %v1773_v20 = vld [vmem:[%s5853_s6 + $0x2dc0] sm:$0xff]  ;;  %v1723_v21 = vld [vmem:[%s5853_s6 + $0x2c30] sm:$0xff] }
 0x330   : > { %4408 = vmatpush.msrb.mxu2 %v1690_v22  ;;  %4427 = vmatpush.msrb.mxu3 %v1707_v23  ;;  %v1740_v22 = vld [vmem:[%s5853_s6 + $0x2cb8] sm:$0xff]  ;;  %v1755_v23 = vld [vmem:[%s5853_s6 + $0x2d30] sm:$0xff] }
 0x331   : > { %4369 = vmatpush.msrb.mxu0 %v1657_v24  ;;  %4388 = vmatpush.msrb.mxu1 %v1674_v25  ;;  %v1772_v24 = vld [vmem:[%s5853_s6 + $0x2db8] sm:$0xff]  ;;  %v1722_v25 = vld [vmem:[%s5853_s6 + $0x2c28] sm:$0xff] }
 0x332   : > { %4409 = vmatpush.msrb.mxu2 %v1689_v26  ;;  %4428 = vmatpush.msrb.mxu3 %v1706_v27  ;;  %v1739_v26 = vld [vmem:[%s5853_s6 + $0x2cb0] sm:$0xff]  ;;  %v1754_v27 = vld [vmem:[%s5853_s6 + $0x2d28] sm:$0xff] }
 0x333   : > { %4370 = vmatpush.msrb.mxu0 %v1656_v28  ;;  %4389 = vmatpush.msrb.mxu1 %v1673_v29  ;;  %v1771_v28 = vld [vmem:[%s5853_s6 + $0x2db0] sm:$0xff]  ;;  %v1721_v29 = vld [vmem:[%s5853_s6 + $0x2c20] sm:$0xff] }
 0x334   : > { %4410 = vmatpush.msrb.mxu2 %v1688_v30  ;;  %4429 = vmatpush.msrb.mxu3 %v1705_v31  ;;  %v1738_v30 = vld [vmem:[%s5853_s6 + $0x2ca8] sm:$0xff]  ;;  %v1753_v31 = vld [vmem:[%s5853_s6 + $0x2d20] sm:$0xff] }
 0x335   : > { %4371 = vmatpush.msrb.mxu0 %v1655_v32  ;;  %4390 = vmatpush.msrb.mxu1 %v1672_v33  ;;  %v1770_v32 = vld [vmem:[%s5853_s6 + $0x2da8] sm:$0xff]  ;;  %v1720_v33 = vld [vmem:[%s5853_s6 + $0x2c18] sm:$0xff] }
 0x336   : > { %4411 = vmatpush.msrb.mxu2 %v1687_v34  ;;  %4430 = vmatpush.msrb.mxu3 %v1704_v35  ;;  %v1737_v34 = vld [vmem:[%s5853_s6 + $0x2ca0] sm:$0xff]  ;;  %v1752_v35 = vld [vmem:[%s5853_s6 + $0x2d18] sm:$0xff] }
 0x337   : > { %4372 = vmatpush.msrb.mxu0 %v1654_v36  ;;  %4391 = vmatpush.msrb.mxu1 %v1671_v37  ;;  %v1769_v36 = vld [vmem:[%s5853_s6 + $0x2da0] sm:$0xff]  ;;  %v1719_v37 = vld [vmem:[%s5853_s6 + $0x2c10] sm:$0xff] }
 0x338   : > { %4412 = vmatpush.msrb.mxu2 %v1686_v39  ;;  %4431 = vmatpush.msrb.mxu3 %v1703_v40  ;;  %v1751_v39 = vld [vmem:[%s5853_s6 + $0x2d10] sm:$0xff]  ;;  %v1768_v40 = vld [vmem:[%s5853_s6 + $0x2d98] sm:$0xff] }
 0x339   : > { %4373 = vmatpush.msrb.mxu0 %v1653_v41  ;;  %4392 = vmatpush.msrb.mxu1 %v1670_v42  ;;  %v1718_v41 = vld [vmem:[%s5853_s6 + $0x2c08] sm:$0xff]  ;;  %v1735_v42 = vld [vmem:[%s5853_s6 + $0x2c90] sm:$0xff] }
 0x33a   : > { %4413 = vmatpush.msrb.mxu2 %v1685_v43  ;;  %4432 = vmatpush.msrb.mxu3 %v1702_v44  ;;  %v300_v43 = vld [vmem:[%s5835_s8 + $0xb8] sm:$0xff]  ;;  %v1750_v44 = vld [vmem:[%s5853_s6 + $0x2d08] sm:$0xff] }
 0x33b   : > { %4374 = vmatmul.f32.vlgmr.msrb.gmra.mxu0 %v2496_v45  ;;  %4414 = vmatmul.f32.vlgmr.msrb.gmra.mxu2 %v2498_v46  ;;  %v1767_v45 = vld [vmem:[%s5853_s6 + $0x2d90] sm:$0xff]  ;;  %2501 = vst [vmem:[#allocation1 + $0x20] ss:$4 sm:$0xff] %v300_v43  ;;  %v1717_v46 = vld [vmem:[%s5853_s6 + $0x2c00] sm:$0xff]  ;;  %v1800_v43 = vld [vmem:[%s5853_s6 + $0x2e98] sm:$0xff] }
 0x33c   : > { %4438 = vmatpush.msra.mxu0 %v1732_v47  ;;  %4478 = vmatpush.msra.mxu2 %v1764_v48  ;;  %v1734_v47 = vld [vmem:[%s5853_s6 + $0x2c88] sm:$0xff]  ;;  %v1749_v48 = vld [vmem:[%s5853_s6 + $0x2d00] sm:$0xff] }
 0x33d   : > { %4393 = vmatpush.msrb.mxu1 %v1669_v49  ;;  %4433 = vmatpush.msrb.mxu3 %v1701_v50  ;;  %v1766_v49 = vld [vmem:[%s5853_s6 + $0x2d88] sm:$0xff]  ;;  %v2502_v50 = vld.sshfl [vmem:[#allocation1] sm:$0xff pattern:$0x73625140] }
 0x33e   : > { %4394 = vmatmul.f32.vlgmr.msrb.gmra.mxu1 %v2497_v51  ;;  %4434 = vmatmul.f32.vlgmr.msrb.gmra.mxu3 %v2499_v52  ;;  %v2504_v51 = vld.sshfl [vmem:[#allocation1 + $0x10] sm:$0xff pattern:$0x73625140]  ;;  %v1796_v52 = vld [vmem:[%s5853_s6 + $0x2e78] sm:$0xff] }
 0x33f   : > { %4439 = vmatpush.msra.mxu0 %v1731_v53  ;;  %4458 = vmatpush.msra.mxu1 %v1748_v54  ;;  %v1828_v53 = vld [vmem:[%s5853_s6 + $0x2f78] sm:$0xff]  ;;  %v1733_v54 = vld [vmem:[%s5853_s6 + $0x2c80] sm:$0xff] }
 0x340   : > { %4479 = vmatpush.msra.mxu2 %v1763_v55  ;;  %4498 = vmatpush.msra.mxu3 %v1780_v56  ;;  %v1765_v55 = vld [vmem:[%s5853_s6 + $0x2d80] sm:$0xff]  ;;  %v2503_v56 = vld.sshfl [vmem:[#allocation1 + $0x8] sm:$0xff pattern:$0x73625140] }
 0x341   : > { %4440 = vmatpush.msra.mxu0 %v1730_v57  ;;  %4459 = vmatpush.msra.mxu1 %v1747_v58  ;;  %v2505_v57 = vld.sshfl [vmem:[#allocation1 + $0x18] sm:$0xff pattern:$0x73625140]  ;;  %v1795_v58 = vld [vmem:[%s5853_s6 + $0x2e70] sm:$0xff] }
 0x342   : > { %4480 = vmatpush.msra.mxu2 %v1762_v59  ;;  %4499 = vmatpush.msra.mxu3 %v1779_v60  ;;  %v1812_v59 = vld [vmem:[%s5853_s6 + $0x2ef8] sm:$0xff]  ;;  %v1827_v60 = vld [vmem:[%s5853_s6 + $0x2f70] sm:$0xff] }
 0x343   : > { %4441 = vmatpush.msra.mxu0 %v1729_v61  ;;  %4460 = vmatpush.msra.mxu1 %v1746_v62  ;;  %v1844_v61 = vld [vmem:[%s5853_s6 + $0x2ff8] sm:$0xff]  ;;  %v1794_v62 = vld [vmem:[%s5853_s6 + $0x2e68] sm:$0xff] }
 0x344   : > { %4481 = vmatpush.msra.mxu2 %v1761_v63  ;;  %4500 = vmatpush.msra.mxu3 %v1778_v0  ;;  %v1811_v63 = vld [vmem:[%s5853_s6 + $0x2ef0] sm:$0xff]  ;;  %v1826_v0 = vld [vmem:[%s5853_s6 + $0x2f68] sm:$0xff] }
 0x345   : > { %4442 = vmatpush.msra.mxu0 %v1728_v1  ;;  %4461 = vmatpush.msra.mxu1 %v1745_v2  ;;  %v1843_v1 = vld [vmem:[%s5853_s6 + $0x2ff0] sm:$0xff]  ;;  %v1793_v2 = vld [vmem:[%s5853_s6 + $0x2e60] sm:$0xff] }
 0x346   : > { %4482 = vmatpush.msra.mxu2 %v1760_v3  ;;  %4501 = vmatpush.msra.mxu3 %v1777_v4  ;;  %v1810_v3 = vld [vmem:[%s5853_s6 + $0x2ee8] sm:$0xff]  ;;  %v1825_v4 = vld [vmem:[%s5853_s6 + $0x2f60] sm:$0xff] }
 0x347   : > { %4443 = vmatpush.msra.mxu0 %v1727_v5  ;;  %4462 = vmatpush.msra.mxu1 %v1744_v6  ;;  %v1842_v5 = vld [vmem:[%s5853_s6 + $0x2fe8] sm:$0xff]  ;;  %v1792_v6 = vld [vmem:[%s5853_s6 + $0x2e58] sm:$0xff] }
 0x348   : > { %4483 = vmatpush.msra.mxu2 %v1759_v7  ;;  %4502 = vmatpush.msra.mxu3 %v1776_v8  ;;  %v1809_v7 = vld [vmem:[%s5853_s6 + $0x2ee0] sm:$0xff]  ;;  %v1824_v8 = vld [vmem:[%s5853_s6 + $0x2f58] sm:$0xff] }
 0x349   : > { %4444 = vmatpush.msra.mxu0 %v1726_v9  ;;  %4463 = vmatpush.msra.mxu1 %v1743_v10  ;;  %v1841_v9 = vld [vmem:[%s5853_s6 + $0x2fe0] sm:$0xff]  ;;  %v1791_v10 = vld [vmem:[%s5853_s6 + $0x2e50] sm:$0xff] }
 0x34a   : > { %4484 = vmatpush.msra.mxu2 %v1758_v11  ;;  %4503 = vmatpush.msra.mxu3 %v1775_v12  ;;  %v1808_v11 = vld [vmem:[%s5853_s6 + $0x2ed8] sm:$0xff]  ;;  %v1823_v12 = vld [vmem:[%s5853_s6 + $0x2f50] sm:$0xff] }
 0x34b   : > { %4445 = vmatpush.msra.mxu0 %v1725_v13  ;;  %4464 = vmatpush.msra.mxu1 %v1742_v14  ;;  %v1840_v13 = vld [vmem:[%s5853_s6 + $0x2fd8] sm:$0xff]  ;;  %v1790_v14 = vld [vmem:[%s5853_s6 + $0x2e48] sm:$0xff] }
 0x34c   : > { %4485 = vmatpush.msra.mxu2 %v1757_v15  ;;  %4504 = vmatpush.msra.mxu3 %v1774_v16  ;;  %v1807_v15 = vld [vmem:[%s5853_s6 + $0x2ed0] sm:$0xff]  ;;  %v1822_v16 = vld [vmem:[%s5853_s6 + $0x2f48] sm:$0xff] }
 0x34d   : > { %4446 = vmatpush.msra.mxu0 %v1724_v17  ;;  %4465 = vmatpush.msra.mxu1 %v1741_v18  ;;  %v1839_v17 = vld [vmem:[%s5853_s6 + $0x2fd0] sm:$0xff]  ;;  %v1789_v18 = vld [vmem:[%s5853_s6 + $0x2e40] sm:$0xff] }
 0x34e   : > { %4486 = vmatpush.msra.mxu2 %v1756_v19  ;;  %4505 = vmatpush.msra.mxu3 %v1773_v20  ;;  %v1806_v19 = vld [vmem:[%s5853_s6 + $0x2ec8] sm:$0xff]  ;;  %v1821_v20 = vld [vmem:[%s5853_s6 + $0x2f40] sm:$0xff] }
 0x34f   : > { %4447 = vmatpush.msra.mxu0 %v1723_v21  ;;  %4466 = vmatpush.msra.mxu1 %v1740_v22  ;;  %v1838_v21 = vld [vmem:[%s5853_s6 + $0x2fc8] sm:$0xff]  ;;  %v1788_v22 = vld [vmem:[%s5853_s6 + $0x2e38] sm:$0xff] }
 0x350   : > { %4487 = vmatpush.msra.mxu2 %v1755_v23  ;;  %4506 = vmatpush.msra.mxu3 %v1772_v24  ;;  %v1805_v23 = vld [vmem:[%s5853_s6 + $0x2ec0] sm:$0xff]  ;;  %v1820_v24 = vld [vmem:[%s5853_s6 + $0x2f38] sm:$0xff] }
 0x351   : > { %4448 = vmatpush.msra.mxu0 %v1722_v25  ;;  %4467 = vmatpush.msra.mxu1 %v1739_v26  ;;  %v1837_v25 = vld [vmem:[%s5853_s6 + $0x2fc0] sm:$0xff]  ;;  %v1787_v26 = vld [vmem:[%s5853_s6 + $0x2e30] sm:$0xff] }
 0x352   : > { %4488 = vmatpush.msra.mxu2 %v1754_v27  ;;  %4507 = vmatpush.msra.mxu3 %v1771_v28  ;;  %v1804_v27 = vld [vmem:[%s5853_s6 + $0x2eb8] sm:$0xff]  ;;  %v1819_v28 = vld [vmem:[%s5853_s6 + $0x2f30] sm:$0xff] }
 0x353   : > { %4449 = vmatpush.msra.mxu0 %v1721_v29  ;;  %4468 = vmatpush.msra.mxu1 %v1738_v30  ;;  %v1836_v29 = vld [vmem:[%s5853_s6 + $0x2fb8] sm:$0xff]  ;;  %v1786_v30 = vld [vmem:[%s5853_s6 + $0x2e28] sm:$0xff] }
 0x354   : > { %4489 = vmatpush.msra.mxu2 %v1753_v31  ;;  %4508 = vmatpush.msra.mxu3 %v1770_v32  ;;  %v1803_v31 = vld [vmem:[%s5853_s6 + $0x2eb0] sm:$0xff]  ;;  %v1818_v32 = vld [vmem:[%s5853_s6 + $0x2f28] sm:$0xff] }
 0x355   : > { %4450 = vmatpush.msra.mxu0 %v1720_v33  ;;  %4469 = vmatpush.msra.mxu1 %v1737_v34  ;;  %v1835_v33 = vld [vmem:[%s5853_s6 + $0x2fb0] sm:$0xff]  ;;  %v1785_v34 = vld [vmem:[%s5853_s6 + $0x2e20] sm:$0xff] }
 0x356   : > { %4490 = vmatpush.msra.mxu2 %v1752_v35  ;;  %4509 = vmatpush.msra.mxu3 %v1769_v36  ;;  %v1802_v35 = vld [vmem:[%s5853_s6 + $0x2ea8] sm:$0xff]  ;;  %v1817_v36 = vld [vmem:[%s5853_s6 + $0x2f20] sm:$0xff] }
 0x357   : > { %4451 = vmatpush.msra.mxu0 %v1719_v37  ;;  %4470 = vmatpush.msra.mxu1 %v1736_v38  ;;  %v1834_v37 = vld [vmem:[%s5853_s6 + $0x2fa8] sm:$0xff]  ;;  %v1784_v38 = vld [vmem:[%s5853_s6 + $0x2e18] sm:$0xff] }
 0x358   : > { %4491 = vmatpush.msra.mxu2 %v1751_v39  ;;  %4510 = vmatpush.msra.mxu3 %v1768_v40  ;;  %v1801_v39 = vld [vmem:[%s5853_s6 + $0x2ea0] sm:$0xff]  ;;  %v1816_v40 = vld [vmem:[%s5853_s6 + $0x2f18] sm:$0xff] }
 0x359   : > { %4452 = vmatpush.msra.mxu0 %v1718_v41  ;;  %4471 = vmatpush.msra.mxu1 %v1735_v42  ;;  %v1833_v41 = vld [vmem:[%s5853_s6 + $0x2fa0] sm:$0xff]  ;;  %v1783_v42 = vld [vmem:[%s5853_s6 + $0x2e10] sm:$0xff] }
 0x35a   : > { %4492 = vmatpush.msra.mxu2 %v1750_v44  ;;  %4511 = vmatpush.msra.mxu3 %v1767_v45  ;;  %v1815_v44 = vld [vmem:[%s5853_s6 + $0x2f10] sm:$0xff]  ;;  %v1832_v45 = vld [vmem:[%s5853_s6 + $0x2f98] sm:$0xff] }
 0x35b   : > { %4453 = vmatpush.msra.mxu0 %v1717_v46  ;;  %4472 = vmatpush.msra.mxu1 %v1734_v47  ;;  %v1782_v46 = vld [vmem:[%s5853_s6 + $0x2e08] sm:$0xff]  ;;  %v1799_v47 = vld [vmem:[%s5853_s6 + $0x2e90] sm:$0xff] }
 0x35c   : > { %4493 = vmatpush.msra.mxu2 %v1749_v48  ;;  %4512 = vmatpush.msra.mxu3 %v1766_v49  ;;  %v301_v48 = vld [vmem:[%s5835_s8 + $0xc0] sm:$0xff] }
 0x35d   : > { %4454 = vmatmul.f32.vlgmr.msra.gmra.mxu0 %v2502_v50  ;;  %4494 = vmatmul.f32.vlgmr.msra.gmra.mxu2 %v2504_v51  ;;  %v1814_v49 = vld [vmem:[%s5853_s6 + $0x2f08] sm:$0xff]  ;;  %v1831_v50 = vld [vmem:[%s5853_s6 + $0x2f90] sm:$0xff]  ;;  %2510 = vst [vmem:[#allocation1] ss:$4 sm:$0xff] %v301_v48  ;;  %v1781_v51 = vld [vmem:[%s5853_s6 + $0x2e00] sm:$0xff] }
 0x35e   : > { %4518 = vmatpush.msrb.mxu0 %v1796_v52  ;;  %4558 = vmatpush.msrb.mxu2 %v1828_v53  ;;  %v1798_v52 = vld [vmem:[%s5853_s6 + $0x2e88] sm:$0xff]  ;;  %v1813_v53 = vld [vmem:[%s5853_s6 + $0x2f00] sm:$0xff]  ;;  %v1880_v48 = vld [vmem:[%s5853_s6 + $0x3118] sm:$0xff] }
 0x35f   : > { %4473 = vmatpush.msra.mxu1 %v1733_v54  ;;  %4513 = vmatpush.msra.mxu3 %v1765_v55  ;;  %v1830_v54 = vld [vmem:[%s5853_s6 + $0x2f88] sm:$0xff]  ;;  %v2506_v55 = vld.sshfl [vmem:[#allocation1 + $0x20] sm:$0xff pattern:$0x73625140] }
 0x360   : > { %4474 = vmatmul.f32.vlgmr.msra.gmra.mxu1 %v2503_v56  ;;  %4514 = vmatmul.f32.vlgmr.msra.gmra.mxu3 %v2505_v57  ;;  %v2508_v56 = vld.sshfl [vmem:[#allocation1 + $0x30] sm:$0xff pattern:$0x73625140]  ;;  %v1860_v57 = vld [vmem:[%s5853_s6 + $0x3078] sm:$0xff] }
 0x361   : > { %4519 = vmatpush.msrb.mxu0 %v1795_v58  ;;  %4538 = vmatpush.msrb.mxu1 %v1812_v59  ;;  %v1892_v58 = vld [vmem:[%s5853_s6 + $0x3178] sm:$0xff]  ;;  %v1797_v59 = vld [vmem:[%s5853_s6 + $0x2e80] sm:$0xff] }
 0x362   : > { %4559 = vmatpush.msrb.mxu2 %v1827_v60  ;;  %4578 = vmatpush.msrb.mxu3 %v1844_v61  ;;  %v1829_v60 = vld [vmem:[%s5853_s6 + $0x2f80] sm:$0xff]  ;;  %v2507_v61 = vld.sshfl [vmem:[#allocation1 + $0x28] sm:$0xff pattern:$0x73625140] }
 0x363   : > { %4520 = vmatpush.msrb.mxu0 %v1794_v62  ;;  %4539 = vmatpush.msrb.mxu1 %v1811_v63  ;;  %v2509_v62 = vld.sshfl [vmem:[#allocation1 + $0x38] sm:$0xff pattern:$0x73625140]  ;;  %v1859_v63 = vld [vmem:[%s5853_s6 + $0x3070] sm:$0xff] }
 0x364   : > { %4560 = vmatpush.msrb.mxu2 %v1826_v0  ;;  %4579 = vmatpush.msrb.mxu3 %v1843_v1  ;;  %v1876_v0 = vld [vmem:[%s5853_s6 + $0x30f8] sm:$0xff]  ;;  %v1891_v1 = vld [vmem:[%s5853_s6 + $0x3170] sm:$0xff] }
 0x365   : > { %4521 = vmatpush.msrb.mxu0 %v1793_v2  ;;  %4540 = vmatpush.msrb.mxu1 %v1810_v3  ;;  %v1908_v2 = vld [vmem:[%s5853_s6 + $0x31f8] sm:$0xff]  ;;  %v1858_v3 = vld [vmem:[%s5853_s6 + $0x3068] sm:$0xff] }
 0x366   : > { %4561 = vmatpush.msrb.mxu2 %v1825_v4  ;;  %4580 = vmatpush.msrb.mxu3 %v1842_v5  ;;  %v1875_v4 = vld [vmem:[%s5853_s6 + $0x30f0] sm:$0xff]  ;;  %v1890_v5 = vld [vmem:[%s5853_s6 + $0x3168] sm:$0xff] }
 0x367   : > { %4522 = vmatpush.msrb.mxu0 %v1792_v6  ;;  %4541 = vmatpush.msrb.mxu1 %v1809_v7  ;;  %v1907_v6 = vld [vmem:[%s5853_s6 + $0x31f0] sm:$0xff]  ;;  %v1857_v7 = vld [vmem:[%s5853_s6 + $0x3060] sm:$0xff] }
 0x368   : > { %4562 = vmatpush.msrb.mxu2 %v1824_v8  ;;  %4581 = vmatpush.msrb.mxu3 %v1841_v9  ;;  %v1874_v8 = vld [vmem:[%s5853_s6 + $0x30e8] sm:$0xff]  ;;  %v1889_v9 = vld [vmem:[%s5853_s6 + $0x3160] sm:$0xff] }
 0x369   : > { %4523 = vmatpush.msrb.mxu0 %v1791_v10  ;;  %4542 = vmatpush.msrb.mxu1 %v1808_v11  ;;  %v1906_v10 = vld [vmem:[%s5853_s6 + $0x31e8] sm:$0xff]  ;;  %v1856_v11 = vld [vmem:[%s5853_s6 + $0x3058] sm:$0xff] }
 0x36a   : > { %4563 = vmatpush.msrb.mxu2 %v1823_v12  ;;  %4582 = vmatpush.msrb.mxu3 %v1840_v13  ;;  %v1873_v12 = vld [vmem:[%s5853_s6 + $0x30e0] sm:$0xff]  ;;  %v1888_v13 = vld [vmem:[%s5853_s6 + $0x3158] sm:$0xff] }
 0x36b   : > { %4524 = vmatpush.msrb.mxu0 %v1790_v14  ;;  %4543 = vmatpush.msrb.mxu1 %v1807_v15  ;;  %v1905_v14 = vld [vmem:[%s5853_s6 + $0x31e0] sm:$0xff]  ;;  %v1855_v15 = vld [vmem:[%s5853_s6 + $0x3050] sm:$0xff] }
 0x36c   : > { %4564 = vmatpush.msrb.mxu2 %v1822_v16  ;;  %4583 = vmatpush.msrb.mxu3 %v1839_v17  ;;  %v1872_v16 = vld [vmem:[%s5853_s6 + $0x30d8] sm:$0xff]  ;;  %v1887_v17 = vld [vmem:[%s5853_s6 + $0x3150] sm:$0xff] }
 0x36d   : > { %4525 = vmatpush.msrb.mxu0 %v1789_v18  ;;  %4544 = vmatpush.msrb.mxu1 %v1806_v19  ;;  %v1904_v18 = vld [vmem:[%s5853_s6 + $0x31d8] sm:$0xff]  ;;  %v1854_v19 = vld [vmem:[%s5853_s6 + $0x3048] sm:$0xff] }
 0x36e   : > { %4565 = vmatpush.msrb.mxu2 %v1821_v20  ;;  %4584 = vmatpush.msrb.mxu3 %v1838_v21  ;;  %v1871_v20 = vld [vmem:[%s5853_s6 + $0x30d0] sm:$0xff]  ;;  %v1886_v21 = vld [vmem:[%s5853_s6 + $0x3148] sm:$0xff] }
 0x36f   : > { %4526 = vmatpush.msrb.mxu0 %v1788_v22  ;;  %4545 = vmatpush.msrb.mxu1 %v1805_v23  ;;  %v1903_v22 = vld [vmem:[%s5853_s6 + $0x31d0] sm:$0xff]  ;;  %v1853_v23 = vld [vmem:[%s5853_s6 + $0x3040] sm:$0xff] }
 0x370   : > { %4566 = vmatpush.msrb.mxu2 %v1820_v24  ;;  %4585 = vmatpush.msrb.mxu3 %v1837_v25  ;;  %v1870_v24 = vld [vmem:[%s5853_s6 + $0x30c8] sm:$0xff]  ;;  %v1885_v25 = vld [vmem:[%s5853_s6 + $0x3140] sm:$0xff] }
 0x371   : > { %4527 = vmatpush.msrb.mxu0 %v1787_v26  ;;  %4546 = vmatpush.msrb.mxu1 %v1804_v27  ;;  %v1902_v26 = vld [vmem:[%s5853_s6 + $0x31c8] sm:$0xff]  ;;  %v1852_v27 = vld [vmem:[%s5853_s6 + $0x3038] sm:$0xff] }
 0x372   : > { %4567 = vmatpush.msrb.mxu2 %v1819_v28  ;;  %4586 = vmatpush.msrb.mxu3 %v1836_v29  ;;  %v1869_v28 = vld [vmem:[%s5853_s6 + $0x30c0] sm:$0xff]  ;;  %v1884_v29 = vld [vmem:[%s5853_s6 + $0x3138] sm:$0xff] }
 0x373   : > { %4528 = vmatpush.msrb.mxu0 %v1786_v30  ;;  %4547 = vmatpush.msrb.mxu1 %v1803_v31  ;;  %v1901_v30 = vld [vmem:[%s5853_s6 + $0x31c0] sm:$0xff]  ;;  %v1851_v31 = vld [vmem:[%s5853_s6 + $0x3030] sm:$0xff] }
 0x374   : > { %4568 = vmatpush.msrb.mxu2 %v1818_v32  ;;  %4587 = vmatpush.msrb.mxu3 %v1835_v33  ;;  %v1868_v32 = vld [vmem:[%s5853_s6 + $0x30b8] sm:$0xff]  ;;  %v1883_v33 = vld [vmem:[%s5853_s6 + $0x3130] sm:$0xff] }
 0x375   : > { %4529 = vmatpush.msrb.mxu0 %v1785_v34  ;;  %4548 = vmatpush.msrb.mxu1 %v1802_v35  ;;  %v1900_v34 = vld [vmem:[%s5853_s6 + $0x31b8] sm:$0xff]  ;;  %v1850_v35 = vld [vmem:[%s5853_s6 + $0x3028] sm:$0xff] }
 0x376   : > { %4569 = vmatpush.msrb.mxu2 %v1817_v36  ;;  %4588 = vmatpush.msrb.mxu3 %v1834_v37  ;;  %v1867_v36 = vld [vmem:[%s5853_s6 + $0x30b0] sm:$0xff]  ;;  %v1882_v37 = vld [vmem:[%s5853_s6 + $0x3128] sm:$0xff] }
 0x377   : > { %4530 = vmatpush.msrb.mxu0 %v1784_v38  ;;  %4549 = vmatpush.msrb.mxu1 %v1801_v39  ;;  %v1899_v38 = vld [vmem:[%s5853_s6 + $0x31b0] sm:$0xff]  ;;  %v2715_v39 = vpop.f32.mrf.mxu1 }
 0x378   : > { %4570 = vmatpush.msrb.mxu2 %v1816_v40  ;;  %4589 = vmatpush.msrb.mxu3 %v1833_v41  ;;  %v1849_v40 = vld [vmem:[%s5853_s6 + $0x3020] sm:$0xff]  ;;  %v1866_v41 = vld [vmem:[%s5853_s6 + $0x30a8] sm:$0xff] }
 0x379   : > { %4531 = vmatpush.msrb.mxu0 %v1783_v42  ;;  %4550 = vmatpush.msrb.mxu1 %v1800_v43  ;;  %v1881_v42 = vld [vmem:[%s5853_s6 + $0x3120] sm:$0xff]  ;;  %v1898_v43 = vld [vmem:[%s5853_s6 + $0x31a8] sm:$0xff] }
 0x37a   : > { %4571 = vmatpush.msrb.mxu2 %v1815_v44  ;;  %4590 = vmatpush.msrb.mxu3 %v1832_v45  ;;  %v2695_v44 = vpop.f32.mrf.mxu0  ;;  %v1848_v45 = vld [vmem:[%s5853_s6 + $0x3018] sm:$0xff] }
 0x37b   : > { %4532 = vmatpush.msrb.mxu0 %v1782_v46  ;;  %4551 = vmatpush.msrb.mxu1 %v1799_v47  ;;  %v1865_v46 = vld [vmem:[%s5853_s6 + $0x30a0] sm:$0xff]  ;;  %v2716_v47 = vadd.f32 %v2715_v39, %v2695_v44  ;;  %v1935_v39 = vld [vmem:[%s5853_s6 + $0x32d0] sm:$0xff]  ;;  %v1934_v44 = vld [vmem:[%s5853_s6 + $0x32c8] sm:$0xff] }
 0x37c   : > { %4572 = vmatpush.msrb.mxu2 %v1814_v49  ;;  %4591 = vmatpush.msrb.mxu3 %v1831_v50  ;;  %v1897_v49 = vld [vmem:[%s5853_s6 + $0x31a0] sm:$0xff]  ;;  %v2735_v50 = vpop.f32.mrf.mxu2 }
 0x37d   : > { %4533 = vmatpush.msrb.mxu0 %v1781_v51  ;;  %4552 = vmatpush.msrb.mxu1 %v1798_v52  ;;  %v1847_v51 = vld [vmem:[%s5853_s6 + $0x3010] sm:$0xff]  ;;  %v1864_v52 = vld [vmem:[%s5853_s6 + $0x3098] sm:$0xff] }
 0x37e   : > { %4573 = vmatpush.msrb.mxu2 %v1813_v53  ;;  %4592 = vmatpush.msrb.mxu3 %v1830_v54  ;;  %v1879_v53 = vld [vmem:[%s5853_s6 + $0x3110] sm:$0xff]  ;;  %v1896_v54 = vld [vmem:[%s5853_s6 + $0x3198] sm:$0xff] }
 0x37f   : > { %4534 = vmatmul.f32.vlgmr.msrb.gmra.mxu0 %v2506_v55  ;;  %4574 = vmatmul.f32.vlgmr.msrb.gmra.mxu2 %v2508_v56  ;;  %v1846_v55 = vld [vmem:[%s5853_s6 + $0x3008] sm:$0xff]  ;;  %v1863_v56 = vld [vmem:[%s5853_s6 + $0x3090] sm:$0xff] }
 0x380   : > { %4598 = vmatpush.msra.mxu0 %v1860_v57  ;;  %4638 = vmatpush.msra.mxu2 %v1892_v58  ;;  %v302_v57 = vld [vmem:[%s5835_s8 + $0xc8] sm:$0xff]  ;;  %v2736_v58 = vadd.f32 %v2735_v50, %v2716_v47  ;;  %v1966_v47 = vld [vmem:[%s5853_s6 + $0x33c8] sm:$0xff] }
 0x381   : > { %4553 = vmatpush.msrb.mxu1 %v1797_v59  ;;  %4593 = vmatpush.msrb.mxu3 %v1829_v60  ;;  %v1878_v59 = vld [vmem:[%s5853_s6 + $0x3108] sm:$0xff]  ;;  %v1895_v60 = vld [vmem:[%s5853_s6 + $0x3190] sm:$0xff]  ;;  %2511 = vst [vmem:[#allocation1 + $0x20] ss:$4 sm:$0xff] %v302_v57  ;;  %v1964_v57 = vld [vmem:[%s5853_s6 + $0x33b8] sm:$0xff] }
 0x382   : > { %4554 = vmatmul.f32.vlgmr.msrb.gmra.mxu1 %v2507_v61  ;;  %4594 = vmatmul.f32.vlgmr.msrb.gmra.mxu3 %v2509_v62  ;;  %v2755_v61 = vpop.f32.mrf.mxu3  ;;  %v1845_v62 = vld [vmem:[%s5853_s6 + $0x3000] sm:$0xff] }
 0x383   : > { %4599 = vmatpush.msra.mxu0 %v1859_v63  ;;  %4618 = vmatpush.msra.mxu1 %v1876_v0  ;;  %v1862_v63 = vld [vmem:[%s5853_s6 + $0x3088] sm:$0xff]  ;;  %v1877_v0 = vld [vmem:[%s5853_s6 + $0x3100] sm:$0xff] }
 0x384   : > { %4639 = vmatpush.msra.mxu2 %v1891_v1  ;;  %4658 = vmatpush.msra.mxu3 %v1908_v2  ;;  %v1894_v1 = vld [vmem:[%s5853_s6 + $0x3188] sm:$0xff]  ;;  %v2512_v2 = vld.sshfl [vmem:[#allocation1] sm:$0xff pattern:$0x73625140] }
 0x385   : > { %4600 = vmatpush.msra.mxu0 %v1858_v3  ;;  %4619 = vmatpush.msra.mxu1 %v1875_v4  ;;  %v2514_v3 = vld.sshfl [vmem:[#allocation1 + $0x10] sm:$0xff pattern:$0x73625140]  ;;  %v2756_v4 = vadd.f32 %v2755_v61, %v2736_v58 }
 0x386   : > { %4640 = vmatpush.msra.mxu2 %v1890_v5  ;;  %4659 = vmatpush.msra.mxu3 %v1907_v6  ;;  %v1924_v5 = vld [vmem:[%s5853_s6 + $0x3278] sm:$0xff] }
 0x387   : > { %4601 = vmatpush.msra.mxu0 %v1857_v7  ;;  %4620 = vmatpush.msra.mxu1 %v1874_v8  ;;  %v1956_v6 = vld [vmem:[%s5853_s6 + $0x3378] sm:$0xff]  ;;  %v2775_v7 = vpop.f32.mrf.mxu0  ;;  %v1861_v8 = vld [vmem:[%s5853_s6 + $0x3080] sm:$0xff] }
 0x388   : > { %4641 = vmatpush.msra.mxu2 %v1889_v9  ;;  %4660 = vmatpush.msra.mxu3 %v1906_v10  ;;  %v1893_v9 = vld [vmem:[%s5853_s6 + $0x3180] sm:$0xff]  ;;  %v2513_v10 = vld.sshfl [vmem:[#allocation1 + $0x8] sm:$0xff pattern:$0x73625140] }
 0x389   : > { %4602 = vmatpush.msra.mxu0 %v1856_v11  ;;  %4621 = vmatpush.msra.mxu1 %v1873_v12  ;;  %v2515_v11 = vld.sshfl [vmem:[#allocation1 + $0x18] sm:$0xff pattern:$0x73625140]  ;;  %v1923_v12 = vld [vmem:[%s5853_s6 + $0x3270] sm:$0xff] }
 0x38a   : > { %4642 = vmatpush.msra.mxu2 %v1888_v13  ;;  %4661 = vmatpush.msra.mxu3 %v1905_v14  ;;  %v1940_v13 = vld [vmem:[%s5853_s6 + $0x32f8] sm:$0xff]  ;;  %v2776_v14 = vadd.f32 %v2775_v7, %v2756_v4  ;;  %v1962_v4 = vld [vmem:[%s5853_s6 + $0x33a8] sm:$0xff]  ;;  %v1929_v7 = vld [vmem:[%s5853_s6 + $0x32a0] sm:$0xff] }
 0x38b   : > { %4603 = vmatpush.msra.mxu0 %v1855_v15  ;;  %4622 = vmatpush.msra.mxu1 %v1872_v16  ;;  %v1955_v15 = vld [vmem:[%s5853_s6 + $0x3370] sm:$0xff]  ;;  %v1972_v16 = vld [vmem:[%s5853_s6 + $0x33f8] sm:$0xff] }
 0x38c   : > { %4643 = vmatpush.msra.mxu2 %v1887_v17  ;;  %4662 = vmatpush.msra.mxu3 %v1904_v18  ;;  %v2795_v17 = vpop.f32.mrf.mxu1  ;;  %v1922_v18 = vld [vmem:[%s5853_s6 + $0x3268] sm:$0xff] }
 0x38d   : > { %4604 = vmatpush.msra.mxu0 %v1854_v19  ;;  %4623 = vmatpush.msra.mxu1 %v1871_v20  ;;  %v1939_v19 = vld [vmem:[%s5853_s6 + $0x32f0] sm:$0xff]  ;;  %v1954_v20 = vld [vmem:[%s5853_s6 + $0x3368] sm:$0xff] }
 0x38e   : > { %4644 = vmatpush.msra.mxu2 %v1886_v21  ;;  %4663 = vmatpush.msra.mxu3 %v1903_v22  ;;  %v1971_v21 = vld [vmem:[%s5853_s6 + $0x33f0] sm:$0xff]  ;;  %v1921_v22 = vld [vmem:[%s5853_s6 + $0x3260] sm:$0xff] }
 0x38f   : > { %4605 = vmatpush.msra.mxu0 %v1853_v23  ;;  %4624 = vmatpush.msra.mxu1 %v1870_v24  ;;  %v1938_v23 = vld [vmem:[%s5853_s6 + $0x32e8] sm:$0xff]  ;;  %v2796_v24 = vadd.f32 %v2795_v17, %v2776_v14  ;;  %v1943_v14 = vld [vmem:[%s5853_s6 + $0x3310] sm:$0xff] }
 0x390   : > { %4645 = vmatpush.msra.mxu2 %v1885_v25  ;;  %4664 = vmatpush.msra.mxu3 %v1902_v26  ;;  %v1953_v25 = vld [vmem:[%s5853_s6 + $0x3360] sm:$0xff]  ;;  %v1970_v26 = vld [vmem:[%s5853_s6 + $0x33e8] sm:$0xff]  ;;  %v1927_v17 = vld [vmem:[%s5853_s6 + $0x3290] sm:$0xff] }
 0x391   : > { %4606 = vmatpush.msra.mxu0 %v1852_v27  ;;  %4625 = vmatpush.msra.mxu1 %v1869_v28  ;;  %v2815_v27 = vpop.f32.mrf.mxu2  ;;  %v1920_v28 = vld [vmem:[%s5853_s6 + $0x3258] sm:$0xff] }
 0x392   : > { %4646 = vmatpush.msra.mxu2 %v1884_v29  ;;  %4665 = vmatpush.msra.mxu3 %v1901_v30  ;;  %v1937_v29 = vld [vmem:[%s5853_s6 + $0x32e0] sm:$0xff]  ;;  %v1952_v30 = vld [vmem:[%s5853_s6 + $0x3358] sm:$0xff] }
 0x393   : > { %4607 = vmatpush.msra.mxu0 %v1851_v31  ;;  %4626 = vmatpush.msra.mxu1 %v1868_v32  ;;  %v1969_v31 = vld [vmem:[%s5853_s6 + $0x33e0] sm:$0xff]  ;;  %v1919_v32 = vld [vmem:[%s5853_s6 + $0x3250] sm:$0xff] }
 0x394   : > { %4647 = vmatpush.msra.mxu2 %v1883_v33  ;;  %4666 = vmatpush.msra.mxu3 %v1900_v34  ;;  %v1936_v33 = vld [vmem:[%s5853_s6 + $0x32d8] sm:$0xff]  ;;  %v2816_v34 = vadd.f32 %v2815_v27, %v2796_v24  ;;  %v1926_v24 = vld [vmem:[%s5853_s6 + $0x3288] sm:$0xff] }
 0x395   : > { %4608 = vmatpush.msra.mxu0 %v1850_v35  ;;  %4627 = vmatpush.msra.mxu1 %v1867_v36  ;;  %v1951_v35 = vld [vmem:[%s5853_s6 + $0x3350] sm:$0xff]  ;;  %v1968_v36 = vld [vmem:[%s5853_s6 + $0x33d8] sm:$0xff] }
 0x396   : > { %4648 = vmatpush.msra.mxu2 %v1882_v37  ;;  %4667 = vmatpush.msra.mxu3 %v1899_v38  ;;  %v2835_v37 = vpop.f32.mrf.mxu3  ;;  %v1918_v38 = vld [vmem:[%s5853_s6 + $0x3248] sm:$0xff] }
 0x397   : > { %4609 = vmatpush.msra.mxu0 %v1849_v40  ;;  %4628 = vmatpush.msra.mxu1 %v1866_v41  ;;  %v1950_v40 = vld [vmem:[%s5853_s6 + $0x3348] sm:$0xff]  ;;  %v1967_v41 = vld [vmem:[%s5853_s6 + $0x33d0] sm:$0xff] }
 0x398   : > { %4649 = vmatpush.msra.mxu2 %v1881_v42  ;;  %4668 = vmatpush.msra.mxu3 %v1898_v43  ;;  %v2855_v42 = vpop.f32.mrf.mxu0  ;;  %v1917_v43 = vld [vmem:[%s5853_s6 + $0x3240] sm:$0xff] }
 0x399   : > { %4610 = vmatpush.msra.mxu0 %v1848_v45  ;;  %4629 = vmatpush.msra.mxu1 %v1865_v46  ;;  %v2836_v45 = vadd.f32 %v2835_v37, %v2816_v34  ;;  %v1949_v46 = vld [vmem:[%s5853_s6 + $0x3340] sm:$0xff]  ;;  %v2895_v58 = vpop.f32.mrf.mxu2  ;;  %v2519_v37 = vld.sshfl [vmem:[#allocation1 + $0x38] sm:$0xff pattern:$0x73625140] }
 0x39a   : > { %4650 = vmatpush.msra.mxu2 %v1880_v48  ;;  %4669 = vmatpush.msra.mxu3 %v1897_v49  ;;  %v1916_v48 = vld [vmem:[%s5853_s6 + $0x3238] sm:$0xff]  ;;  %v1933_v49 = vld [vmem:[%s5853_s6 + $0x32c0] sm:$0xff] }
 0x39b   : > { %4611 = vmatpush.msra.mxu0 %v1847_v51  ;;  %4630 = vmatpush.msra.mxu1 %v1864_v52  ;;  %v2856_v50 = vadd.f32 %v2855_v42, %v2836_v45  ;;  %v1948_v51 = vld [vmem:[%s5853_s6 + $0x3338] sm:$0xff]  ;;  %v1965_v52 = vld [vmem:[%s5853_s6 + $0x33c0] sm:$0xff]  ;;  %v2003_v45 = vld [vmem:[%s5853_s6 + $0x34f0] sm:$0xff] }
 0x39c   : > { %4651 = vmatpush.msra.mxu2 %v1879_v53  ;;  %4670 = vmatpush.msra.mxu3 %v1896_v54  ;;  %v2875_v53 = vpop.f32.mrf.mxu1  ;;  %v1915_v54 = vld [vmem:[%s5853_s6 + $0x3230] sm:$0xff]  ;;  %v1957_v34 = vld [vmem:[%s5853_s6 + $0x3380] sm:$0xff]  ;;  %v2036_v42 = vld [vmem:[%s5853_s6 + $0x35f8] sm:$0xff] }
 0x39d   : > { %4612 = vmatpush.msra.mxu0 %v1846_v55  ;;  %4631 = vmatpush.msra.mxu1 %v1863_v56  ;;  %v1932_v55 = vld [vmem:[%s5853_s6 + $0x32b8] sm:$0xff]  ;;  %v1947_v56 = vld [vmem:[%s5853_s6 + $0x3330] sm:$0xff]  ;;  %v2876_v61 = vadd.f32 %v2875_v53, %v2856_v50  ;;  %v2002_v50 = vld [vmem:[%s5853_s6 + $0x34e8] sm:$0xff] }
 0x39e   : > { %4652 = vmatpush.msra.mxu2 %v1878_v59  ;;  %4671 = vmatpush.msra.mxu3 %v1895_v60  ;;  %v1914_v59 = vld [vmem:[%s5853_s6 + $0x3228] sm:$0xff]  ;;  %v1931_v60 = vld [vmem:[%s5853_s6 + $0x32b0] sm:$0xff] }
 0x39f   : > { %4613 = vmatpush.msra.mxu0 %v1845_v62  ;;  %4632 = vmatpush.msra.mxu1 %v1862_v63  ;;  %v1946_v62 = vld [vmem:[%s5853_s6 + $0x3328] sm:$0xff]  ;;  %v1963_v63 = vld [vmem:[%s5853_s6 + $0x33b0] sm:$0xff] }
 0x3a0   : > { %4653 = vmatpush.msra.mxu2 %v1877_v0  ;;  %4672 = vmatpush.msra.mxu3 %v1894_v1  ;;  %v1913_v0 = vld [vmem:[%s5853_s6 + $0x3220] sm:$0xff]  ;;  %v1930_v1 = vld [vmem:[%s5853_s6 + $0x32a8] sm:$0xff] }
 0x3a1   : > { %4614 = vmatmul.f32.vlgmr.msra.gmra.mxu0 %v2512_v2  ;;  %4654 = vmatmul.f32.vlgmr.msra.gmra.mxu2 %v2514_v3  ;;  %v2896_v2 = vadd.f32 %v2895_v58, %v2876_v61  ;;  %v1945_v3 = vld [vmem:[%s5853_s6 + $0x3320] sm:$0xff]  ;;  %v2975_v27 = vpop.f32.mrf.mxu2  ;;  %v2034_v53 = vld [vmem:[%s5853_s6 + $0x35e8] sm:$0xff]  ;;  %v2000_v61 = vld [vmem:[%s5853_s6 + $0x34d8] sm:$0xff] }
 0x3a2   : > { %4678 = vmatpush.msrb.mxu0 %v1924_v5  ;;  %4718 = vmatpush.msrb.mxu2 %v1956_v6  ;;  %v2915_v5 = vpop.f32.mrf.mxu3  ;;  %v1912_v6 = vld [vmem:[%s5853_s6 + $0x3218] sm:$0xff]  ;;  %v2033_v58 = vld [vmem:[%s5853_s6 + $0x35e0] sm:$0xff] }
 0x3a3   : > { %4633 = vmatpush.msra.mxu1 %v1861_v8  ;;  %4673 = vmatpush.msra.mxu3 %v1893_v9  ;;  %v1944_v8 = vld [vmem:[%s5853_s6 + $0x3318] sm:$0xff]  ;;  %v1961_v9 = vld [vmem:[%s5853_s6 + $0x33a0] sm:$0xff] }
 0x3a4   : > { %4634 = vmatmul.f32.vlgmr.msra.gmra.mxu1 %v2513_v10  ;;  %4674 = vmatmul.f32.vlgmr.msra.gmra.mxu3 %v2515_v11  ;;  %v2935_v10 = vpop.f32.mrf.mxu0  ;;  %v1911_v11 = vld [vmem:[%s5853_s6 + $0x3210] sm:$0xff] }
 0x3a5   : > { %4679 = vmatpush.msrb.mxu0 %v1923_v12  ;;  %4698 = vmatpush.msrb.mxu1 %v1940_v13  ;;  %v1928_v12 = vld [vmem:[%s5853_s6 + $0x3298] sm:$0xff]  ;;  %v2916_v13 = vadd.f32 %v2915_v5, %v2896_v2  ;;  %v1999_v2 = vld [vmem:[%s5853_s6 + $0x34d0] sm:$0xff] }
 0x3a6   : > { %4719 = vmatpush.msrb.mxu2 %v1955_v15  ;;  %4738 = vmatpush.msrb.mxu3 %v1972_v16  ;;  %v1960_v15 = vld [vmem:[%s5853_s6 + $0x3398] sm:$0xff]  ;;  %v1910_v16 = vld [vmem:[%s5853_s6 + $0x3208] sm:$0xff]  ;;  %v2031_v5 = vld [vmem:[%s5853_s6 + $0x35d0] sm:$0xff] }
 0x3a7   : > { %4680 = vmatpush.msrb.mxu0 %v1922_v18  ;;  %4699 = vmatpush.msrb.mxu1 %v1939_v19  ;;  %v303_v18 = vld [vmem:[%s5835_s8 + $0xd0] sm:$0xff]  ;;  %v2936_v19 = vadd.f32 %v2935_v10, %v2916_v13  ;;  %v2030_v10 = vld [vmem:[%s5853_s6 + $0x35c8] sm:$0xff]  ;;  %v1997_v13 = vld [vmem:[%s5853_s6 + $0x34c0] sm:$0xff] }
 0x3a8   : > { %4720 = vmatpush.msrb.mxu2 %v1954_v20  ;;  %4739 = vmatpush.msrb.mxu3 %v1971_v21  ;;  %v1942_v20 = vld [vmem:[%s5853_s6 + $0x3308] sm:$0xff]  ;;  %v1959_v21 = vld [vmem:[%s5853_s6 + $0x3390] sm:$0xff]  ;;  %2520 = vst [vmem:[#allocation1] ss:$4 sm:$0xff] %v303_v18  ;;  %v1996_v18 = vld [vmem:[%s5853_s6 + $0x34b8] sm:$0xff] }
 0x3a9   : > { %4681 = vmatpush.msrb.mxu0 %v1921_v22  ;;  %4700 = vmatpush.msrb.mxu1 %v1938_v23  ;;  %v2955_v22 = vpop.f32.mrf.mxu1  ;;  %v1909_v23 = vld [vmem:[%s5853_s6 + $0x3200] sm:$0xff] }
 0x3aa   : > { %4721 = vmatpush.msrb.mxu2 %v1953_v25  ;;  %4740 = vmatpush.msrb.mxu3 %v1970_v26  ;;  %v1941_v25 = vld [vmem:[%s5853_s6 + $0x3300] sm:$0xff]  ;;  %v1958_v26 = vld [vmem:[%s5853_s6 + $0x3388] sm:$0xff] }
 0x3ab   : > { %4682 = vmatpush.msrb.mxu0 %v1920_v28  ;;  %4701 = vmatpush.msrb.mxu1 %v1937_v29  ;;  %v2516_v28 = vld.sshfl [vmem:[#allocation1 + $0x20] sm:$0xff pattern:$0x73625140]  ;;  %v2518_v29 = vld.sshfl [vmem:[#allocation1 + $0x30] sm:$0xff pattern:$0x73625140] }
 0x3ac   : > { %4722 = vmatpush.msrb.mxu2 %v1952_v30  ;;  %4741 = vmatpush.msrb.mxu3 %v1969_v31  ;;  %v2956_v30 = vadd.f32 %v2955_v22, %v2936_v19  ;;  %v1988_v31 = vld [vmem:[%s5853_s6 + $0x3478] sm:$0xff] }
 0x3ad   : > { %4683 = vmatpush.msrb.mxu0 %v1919_v32  ;;  %4702 = vmatpush.msrb.mxu1 %v1936_v33  ;;  %v2020_v32 = vld [vmem:[%s5853_s6 + $0x3578] sm:$0xff]  ;;  %v1925_v33 = vld [vmem:[%s5853_s6 + $0x3280] sm:$0xff] }
 0x3ae   : > { %4723 = vmatpush.msrb.mxu2 %v1951_v35  ;;  %4742 = vmatpush.msrb.mxu3 %v1968_v36  ;;  %v2976_v35 = vadd.f32 %v2975_v27, %v2956_v30  ;;  %v2517_v36 = vld.sshfl [vmem:[#allocation1 + $0x28] sm:$0xff pattern:$0x73625140] }
 0x3af   : > { %4684 = vmatpush.msrb.mxu0 %v1918_v38  ;;  %4703 = vmatpush.msrb.mxu1 %v1935_v39  ;;  %v2995_v38 = vpop.f32.mrf.mxu3  ;;  %v1987_v39 = vld [vmem:[%s5853_s6 + $0x3470] sm:$0xff] }
 0x3b0   : > { %4724 = vmatpush.msrb.mxu2 %v1950_v40  ;;  %4743 = vmatpush.msrb.mxu3 %v1967_v41  ;;  %v2004_v40 = vld [vmem:[%s5853_s6 + $0x34f8] sm:$0xff]  ;;  %v2019_v41 = vld [vmem:[%s5853_s6 + $0x3570] sm:$0xff] }
 0x3b1   : > { %4685 = vmatpush.msrb.mxu0 %v1917_v43  ;;  %4704 = vmatpush.msrb.mxu1 %v1934_v44  ;;  %v3015_v43 = vpop.f32.mrf.mxu0  ;;  %v1986_v44 = vld [vmem:[%s5853_s6 + $0x3468] sm:$0xff] }
 0x3b2   : > { %4725 = vmatpush.msrb.mxu2 %v1949_v46  ;;  %4744 = vmatpush.msrb.mxu3 %v1966_v47  ;;  %v2996_v46 = vadd.f32 %v2995_v38, %v2976_v35  ;;  %v2018_v47 = vld [vmem:[%s5853_s6 + $0x3568] sm:$0xff] }
 0x3b3   : > { %4686 = vmatpush.msrb.mxu0 %v1916_v48  ;;  %4705 = vmatpush.msrb.mxu1 %v1933_v49  ;;  %v2035_v48 = vld [vmem:[%s5853_s6 + $0x35f0] sm:$0xff]  ;;  %v1985_v49 = vld [vmem:[%s5853_s6 + $0x3460] sm:$0xff] }
 0x3b4   : > { %4726 = vmatpush.msrb.mxu2 %v1948_v51  ;;  %4745 = vmatpush.msrb.mxu3 %v1965_v52  ;;  %v3016_v51 = vadd.f32 %v3015_v43, %v2996_v46  ;;  %v2017_v52 = vld [vmem:[%s5853_s6 + $0x3560] sm:$0xff] }
 0x3b5   : > { %4687 = vmatpush.msrb.mxu0 %v1915_v54  ;;  %4706 = vmatpush.msrb.mxu1 %v1932_v55  ;;  %v3035_v54 = vpop.f32.mrf.mxu1  ;;  %v1984_v55 = vld [vmem:[%s5853_s6 + $0x3458] sm:$0xff]  ;;  %v304_v46 = vld [vmem:[%s5835_s8 + $0xd8] sm:$0xff] }
 0x3b6   : > { %4727 = vmatpush.msrb.mxu2 %v1947_v56  ;;  %4746 = vmatpush.msrb.mxu3 %v1964_v57  ;;  %v2001_v56 = vld [vmem:[%s5853_s6 + $0x34e0] sm:$0xff]  ;;  %v2016_v57 = vld [vmem:[%s5853_s6 + $0x3558] sm:$0xff]  ;;  %2521 = vst [vmem:[#allocation1 + $0x20] ss:$4 sm:$0xff] %v304_v46 }
 0x3b7   : > { %4688 = vmatpush.msrb.mxu0 %v1914_v59  ;;  %4707 = vmatpush.msrb.mxu1 %v1931_v60  ;;  %v3055_v59 = vpop.f32.mrf.mxu2  ;;  %v1983_v60 = vld [vmem:[%s5853_s6 + $0x3450] sm:$0xff]  ;;  %v2060_v46 = vld [vmem:[%s5853_s6 + $0x36b8] sm:$0xff] }
 0x3b8   : > { %4728 = vmatpush.msrb.mxu2 %v1946_v62  ;;  %4747 = vmatpush.msrb.mxu3 %v1963_v63  ;;  %v3036_v62 = vadd.f32 %v3035_v54, %v3016_v51  ;;  %v2015_v63 = vld [vmem:[%s5853_s6 + $0x3550] sm:$0xff]  ;;  %v1990_v51 = vld [vmem:[%s5853_s6 + $0x3488] sm:$0xff] }
 0x3b9   : > { %4689 = vmatpush.msrb.mxu0 %v1913_v0  ;;  %4708 = vmatpush.msrb.mxu1 %v1930_v1  ;;  %v2032_v0 = vld [vmem:[%s5853_s6 + $0x35d8] sm:$0xff]  ;;  %v1982_v1 = vld [vmem:[%s5853_s6 + $0x3448] sm:$0xff] }
 0x3ba   : > { %4729 = vmatpush.msrb.mxu2 %v1945_v3  ;;  %4748 = vmatpush.msrb.mxu3 %v1962_v4  ;;  %v3056_v3 = vadd.f32 %v3055_v59, %v3036_v62  ;;  %v2014_v4 = vld [vmem:[%s5853_s6 + $0x3548] sm:$0xff]  ;;  %v2084_v59 = vld [vmem:[%s5853_s6 + $0x3778] sm:$0xff]  ;;  %v2021_v62 = vld [vmem:[%s5853_s6 + $0x3580] sm:$0xff] }
 0x3bb   : > { %4690 = vmatpush.msrb.mxu0 %v1912_v6  ;;  %4709 = vmatpush.msrb.mxu1 %v1929_v7  ;;  %v3075_v6 = vpop.f32.mrf.mxu3  ;;  %v1981_v7 = vld [vmem:[%s5853_s6 + $0x3440] sm:$0xff]  ;;  %v2022_v54 = vld [vmem:[%s5853_s6 + $0x3588] sm:$0xff] }
 0x3bc   : > { %4730 = vmatpush.msrb.mxu2 %v1944_v8  ;;  %4749 = vmatpush.msrb.mxu3 %v1961_v9  ;;  %v1998_v8 = vld [vmem:[%s5853_s6 + $0x34c8] sm:$0xff]  ;;  %v2013_v9 = vld [vmem:[%s5853_s6 + $0x3540] sm:$0xff] }
 0x3bd   : > { %4691 = vmatpush.msrb.mxu0 %v1911_v11  ;;  %4710 = vmatpush.msrb.mxu1 %v1928_v12  ;;  %v3095_v11 = vpop.f32.mrf.mxu0  ;;  %v1980_v12 = vld [vmem:[%s5853_s6 + $0x3438] sm:$0xff]  ;;  %v3115_v22 = vpop.f32.mrf.mxu1 }
 0x3be   : > { %4731 = vmatpush.msrb.mxu2 %v1943_v14  ;;  %4750 = vmatpush.msrb.mxu3 %v1960_v15  ;;  %v3076_v14 = vadd.f32 %v3075_v6, %v3056_v3  ;;  %v2012_v15 = vld [vmem:[%s5853_s6 + $0x3538] sm:$0xff] }
 0x3bf   : > { %4692 = vmatpush.msrb.mxu0 %v1910_v16  ;;  %4711 = vmatpush.msrb.mxu1 %v1927_v17  ;;  %v2029_v16 = vld [vmem:[%s5853_s6 + $0x35c0] sm:$0xff]  ;;  %v1979_v17 = vld [vmem:[%s5853_s6 + $0x3430] sm:$0xff]  ;;  %v3135_v27 = vpop.f32.mrf.mxu2  ;;  %v2068_v3 = vld [vmem:[%s5853_s6 + $0x36f8] sm:$0xff] }
 0x3c0   : > { %4732 = vmatpush.msrb.mxu2 %v1942_v20  ;;  %4751 = vmatpush.msrb.mxu3 %v1959_v21  ;;  %v3096_v19 = vadd.f32 %v3095_v11, %v3076_v14  ;;  %v2011_v20 = vld [vmem:[%s5853_s6 + $0x3530] sm:$0xff]  ;;  %v2028_v21 = vld [vmem:[%s5853_s6 + $0x35b8] sm:$0xff]  ;;  %v2066_v14 = vld [vmem:[%s5853_s6 + $0x36e8] sm:$0xff] }
 0x3c1   : > { %4693 = vmatpush.msrb.mxu0 %v1909_v23  ;;  %4712 = vmatpush.msrb.mxu1 %v1926_v24  ;;  %v1978_v23 = vld [vmem:[%s5853_s6 + $0x3428] sm:$0xff]  ;;  %v1995_v24 = vld [vmem:[%s5853_s6 + $0x34b0] sm:$0xff]  ;;  %v2100_v6 = vld [vmem:[%s5853_s6 + $0x37f8] sm:$0xff] }
 0x3c2   : > { %4733 = vmatpush.msrb.mxu2 %v1941_v25  ;;  %4752 = vmatpush.msrb.mxu3 %v1958_v26  ;;  %v2010_v25 = vld [vmem:[%s5853_s6 + $0x3528] sm:$0xff]  ;;  %v2027_v26 = vld [vmem:[%s5853_s6 + $0x35b0] sm:$0xff]  ;;  %v3116_v30 = vadd.f32 %v3115_v22, %v3096_v19  ;;  %v2065_v19 = vld [vmem:[%s5853_s6 + $0x36e0] sm:$0xff] }
 0x3c3   : > { %4694 = vmatmul.f32.vlgmr.msrb.gmra.mxu0 %v2516_v28  ;;  %4734 = vmatmul.f32.vlgmr.msrb.gmra.mxu2 %v2518_v29  ;;  %v1977_v28 = vld [vmem:[%s5853_s6 + $0x3420] sm:$0xff]  ;;  %v1994_v29 = vld [vmem:[%s5853_s6 + $0x34a8] sm:$0xff]  ;;  %v3155_v38 = vpop.f32.mrf.mxu3  ;;  %v2099_v11 = vld [vmem:[%s5853_s6 + $0x37f0] sm:$0xff] }
 0x3c4   : > { %4758 = vmatpush.msra.mxu0 %v1988_v31  ;;  %4798 = vmatpush.msra.mxu2 %v2020_v32  ;;  %v2009_v31 = vld [vmem:[%s5853_s6 + $0x3520] sm:$0xff]  ;;  %v2026_v32 = vld [vmem:[%s5853_s6 + $0x35a8] sm:$0xff]  ;;  %v3136_v35 = vadd.f32 %v3135_v27, %v3116_v30  ;;  %v2096_v27 = vld [vmem:[%s5853_s6 + $0x37d8] sm:$0xff] }
 0x3c5   : > { %4713 = vmatpush.msrb.mxu1 %v1925_v33  ;;  %4753 = vmatpush.msrb.mxu3 %v1957_v34  ;;  %v1976_v33 = vld [vmem:[%s5853_s6 + $0x3418] sm:$0xff]  ;;  %v1993_v34 = vld [vmem:[%s5853_s6 + $0x34a0] sm:$0xff]  ;;  %v3175_v43 = vpop.f32.mrf.mxu0  ;;  %v2063_v30 = vld [vmem:[%s5853_s6 + $0x36d0] sm:$0xff] }
 0x3c6   : > { %4714 = vmatmul.f32.vlgmr.msrb.gmra.mxu1 %v2517_v36  ;;  %4754 = vmatmul.f32.vlgmr.msrb.gmra.mxu3 %v2519_v37  ;;  %v2008_v36 = vld [vmem:[%s5853_s6 + $0x3518] sm:$0xff]  ;;  %v2025_v37 = vld [vmem:[%s5853_s6 + $0x35a0] sm:$0xff] }
 0x3c7   : > { %4759 = vmatpush.msra.mxu0 %v1987_v39  ;;  %4778 = vmatpush.msra.mxu1 %v2004_v40  ;;  %v1975_v39 = vld [vmem:[%s5853_s6 + $0x3410] sm:$0xff]  ;;  %v1992_v40 = vld [vmem:[%s5853_s6 + $0x3498] sm:$0xff]  ;;  %v2097_v22 = vld [vmem:[%s5853_s6 + $0x37e0] sm:$0xff] }
 0x3c8   : > { %4799 = vmatpush.msra.mxu2 %v2019_v41  ;;  %4818 = vmatpush.msra.mxu3 %v2036_v42  ;;  %v2007_v41 = vld [vmem:[%s5853_s6 + $0x3510] sm:$0xff]  ;;  %v2024_v42 = vld [vmem:[%s5853_s6 + $0x3598] sm:$0xff] }
 0x3c9   : > { %4760 = vmatpush.msra.mxu0 %v1986_v44  ;;  %4779 = vmatpush.msra.mxu1 %v2003_v45  ;;  %v1974_v44 = vld [vmem:[%s5853_s6 + $0x3408] sm:$0xff]  ;;  %v1991_v45 = vld [vmem:[%s5853_s6 + $0x3490] sm:$0xff] }
 0x3ca   : > { %4800 = vmatpush.msra.mxu2 %v2018_v47  ;;  %4819 = vmatpush.msra.mxu3 %v2035_v48  ;;  %v3156_v47 = vadd.f32 %v3155_v38, %v3136_v35  ;;  %v2006_v48 = vld [vmem:[%s5853_s6 + $0x3508] sm:$0xff] }
 0x3cb   : > { %4761 = vmatpush.msra.mxu0 %v1985_v49  ;;  %4780 = vmatpush.msra.mxu1 %v2002_v50  ;;  %v2023_v49 = vld [vmem:[%s5853_s6 + $0x3590] sm:$0xff]  ;;  %v1973_v50 = vld [vmem:[%s5853_s6 + $0x3400] sm:$0xff]  ;;  %v2062_v35 = vld [vmem:[%s5853_s6 + $0x36c8] sm:$0xff] }
 0x3cc   : > { %4801 = vmatpush.msra.mxu2 %v2017_v52  ;;  %4820 = vmatpush.msra.mxu3 %v2034_v53  ;;  %v3176_v52 = vadd.f32 %v3175_v43, %v3156_v47  ;;  %v2005_v53 = vld [vmem:[%s5853_s6 + $0x3500] sm:$0xff]  ;;  %v2094_v38 = vld [vmem:[%s5853_s6 + $0x37c8] sm:$0xff] }
 0x3cd   : > { %4762 = vmatpush.msra.mxu0 %v1984_v55  ;;  %4781 = vmatpush.msra.mxu1 %v2001_v56  ;;  %v3195_v55 = vpop.f32.mrf.mxu1  ;;  %v2522_v56 = vld.sshfl [vmem:[#allocation1] sm:$0xff pattern:$0x73625140] }
 0x3ce   : > { %4802 = vmatpush.msra.mxu2 %v2016_v57  ;;  %4821 = vmatpush.msra.mxu3 %v2033_v58  ;;  %v2524_v57 = vld.sshfl [vmem:[#allocation1 + $0x10] sm:$0xff pattern:$0x73625140]  ;;  %v2052_v58 = vld [vmem:[%s5853_s6 + $0x3678] sm:$0xff]  ;;  %v2093_v43 = vld [vmem:[%s5853_s6 + $0x37c0] sm:$0xff] }
 0x3cf   : > { %4763 = vmatpush.msra.mxu0 %v1983_v60  ;;  %4782 = vmatpush.msra.mxu1 %v2000_v61  ;;  %v3215_v60 = vpop.f32.mrf.mxu2  ;;  %v1989_v61 = vld [vmem:[%s5853_s6 + $0x3480] sm:$0xff] }
 0x3d0   : > { %4803 = vmatpush.msra.mxu2 %v2015_v63  ;;  %4822 = vmatpush.msra.mxu3 %v2032_v0  ;;  %v3196_v63 = vadd.f32 %v3195_v55, %v3176_v52  ;;  %v2523_v0 = vld.sshfl [vmem:[#allocation1 + $0x8] sm:$0xff pattern:$0x73625140] }
 0x3d1   : > { %4764 = vmatpush.msra.mxu0 %v1982_v1  ;;  %4783 = vmatpush.msra.mxu1 %v1999_v2  ;;  %v2525_v1 = vld.sshfl [vmem:[#allocation1 + $0x18] sm:$0xff pattern:$0x73625140]  ;;  %v2051_v2 = vld [vmem:[%s5853_s6 + $0x3670] sm:$0xff] }
 0x3d2   : > { %4804 = vmatpush.msra.mxu2 %v2014_v4  ;;  %4823 = vmatpush.msra.mxu3 %v2031_v5  ;;  %v3216_v4 = vadd.f32 %v3215_v60, %v3196_v63  ;;  %v2083_v5 = vld [vmem:[%s5853_s6 + $0x3770] sm:$0xff] }
 0x3d3   : > { %4765 = vmatpush.msra.mxu0 %v1981_v7  ;;  %4784 = vmatpush.msra.mxu1 %v1998_v8  ;;  %v3235_v7 = vpop.f32.mrf.mxu3  ;;  %v2050_v8 = vld [vmem:[%s5853_s6 + $0x3668] sm:$0xff] }
 0x3d4   : > { %4805 = vmatpush.msra.mxu2 %v2013_v9  ;;  %4824 = vmatpush.msra.mxu3 %v2030_v10  ;;  %v2067_v9 = vld [vmem:[%s5853_s6 + $0x36f0] sm:$0xff]  ;;  %v2082_v10 = vld [vmem:[%s5853_s6 + $0x3768] sm:$0xff] }
 0x3d5   : > { %4766 = vmatpush.msra.mxu0 %v1980_v12  ;;  %4785 = vmatpush.msra.mxu1 %v1997_v13  ;;  %v3255_v12 = vpop.f32.mrf.mxu0  ;;  %v2049_v13 = vld [vmem:[%s5853_s6 + $0x3660] sm:$0xff] }
 0x3d6   : > { %4806 = vmatpush.msra.mxu2 %v2012_v15  ;;  %4825 = vmatpush.msra.mxu3 %v2029_v16  ;;  %v3236_v15 = vadd.f32 %v3235_v7, %v3216_v4  ;;  %v2081_v16 = vld [vmem:[%s5853_s6 + $0x3760] sm:$0xff] }
 0x3d7   : > { %4767 = vmatpush.msra.mxu0 %v1979_v17  ;;  %4786 = vmatpush.msra.mxu1 %v1996_v18  ;;  %v2098_v17 = vld [vmem:[%s5853_s6 + $0x37e8] sm:$0xff]  ;;  %v2048_v18 = vld [vmem:[%s5853_s6 + $0x3658] sm:$0xff] }
 0x3d8   : > { %4807 = vmatpush.msra.mxu2 %v2011_v20  ;;  %4826 = vmatpush.msra.mxu3 %v2028_v21  ;;  %v3256_v20 = vadd.f32 %v3255_v12, %v3236_v15  ;;  %v2080_v21 = vld [vmem:[%s5853_s6 + $0x3758] sm:$0xff]  ;;  %v2087_v12 = vld [vmem:[%s5853_s6 + $0x3790] sm:$0xff]  ;;  %v2054_v15 = vld [vmem:[%s5853_s6 + $0x3688] sm:$0xff] }
 0x3d9   : > { %4768 = vmatpush.msra.mxu0 %v1978_v23  ;;  %4787 = vmatpush.msra.mxu1 %v1995_v24  ;;  %v3275_v23 = vpop.f32.mrf.mxu1  ;;  %v2047_v24 = vld [vmem:[%s5853_s6 + $0x3650] sm:$0xff] }
 0x3da   : > { %4808 = vmatpush.msra.mxu2 %v2010_v25  ;;  %4827 = vmatpush.msra.mxu3 %v2027_v26  ;;  %v2064_v25 = vld [vmem:[%s5853_s6 + $0x36d8] sm:$0xff]  ;;  %v2079_v26 = vld [vmem:[%s5853_s6 + $0x3750] sm:$0xff] }
 0x3db   : > { %4769 = vmatpush.msra.mxu0 %v1977_v28  ;;  %4788 = vmatpush.msra.mxu1 %v1994_v29  ;;  %v3295_v28 = vpop.f32.mrf.mxu2  ;;  %v2046_v29 = vld [vmem:[%s5853_s6 + $0x3648] sm:$0xff] }
 0x3dc   : > { %4809 = vmatpush.msra.mxu2 %v2009_v31  ;;  %4828 = vmatpush.msra.mxu3 %v2026_v32  ;;  %v3276_v31 = vadd.f32 %v3275_v23, %v3256_v20  ;;  %v2078_v32 = vld [vmem:[%s5853_s6 + $0x3748] sm:$0xff]  ;;  %v2528_v20 = vld.sshfl [vmem:[#allocation1 + $0x30] sm:$0xff pattern:$0x73625140]  ;;  %v2148_v23 = vld [vmem:[%s5853_s6 + $0x3978] sm:$0xff] }
 0x3dd   : > { %4770 = vmatpush.msra.mxu0 %v1976_v33  ;;  %4789 = vmatpush.msra.mxu1 %v1993_v34  ;;  %v2095_v33 = vld [vmem:[%s5853_s6 + $0x37d0] sm:$0xff]  ;;  %v2045_v34 = vld [vmem:[%s5853_s6 + $0x3640] sm:$0xff] }
 0x3de   : > { %4810 = vmatpush.msra.mxu2 %v2008_v36  ;;  %4829 = vmatpush.msra.mxu3 %v2025_v37  ;;  %v3296_v36 = vadd.f32 %v3295_v28, %v3276_v31  ;;  %v2077_v37 = vld [vmem:[%s5853_s6 + $0x3740] sm:$0xff]  ;;  %v2529_v28 = vld.sshfl [vmem:[#allocation1 + $0x38] sm:$0xff pattern:$0x73625140] }
 0x3df   : > { %4771 = vmatpush.msra.mxu0 %v1975_v39  ;;  %4790 = vmatpush.msra.mxu1 %v1992_v40  ;;  %v3315_v39 = vpop.f32.mrf.mxu3  ;;  %v2044_v40 = vld [vmem:[%s5853_s6 + $0x3638] sm:$0xff] }
 0x3e0   : > { %4811 = vmatpush.msra.mxu2 %v2007_v41  ;;  %4830 = vmatpush.msra.mxu3 %v2024_v42  ;;  %v2061_v41 = vld [vmem:[%s5853_s6 + $0x36c0] sm:$0xff]  ;;  %v2076_v42 = vld [vmem:[%s5853_s6 + $0x3738] sm:$0xff]  ;;  %v3316_v47 = vadd.f32 %v3315_v39, %v3296_v36  ;;  %v2131_v36 = vld [vmem:[%s5853_s6 + $0x38f0] sm:$0xff] }
 0x3e1   : > { %4772 = vmatpush.msra.mxu0 %v1974_v44  ;;  %4791 = vmatpush.msra.mxu1 %v1991_v45  ;;  %v3335_v44 = vpop.f32.mrf.mxu0  ;;  %v2043_v45 = vld [vmem:[%s5853_s6 + $0x3630] sm:$0xff]  ;;  %v3355_v55 = vpop.f32.mrf.mxu1  ;;  %v2132_v31 = vld [vmem:[%s5853_s6 + $0x38f8] sm:$0xff] }
 0x3e2   : > { %4812 = vmatpush.msra.mxu2 %v2006_v48  ;;  %4831 = vmatpush.msra.mxu3 %v2023_v49  ;;  %v2075_v48 = vld [vmem:[%s5853_s6 + $0x3730] sm:$0xff]  ;;  %v2092_v49 = vld [vmem:[%s5853_s6 + $0x37b8] sm:$0xff]  ;;  %v3336_v52 = vadd.f32 %v3335_v44, %v3316_v47  ;;  %v2162_v44 = vld [vmem:[%s5853_s6 + $0x39e8] sm:$0xff] }
 0x3e3   : > { %4773 = vmatpush.msra.mxu0 %v1973_v50  ;;  %4792 = vmatpush.msra.mxu1 %v1990_v51  ;;  %v2042_v50 = vld [vmem:[%s5853_s6 + $0x3628] sm:$0xff]  ;;  %v2059_v51 = vld [vmem:[%s5853_s6 + $0x36b0] sm:$0xff]  ;;  %v3375_v60 = vpop.f32.mrf.mxu2  ;;  %v2129_v47 = vld [vmem:[%s5853_s6 + $0x38e0] sm:$0xff] }
 0x3e4   : > { %4813 = vmatpush.msra.mxu2 %v2005_v53  ;;  %4832 = vmatpush.msra.mxu3 %v2022_v54  ;;  %v2074_v53 = vld [vmem:[%s5853_s6 + $0x3728] sm:$0xff]  ;;  %v2091_v54 = vld [vmem:[%s5853_s6 + $0x37b0] sm:$0xff]  ;;  %v3356_v63 = vadd.f32 %v3355_v55, %v3336_v52  ;;  %v2128_v52 = vld [vmem:[%s5853_s6 + $0x38d8] sm:$0xff] }
 0x3e5   : > { %4774 = vmatmul.f32.vlgmr.msra.gmra.mxu0 %v2522_v56  ;;  %4814 = vmatmul.f32.vlgmr.msra.gmra.mxu2 %v2524_v57  ;;  %v2041_v56 = vld [vmem:[%s5853_s6 + $0x3620] sm:$0xff]  ;;  %v2058_v57 = vld [vmem:[%s5853_s6 + $0x36a8] sm:$0xff]  ;;  %v2163_v39 = vld [vmem:[%s5853_s6 + $0x39f0] sm:$0xff] }
 0x3e6   : > { %4838 = vmatpush.msrb.mxu0 %v2052_v58  ;;  %4878 = vmatpush.msrb.mxu2 %v2084_v59  ;;  %v2073_v58 = vld [vmem:[%s5853_s6 + $0x3720] sm:$0xff]  ;;  %v2090_v59 = vld [vmem:[%s5853_s6 + $0x37a8] sm:$0xff]  ;;  %v3376_v4 = vadd.f32 %v3375_v60, %v3356_v63  ;;  %v2160_v55 = vld [vmem:[%s5853_s6 + $0x39d8] sm:$0xff] }
 0x3e7   : > { %4793 = vmatpush.msra.mxu1 %v1989_v61  ;;  %4833 = vmatpush.msra.mxu3 %v2021_v62  ;;  %v2040_v61 = vld [vmem:[%s5853_s6 + $0x3618] sm:$0xff]  ;;  %v2057_v62 = vld [vmem:[%s5853_s6 + $0x36a0] sm:$0xff]  ;;  %v3395_v7 = vpop.f32.mrf.mxu3  ;;  %v2159_v60 = vld [vmem:[%s5853_s6 + $0x39d0] sm:$0xff] }
 0x3e8   : > { %4794 = vmatmul.f32.vlgmr.msra.gmra.mxu1 %v2523_v0  ;;  %4834 = vmatmul.f32.vlgmr.msra.gmra.mxu3 %v2525_v1  ;;  %v2072_v0 = vld [vmem:[%s5853_s6 + $0x3718] sm:$0xff]  ;;  %v2089_v1 = vld [vmem:[%s5853_s6 + $0x37a0] sm:$0xff]  ;;  %v2126_v63 = vld [vmem:[%s5853_s6 + $0x38c8] sm:$0xff] }
 0x3e9   : > { %4839 = vmatpush.msrb.mxu0 %v2051_v2  ;;  %4858 = vmatpush.msrb.mxu1 %v2068_v3  ;;  %v2039_v2 = vld [vmem:[%s5853_s6 + $0x3610] sm:$0xff]  ;;  %v2056_v3 = vld [vmem:[%s5853_s6 + $0x3698] sm:$0xff] }
 0x3ea   : > { %4879 = vmatpush.msrb.mxu2 %v2083_v5  ;;  %4898 = vmatpush.msrb.mxu3 %v2100_v6  ;;  %v2071_v5 = vld [vmem:[%s5853_s6 + $0x3710] sm:$0xff]  ;;  %v2088_v6 = vld [vmem:[%s5853_s6 + $0x3798] sm:$0xff] }
 0x3eb   : > { %4840 = vmatpush.msrb.mxu0 %v2050_v8  ;;  %4859 = vmatpush.msrb.mxu1 %v2067_v9  ;;  %v2038_v8 = vld [vmem:[%s5853_s6 + $0x3608] sm:$0xff]  ;;  %v2055_v9 = vld [vmem:[%s5853_s6 + $0x3690] sm:$0xff] }
 0x3ec   : > { %4880 = vmatpush.msrb.mxu2 %v2082_v10  ;;  %4899 = vmatpush.msrb.mxu3 %v2099_v11  ;;  %v305_v10 = vld [vmem:[%s5835_s8 + $0xe0] sm:$0xff] }
 0x3ed   : > { %4841 = vmatpush.msrb.mxu0 %v2049_v13  ;;  %4860 = vmatpush.msrb.mxu1 %v2066_v14  ;;  %v2070_v11 = vld [vmem:[%s5853_s6 + $0x3708] sm:$0xff]  ;;  %2530 = vst [vmem:[#allocation1] ss:$4 sm:$0xff] %v305_v10  ;;  %v3415_v13 = vpop.f32.mrf.mxu0  ;;  %v2037_v14 = vld [vmem:[%s5853_s6 + $0x3600] sm:$0xff]  ;;  %v2124_v10 = vld [vmem:[%s5853_s6 + $0x38b8] sm:$0xff] }
 0x3ee   : > { %4881 = vmatpush.msrb.mxu2 %v2081_v16  ;;  %4900 = vmatpush.msrb.mxu3 %v2098_v17  ;;  %v3396_v16 = vadd.f32 %v3395_v7, %v3376_v4  ;;  %v2069_v17 = vld [vmem:[%s5853_s6 + $0x3700] sm:$0xff] }
 0x3ef   : > { %4842 = vmatpush.msrb.mxu0 %v2048_v18  ;;  %4861 = vmatpush.msrb.mxu1 %v2065_v19  ;;  %v2086_v18 = vld [vmem:[%s5853_s6 + $0x3788] sm:$0xff]  ;;  %v2526_v19 = vld.sshfl [vmem:[#allocation1 + $0x20] sm:$0xff pattern:$0x73625140] }
 0x3f0   : > { %4882 = vmatpush.msrb.mxu2 %v2080_v21  ;;  %4901 = vmatpush.msrb.mxu3 %v2097_v22  ;;  %v3416_v21 = vadd.f32 %v3415_v13, %v3396_v16  ;;  %v2116_v22 = vld [vmem:[%s5853_s6 + $0x3878] sm:$0xff]  ;;  %v2125_v4 = vld [vmem:[%s5853_s6 + $0x38c0] sm:$0xff] }
 0x3f1   : > { %4843 = vmatpush.msrb.mxu0 %v2047_v24  ;;  %4862 = vmatpush.msrb.mxu1 %v2064_v25  ;;  %v3435_v24 = vpop.f32.mrf.mxu1  ;;  %v2053_v25 = vld [vmem:[%s5853_s6 + $0x3680] sm:$0xff] }
 0x3f2   : > { %4883 = vmatpush.msrb.mxu2 %v2079_v26  ;;  %4902 = vmatpush.msrb.mxu3 %v2096_v27  ;;  %v2085_v26 = vld [vmem:[%s5853_s6 + $0x3780] sm:$0xff]  ;;  %v2527_v27 = vld.sshfl [vmem:[#allocation1 + $0x28] sm:$0xff pattern:$0x73625140] }
 0x3f3   : > { %4844 = vmatpush.msrb.mxu0 %v2046_v29  ;;  %4863 = vmatpush.msrb.mxu1 %v2063_v30  ;;  %v3455_v29 = vpop.f32.mrf.mxu2  ;;  %v2115_v30 = vld [vmem:[%s5853_s6 + $0x3870] sm:$0xff]  ;;  %v2157_v7 = vld [vmem:[%s5853_s6 + $0x39c0] sm:$0xff] }
 0x3f4   : > { %4884 = vmatpush.msrb.mxu2 %v2078_v32  ;;  %4903 = vmatpush.msrb.mxu3 %v2095_v33  ;;  %v3436_v32 = vadd.f32 %v3435_v24, %v3416_v21  ;;  %v2147_v33 = vld [vmem:[%s5853_s6 + $0x3970] sm:$0xff] }
 0x3f5   : > { %4845 = vmatpush.msrb.mxu0 %v2045_v34  ;;  %4864 = vmatpush.msrb.mxu1 %v2062_v35  ;;  %v2164_v34 = vld [vmem:[%s5853_s6 + $0x39f8] sm:$0xff]  ;;  %v2114_v35 = vld [vmem:[%s5853_s6 + $0x3868] sm:$0xff] }
 0x3f6   : > { %4885 = vmatpush.msrb.mxu2 %v2077_v37  ;;  %4904 = vmatpush.msrb.mxu3 %v2094_v38  ;;  %v3456_v37 = vadd.f32 %v3455_v29, %v3436_v32  ;;  %v2146_v38 = vld [vmem:[%s5853_s6 + $0x3968] sm:$0xff] }
 0x3f7   : > { %4846 = vmatpush.msrb.mxu0 %v2044_v40  ;;  %4865 = vmatpush.msrb.mxu1 %v2061_v41  ;;  %v3475_v40 = vpop.f32.mrf.mxu3  ;;  %v2113_v41 = vld [vmem:[%s5853_s6 + $0x3860] sm:$0xff] }
 0x3f8   : > { %4886 = vmatpush.msrb.mxu2 %v2076_v42  ;;  %4905 = vmatpush.msrb.mxu3 %v2093_v43  ;;  %v2130_v42 = vld [vmem:[%s5853_s6 + $0x38e8] sm:$0xff]  ;;  %v2145_v43 = vld [vmem:[%s5853_s6 + $0x3960] sm:$0xff] }
 0x3f9   : > { %4847 = vmatpush.msrb.mxu0 %v2043_v45  ;;  %4866 = vmatpush.msrb.mxu1 %v2060_v46  ;;  %v3495_v45 = vpop.f32.mrf.mxu0  ;;  %v2112_v46 = vld [vmem:[%s5853_s6 + $0x3858] sm:$0xff] }
 0x3fa   : > { %4887 = vmatpush.msrb.mxu2 %v2075_v48  ;;  %4906 = vmatpush.msrb.mxu3 %v2092_v49  ;;  %v3476_v48 = vadd.f32 %v3475_v40, %v3456_v37  ;;  %v2144_v49 = vld [vmem:[%s5853_s6 + $0x3958] sm:$0xff]  ;;  %v306_v37 = vld [vmem:[%s5835_s8 + $0xe8] sm:$0xff] }
 0x3fb   : > { %4848 = vmatpush.msrb.mxu0 %v2042_v50  ;;  %4867 = vmatpush.msrb.mxu1 %v2059_v51  ;;  %v2161_v50 = vld [vmem:[%s5853_s6 + $0x39e0] sm:$0xff]  ;;  %v2111_v51 = vld [vmem:[%s5853_s6 + $0x3850] sm:$0xff]  ;;  %2531 = vst [vmem:[#allocation1 + $0x20] ss:$4 sm:$0xff] %v306_v37  ;;  %v2188_v37 = vld [vmem:[%s5853_s6 + $0x3ab8] sm:$0xff] }
 0x3fc   : > { %4888 = vmatpush.msrb.mxu2 %v2074_v53  ;;  %4907 = vmatpush.msrb.mxu3 %v2091_v54  ;;  %v3496_v53 = vadd.f32 %v3495_v45, %v3476_v48  ;;  %v2143_v54 = vld [vmem:[%s5853_s6 + $0x3950] sm:$0xff]  ;;  %v2150_v45 = vld [vmem:[%s5853_s6 + $0x3988] sm:$0xff] }
 0x3fd   : > { %4849 = vmatpush.msrb.mxu0 %v2041_v56  ;;  %4868 = vmatpush.msrb.mxu1 %v2058_v57  ;;  %v3515_v56 = vpop.f32.mrf.mxu1  ;;  %v2110_v57 = vld [vmem:[%s5853_s6 + $0x3848] sm:$0xff]  ;;  %v2151_v40 = vld [vmem:[%s5853_s6 + $0x3990] sm:$0xff] }
 0x3fe   : > { %4889 = vmatpush.msrb.mxu2 %v2073_v58  ;;  %4908 = vmatpush.msrb.mxu3 %v2090_v59  ;;  %v2127_v58 = vld [vmem:[%s5853_s6 + $0x38d0] sm:$0xff]  ;;  %v2142_v59 = vld [vmem:[%s5853_s6 + $0x3948] sm:$0xff] }
 0x3ff   : > { %4850 = vmatpush.msrb.mxu0 %v2040_v61  ;;  %4869 = vmatpush.msrb.mxu1 %v2057_v62  ;;  %v3535_v61 = vpop.f32.mrf.mxu2  ;;  %v2109_v62 = vld [vmem:[%s5853_s6 + $0x3840] sm:$0xff]  ;;  %v2534_v48 = vld.sshfl [vmem:[#allocation1 + $0x10] sm:$0xff pattern:$0x73625140] }
 0x400   : > { %4890 = vmatpush.msrb.mxu2 %v2072_v0  ;;  %4909 = vmatpush.msrb.mxu3 %v2089_v1  ;;  %v3516_v0 = vadd.f32 %v3515_v56, %v3496_v53  ;;  %v2141_v1 = vld [vmem:[%s5853_s6 + $0x3940] sm:$0xff]  ;;  %v2535_v56 = vld.sshfl [vmem:[#allocation1 + $0x18] sm:$0xff pattern:$0x73625140] }
 0x401   : > { %4851 = vmatpush.msrb.mxu0 %v2039_v2  ;;  %4870 = vmatpush.msrb.mxu1 %v2056_v3  ;;  %v2158_v2 = vld [vmem:[%s5853_s6 + $0x39c8] sm:$0xff]  ;;  %v2108_v3 = vld [vmem:[%s5853_s6 + $0x3838] sm:$0xff]  ;;  %v3575_v13 = vpop.f32.mrf.mxu0  ;;  %v2149_v53 = vld [vmem:[%s5853_s6 + $0x3980] sm:$0xff] }
 0x402   : > { %4891 = vmatpush.msrb.mxu2 %v2071_v5  ;;  %4910 = vmatpush.msrb.mxu3 %v2088_v6  ;;  %v3536_v5 = vadd.f32 %v3535_v61, %v3516_v0  ;;  %v2140_v6 = vld [vmem:[%s5853_s6 + $0x3938] sm:$0xff]  ;;  %v2195_v0 = vld [vmem:[%s5853_s6 + $0x3af0] sm:$0xff] }
 0x403   : > { %4852 = vmatpush.msrb.mxu0 %v2038_v8  ;;  %4871 = vmatpush.msrb.mxu1 %v2055_v9  ;;  %v3555_v8 = vpop.f32.mrf.mxu3  ;;  %v2107_v9 = vld [vmem:[%s5853_s6 + $0x3830] sm:$0xff]  ;;  %v2228_v61 = vld [vmem:[%s5853_s6 + $0x3bf8] sm:$0xff] }
 0x404   : > { %4892 = vmatpush.msrb.mxu2 %v2070_v11  ;;  %4911 = vmatpush.msrb.mxu3 %v2087_v12  ;;  %v2139_v11 = vld [vmem:[%s5853_s6 + $0x3930] sm:$0xff]  ;;  %v2156_v12 = vld [vmem:[%s5853_s6 + $0x39b8] sm:$0xff]  ;;  %v3556_v16 = vadd.f32 %v3555_v8, %v3536_v5  ;;  %v2194_v5 = vld [vmem:[%s5853_s6 + $0x3ae8] sm:$0xff] }
 0x405   : > { %4853 = vmatpush.msrb.mxu0 %v2037_v14  ;;  %4872 = vmatpush.msrb.mxu1 %v2054_v15  ;;  %v2106_v14 = vld [vmem:[%s5853_s6 + $0x3828] sm:$0xff]  ;;  %v2123_v15 = vld [vmem:[%s5853_s6 + $0x38b0] sm:$0xff]  ;;  %v3595_v24 = vpop.f32.mrf.mxu1 }
 0x406   : > { %4893 = vmatpush.msrb.mxu2 %v2069_v17  ;;  %4912 = vmatpush.msrb.mxu3 %v2086_v18  ;;  %v2138_v17 = vld [vmem:[%s5853_s6 + $0x3928] sm:$0xff]  ;;  %v2155_v18 = vld [vmem:[%s5853_s6 + $0x39b0] sm:$0xff]  ;;  %v3576_v21 = vadd.f32 %v3575_v13, %v3556_v16  ;;  %v2225_v13 = vld [vmem:[%s5853_s6 + $0x3be0] sm:$0xff] }
 0x407   : > { %4854 = vmatmul.f32.vlgmr.msrb.gmra.mxu0 %v2526_v19  ;;  %4894 = vmatmul.f32.vlgmr.msrb.gmra.mxu2 %v2528_v20  ;;  %v2105_v19 = vld [vmem:[%s5853_s6 + $0x3820] sm:$0xff]  ;;  %v2122_v20 = vld [vmem:[%s5853_s6 + $0x38a8] sm:$0xff]  ;;  %v3615_v29 = vpop.f32.mrf.mxu2  ;;  %v2192_v16 = vld [vmem:[%s5853_s6 + $0x3ad8] sm:$0xff] }
 0x408   : > { %4918 = vmatpush.msra.mxu0 %v2116_v22  ;;  %4958 = vmatpush.msra.mxu2 %v2148_v23  ;;  %v2137_v22 = vld [vmem:[%s5853_s6 + $0x3920] sm:$0xff]  ;;  %v2154_v23 = vld [vmem:[%s5853_s6 + $0x39a8] sm:$0xff]  ;;  %v3596_v32 = vadd.f32 %v3595_v24, %v3576_v21  ;;  %v2191_v21 = vld [vmem:[%s5853_s6 + $0x3ad0] sm:$0xff] }
 0x409   : > { %4873 = vmatpush.msrb.mxu1 %v2053_v25  ;;  %4913 = vmatpush.msrb.mxu3 %v2085_v26  ;;  %v2104_v25 = vld [vmem:[%s5853_s6 + $0x3818] sm:$0xff]  ;;  %v2121_v26 = vld [vmem:[%s5853_s6 + $0x38a0] sm:$0xff]  ;;  %v2226_v8 = vld [vmem:[%s5853_s6 + $0x3be8] sm:$0xff] }
 0x40a   : > { %4874 = vmatmul.f32.vlgmr.msrb.gmra.mxu1 %v2527_v27  ;;  %4914 = vmatmul.f32.vlgmr.msrb.gmra.mxu3 %v2529_v28  ;;  %v2136_v27 = vld [vmem:[%s5853_s6 + $0x3918] sm:$0xff]  ;;  %v2153_v28 = vld [vmem:[%s5853_s6 + $0x39a0] sm:$0xff]  ;;  %v2223_v24 = vld [vmem:[%s5853_s6 + $0x3bd0] sm:$0xff] }
 0x40b   : > { %4919 = vmatpush.msra.mxu0 %v2115_v30  ;;  %4938 = vmatpush.msra.mxu1 %v2132_v31  ;;  %v2103_v30 = vld [vmem:[%s5853_s6 + $0x3810] sm:$0xff]  ;;  %v2120_v31 = vld [vmem:[%s5853_s6 + $0x3898] sm:$0xff] }
 0x40c   : > { %4959 = vmatpush.msra.mxu2 %v2147_v33  ;;  %4978 = vmatpush.msra.mxu3 %v2164_v34  ;;  %v2135_v33 = vld [vmem:[%s5853_s6 + $0x3910] sm:$0xff]  ;;  %v2152_v34 = vld [vmem:[%s5853_s6 + $0x3998] sm:$0xff] }
 0x40d   : > { %4920 = vmatpush.msra.mxu0 %v2114_v35  ;;  %4939 = vmatpush.msra.mxu1 %v2131_v36  ;;  %v2102_v35 = vld [vmem:[%s5853_s6 + $0x3808] sm:$0xff]  ;;  %v2119_v36 = vld [vmem:[%s5853_s6 + $0x3890] sm:$0xff] }
 0x40e   : > { %4960 = vmatpush.msra.mxu2 %v2146_v38  ;;  %4979 = vmatpush.msra.mxu3 %v2163_v39  ;;  %v3616_v38 = vadd.f32 %v3615_v29, %v3596_v32  ;;  %v2134_v39 = vld [vmem:[%s5853_s6 + $0x3908] sm:$0xff]  ;;  %v2189_v32 = vld [vmem:[%s5853_s6 + $0x3ac0] sm:$0xff] }
 0x40f   : > { %4921 = vmatpush.msra.mxu0 %v2113_v41  ;;  %4940 = vmatpush.msra.mxu1 %v2130_v42  ;;  %v3635_v41 = vpop.f32.mrf.mxu3  ;;  %v2101_v42 = vld [vmem:[%s5853_s6 + $0x3800] sm:$0xff]  ;;  %v2222_v29 = vld [vmem:[%s5853_s6 + $0x3bc8] sm:$0xff] }
 0x410   : > { %4961 = vmatpush.msra.mxu2 %v2145_v43  ;;  %4980 = vmatpush.msra.mxu3 %v2162_v44  ;;  %v2118_v43 = vld [vmem:[%s5853_s6 + $0x3888] sm:$0xff]  ;;  %v2133_v44 = vld [vmem:[%s5853_s6 + $0x3900] sm:$0xff] }
 0x411   : > { %4922 = vmatpush.msra.mxu0 %v2112_v46  ;;  %4941 = vmatpush.msra.mxu1 %v2129_v47  ;;  %v3655_v46 = vpop.f32.mrf.mxu0  ;;  %v2532_v47 = vld.sshfl [vmem:[#allocation1] sm:$0xff pattern:$0x73625140] }
 0x412   : > { %4962 = vmatpush.msra.mxu2 %v2144_v49  ;;  %4981 = vmatpush.msra.mxu3 %v2161_v50  ;;  %v3636_v49 = vadd.f32 %v3635_v41, %v3616_v38  ;;  %v2180_v50 = vld [vmem:[%s5853_s6 + $0x3a78] sm:$0xff] }
 0x413   : > { %4923 = vmatpush.msra.mxu0 %v2111_v51  ;;  %4942 = vmatpush.msra.mxu1 %v2128_v52  ;;  %v2212_v51 = vld [vmem:[%s5853_s6 + $0x3b78] sm:$0xff]  ;;  %v2117_v52 = vld [vmem:[%s5853_s6 + $0x3880] sm:$0xff] }
 0x414   : > { %4963 = vmatpush.msra.mxu2 %v2143_v54  ;;  %4982 = vmatpush.msra.mxu3 %v2160_v55  ;;  %v3656_v54 = vadd.f32 %v3655_v46, %v3636_v49  ;;  %v2533_v55 = vld.sshfl [vmem:[#allocation1 + $0x8] sm:$0xff pattern:$0x73625140] }
 0x415   : > { %4924 = vmatpush.msra.mxu0 %v2110_v57  ;;  %4943 = vmatpush.msra.mxu1 %v2127_v58  ;;  %v3675_v57 = vpop.f32.mrf.mxu1  ;;  %v2179_v58 = vld [vmem:[%s5853_s6 + $0x3a70] sm:$0xff] }
 0x416   : > { %4964 = vmatpush.msra.mxu2 %v2142_v59  ;;  %4983 = vmatpush.msra.mxu3 %v2159_v60  ;;  %v2196_v59 = vld [vmem:[%s5853_s6 + $0x3af8] sm:$0xff]  ;;  %v2211_v60 = vld [vmem:[%s5853_s6 + $0x3b70] sm:$0xff] }
 0x417   : > { %4925 = vmatpush.msra.mxu0 %v2109_v62  ;;  %4944 = vmatpush.msra.mxu1 %v2126_v63  ;;  %v3695_v62 = vpop.f32.mrf.mxu2  ;;  %v2178_v63 = vld [vmem:[%s5853_s6 + $0x3a68] sm:$0xff] }
 0x418   : > { %4965 = vmatpush.msra.mxu2 %v2141_v1  ;;  %4984 = vmatpush.msra.mxu3 %v2158_v2  ;;  %v3676_v1 = vadd.f32 %v3675_v57, %v3656_v54  ;;  %v2210_v2 = vld [vmem:[%s5853_s6 + $0x3b68] sm:$0xff] }
 0x419   : > { %4926 = vmatpush.msra.mxu0 %v2108_v3  ;;  %4945 = vmatpush.msra.mxu1 %v2125_v4  ;;  %v2227_v3 = vld [vmem:[%s5853_s6 + $0x3bf0] sm:$0xff]  ;;  %v2177_v4 = vld [vmem:[%s5853_s6 + $0x3a60] sm:$0xff] }
 0x41a   : > { %4966 = vmatpush.msra.mxu2 %v2140_v6  ;;  %4985 = vmatpush.msra.mxu3 %v2157_v7  ;;  %v3696_v6 = vadd.f32 %v3695_v62, %v3676_v1  ;;  %v2209_v7 = vld [vmem:[%s5853_s6 + $0x3b60] sm:$0xff]  ;;  %v307_v1 = vld [vmem:[%s5835_s8 + $0xf0] sm:$0xff] }
 0x41b   : > { %4927 = vmatpush.msra.mxu0 %v2107_v9  ;;  %4946 = vmatpush.msra.mxu1 %v2124_v10  ;;  %v3715_v9 = vpop.f32.mrf.mxu3  ;;  %v2176_v10 = vld [vmem:[%s5853_s6 + $0x3a58] sm:$0xff]  ;;  %2540 = vst [vmem:[#allocation1] ss:$4 sm:$0xff] %v307_v1 }
 0x41c   : > { %4967 = vmatpush.msra.mxu2 %v2139_v11  ;;  %4986 = vmatpush.msra.mxu3 %v2156_v12  ;;  %v2193_v11 = vld [vmem:[%s5853_s6 + $0x3ae0] sm:$0xff]  ;;  %v2208_v12 = vld [vmem:[%s5853_s6 + $0x3b58] sm:$0xff] }
 0x41d   : > { %4928 = vmatpush.msra.mxu0 %v2106_v14  ;;  %4947 = vmatpush.msra.mxu1 %v2123_v15  ;;  %v3735_v14 = vpop.f32.mrf.mxu0  ;;  %v2175_v15 = vld [vmem:[%s5853_s6 + $0x3a50] sm:$0xff]  ;;  %v2252_v1 = vld [vmem:[%s5853_s6 + $0x3cb8] sm:$0xff] }
 0x41e   : > { %4968 = vmatpush.msra.mxu2 %v2138_v17  ;;  %4987 = vmatpush.msra.mxu3 %v2155_v18  ;;  %v3716_v17 = vadd.f32 %v3715_v9, %v3696_v6  ;;  %v2207_v18 = vld [vmem:[%s5853_s6 + $0x3b50] sm:$0xff]  ;;  %v2182_v6 = vld [vmem:[%s5853_s6 + $0x3a88] sm:$0xff] }
 0x41f   : > { %4929 = vmatpush.msra.mxu0 %v2105_v19  ;;  %4948 = vmatpush.msra.mxu1 %v2122_v20  ;;  %v2224_v19 = vld [vmem:[%s5853_s6 + $0x3bd8] sm:$0xff]  ;;  %v2174_v20 = vld [vmem:[%s5853_s6 + $0x3a48] sm:$0xff] }
 0x420   : > { %4969 = vmatpush.msra.mxu2 %v2137_v22  ;;  %4988 = vmatpush.msra.mxu3 %v2154_v23  ;;  %v3736_v22 = vadd.f32 %v3735_v14, %v3716_v17  ;;  %v2206_v23 = vld [vmem:[%s5853_s6 + $0x3b48] sm:$0xff]  ;;  %v2276_v14 = vld [vmem:[%s5853_s6 + $0x3d78] sm:$0xff]  ;;  %v2213_v17 = vld [vmem:[%s5853_s6 + $0x3b80] sm:$0xff] }
 0x421   : > { %4930 = vmatpush.msra.mxu0 %v2104_v25  ;;  %4949 = vmatpush.msra.mxu1 %v2121_v26  ;;  %v3755_v25 = vpop.f32.mrf.mxu1  ;;  %v2173_v26 = vld [vmem:[%s5853_s6 + $0x3a40] sm:$0xff]  ;;  %v2214_v9 = vld [vmem:[%s5853_s6 + $0x3b88] sm:$0xff] }
 0x422   : > { %4970 = vmatpush.msra.mxu2 %v2136_v27  ;;  %4989 = vmatpush.msra.mxu3 %v2153_v28  ;;  %v2190_v27 = vld [vmem:[%s5853_s6 + $0x3ac8] sm:$0xff]  ;;  %v2205_v28 = vld [vmem:[%s5853_s6 + $0x3b40] sm:$0xff] }
 0x423   : > { %4931 = vmatpush.msra.mxu0 %v2103_v30  ;;  %4950 = vmatpush.msra.mxu1 %v2120_v31  ;;  %v3775_v30 = vpop.f32.mrf.mxu2  ;;  %v2172_v31 = vld [vmem:[%s5853_s6 + $0x3a38] sm:$0xff]  ;;  %v3795_v41 = vpop.f32.mrf.mxu3 }
 0x424   : > { %4971 = vmatpush.msra.mxu2 %v2135_v33  ;;  %4990 = vmatpush.msra.mxu3 %v2152_v34  ;;  %v3756_v33 = vadd.f32 %v3755_v25, %v3736_v22  ;;  %v2204_v34 = vld [vmem:[%s5853_s6 + $0x3b38] sm:$0xff] }
 0x425   : > { %4932 = vmatpush.msra.mxu0 %v2102_v35  ;;  %4951 = vmatpush.msra.mxu1 %v2119_v36  ;;  %v2221_v35 = vld [vmem:[%s5853_s6 + $0x3bc0] sm:$0xff]  ;;  %v2171_v36 = vld [vmem:[%s5853_s6 + $0x3a30] sm:$0xff]  ;;  %v3815_v46 = vpop.f32.mrf.mxu0  ;;  %v2260_v22 = vld [vmem:[%s5853_s6 + $0x3cf8] sm:$0xff] }
 0x426   : > { %4972 = vmatpush.msra.mxu2 %v2134_v39  ;;  %4991 = vmatpush.msra.mxu3 %v2151_v40  ;;  %v3776_v38 = vadd.f32 %v3775_v30, %v3756_v33  ;;  %v2203_v39 = vld [vmem:[%s5853_s6 + $0x3b30] sm:$0xff]  ;;  %v2220_v40 = vld [vmem:[%s5853_s6 + $0x3bb8] sm:$0xff]  ;;  %v2258_v33 = vld [vmem:[%s5853_s6 + $0x3ce8] sm:$0xff] }
 0x427   : > { %4933 = vmatpush.msra.mxu0 %v2101_v42  ;;  %4952 = vmatpush.msra.mxu1 %v2118_v43  ;;  %v2170_v42 = vld [vmem:[%s5853_s6 + $0x3a28] sm:$0xff]  ;;  %v2187_v43 = vld [vmem:[%s5853_s6 + $0x3ab0] sm:$0xff]  ;;  %v2292_v25 = vld [vmem:[%s5853_s6 + $0x3df8] sm:$0xff] }
 0x428   : > { %4973 = vmatpush.msra.mxu2 %v2133_v44  ;;  %4992 = vmatpush.msra.mxu3 %v2150_v45  ;;  %v2202_v44 = vld [vmem:[%s5853_s6 + $0x3b28] sm:$0xff]  ;;  %v2219_v45 = vld [vmem:[%s5853_s6 + $0x3bb0] sm:$0xff]  ;;  %v3796_v49 = vadd.f32 %v3795_v41, %v3776_v38  ;;  %v2257_v38 = vld [vmem:[%s5853_s6 + $0x3ce0] sm:$0xff] }
 0x429   : > { %4934 = vmatmul.f32.vlgmr.msra.gmra.mxu0 %v2532_v47  ;;  %4974 = vmatmul.f32.vlgmr.msra.gmra.mxu2 %v2534_v48  ;;  %v2169_v47 = vld [vmem:[%s5853_s6 + $0x3a20] sm:$0xff]  ;;  %v2186_v48 = vld [vmem:[%s5853_s6 + $0x3aa8] sm:$0xff]  ;;  %v3835_v57 = vpop.f32.mrf.mxu1  ;;  %v2291_v30 = vld [vmem:[%s5853_s6 + $0x3df0] sm:$0xff] }
 0x42a   : > { %4998 = vmatpush.msrb.mxu0 %v2180_v50  ;;  %5038 = vmatpush.msrb.mxu2 %v2212_v51  ;;  %v2201_v50 = vld [vmem:[%s5853_s6 + $0x3b20] sm:$0xff]  ;;  %v2218_v51 = vld [vmem:[%s5853_s6 + $0x3ba8] sm:$0xff]  ;;  %v3816_v54 = vadd.f32 %v3815_v46, %v3796_v49  ;;  %v2288_v46 = vld [vmem:[%s5853_s6 + $0x3dd8] sm:$0xff] }
 0x42b   : > { %4953 = vmatpush.msra.mxu1 %v2117_v52  ;;  %4993 = vmatpush.msra.mxu3 %v2149_v53  ;;  %v2168_v52 = vld [vmem:[%s5853_s6 + $0x3a18] sm:$0xff]  ;;  %v2185_v53 = vld [vmem:[%s5853_s6 + $0x3aa0] sm:$0xff]  ;;  %v3855_v62 = vpop.f32.mrf.mxu2  ;;  %v2255_v49 = vld [vmem:[%s5853_s6 + $0x3cd0] sm:$0xff] }
 0x42c   : > { %4954 = vmatmul.f32.vlgmr.msra.gmra.mxu1 %v2533_v55  ;;  %4994 = vmatmul.f32.vlgmr.msra.gmra.mxu3 %v2535_v56  ;;  %v2200_v55 = vld [vmem:[%s5853_s6 + $0x3b18] sm:$0xff]  ;;  %v2217_v56 = vld [vmem:[%s5853_s6 + $0x3ba0] sm:$0xff] }
 0x42d   : > { %4999 = vmatpush.msrb.mxu0 %v2179_v58  ;;  %5018 = vmatpush.msrb.mxu1 %v2196_v59  ;;  %v2167_v58 = vld [vmem:[%s5853_s6 + $0x3a10] sm:$0xff]  ;;  %v2184_v59 = vld [vmem:[%s5853_s6 + $0x3a98] sm:$0xff]  ;;  %v2289_v41 = vld [vmem:[%s5853_s6 + $0x3de0] sm:$0xff] }
 0x42e   : > { %5039 = vmatpush.msrb.mxu2 %v2211_v60  ;;  %5058 = vmatpush.msrb.mxu3 %v2228_v61  ;;  %v2199_v60 = vld [vmem:[%s5853_s6 + $0x3b10] sm:$0xff]  ;;  %v2216_v61 = vld [vmem:[%s5853_s6 + $0x3b98] sm:$0xff] }
 0x42f   : > { %5000 = vmatpush.msrb.mxu0 %v2178_v63  ;;  %5019 = vmatpush.msrb.mxu1 %v2195_v0  ;;  %v2166_v63 = vld [vmem:[%s5853_s6 + $0x3a08] sm:$0xff]  ;;  %v2183_v0 = vld [vmem:[%s5853_s6 + $0x3a90] sm:$0xff] }
 0x430   : > { %5040 = vmatpush.msrb.mxu2 %v2210_v2  ;;  %5059 = vmatpush.msrb.mxu3 %v2227_v3  ;;  %v3836_v2 = vadd.f32 %v3835_v57, %v3816_v54  ;;  %v2198_v3 = vld [vmem:[%s5853_s6 + $0x3b08] sm:$0xff] }
 0x431   : > { %5001 = vmatpush.msrb.mxu0 %v2177_v4  ;;  %5020 = vmatpush.msrb.mxu1 %v2194_v5  ;;  %v2215_v4 = vld [vmem:[%s5853_s6 + $0x3b90] sm:$0xff]  ;;  %v2165_v5 = vld [vmem:[%s5853_s6 + $0x3a00] sm:$0xff]  ;;  %v2254_v54 = vld [vmem:[%s5853_s6 + $0x3cc8] sm:$0xff] }
 0x432   : > { %5041 = vmatpush.msrb.mxu2 %v2209_v7  ;;  %5060 = vmatpush.msrb.mxu3 %v2226_v8  ;;  %v3856_v7 = vadd.f32 %v3855_v62, %v3836_v2  ;;  %v2197_v8 = vld [vmem:[%s5853_s6 + $0x3b00] sm:$0xff]  ;;  %v2286_v57 = vld [vmem:[%s5853_s6 + $0x3dc8] sm:$0xff] }
 0x433   : > { %5002 = vmatpush.msrb.mxu0 %v2176_v10  ;;  %5021 = vmatpush.msrb.mxu1 %v2193_v11  ;;  %v3875_v10 = vpop.f32.mrf.mxu3  ;;  %v2536_v11 = vld.sshfl [vmem:[#allocation1 + $0x20] sm:$0xff pattern:$0x73625140] }
 0x434   : > { %5042 = vmatpush.msrb.mxu2 %v2208_v12  ;;  %5061 = vmatpush.msrb.mxu3 %v2225_v13  ;;  %v2538_v12 = vld.sshfl [vmem:[#allocation1 + $0x30] sm:$0xff pattern:$0x73625140]  ;;  %v2244_v13 = vld [vmem:[%s5853_s6 + $0x3c78] sm:$0xff]  ;;  %v2285_v62 = vld [vmem:[%s5853_s6 + $0x3dc0] sm:$0xff] }
 0x435   : > { %5003 = vmatpush.msrb.mxu0 %v2175_v15  ;;  %5022 = vmatpush.msrb.mxu1 %v2192_v16  ;;  %v3895_v15 = vpop.f32.mrf.mxu0  ;;  %v2181_v16 = vld [vmem:[%s5853_s6 + $0x3a80] sm:$0xff] }
 0x436   : > { %5043 = vmatpush.msrb.mxu2 %v2207_v18  ;;  %5062 = vmatpush.msrb.mxu3 %v2224_v19  ;;  %v3876_v18 = vadd.f32 %v3875_v10, %v3856_v7  ;;  %v2537_v19 = vld.sshfl [vmem:[#allocation1 + $0x28] sm:$0xff pattern:$0x73625140] }
 0x437   : > { %5004 = vmatpush.msrb.mxu0 %v2174_v20  ;;  %5023 = vmatpush.msrb.mxu1 %v2191_v21  ;;  %v2539_v20 = vld.sshfl [vmem:[#allocation1 + $0x38] sm:$0xff pattern:$0x73625140]  ;;  %v2243_v21 = vld [vmem:[%s5853_s6 + $0x3c70] sm:$0xff] }
 0x438   : > { %5044 = vmatpush.msrb.mxu2 %v2206_v23  ;;  %5063 = vmatpush.msrb.mxu3 %v2223_v24  ;;  %v3896_v23 = vadd.f32 %v3895_v15, %v3876_v18  ;;  %v2275_v24 = vld [vmem:[%s5853_s6 + $0x3d70] sm:$0xff] }
 0x439   : > { %5005 = vmatpush.msrb.mxu0 %v2173_v26  ;;  %5024 = vmatpush.msrb.mxu1 %v2190_v27  ;;  %v3915_v26 = vpop.f32.mrf.mxu1  ;;  %v2242_v27 = vld [vmem:[%s5853_s6 + $0x3c68] sm:$0xff] }
 0x43a   : > { %5045 = vmatpush.msrb.mxu2 %v2205_v28  ;;  %5064 = vmatpush.msrb.mxu3 %v2222_v29  ;;  %v2259_v28 = vld [vmem:[%s5853_s6 + $0x3cf0] sm:$0xff]  ;;  %v2274_v29 = vld [vmem:[%s5853_s6 + $0x3d68] sm:$0xff] }
 0x43b   : > { %5006 = vmatpush.msrb.mxu0 %v2172_v31  ;;  %5025 = vmatpush.msrb.mxu1 %v2189_v32  ;;  %v3935_v31 = vpop.f32.mrf.mxu2  ;;  %v2241_v32 = vld [vmem:[%s5853_s6 + $0x3c60] sm:$0xff] }
 0x43c   : > { %5046 = vmatpush.msrb.mxu2 %v2204_v34  ;;  %5065 = vmatpush.msrb.mxu3 %v2221_v35  ;;  %v3916_v34 = vadd.f32 %v3915_v26, %v3896_v23  ;;  %v2273_v35 = vld [vmem:[%s5853_s6 + $0x3d60] sm:$0xff] }
 0x43d   : > { %5007 = vmatpush.msrb.mxu0 %v2171_v36  ;;  %5026 = vmatpush.msrb.mxu1 %v2188_v37  ;;  %v2290_v36 = vld [vmem:[%s5853_s6 + $0x3de8] sm:$0xff]  ;;  %v2240_v37 = vld [vmem:[%s5853_s6 + $0x3c58] sm:$0xff] }
 0x43e   : > { %5047 = vmatpush.msrb.mxu2 %v2203_v39  ;;  %5066 = vmatpush.msrb.mxu3 %v2220_v40  ;;  %v3936_v39 = vadd.f32 %v3935_v31, %v3916_v34  ;;  %v2272_v40 = vld [vmem:[%s5853_s6 + $0x3d58] sm:$0xff]  ;;  %v2279_v31 = vld [vmem:[%s5853_s6 + $0x3d90] sm:$0xff]  ;;  %v2246_v34 = vld [vmem:[%s5853_s6 + $0x3c88] sm:$0xff] }
 0x43f   : > { %5008 = vmatpush.msrb.mxu0 %v2170_v42  ;;  %5027 = vmatpush.msrb.mxu1 %v2187_v43  ;;  %v3955_v42 = vpop.f32.mrf.mxu3  ;;  %v2239_v43 = vld [vmem:[%s5853_s6 + $0x3c50] sm:$0xff] }
 0x440   : > { %5048 = vmatpush.msrb.mxu2 %v2202_v44  ;;  %5067 = vmatpush.msrb.mxu3 %v2219_v45  ;;  %v2256_v44 = vld [vmem:[%s5853_s6 + $0x3cd8] sm:$0xff]  ;;  %v2271_v45 = vld [vmem:[%s5853_s6 + $0x3d50] sm:$0xff] }
 0x441   : > { %5009 = vmatpush.msrb.mxu0 %v2169_v47  ;;  %5028 = vmatpush.msrb.mxu1 %v2186_v48  ;;  %v3975_v47 = vpop.f32.mrf.mxu0  ;;  %v2238_v48 = vld [vmem:[%s5853_s6 + $0x3c48] sm:$0xff] }
 0x442   : > { %5049 = vmatpush.msrb.mxu2 %v2201_v50  ;;  %5068 = vmatpush.msrb.mxu3 %v2218_v51  ;;  %v3956_v50 = vadd.f32 %v3955_v42, %v3936_v39  ;;  %v2270_v51 = vld [vmem:[%s5853_s6 + $0x3d48] sm:$0xff]  ;;  %v2544_v39 = vld.sshfl [vmem:[#allocation1 + $0x10] sm:$0xff pattern:$0x73625140]  ;;  %v2340_v42 = vld [vmem:[%s5853_s6 + $0x3f78] sm:$0xff] }
 0x443   : > { %5010 = vmatpush.msrb.mxu0 %v2168_v52  ;;  %5029 = vmatpush.msrb.mxu1 %v2185_v53  ;;  %v2287_v52 = vld [vmem:[%s5853_s6 + $0x3dd0] sm:$0xff]  ;;  %v2237_v53 = vld [vmem:[%s5853_s6 + $0x3c40] sm:$0xff] }
 0x444   : > { %5050 = vmatpush.msrb.mxu2 %v2200_v55  ;;  %5069 = vmatpush.msrb.mxu3 %v2217_v56  ;;  %v3976_v55 = vadd.f32 %v3975_v47, %v3956_v50  ;;  %v2269_v56 = vld [vmem:[%s5853_s6 + $0x3d40] sm:$0xff]  ;;  %v2545_v47 = vld.sshfl [vmem:[#allocation1 + $0x18] sm:$0xff pattern:$0x73625140] }
 0x445   : > { %5011 = vmatpush.msrb.mxu0 %v2167_v58  ;;  %5030 = vmatpush.msrb.mxu1 %v2184_v59  ;;  %v3995_v58 = vpop.f32.mrf.mxu1  ;;  %v2236_v59 = vld [vmem:[%s5853_s6 + $0x3c38] sm:$0xff] }
 0x446   : > { %5051 = vmatpush.msrb.mxu2 %v2199_v60  ;;  %5070 = vmatpush.msrb.mxu3 %v2216_v61  ;;  %v2253_v60 = vld [vmem:[%s5853_s6 + $0x3cc0] sm:$0xff]  ;;  %v2268_v61 = vld [vmem:[%s5853_s6 + $0x3d38] sm:$0xff]  ;;  %v3996_v2 = vadd.f32 %v3995_v58, %v3976_v55  ;;  %v2323_v55 = vld [vmem:[%s5853_s6 + $0x3ef0] sm:$0xff] }
 0x447   : > { %5012 = vmatpush.msrb.mxu0 %v2166_v63  ;;  %5031 = vmatpush.msrb.mxu1 %v2183_v0  ;;  %v4015_v63 = vpop.f32.mrf.mxu2  ;;  %v2235_v0 = vld [vmem:[%s5853_s6 + $0x3c30] sm:$0xff]  ;;  %v4035_v10 = vpop.f32.mrf.mxu3  ;;  %v2324_v50 = vld [vmem:[%s5853_s6 + $0x3ef8] sm:$0xff] }
 0x448   : > { %5052 = vmatpush.msrb.mxu2 %v2198_v3  ;;  %5071 = vmatpush.msrb.mxu3 %v2215_v4  ;;  %v2267_v3 = vld [vmem:[%s5853_s6 + $0x3d30] sm:$0xff]  ;;  %v2284_v4 = vld [vmem:[%s5853_s6 + $0x3db8] sm:$0xff]  ;;  %v4016_v7 = vadd.f32 %v4015_v63, %v3996_v2  ;;  %v2354_v63 = vld [vmem:[%s5853_s6 + $0x3fe8] sm:$0xff] }
 0x449   : > { %5013 = vmatpush.msrb.mxu0 %v2165_v5  ;;  %5032 = vmatpush.msrb.mxu1 %v2182_v6  ;;  %v2234_v5 = vld [vmem:[%s5853_s6 + $0x3c28] sm:$0xff]  ;;  %v2251_v6 = vld [vmem:[%s5853_s6 + $0x3cb0] sm:$0xff]  ;;  %v4055_v15 = vpop.f32.mrf.mxu0  ;;  %v2321_v2 = vld [vmem:[%s5853_s6 + $0x3ee0] sm:$0xff] }
 0x44a   : > { %5053 = vmatpush.msrb.mxu2 %v2197_v8  ;;  %5072 = vmatpush.msrb.mxu3 %v2214_v9  ;;  %v2266_v8 = vld [vmem:[%s5853_s6 + $0x3d28] sm:$0xff]  ;;  %v2283_v9 = vld [vmem:[%s5853_s6 + $0x3db0] sm:$0xff]  ;;  %v4036_v18 = vadd.f32 %v4035_v10, %v4016_v7  ;;  %v2320_v7 = vld [vmem:[%s5853_s6 + $0x3ed8] sm:$0xff] }
 0x44b   : > { %5014 = vmatmul.f32.vlgmr.msrb.gmra.mxu0 %v2536_v11  ;;  %5054 = vmatmul.f32.vlgmr.msrb.gmra.mxu2 %v2538_v12  ;;  %v2233_v11 = vld [vmem:[%s5853_s6 + $0x3c20] sm:$0xff]  ;;  %v2250_v12 = vld [vmem:[%s5853_s6 + $0x3ca8] sm:$0xff]  ;;  %v2355_v58 = vld [vmem:[%s5853_s6 + $0x3ff0] sm:$0xff] }
 0x44c   : > { %5078 = vmatpush.msra.mxu0 %v2244_v13  ;;  %5118 = vmatpush.msra.mxu2 %v2276_v14  ;;  %v2265_v13 = vld [vmem:[%s5853_s6 + $0x3d20] sm:$0xff]  ;;  %v2282_v14 = vld [vmem:[%s5853_s6 + $0x3da8] sm:$0xff]  ;;  %v4056_v23 = vadd.f32 %v4055_v15, %v4036_v18  ;;  %v2352_v10 = vld [vmem:[%s5853_s6 + $0x3fd8] sm:$0xff] }
 0x44d   : > { %5033 = vmatpush.msrb.mxu1 %v2181_v16  ;;  %5073 = vmatpush.msrb.mxu3 %v2213_v17  ;;  %v2232_v16 = vld [vmem:[%s5853_s6 + $0x3c18] sm:$0xff]  ;;  %v2249_v17 = vld [vmem:[%s5853_s6 + $0x3ca0] sm:$0xff]  ;;  %v4075_v26 = vpop.f32.mrf.mxu1  ;;  %v2351_v15 = vld [vmem:[%s5853_s6 + $0x3fd0] sm:$0xff] }
 0x44e   : > { %5034 = vmatmul.f32.vlgmr.msrb.gmra.mxu1 %v2537_v19  ;;  %5074 = vmatmul.f32.vlgmr.msrb.gmra.mxu3 %v2539_v20  ;;  %v2264_v19 = vld [vmem:[%s5853_s6 + $0x3d18] sm:$0xff]  ;;  %v2281_v20 = vld [vmem:[%s5853_s6 + $0x3da0] sm:$0xff]  ;;  %v2318_v18 = vld [vmem:[%s5853_s6 + $0x3ec8] sm:$0xff] }
 0x44f   : > { %5079 = vmatpush.msra.mxu0 %v2243_v21  ;;  %5098 = vmatpush.msra.mxu1 %v2260_v22  ;;  %v2231_v21 = vld [vmem:[%s5853_s6 + $0x3c10] sm:$0xff]  ;;  %v2248_v22 = vld [vmem:[%s5853_s6 + $0x3c98] sm:$0xff] }
 0x450   : > { %5119 = vmatpush.msra.mxu2 %v2275_v24  ;;  %5138 = vmatpush.msra.mxu3 %v2292_v25  ;;  %v2263_v24 = vld [vmem:[%s5853_s6 + $0x3d10] sm:$0xff]  ;;  %v2280_v25 = vld [vmem:[%s5853_s6 + $0x3d98] sm:$0xff] }
 0x451   : > { %5080 = vmatpush.msra.mxu0 %v2242_v27  ;;  %5099 = vmatpush.msra.mxu1 %v2259_v28  ;;  %v2230_v27 = vld [vmem:[%s5853_s6 + $0x3c08] sm:$0xff]  ;;  %v2247_v28 = vld [vmem:[%s5853_s6 + $0x3c90] sm:$0xff] }
 0x452   : > { %5120 = vmatpush.msra.mxu2 %v2274_v29  ;;  %5139 = vmatpush.msra.mxu3 %v2291_v30  ;;  %v308_v29 = vld [vmem:[%s5835_s8 + $0xf8] sm:$0xff]  ;;  %v2262_v30 = vld [vmem:[%s5853_s6 + $0x3d08] sm:$0xff]  ;;  %s8028_s8 = sld [smem:[#allocation19_spill]] }
 0x453   : > { %5081 = vmatpush.msra.mxu0 %v2241_v32  ;;  %5100 = vmatpush.msra.mxu1 %v2258_v33  ;;  %2541 = vst [vmem:[#allocation1 + $0x20] ss:$4 sm:$0xff] %v308_v29  ;;  %v4095_v32 = vpop.f32.mrf.mxu2  ;;  %v2229_v33 = vld [vmem:[%s5853_s6 + $0x3c00] sm:$0xff]  ;;  %v2316_v29 = vld [vmem:[%s5853_s6 + $0x3eb8] sm:$0xff] }
 0x454   : > { %5121 = vmatpush.msra.mxu2 %v2273_v35  ;;  %5140 = vmatpush.msra.mxu3 %v2290_v36  ;;  %v4076_v35 = vadd.f32 %v4075_v26, %v4056_v23  ;;  %v2261_v36 = vld [vmem:[%s5853_s6 + $0x3d00] sm:$0xff] }
 0x455   : > { %5082 = vmatpush.msra.mxu0 %v2240_v37  ;;  %5101 = vmatpush.msra.mxu1 %v2257_v38  ;;  %v2278_v37 = vld [vmem:[%s5853_s6 + $0x3d88] sm:$0xff]  ;;  %v2542_v38 = vld.sshfl [vmem:[#allocation1] sm:$0xff pattern:$0x73625140] }
 0x456   : > { %5122 = vmatpush.msra.mxu2 %v2272_v40  ;;  %5141 = vmatpush.msra.mxu3 %v2289_v41  ;;  %v4096_v40 = vadd.f32 %v4095_v32, %v4076_v35  ;;  %v2308_v41 = vld [vmem:[%s5853_s6 + $0x3e78] sm:$0xff]  ;;  %v2317_v23 = vld [vmem:[%s5853_s6 + $0x3ec0] sm:$0xff] }
 0x457   : > { %5083 = vmatpush.msra.mxu0 %v2239_v43  ;;  %5102 = vmatpush.msra.mxu1 %v2256_v44  ;;  %v4115_v43 = vpop.f32.mrf.mxu3  ;;  %v2245_v44 = vld [vmem:[%s5853_s6 + $0x3c80] sm:$0xff] }
 0x458   : > { %5123 = vmatpush.msra.mxu2 %v2271_v45  ;;  %5142 = vmatpush.msra.mxu3 %v2288_v46  ;;  %v2277_v45 = vld [vmem:[%s5853_s6 + $0x3d80] sm:$0xff]  ;;  %v2543_v46 = vld.sshfl [vmem:[#allocation1 + $0x8] sm:$0xff pattern:$0x73625140]  ;;  %s5252_s1 = scalar_lea.hbm %s8028_s8, %s5378_s2  ;;  %s5575_s4 = scalar_lea.hbm %s8028_s8, 4 }
 0x459   : > { %5084 = vmatpush.msra.mxu0 %v2238_v48  ;;  %5103 = vmatpush.msra.mxu1 %v2255_v49  ;;  %v4135_v48 = vpop.f32.mrf.mxu0  ;;  %v2307_v49 = vld [vmem:[%s5853_s6 + $0x3e70] sm:$0xff]  ;;  %v2349_v26 = vld [vmem:[%s5853_s6 + $0x3fc0] sm:$0xff]  ;;  %s5256_s5 = sshll.u32 %s5252_s1, 4  ;;  %s5257_s5 = int_to_ptr.hbm [resolvable:$true] %s5256_s5 }
 0x45a   : > { %5124 = vmatpush.msra.mxu2 %v2270_v51  ;;  %5143 = vmatpush.msra.mxu3 %v2287_v52  ;;  %v4116_v51 = vadd.f32 %v4115_v43, %v4096_v40  ;;  %v2339_v52 = vld [vmem:[%s5853_s6 + $0x3f70] sm:$0xff]  ;;  %s5569_s23 = sshra.s32 %s5257_s5, 4  ;;  %s5570_s23 = int_to_ptr.hbm [resolvable:$true] %s5569_s23 }
 0x45b   : > { %5085 = vmatpush.msra.mxu0 %v2237_v53  ;;  %5104 = vmatpush.msra.mxu1 %v2254_v54  ;;  %v2356_v53 = vld [vmem:[%s5853_s6 + $0x3ff8] sm:$0xff]  ;;  %v2306_v54 = vld [vmem:[%s5853_s6 + $0x3e68] sm:$0xff]  ;;  %s5571_s26 = scalar_lea.hbm %s5570_s23, 2  ;;  %p5576_p5 = scmp.lt.s32.totalorder %s5570_s23, %s8028_s8 }
 0x45c   : > { %5125 = vmatpush.msra.mxu2 %v2269_v56  ;;  %5144 = vmatpush.msra.mxu3 %v2286_v57  ;;  %v4136_v56 = vadd.f32 %v4135_v48, %v4116_v51  ;;  %v2338_v57 = vld [vmem:[%s5853_s6 + $0x3f68] sm:$0xff]  ;;  %p5572_p0 = scmp.ne.s32.totalorder %s5570_s23, %s5571_s26  ;;  %p5577_p6 = scmp.lt.s32.totalorder %s5575_s4, %s5571_s26 }
 0x45d   : > { %5086 = vmatpush.msra.mxu0 %v2236_v59  ;;  %5105 = vmatpush.msra.mxu1 %v2253_v60  ;;  %v4155_v59 = vpop.f32.mrf.mxu1  ;;  %v2305_v60 = vld [vmem:[%s5853_s6 + $0x3e60] sm:$0xff] }
 0x45e   : > { %5126 = vmatpush.msra.mxu2 %v2268_v61  ;;  %5145 = vmatpush.msra.mxu3 %v2285_v62  ;;  %v2322_v61 = vld [vmem:[%s5853_s6 + $0x3ee8] sm:$0xff]  ;;  %v2337_v62 = vld [vmem:[%s5853_s6 + $0x3f60] sm:$0xff]  ;;  %p5573_p2 = pnand %p5572_p0, %p5774_p7  ;;  %p5578_p8 = por %p5577_p6, %p5576_p5 }
 0x45f   : > { %5087 = vmatpush.msra.mxu0 %v2235_v0  ;;  %5106 = vmatpush.msra.mxu1 %v2252_v1  ;;  %v4175_v0 = vpop.f32.mrf.mxu2  ;;  %v2304_v1 = vld [vmem:[%s5853_s6 + $0x3e58] sm:$0xff] }
 0x460   : > { %5127 = vmatpush.msra.mxu2 %v2267_v3  ;;  %5146 = vmatpush.msra.mxu3 %v2284_v4  ;;  %v4156_v3 = vadd.f32 %v4155_v59, %v4136_v56  ;;  %v2336_v4 = vld [vmem:[%s5853_s6 + $0x3f58] sm:$0xff]  ;;  %p5574_p4 = pneg %p5573_p2 }
 0x461   : > { %5088 = vmatpush.msra.mxu0 %v2234_v5  ;;  %5107 = vmatpush.msra.mxu1 %v2251_v6  ;;  %v2353_v5 = vld [vmem:[%s5853_s6 + $0x3fe0] sm:$0xff]  ;;  %v2303_v6 = vld [vmem:[%s5853_s6 + $0x3e50] sm:$0xff] }
 0x462   : > { %5128 = vmatpush.msra.mxu2 %v2266_v8  ;;  %5147 = vmatpush.msra.mxu3 %v2283_v9  ;;  %v4176_v8 = vadd.f32 %v4175_v0, %v4156_v3  ;;  %v2335_v9 = vld [vmem:[%s5853_s6 + $0x3f50] sm:$0xff]  ;;  %p5579_p10 = pnand %p5578_p8, %p5574_p4 }
 0x463   : > { %5089 = vmatpush.msra.mxu0 %v2233_v11  ;;  %5108 = vmatpush.msra.mxu1 %v2250_v12  ;;  %v4195_v11 = vpop.f32.mrf.mxu3  ;;  %v2302_v12 = vld [vmem:[%s5853_s6 + $0x3e48] sm:$0xff] }
 0x464   : > { %5129 = vmatpush.msra.mxu2 %v2265_v13  ;;  %5148 = vmatpush.msra.mxu3 %v2282_v14  ;;  %v2319_v13 = vld [vmem:[%s5853_s6 + $0x3ed0] sm:$0xff]  ;;  %v2334_v14 = vld [vmem:[%s5853_s6 + $0x3f48] sm:$0xff] }
 0x465   : > { %5090 = vmatpush.msra.mxu0 %v2232_v16  ;;  %5109 = vmatpush.msra.mxu1 %v2249_v17  ;;  %v4215_v16 = vpop.f32.mrf.mxu0  ;;  %v2301_v17 = vld [vmem:[%s5853_s6 + $0x3e40] sm:$0xff] }
 0x466   : > { %5130 = vmatpush.msra.mxu2 %v2264_v19  ;;  %5149 = vmatpush.msra.mxu3 %v2281_v20  ;;  %v4196_v19 = vadd.f32 %v4195_v11, %v4176_v8  ;;  %v2333_v20 = vld [vmem:[%s5853_s6 + $0x3f40] sm:$0xff] }
 0x467   : > { %5091 = vmatpush.msra.mxu0 %v2231_v21  ;;  %5110 = vmatpush.msra.mxu1 %v2248_v22  ;;  %v2350_v21 = vld [vmem:[%s5853_s6 + $0x3fc8] sm:$0xff]  ;;  %v2300_v22 = vld [vmem:[%s5853_s6 + $0x3e38] sm:$0xff]  ;;  %v4255_v32 = vpop.f32.mrf.mxu2 }
 0x468   : > { %5131 = vmatpush.msra.mxu2 %v2263_v24  ;;  %5150 = vmatpush.msra.mxu3 %v2280_v25  ;;  %v4216_v24 = vadd.f32 %v4215_v16, %v4196_v19  ;;  %v2332_v25 = vld [vmem:[%s5853_s6 + $0x3f38] sm:$0xff] }
 0x469   : > { %5092 = vmatpush.msra.mxu0 %v2230_v27  ;;  %5111 = vmatpush.msra.mxu1 %v2247_v28  ;;  %v4235_v27 = vpop.f32.mrf.mxu1  ;;  %v2299_v28 = vld [vmem:[%s5853_s6 + $0x3e30] sm:$0xff] }
 0x46a   : > { %5132 = vmatpush.msra.mxu2 %v2262_v30  ;;  %5151 = vmatpush.msra.mxu3 %v2279_v31  ;;  %v2331_v30 = vld [vmem:[%s5853_s6 + $0x3f30] sm:$0xff]  ;;  %v2348_v31 = vld [vmem:[%s5853_s6 + $0x3fb8] sm:$0xff]  ;;  %v4236_v35 = vadd.f32 %v4235_v27, %v4216_v24 }
 0x46b   : > { %5093 = vmatpush.msra.mxu0 %v2229_v33  ;;  %5112 = vmatpush.msra.mxu1 %v2246_v34  ;;  %v2298_v33 = vld [vmem:[%s5853_s6 + $0x3e28] sm:$0xff]  ;;  %v2315_v34 = vld [vmem:[%s5853_s6 + $0x3eb0] sm:$0xff]  ;;  %v4275_v43 = vpop.f32.mrf.mxu3 }
 0x46c   : > { %5133 = vmatpush.msra.mxu2 %v2261_v36  ;;  %5152 = vmatpush.msra.mxu3 %v2278_v37  ;;  %v2330_v36 = vld [vmem:[%s5853_s6 + $0x3f28] sm:$0xff]  ;;  %v2347_v37 = vld [vmem:[%s5853_s6 + $0x3fb0] sm:$0xff]  ;;  %v4256_v40 = vadd.f32 %v4255_v32, %v4236_v35 }
 0x46d   : > { %5094 = vmatmul.f32.vlgmr.msra.gmra.mxu0 %v2542_v38  ;;  %5134 = vmatmul.f32.vlgmr.msra.gmra.mxu2 %v2544_v39  ;;  %v2297_v38 = vld [vmem:[%s5853_s6 + $0x3e20] sm:$0xff]  ;;  %v2314_v39 = vld [vmem:[%s5853_s6 + $0x3ea8] sm:$0xff]  ;;  %v4295_v48 = vpop.f32.mrf.mxu0 }
 0x46e   : > { %5158 = vmatpush.msrb.mxu0 %v2308_v41  ;;  %5198 = vmatpush.msrb.mxu2 %v2340_v42  ;;  %v2329_v41 = vld [vmem:[%s5853_s6 + $0x3f20] sm:$0xff]  ;;  %v2346_v42 = vld [vmem:[%s5853_s6 + $0x3fa8] sm:$0xff]  ;;  %v4276_v51 = vadd.f32 %v4275_v43, %v4256_v40 }
 0x46f   : > { %5113 = vmatpush.msra.mxu1 %v2245_v44  ;;  %5153 = vmatpush.msra.mxu3 %v2277_v45  ;;  %v2296_v44 = vld [vmem:[%s5853_s6 + $0x3e18] sm:$0xff]  ;;  %v2313_v45 = vld [vmem:[%s5853_s6 + $0x3ea0] sm:$0xff]  ;;  %v4335_v0 = vpop.f32.mrf.mxu2 }
 0x470   : > { %5114 = vmatmul.f32.vlgmr.msra.gmra.mxu1 %v2543_v46  ;;  %5154 = vmatmul.f32.vlgmr.msra.gmra.mxu3 %v2545_v47  ;;  %v2328_v46 = vld [vmem:[%s5853_s6 + $0x3f18] sm:$0xff]  ;;  %v2345_v47 = vld [vmem:[%s5853_s6 + $0x3fa0] sm:$0xff]  ;;  %v4296_v56 = vadd.f32 %v4295_v48, %v4276_v51 }
 0x471   : > { %5159 = vmatpush.msrb.mxu0 %v2307_v49  ;;  %5178 = vmatpush.msrb.mxu1 %v2324_v50  ;;  %v2295_v49 = vld [vmem:[%s5853_s6 + $0x3e10] sm:$0xff]  ;;  %v2312_v50 = vld [vmem:[%s5853_s6 + $0x3e98] sm:$0xff]  ;;  %v4315_v59 = vpop.f32.mrf.mxu1 }
 0x472   : > { %5199 = vmatpush.msrb.mxu2 %v2339_v52  ;;  %5218 = vmatpush.msrb.mxu3 %v2356_v53  ;;  %v2327_v52 = vld [vmem:[%s5853_s6 + $0x3f10] sm:$0xff]  ;;  %v2344_v53 = vld [vmem:[%s5853_s6 + $0x3f98] sm:$0xff]  ;;  %v4316_v3 = vadd.f32 %v4315_v59, %v4296_v56 }
 0x473   : > { %5160 = vmatpush.msrb.mxu0 %v2306_v54  ;;  %5179 = vmatpush.msrb.mxu1 %v2323_v55  ;;  %v2294_v54 = vld [vmem:[%s5853_s6 + $0x3e08] sm:$0xff]  ;;  %v2311_v55 = vld [vmem:[%s5853_s6 + $0x3e90] sm:$0xff] }
 0x474   : > { %5200 = vmatpush.msrb.mxu2 %v2338_v57  ;;  %5219 = vmatpush.msrb.mxu3 %v2355_v58  ;;  %v2326_v57 = vld [vmem:[%s5853_s6 + $0x3f08] sm:$0xff]  ;;  %v2343_v58 = vld [vmem:[%s5853_s6 + $0x3f90] sm:$0xff]  ;;  %v4336_v8 = vadd.f32 %v4335_v0, %v4316_v3 }
 0x475   : > { %5161 = vmatpush.msrb.mxu0 %v2305_v60  ;;  %5180 = vmatpush.msrb.mxu1 %v2322_v61  ;;  %v2293_v60 = vld [vmem:[%s5853_s6 + $0x3e00] sm:$0xff]  ;;  %v2310_v61 = vld [vmem:[%s5853_s6 + $0x3e88] sm:$0xff] }
 0x476   : > { %5201 = vmatpush.msrb.mxu2 %v2337_v62  ;;  %5220 = vmatpush.msrb.mxu3 %v2354_v63  ;;  %v2325_v62 = vld [vmem:[%s5853_s6 + $0x3f00] sm:$0xff]  ;;  %v2342_v63 = vld [vmem:[%s5853_s6 + $0x3f88] sm:$0xff] }
 0x477   : > { %5162 = vmatpush.msrb.mxu0 %v2304_v1  ;;  %5181 = vmatpush.msrb.mxu1 %v2321_v2  ;;  %v2546_v1 = vld.sshfl [vmem:[#allocation1 + $0x20] sm:$0xff pattern:$0x73625140]  ;;  %v2548_v2 = vld.sshfl [vmem:[#allocation1 + $0x30] sm:$0xff pattern:$0x73625140] }
 0x478   : > { %5202 = vmatpush.msrb.mxu2 %v2336_v4  ;;  %5221 = vmatpush.msrb.mxu3 %v2353_v5  ;;  %v2309_v4 = vld [vmem:[%s5853_s6 + $0x3e80] sm:$0xff] }
 0x479   : > { %5163 = vmatpush.msrb.mxu0 %v2303_v6  ;;  %5182 = vmatpush.msrb.mxu1 %v2320_v7  ;;  %v2341_v5 = vld [vmem:[%s5853_s6 + $0x3f80] sm:$0xff]  ;;  %v2547_v6 = vld.sshfl [vmem:[#allocation1 + $0x28] sm:$0xff pattern:$0x73625140] }
 0x47a   : > { %5203 = vmatpush.msrb.mxu2 %v2335_v9  ;;  %5222 = vmatpush.msrb.mxu3 %v2352_v10  ;;  %v2549_v7 = vld.sshfl [vmem:[#allocation1 + $0x38] sm:$0xff pattern:$0x73625140]  ;;  %v4355_v9 = vpop.f32.mrf.mxu3  ;;  %v4375_v10 = vpop.f32.mrf.mxu0 }
 0x47b   : > { %5164 = vmatpush.msrb.mxu0 %v2302_v12  ;;  %5183 = vmatpush.msrb.mxu1 %v2319_v13  ;;  %v4356_v11 = vadd.f32 %v4355_v9, %v4336_v8  ;;  %v4395_v13 = vpop.f32.mrf.mxu1 }
 0x47c   : > { %5204 = vmatpush.msrb.mxu2 %v2334_v14  ;;  %5223 = vmatpush.msrb.mxu3 %v2351_v15  ;;  %v4415_v14 = vpop.f32.mrf.mxu2 }
 0x47d   : > { %5165 = vmatpush.msrb.mxu0 %v2301_v17  ;;  %5184 = vmatpush.msrb.mxu1 %v2318_v18  ;;  %v4376_v12 = vadd.f32 %v4375_v10, %v4356_v11 }
 0x47e   : > { %5205 = vmatpush.msrb.mxu2 %v2333_v20  ;;  %5224 = vmatpush.msrb.mxu3 %v2350_v21 }
 0x47f   : > { %5166 = vmatpush.msrb.mxu0 %v2300_v22  ;;  %5185 = vmatpush.msrb.mxu1 %v2317_v23  ;;  %v4396_v15 = vadd.f32 %v4395_v13, %v4376_v12 }
 0x480   : > { %5206 = vmatpush.msrb.mxu2 %v2332_v25  ;;  %5225 = vmatpush.msrb.mxu3 %v2349_v26 }
 0x481   : > { %5167 = vmatpush.msrb.mxu0 %v2299_v28  ;;  %5186 = vmatpush.msrb.mxu1 %v2316_v29  ;;  %v4416_v16 = vadd.f32 %v4415_v14, %v4396_v15 }
 0x482   : > { %5207 = vmatpush.msrb.mxu2 %v2331_v30  ;;  %5226 = vmatpush.msrb.mxu3 %v2348_v31  ;;  %v4435_v17 = vpop.f32.mrf.mxu3  ;;  %v4455_v18 = vpop.f32.mrf.mxu0 }
 0x483   : > { %5168 = vmatpush.msrb.mxu0 %v2298_v33  ;;  %5187 = vmatpush.msrb.mxu1 %v2315_v34  ;;  %v4436_v19 = vadd.f32 %v4435_v17, %v4416_v16  ;;  %v4475_v21 = vpop.f32.mrf.mxu1 }
 0x484   : > { %5208 = vmatpush.msrb.mxu2 %v2330_v36  ;;  %5227 = vmatpush.msrb.mxu3 %v2347_v37  ;;  %v4495_v22 = vpop.f32.mrf.mxu2 }
 0x485   : > { %5169 = vmatpush.msrb.mxu0 %v2297_v38  ;;  %5188 = vmatpush.msrb.mxu1 %v2314_v39  ;;  %v4456_v20 = vadd.f32 %v4455_v18, %v4436_v19 }
 0x486   : > { %5209 = vmatpush.msrb.mxu2 %v2329_v41  ;;  %5228 = vmatpush.msrb.mxu3 %v2346_v42 }
 0x487   : > { %5170 = vmatpush.msrb.mxu0 %v2296_v44  ;;  %5189 = vmatpush.msrb.mxu1 %v2313_v45  ;;  %v4476_v23 = vadd.f32 %v4475_v21, %v4456_v20 }
 0x488   : > { %5210 = vmatpush.msrb.mxu2 %v2328_v46  ;;  %5229 = vmatpush.msrb.mxu3 %v2345_v47 }
 0x489   : > { %5171 = vmatpush.msrb.mxu0 %v2295_v49  ;;  %5190 = vmatpush.msrb.mxu1 %v2312_v50  ;;  %v4496_v24 = vadd.f32 %v4495_v22, %v4476_v23 }
 0x48a   : > { %5211 = vmatpush.msrb.mxu2 %v2327_v52  ;;  %5230 = vmatpush.msrb.mxu3 %v2344_v53  ;;  %v4515_v25 = vpop.f32.mrf.mxu3  ;;  %v4535_v26 = vpop.f32.mrf.mxu0 }
 0x48b   : > { %5172 = vmatpush.msrb.mxu0 %v2294_v54  ;;  %5191 = vmatpush.msrb.mxu1 %v2311_v55  ;;  %v4516_v27 = vadd.f32 %v4515_v25, %v4496_v24  ;;  %v4555_v29 = vpop.f32.mrf.mxu1 }
 0x48c   : > { %5212 = vmatpush.msrb.mxu2 %v2326_v57  ;;  %5231 = vmatpush.msrb.mxu3 %v2343_v58  ;;  %v4575_v30 = vpop.f32.mrf.mxu2 }
 0x48d   : > { %5173 = vmatpush.msrb.mxu0 %v2293_v60  ;;  %5192 = vmatpush.msrb.mxu1 %v2310_v61  ;;  %v4536_v28 = vadd.f32 %v4535_v26, %v4516_v27 }
 0x48e   : > { %5213 = vmatpush.msrb.mxu2 %v2325_v62  ;;  %5232 = vmatpush.msrb.mxu3 %v2342_v63 }
 0x48f   : > { %5174 = vmatmul.f32.vlgmr.msrb.gmra.mxu0 %v2546_v1  ;;  %5214 = vmatmul.f32.vlgmr.msrb.gmra.mxu2 %v2548_v2  ;;  %v4556_v31 = vadd.f32 %v4555_v29, %v4536_v28 }
 0x490   : > { %5193 = vmatpush.msrb.mxu1 %v2309_v4  ;;  %5233 = vmatpush.msrb.mxu3 %v2341_v5 }
 0x491   : > { %5194 = vmatmul.f32.vlgmr.msrb.gmra.mxu1 %v2547_v6  ;;  %5234 = vmatmul.f32.vlgmr.msrb.gmra.mxu3 %v2549_v7  ;;  %v4576_v32 = vadd.f32 %v4575_v30, %v4556_v31 }
 0x492   : > { %v4595_v33 = vpop.f32.mrf.mxu3  ;;  %v4615_v34 = vpop.f32.mrf.mxu0 }
 0x493   : > { %v4596_v35 = vadd.f32 %v4595_v33, %v4576_v32  ;;  %v4635_v37 = vpop.f32.mrf.mxu1  ;;  %v276_v33 = vld [vmem:[%s5855_s25] sm:$0x3] }
 0x494   : > { %v4655_v38 = vpop.f32.mrf.mxu2 }
 0x495   : > { %v4616_v36 = vadd.f32 %v4615_v34, %v4596_v35 }
 0x497   : > { %v4636_v39 = vadd.f32 %v4635_v37, %v4616_v36 }
 0x499   : > { %v4656_v40 = vadd.f32 %v4655_v38, %v4636_v39 }
 0x49a   : > { %v4675_v41 = vpop.f32.mrf.mxu3  ;;  %v4695_v42 = vpop.f32.mrf.mxu0 }
 0x49b   : > { %v4676_v43 = vadd.f32 %v4675_v41, %v4656_v40  ;;  %v4715_v45 = vpop.f32.mrf.mxu1 }
 0x49c   : > { %v4735_v46 = vpop.f32.mrf.mxu2 }
 0x49d   : > { %v4696_v44 = vadd.f32 %v4695_v42, %v4676_v43 }
 0x49f   : > { %v4716_v47 = vadd.f32 %v4715_v45, %v4696_v44 }
 0x4a1   : > { %v4736_v48 = vadd.f32 %v4735_v46, %v4716_v47 }
 0x4a2   : > { %v4755_v49 = vpop.f32.mrf.mxu3  ;;  %v4775_v50 = vpop.f32.mrf.mxu0 }
 0x4a3   : > { %v4756_v51 = vadd.f32 %v4755_v49, %v4736_v48  ;;  %v4795_v53 = vpop.f32.mrf.mxu1 }
 0x4a4   : > { %v4815_v54 = vpop.f32.mrf.mxu2 }
 0x4a5   : > { %v4776_v52 = vadd.f32 %v4775_v50, %v4756_v51 }
 0x4a7   : > { %v4796_v55 = vadd.f32 %v4795_v53, %v4776_v52 }
 0x4a9   : > { %v4816_v56 = vadd.f32 %v4815_v54, %v4796_v55 }
 0x4aa   : > { %v4835_v57 = vpop.f32.mrf.mxu3  ;;  %v4855_v58 = vpop.f32.mrf.mxu0 }
 0x4ab   : > { %v4836_v59 = vadd.f32 %v4835_v57, %v4816_v56  ;;  %v4875_v61 = vpop.f32.mrf.mxu1 }
 0x4ac   : > { %v4895_v62 = vpop.f32.mrf.mxu2 }
 0x4ad   : > { %v4856_v60 = vadd.f32 %v4855_v58, %v4836_v59 }
 0x4af   : > { %v4876_v63 = vadd.f32 %v4875_v61, %v4856_v60 }
 0x4b1   : > { %v4896_v0 = vadd.f32 %v4895_v62, %v4876_v63 }
 0x4b2   : > { %v4915_v1 = vpop.f32.mrf.mxu3  ;;  %v4935_v2 = vpop.f32.mrf.mxu0 }
 0x4b3   : > { %v4916_v3 = vadd.f32 %v4915_v1, %v4896_v0  ;;  %v4955_v5 = vpop.f32.mrf.mxu1 }
 0x4b4   : > { %v4975_v6 = vpop.f32.mrf.mxu2 }
 0x4b5   : > { %v4936_v4 = vadd.f32 %v4935_v2, %v4916_v3 }
 0x4b7   : > { %v4956_v7 = vadd.f32 %v4955_v5, %v4936_v4 }
 0x4b9   : > { %v4976_v8 = vadd.f32 %v4975_v6, %v4956_v7 }
 0x4ba   : > { %v4995_v9 = vpop.f32.mrf.mxu3 }
 0x4bb   : > { %v4996_v11 = vadd.f32 %v4995_v9, %v4976_v8 }
 0x4c8   : > { %v5015_v10 = vpop.f32.mrf.mxu0 }
 0x4c9   : > { %v5016_v12 = vadd.f32 %v5015_v10, %v4996_v11 }
 0x4cb   : > { %v5035_v13 = vpop.f32.mrf.mxu1 }
 0x4cc   : > { %v5036_v15 = vadd.f32 %v5035_v13, %v5016_v12 }
 0x4ce   : > { %v5055_v14 = vpop.f32.mrf.mxu2 }
 0x4cf   : > { %v5056_v16 = vadd.f32 %v5055_v14, %v5036_v15 }
 0x4d1   : > { %v5075_v17 = vpop.f32.mrf.mxu3 }
 0x4d2   : > { %v5076_v19 = vadd.f32 %v5075_v17, %v5056_v16 }
 0x4ea   : > { %v5095_v18 = vpop.f32.mrf.mxu0 }
 0x4eb   : > { %v5096_v20 = vadd.f32 %v5095_v18, %v5076_v19 }
 0x4ed   : > { %v5115_v21 = vpop.f32.mrf.mxu1 }
 0x4ee   : > { %v5116_v23 = vadd.f32 %v5115_v21, %v5096_v20 }
 0x4f0   : > { %v5135_v22 = vpop.f32.mrf.mxu2 }
 0x4f1   : > { %v5136_v24 = vadd.f32 %v5135_v22, %v5116_v23 }
 0x4f3   : > { %v5155_v25 = vpop.f32.mrf.mxu3 }
 0x4f4   : > { %v5156_v26 = vadd.f32 %v5155_v25, %v5136_v24 }
 0x50c   : > { %v5175_v27 = vpop.f32.mrf.mxu0 }
 0x50d   : > { %v5176_v28 = vadd.f32 %v5175_v27, %v5156_v26 }
 0x50e   : > { %v5195_v29 = vpop.f32.mrf.mxu1 }
 0x50f   : > { %v5196_v30 = vadd.f32 %v5195_v29, %v5176_v28 }
 0x512   : > { %v5215_v31 = vpop.f32.mrf.mxu2 }
 0x513   : > { %v5216_v32 = vadd.f32 %v5215_v31, %v5196_v30 }
 0x514   : > { %v5235_v34 = vpop.f32.mrf.mxu3 }
 0x515   : > { %v5236_v35 = vadd.f32 %v5235_v34, %v5216_v32 }
 0x517   : > { %v5238_v36 = vadd.f32 %v5236_v35, %v276_v33 }
 0x519   : > { %5240 = vst.msk [vmem:[%s5855_s25] sm:$0x3] %vm5239_vm2, %v5238_v36 }
 0x51a   : > { %5582 = shalt.err (!%p5579_p10)
}
 0x51b   : > { %5388 = dma.vmem_to_hbm [thread:$0]  (%p5774_p7), %s5255_s19, 32, %s5257_s5, %s5242_s15  }
 0x51c PF: > { %s8030_s18 = sld [smem:[#allocation11_spill]]  ;;  %p5405_p12 = scmp.ge.s32.totalorder %s5681_s22, 2 }
 0x51e   : > { %p5399_p13 = pnand %p5405_p12, %p5779_p9 }
 0x520   : > { %p5400_p11 = pneg %p5399_p13 }
 0x522   : > { %s5268_s11 = sand.u32 1, %s8030_s18  }
 0x523   : > { %s5269_s30 = scalar_lea.sflag [#allocation4], %s5268_s11 }
 0x524   : > { %5636 = dma.done.wait (%p5400_p11), %s5269_s30, 32  }
 0x525   : > { %5638 = vsyncadd (%p5400_p11), %s5269_s30, 4294967264  ;;  %s20_s22 = sadd.s32 1, %s5681_s22   ;;  %s8032_s18 = sld [smem:[#allocation14_spill]] }
 0x526   : > { %p17_p1 = scmp.ge.s32.totalorder %s20_s22, 14   ;;  %s8033_s12 = smov %s5645_s13 }
 0x527   : > { %s8034_s13 = smov %s5649_s14  ;;  %s8035_s14 = smov %s5823_s27 }
 0x528   : > { %s8036_s15 = smov %s5657_s16  ;;  %s8037_s16 = smov %s5661_s17 }
 0x529   : > { %s8038_s17 = smov %s5826_s3  ;;  %s8039_s19 = smov %s5677_s21 }
 0x52a   : > { %s8040_s20 = smov %s8043_s9  ;;  %s8041_s21 = smov %s8047_s10 }
 0x52b   :  { %19 = sbr.rel (!%p17_p1) target bundleno = 14 (0xe), region = 89 }
 0x530   :  { %5275 = vsyncpa [#allocation3], 1 }
 0x531   :  { %5277 = vsyncpa [#allocation3 + $0x1], 1 }
 0x532   :  { %5278 = vsyncpa [#allocation6], 1 }
 0x533   :  { %5279 = vsyncpa [#allocation4], 1 }
 0x534   :  { %5281 = vsyncpa [#allocation4 + $0x1], 1 }

</bundles_post_ra>
